<compile_context>
chip_gen: v6e
topology: v6e:2x2x1
jax: 0.10.0
libtpu: 0.0.40
codegen_flags: <defaults>
</compile_context>

<pallas_src>
import functools
import numpy as np
import jax
import jax.numpy as jnp
from jax.experimental import pallas as pl
from jax.experimental.pallas import tpu as pltpu


# ----------------------------- kernels ---------------------------------------

def _layernorm(x, gamma, beta, eps=1e-5):
    mean = jnp.mean(x, axis=-1, keepdims=True)
    var = jnp.mean((x - mean) ** 2, axis=-1, keepdims=True)
    return (x - mean) * jax.lax.rsqrt(var + eps) * gamma + beta


def window_attn_kernel(x_ref, bias_ref, g1_ref, b1_ref, wqkv_ref, bqkv_ref,
                       wp_ref, bp_ref, o_ref, ctx_scr,
                       *, num_windows, num_heads):
    """One slab of `num_windows` windows: norm1 + fused QKV + (S)W-MSA + proj.

    bf16 matmul operands, f32 accumulation.  q-scale and the shift mask are
    folded into the operands by the wrapper.  Per-head context is staged in a
    VMEM scratch so the output projection is one (M,C)x(C,C) matmul (K = C).
    """
    x = x_ref[...]                                     # (M, C) f32 token slab
    M, C = x.shape
    Wb = num_windows
    N = M // Wb
    D = C // num_heads

    xn = _layernorm(x, g1_ref[...], b1_ref[...])       # norm1 in f32

    # Fused QKV: one (M, C) x (C, 3C) bf16 matmul, f32 accumulation + bias.
    qkv = jnp.dot(xn.astype(jnp.bfloat16), wqkv_ref[...],
                  preferred_element_type=jnp.float32) + bqkv_ref[...]
    qkv = qkv.astype(jnp.bfloat16)                     # halve live vreg footprint

    for h in range(num_heads):                         # static unrolled head loop
        qh = qkv[:, 0 * C + h * D: 0 * C + (h + 1) * D].reshape(Wb, N, D)
        kh = qkv[:, 1 * C + h * D: 1 * C + (h + 1) * D].reshape(Wb, N, D)
        vh = qkv[:, 2 * C + h * D: 2 * C + (h + 1) * D].reshape(Wb, N, D)

        s = jnp.einsum('bnd,bmd->bnm', qh, kh,
                       preferred_element_type=jnp.float32)     # (Wb, N, N) f32
        s = s + bias_ref[h]                            # rel-pos bias (+ shift mask)
        s = s - jnp.max(s, axis=-1, keepdims=True)
        p = jnp.exp(s)
        p = p * pl.reciprocal(jnp.sum(p, axis=-1, keepdims=True), approx=True)

        ctx = jnp.einsum('bnm,bmd->bnd', p.astype(jnp.bfloat16), vh,
                         preferred_element_type=jnp.float32)   # (Wb, N, D) f32
        ctx_scr[:, h * D:(h + 1) * D] = ctx.reshape(M, D)      # stage at lane h*D

    out = jnp.dot(ctx_scr[...].astype(jnp.bfloat16), wp_ref[...],
                  preferred_element_type=jnp.float32) + bp_ref[...]
    o_ref[...] = out.astype(o_ref.dtype)               # bf16 intermediate output


def mlp_residual_kernel(short_ref, y_ref, g2_ref, b2_ref,
                        w1_ref, b1_ref, w2_ref, b2m_ref, o_ref):
    """Token tile (window order): x = shortcut + attn; out = x + MLP(norm2(x))."""
    x = short_ref[...] + y_ref[...].astype(jnp.float32)        # residual 1 in f32
    xn = _layernorm(x, g2_ref[...], b2_ref[...])                # norm2
    h = jnp.dot(xn.astype(jnp.bfloat16), w1_ref[...],
                preferred_element_type=jnp.float32) + b1_ref[...]
    # TODO(synk): nn.GELU default is exact (erf); tanh approximation used per
    # perf review (EUP slot), max deviation ~3e-3 per element.
    h = jax.nn.gelu(h, approximate=True)
    m = jnp.dot(h.astype(jnp.bfloat16), w2_ref[...],
                preferred_element_type=jnp.float32) + b2m_ref[...]
    o_ref[...] = x + m                                          # residual 2


# ----------------------------- tiling helpers ---------------------------------

def _pick_images_per_slab(batch, tokens_per_image, target_rows=256):
    """Whole images per attention grid step.

    Prefers grid >= 2 (dual TensorCores / pipelining), even grids, and slabs of
    >= target_rows rows (256-wide MXUs on v6e/v7x) subject to that.
    """
    best_r, best_key = None, None
    for r in range(1, batch + 1):
        if batch % r:
            continue
        rows = r * tokens_per_image
        if rows % 8:
            continue
        g = batch // r
        key = (g >= 2, g >= 2 and g % 2 == 0, min(rows, target_rows), -rows)
        if best_key is None or key > best_key:
            best_r, best_key = r, key
    return best_r if best_r is not None else batch


def _pick_row_tile(rows, max_tile=512):
    """Row tile for the MLP kernel: grid >= 2 and even when possible."""
    best, best_key = rows, None
    t = 8
    while t <= min(max_tile, rows):
        if rows % t == 0:
            g = rows // t
            key = (g >= 2, g >= 2 and g % 2 == 0, t)
            if best_key is None or key > best_key:
                best, best_key = t, key
        t += 8
    return best


# ----------------------------- wrapper ----------------------------------------

def swin_block_forward(x, attn_mask, params, *, H, W, window_size, shift_size,
                       num_heads):
    B, L, C = x.shape
    assert L == H * W, "input feature has wrong size"
    ws = window_size
    # TODO(synk): padding path (H or W not divisible by window_size) not implemented.
    assert H % ws == 0 and W % ws == 0
    nWh, nWw = H // ws, W // ws
    nW = nWh * nWw
    N = ws * ws
    D = C // num_heads
    hidden = params["w1"].shape[0]
    scale = D ** (-0.5)

    # ---- weight prep (traced once under jit): fuse, fold scale, cast bf16 ----
    wqkv = params["wqkv"]                                  # torch layout (3C, C)
    wq_t = wqkv[0 * C:1 * C, :].T * scale                  # fold q-scale in
    wk_t = wqkv[1 * C:2 * C, :].T
    wv_t = wqkv[2 * C:3 * C, :].T
    wqkv_t = jnp.concatenate([wq_t, wk_t, wv_t], axis=1).astype(jnp.bfloat16)  # (C, 3C)
    bq = params["bqkv"][:, 0 * C:1 * C] * scale
    bqkv_f = jnp.concatenate(
        [bq, params["bqkv"][:, 1 * C:2 * C], params["bqkv"][:, 2 * C:3 * C]],
        axis=1)                                            # (1, 3C) f32
    wproj_t = params["wproj"].T.astype(jnp.bfloat16)       # (C, C)
    w1_t = params["w1"].T.astype(jnp.bfloat16)             # (C, hidden)
    w2_t = params["w2"].T.astype(jnp.bfloat16)             # (hidden, C)

    # ---- cyclic shift + window partition (index permutation, XLA glue) -------
    # TODO(synk): fuse this permutation into the attention kernel via a
    # prefetched row-index table / manual DMA gather for large feature maps.
    xs = x.reshape(B, H, W, C)
    if shift_size > 0:
        xs = jnp.roll(xs, shift=(-shift_size, -shift_size), axis=(1, 2))
    xw = xs.reshape(B, nWh, ws, nWw, ws, C).transpose(0, 1, 3, 2, 4, 5)
    xw2d = xw.reshape(B * nW * N, C)                       # window-major token rows

    # ---- slab / grid selection ------------------------------------------------
    r = _pick_images_per_slab(B, nW * N)
    Wb = r * nW                                            # windows per grid step
    slab = Wb * N                                          # token rows per step
    G = (B * nW * N) // slab

    # ---- relative-position bias with the SW-MSA mask pre-added ----------------
    relbias = params["relbias"]                            # (nh, N, N) f32
    if shift_size > 0:
        mask_t = jnp.tile(attn_mask.astype(jnp.float32), (r, 1, 1))   # (Wb, N, N)
        bias = relbias[:, None, :, :] + mask_t[None, :, :, :]         # (nh, Wb, N, N)
    else:
        bias = relbias[:, None, :, :]                                 # (nh, 1, N, N)
    Wbb = bias.shape[1]

    c2 = lambda g: (0, 0)
    c4 = lambda g: (0, 0, 0, 0)

    attn_out2d = pl.pallas_call(
        functools.partial(window_attn_kernel, num_windows=Wb, num_heads=num_heads),
        out_shape=jax.ShapeDtypeStruct((B * nW * N, C), jnp.bfloat16),
        grid_spec=pltpu.PrefetchScalarGridSpec(
            num_scalar_prefetch=0,
            grid=(G,),
            in_specs=[
                pl.BlockSpec((slab, C), lambda g: (g, 0)),            # token slab
                pl.BlockSpec((num_heads, Wbb, N, N), c4),             # bias (+mask)
                pl.BlockSpec((1, C), c2), pl.BlockSpec((1, C), c2),   # norm1
                pl.BlockSpec((C, 3 * C), c2), pl.BlockSpec((1, 3 * C), c2),  # fused QKV
                pl.BlockSpec((C, C), c2), pl.BlockSpec((1, C), c2),   # out proj
            ],
            out_specs=pl.BlockSpec((slab, C), lambda g: (g, 0)),
            scratch_shapes=[pltpu.VMEM((slab, C), jnp.float32)],      # ctx staging
        ),
        compiler_params=pltpu.CompilerParams(
            dimension_semantics=("parallel",),
            vmem_limit_bytes=48 * 1024 * 1024),
    )(xw2d, bias, params["g1"], params["b1"], wqkv_t, bqkv_f, wproj_t,
      params["bproj"])

    # ---- residual + norm2 + MLP + residual (still in window order) ------------
    rows = B * nW * N                                      # == B * L
    Rt = _pick_row_tile(rows)
    G2 = rows // Rt

    out_w2d = pl.pallas_call(
        mlp_residual_kernel,
        out_shape=jax.ShapeDtypeStruct((rows, C), jnp.float32),
        grid_spec=pltpu.PrefetchScalarGridSpec(
            num_scalar_prefetch=0,
            grid=(G2,),
            in_specs=[
                pl.BlockSpec((Rt, C), lambda t: (t, 0)),             # permuted shortcut
                pl.BlockSpec((Rt, C), lambda t: (t, 0)),             # attn branch (bf16)
                pl.BlockSpec((1, C), c2), pl.BlockSpec((1, C), c2),  # norm2
                pl.BlockSpec((C, hidden), c2), pl.BlockSpec((1, hidden), c2),
                pl.BlockSpec((hidden, C), c2), pl.BlockSpec((1, C), c2),
            ],
            out_specs=pl.BlockSpec((Rt, C), lambda t: (t, 0)),
        ),
        compiler_params=pltpu.CompilerParams(
            dimension_semantics=("parallel",),
            vmem_limit_bytes=48 * 1024 * 1024),
    )(xw2d, attn_out2d, params["g2"], params["b2"],
      w1_t, params["b1_mlp"], w2_t, params["b2_mlp"])

    # ---- single inverse window/shift permutation at the very end ---------------
    y = out_w2d.reshape(B, nWh, nWw, ws, ws, C).transpose(0, 1, 3, 2, 4, 5)
    y = y.reshape(B, H, W, C)
    if shift_size > 0:
        y = jnp.roll(y, shift=(shift_size, shift_size), axis=(1, 2))
    return y.reshape(B, L, C)


# -------------------- parameter / buffer construction -------------------------

def make_relative_position_bias(table, window_size, num_heads):
    """table: ((2*ws-1)**2, num_heads) -> (num_heads, N, N) bias (host gather)."""
    ws = window_size
    coords = np.stack(np.meshgrid(np.arange(ws), np.arange(ws), indexing="ij"))
    coords_flat = coords.reshape(2, -1)
    rel = coords_flat[:, :, None] - coords_flat[:, None, :]
    rel = rel.transpose(1, 2, 0).astype(np.int64)
    rel[:, :, 0] += ws - 1
    rel[:, :, 1] += ws - 1
    rel[:, :, 0] *= 2 * ws - 1
    rp_index = rel.sum(-1)
    N = ws * ws
    bias = table[rp_index.reshape(-1)].reshape(N, N, num_heads)
    return jnp.transpose(bias, (2, 0, 1)).astype(jnp.float32)


def make_shift_attn_mask(H, W, window_size, shift_size):
    """Standard SW-MSA mask, (nW, N, N) with 0 / -100."""
    ws = window_size
    img_mask = np.zeros((1, H, W, 1), np.float32)
    cnt = 0
    for hs in (slice(0, -ws), slice(-ws, -shift_size), slice(-shift_size, None)):
        for wsl in (slice(0, -ws), slice(-ws, -shift_size), slice(-shift_size, None)):
            img_mask[:, hs, wsl, :] = cnt
            cnt += 1
    mw = img_mask.reshape(1, H // ws, ws, W // ws, ws, 1).transpose(0, 1, 3, 2, 4, 5)
    mw = mw.reshape(-1, ws * ws)
    attn_mask = mw[:, None, :] - mw[:, :, None]
    attn_mask = np.where(attn_mask != 0, -100.0, 0.0).astype(np.float32)
    return jnp.asarray(attn_mask)


def init_params(key, dim, num_heads, window_size, mlp_ratio):
    hidden = int(dim * mlp_ratio)
    keys = jax.random.split(key, 8)
    p = {
        "g1": jnp.ones((1, dim), jnp.float32),
        "b1": jnp.zeros((1, dim), jnp.float32),
        "wqkv": 0.02 * jax.random.normal(keys[0], (3 * dim, dim), jnp.float32),
        "bqkv": 0.01 * jax.random.normal(keys[1], (1, 3 * dim), jnp.float32),
        "wproj": 0.02 * jax.random.normal(keys[2], (dim, dim), jnp.float32),
        "bproj": 0.01 * jax.random.normal(keys[3], (1, dim), jnp.float32),
        "g2": jnp.ones((1, dim), jnp.float32),
        "b2": jnp.zeros((1, dim), jnp.float32),
        "w1": 0.02 * jax.random.normal(keys[4], (hidden, dim), jnp.float32),
        "b1_mlp": 0.01 * jax.random.normal(keys[5], (1, hidden), jnp.float32),
        "w2": 0.02 * jax.random.normal(keys[6], (dim, hidden), jnp.float32),
        "b2_mlp": 0.01 * jax.random.normal(keys[7], (1, dim), jnp.float32),
    }
    table = 0.02 * jax.random.normal(jax.random.PRNGKey(42),
                                     ((2 * window_size - 1) ** 2, num_heads),
                                     jnp.float32)
    p["relbias"] = make_relative_position_bias(np.asarray(table), window_size,
                                               num_heads)
    return p


# ------------------------- pure-JAX reference ---------------------------------

def swin_block_reference(x, attn_mask, params, *, H, W, window_size, shift_size,
                         num_heads):
    B, L, C = x.shape
    ws = window_size
    nWh, nWw = H // ws, W // ws
    nW = nWh * nWw
    N = ws * ws
    D = C // num_heads
    scale = D ** (-0.5)

    def ln(v, g, b):
        mu = jnp.mean(v, -1, keepdims=True)
        var = jnp.mean((v - mu) ** 2, -1, keepdims=True)
        return (v - mu) / jnp.sqrt(var + 1e-5) * g + b

    shortcut = x
    xn = ln(x, params["g1"], params["b1"])
    xs = xn.reshape(B, H, W, C)
    if shift_size > 0:
        xs = jnp.roll(xs, shift=(-shift_size, -shift_size), axis=(1, 2))
    xw = xs.reshape(B, nWh, ws, nWw, ws, C).transpose(0, 1, 3, 2, 4, 5)
    xw = xw.reshape(B * nW, N, C)

    qkv = xw @ params["wqkv"].T + params["bqkv"][0]
    qkv = qkv.reshape(B * nW, N, 3, num_heads, D).transpose(2, 0, 3, 1, 4)
    q, k, v = qkv[0] * scale, qkv[1], qkv[2]
    attn = q @ jnp.swapaxes(k, -2, -1) + params["relbias"][None]
    if shift_size > 0:
        attn = attn.reshape(B, nW, num_heads, N, N) + attn_mask[None, :, None]
        attn = attn.reshape(B * nW, num_heads, N, N)
    attn = jax.nn.softmax(attn, axis=-1)
    out = (attn @ v).transpose(0, 2, 1, 3).reshape(B * nW, N, C)
    out = out @ params["wproj"].T + params["bproj"][0]

    y = out.reshape(B, nWh, nWw, ws, ws, C).transpose(0, 1, 3, 2, 4, 5)
    y = y.reshape(B, H, W, C)
    if shift_size > 0:
        y = jnp.roll(y, shift=(shift_size, shift_size), axis=(1, 2))
    y = y.reshape(B, L, C)

    x1 = shortcut + y
    h = ln(x1, params["g2"], params["b2"]) @ params["w1"].T + params["b1_mlp"][0]
    h = jax.nn.gelu(h, approximate=False)
    return x1 + h @ params["w2"].T + params["b2_mlp"][0]


# --------------------------------- main ----------------------------------------

if __name__ == "__main__":
    B, dim = 4, 128           # C = 128 -> lane-dense activations / stores
    H = W = 8
    window_size = 4
    shift_size = 2            # SW-MSA path (shift + mask folded into bias)
    num_heads = 4
    mlp_ratio = 4.0
    L = H * W

    key = jax.random.PRNGKey(0)
    kx, kp = jax.random.split(key)
    x = jax.random.normal(kx, (B, L, dim), jnp.float32)
    params = init_params(kp, dim, num_heads, window_size, mlp_ratio)
    attn_mask = make_shift_attn_mask(H, W, window_size, shift_size)

    # SW-MSA (shifted, masked) variant
    fwd_sw = jax.jit(functools.partial(
        swin_block_forward, H=H, W=W, window_size=window_size,
        shift_size=shift_size, num_heads=num_heads))
    out_sw = fwd_sw(x, attn_mask, params)

    # W-MSA (no shift) variant
    fwd_w = jax.jit(functools.partial(
        swin_block_forward, H=H, W=W, window_size=window_size,
        shift_size=0, num_heads=num_heads))
    out_w = fwd_w(x, attn_mask, params)

    jax.block_until_ready((out_sw, out_w))

    # Pure-JAX reference (erf GELU, exact softmax, f32 matmuls).
    ref_sw = swin_block_reference(x, attn_mask, params, H=H, W=W,
                                  window_size=window_size,
                                  shift_size=shift_size, num_heads=num_heads)
    ref_w = swin_block_reference(x, attn_mask, params, H=H, W=W,
                                 window_size=window_size,
                                 shift_size=0, num_heads=num_heads)

    err_sw = float(jnp.max(jnp.abs(out_sw - ref_sw)))
    err_w = float(jnp.max(jnp.abs(out_w - ref_w)))

    assert out_sw.shape == (B, L, dim) and out_w.shape == (B, L, dim)
    assert bool(jnp.all(jnp.isfinite(out_sw))) and bool(jnp.all(jnp.isfinite(out_w)))
    # bf16 matmuls + approx reciprocal + tanh GELU -> loose tolerance.
    assert err_sw < 0.1 and err_w < 0.1, (err_sw, err_w)
    print("KERNEL_OK")
</pallas_src>

<mosaic_0001>
module attributes {stable_mosaic.version = 11 : i64} {
  func.func @window_attn_kernel(%arg0: i32, %arg1: memref<128x128xf32, #tpu.memory_space<vmem>>, %arg2: memref<4x8x16x16xf32, #tpu.memory_space<vmem>>, %arg3: memref<1x128xf32, #tpu.memory_space<vmem>>, %arg4: memref<1x128xf32, #tpu.memory_space<vmem>>, %arg5: memref<128x384xbf16, #tpu.memory_space<vmem>>, %arg6: memref<1x384xf32, #tpu.memory_space<vmem>>, %arg7: memref<128x128xbf16, #tpu.memory_space<vmem>>, %arg8: memref<1x128xf32, #tpu.memory_space<vmem>>, %arg9: memref<128x128xbf16, #tpu.memory_space<vmem>>, %arg10: memref<128x128xf32, #tpu.memory_space<vmem>>) attributes {dimension_semantics = [#tpu.dimension_semantics<parallel>], iteration_bounds = array<i64: 2>, scalar_prefetch = 0 : i64, scratch_operands = 1 : i64, tpu.core_type = #tpu.core_type<tc>, window_params = [{transform_indices = @transform_0, window_bounds = array<i64: 128, 128>}, {pipeline_mode = #tpu.pipeline_mode<synchronous>, transform_indices = @transform_1, window_bounds = array<i64: 4, 8, 16, 16>}, {pipeline_mode = #tpu.pipeline_mode<synchronous>, transform_indices = @transform_2, window_bounds = array<i64: 1, 128>}, {pipeline_mode = #tpu.pipeline_mode<synchronous>, transform_indices = @transform_3, window_bounds = array<i64: 1, 128>}, {pipeline_mode = #tpu.pipeline_mode<synchronous>, transform_indices = @transform_4, window_bounds = array<i64: 128, 384>}, {pipeline_mode = #tpu.pipeline_mode<synchronous>, transform_indices = @transform_5, window_bounds = array<i64: 1, 384>}, {pipeline_mode = #tpu.pipeline_mode<synchronous>, transform_indices = @transform_6, window_bounds = array<i64: 128, 128>}, {pipeline_mode = #tpu.pipeline_mode<synchronous>, transform_indices = @transform_7, window_bounds = array<i64: 1, 128>}, {transform_indices = @transform_8, window_bounds = array<i64: 128, 128>}]} {
    %c0 = arith.constant 0 : index
    %c0_0 = arith.constant 0 : index
    %0 = vector.load %arg1[%c0, %c0_0] : memref<128x128xf32, #tpu.memory_space<vmem>>, vector<128x128xf32>
    %c0_1 = arith.constant 0 : index
    %c0_2 = arith.constant 0 : index
    %1 = vector.load %arg3[%c0_1, %c0_2] : memref<1x128xf32, #tpu.memory_space<vmem>>, vector<1x128xf32>
    %c0_3 = arith.constant 0 : index
    %c0_4 = arith.constant 0 : index
    %2 = vector.load %arg4[%c0_3, %c0_4] : memref<1x128xf32, #tpu.memory_space<vmem>>, vector<1x128xf32>
    %cst = arith.constant dense<0.000000e+00> : vector<128xf32>
    %3 = vector.multi_reduction <add>, %0, %cst [1] : vector<128x128xf32> to vector<128xf32>
    %4 = vector.shape_cast %3 : vector<128xf32> to vector<128x1xf32>
    %cst_5 = arith.constant 1.280000e+02 : f32
    %5 = vector.broadcast %cst_5 : f32 to vector<128x1xf32>
    %6 = arith.divf %4, %5 : vector<128x1xf32>
    %7 = vector.broadcast %6 : vector<128x1xf32> to vector<128x128xf32>
    %8 = arith.subf %0, %7 : vector<128x128xf32>
    %9 = arith.mulf %8, %8 : vector<128x128xf32>
    %cst_6 = arith.constant dense<0.000000e+00> : vector<128xf32>
    %10 = vector.multi_reduction <add>, %9, %cst_6 [1] : vector<128x128xf32> to vector<128xf32>
    %11 = vector.shape_cast %10 : vector<128xf32> to vector<128x1xf32>
    %cst_7 = arith.constant 1.280000e+02 : f32
    %12 = vector.broadcast %cst_7 : f32 to vector<128x1xf32>
    %13 = arith.divf %11, %12 : vector<128x1xf32>
    %14 = vector.broadcast %6 : vector<128x1xf32> to vector<128x128xf32>
    %15 = arith.subf %0, %14 : vector<128x128xf32>
    %cst_8 = arith.constant 9.99999974E-6 : f32
    %16 = vector.broadcast %cst_8 : f32 to vector<128x1xf32>
    %17 = arith.addf %13, %16 : vector<128x1xf32>
    %18 = math.rsqrt %17 : vector<128x1xf32>
    %19 = vector.broadcast %18 : vector<128x1xf32> to vector<128x128xf32>
    %20 = arith.mulf %15, %19 : vector<128x128xf32>
    %21 = vector.broadcast %1 : vector<1x128xf32> to vector<128x128xf32>
    %22 = arith.mulf %20, %21 : vector<128x128xf32>
    %23 = vector.broadcast %2 : vector<1x128xf32> to vector<128x128xf32>
    %24 = arith.addf %22, %23 : vector<128x128xf32>
    %25 = arith.truncf %24 : vector<128x128xf32> to vector<128x128xbf16>
    %c0_9 = arith.constant 0 : index
    %c0_10 = arith.constant 0 : index
    %26 = vector.load %arg5[%c0_9, %c0_10] : memref<128x384xbf16, #tpu.memory_space<vmem>>, vector<128x384xbf16>
    %cst_11 = arith.constant dense<0.000000e+00> : vector<128x384xf32>
    %27 = tpu.matmul %25, %26, %cst_11 {dimension_numbers = #tpu.dot_dimension_numbers<[1], [0], [0], [1], [0, 0, 1, 1], [], []>} : vector<128x128xbf16>, vector<128x384xbf16>, vector<128x384xf32> -> vector<128x384xf32>
    %c0_12 = arith.constant 0 : index
    %c0_13 = arith.constant 0 : index
    %28 = vector.load %arg6[%c0_12, %c0_13] : memref<1x384xf32, #tpu.memory_space<vmem>>, vector<1x384xf32>
    %29 = vector.broadcast %28 : vector<1x384xf32> to vector<128x384xf32>
    %30 = arith.addf %27, %29 : vector<128x384xf32>
    %31 = arith.truncf %30 : vector<128x384xf32> to vector<128x384xbf16>
    %32 = vector.extract_strided_slice %31 {offsets = [0, 0], sizes = [128, 32], strides = [1, 1]} : vector<128x384xbf16> to vector<128x32xbf16>
    %33 = vector.shape_cast %32 : vector<128x32xbf16> to vector<8x16x32xbf16>
    %34 = vector.extract_strided_slice %31 {offsets = [0, 128], sizes = [128, 32], strides = [1, 1]} : vector<128x384xbf16> to vector<128x32xbf16>
    %35 = vector.shape_cast %34 : vector<128x32xbf16> to vector<8x16x32xbf16>
    %36 = vector.extract_strided_slice %31 {offsets = [0, 256], sizes = [128, 32], strides = [1, 1]} : vector<128x384xbf16> to vector<128x32xbf16>
    %37 = vector.shape_cast %36 : vector<128x32xbf16> to vector<8x16x32xbf16>
    "tpu.trace_start"() <{level = 10 : i32, message = "bnd,bmd->bnm"}> : () -> ()
    %cst_14 = arith.constant dense<0.000000e+00> : vector<8x16x16xf32>
    %38 = tpu.matmul %33, %35, %cst_14 {dimension_numbers = #tpu.dot_dimension_numbers<[2], [2], [1], [1], [0, 0, 0, 1, 1, 1], [0], [0]>} : vector<8x16x32xbf16>, vector<8x16x32xbf16>, vector<8x16x16xf32> -> vector<8x16x16xf32>
    "tpu.trace_stop"() : () -> ()
    %c0_15 = arith.constant 0 : index
    %c0_16 = arith.constant 0 : index
    %c0_17 = arith.constant 0 : index
    %c0_18 = arith.constant 0 : index
    %39 = vector.load %arg2[%c0_15, %c0_16, %c0_17, %c0_18] : memref<4x8x16x16xf32, #tpu.memory_space<vmem>>, vector<1x8x16x16xf32>
    %40 = vector.shape_cast %39 : vector<1x8x16x16xf32> to vector<8x16x16xf32>
    %41 = arith.addf %38, %40 : vector<8x16x16xf32>
    %cst_19 = arith.constant dense<0xFF800000> : vector<8x16xf32>
    %42 = vector.multi_reduction <maximumf>, %41, %cst_19 [2] : vector<8x16x16xf32> to vector<8x16xf32>
    %43 = vector.shape_cast %42 : vector<8x16xf32> to vector<8x16x1xf32>
    %44 = vector.broadcast %43 : vector<8x16x1xf32> to vector<8x16x16xf32>
    %45 = arith.subf %41, %44 : vector<8x16x16xf32>
    %46 = math.exp %45 : vector<8x16x16xf32>
    %cst_20 = arith.constant dense<0.000000e+00> : vector<8x16xf32>
    %47 = vector.multi_reduction <add>, %46, %cst_20 [2] : vector<8x16x16xf32> to vector<8x16xf32>
    %48 = vector.shape_cast %47 : vector<8x16xf32> to vector<8x16x1xf32>
    %49 = tpu.reciprocal %48 {approx = true} : vector<8x16x1xf32> -> vector<8x16x1xf32>
    %50 = vector.broadcast %49 : vector<8x16x1xf32> to vector<8x16x16xf32>
    %51 = arith.mulf %46, %50 : vector<8x16x16xf32>
    %52 = arith.truncf %51 : vector<8x16x16xf32> to vector<8x16x16xbf16>
    "tpu.trace_start"() <{level = 10 : i32, message = "bnm,bmd->bnd"}> : () -> ()
    %cst_21 = arith.constant dense<0.000000e+00> : vector<8x16x32xf32>
    %53 = tpu.matmul %52, %37, %cst_21 {dimension_numbers = #tpu.dot_dimension_numbers<[2], [1], [1], [2], [0, 0, 0, 1, 1, 2], [0], [0]>} : vector<8x16x16xbf16>, vector<8x16x32xbf16>, vector<8x16x32xf32> -> vector<8x16x32xf32>
    "tpu.trace_stop"() : () -> ()
    %54 = vector.shape_cast %53 : vector<8x16x32xf32> to vector<128x32xf32>
    %c0_22 = arith.constant 0 : index
    %c0_23 = arith.constant 0 : index
    %55 = vector.load %arg10[%c0_22, %c0_23] : memref<128x128xf32, #tpu.memory_space<vmem>>, vector<128x32xf32>
    tpu.vector_store %arg10[%c0_22, %c0_23], %54 {strides = array<i32>} : memref<128x128xf32, #tpu.memory_space<vmem>>, vector<128x32xf32>,
    %56 = vector.extract_strided_slice %31 {offsets = [0, 32], sizes = [128, 32], strides = [1, 1]} : vector<128x384xbf16> to vector<128x32xbf16>
    %57 = vector.shape_cast %56 : vector<128x32xbf16> to vector<8x16x32xbf16>
    %58 = vector.extract_strided_slice %31 {offsets = [0, 160], sizes = [128, 32], strides = [1, 1]} : vector<128x384xbf16> to vector<128x32xbf16>
    %59 = vector.shape_cast %58 : vector<128x32xbf16> to vector<8x16x32xbf16>
    %60 = vector.extract_strided_slice %31 {offsets = [0, 288], sizes = [128, 32], strides = [1, 1]} : vector<128x384xbf16> to vector<128x32xbf16>
    %61 = vector.shape_cast %60 : vector<128x32xbf16> to vector<8x16x32xbf16>
    "tpu.trace_start"() <{level = 10 : i32, message = "bnd,bmd->bnm"}> : () -> ()
    %cst_24 = arith.constant dense<0.000000e+00> : vector<8x16x16xf32>
    %62 = tpu.matmul %57, %59, %cst_24 {dimension_numbers = #tpu.dot_dimension_numbers<[2], [2], [1], [1], [0, 0, 0, 1, 1, 1], [0], [0]>} : vector<8x16x32xbf16>, vector<8x16x32xbf16>, vector<8x16x16xf32> -> vector<8x16x16xf32>
    "tpu.trace_stop"() : () -> ()
    %c1 = arith.constant 1 : index
    %c0_25 = arith.constant 0 : index
    %c0_26 = arith.constant 0 : index
    %c0_27 = arith.constant 0 : index
    %63 = vector.load %arg2[%c1, %c0_25, %c0_26, %c0_27] : memref<4x8x16x16xf32, #tpu.memory_space<vmem>>, vector<1x8x16x16xf32>
    %64 = vector.shape_cast %63 : vector<1x8x16x16xf32> to vector<8x16x16xf32>
    %65 = arith.addf %62, %64 : vector<8x16x16xf32>
    %cst_28 = arith.constant dense<0xFF800000> : vector<8x16xf32>
    %66 = vector.multi_reduction <maximumf>, %65, %cst_28 [2] : vector<8x16x16xf32> to vector<8x16xf32>
    %67 = vector.shape_cast %66 : vector<8x16xf32> to vector<8x16x1xf32>
    %68 = vector.broadcast %67 : vector<8x16x1xf32> to vector<8x16x16xf32>
    %69 = arith.subf %65, %68 : vector<8x16x16xf32>
    %70 = math.exp %69 : vector<8x16x16xf32>
    %cst_29 = arith.constant dense<0.000000e+00> : vector<8x16xf32>
    %71 = vector.multi_reduction <add>, %70, %cst_29 [2] : vector<8x16x16xf32> to vector<8x16xf32>
    %72 = vector.shape_cast %71 : vector<8x16xf32> to vector<8x16x1xf32>
    %73 = tpu.reciprocal %72 {approx = true} : vector<8x16x1xf32> -> vector<8x16x1xf32>
    %74 = vector.broadcast %73 : vector<8x16x1xf32> to vector<8x16x16xf32>
    %75 = arith.mulf %70, %74 : vector<8x16x16xf32>
    %76 = arith.truncf %75 : vector<8x16x16xf32> to vector<8x16x16xbf16>
    "tpu.trace_start"() <{level = 10 : i32, message = "bnm,bmd->bnd"}> : () -> ()
    %cst_30 = arith.constant dense<0.000000e+00> : vector<8x16x32xf32>
    %77 = tpu.matmul %76, %61, %cst_30 {dimension_numbers = #tpu.dot_dimension_numbers<[2], [1], [1], [2], [0, 0, 0, 1, 1, 2], [0], [0]>} : vector<8x16x16xbf16>, vector<8x16x32xbf16>, vector<8x16x32xf32> -> vector<8x16x32xf32>
    "tpu.trace_stop"() : () -> ()
    %78 = vector.shape_cast %77 : vector<8x16x32xf32> to vector<128x32xf32>
    %c0_31 = arith.constant 0 : index
    %c32 = arith.constant 32 : index
    %79 = vector.load %arg10[%c0_31, %c32] : memref<128x128xf32, #tpu.memory_space<vmem>>, vector<128x32xf32>
    tpu.vector_store %arg10[%c0_31, %c32], %78 {strides = array<i32>} : memref<128x128xf32, #tpu.memory_space<vmem>>, vector<128x32xf32>,
    %80 = vector.extract_strided_slice %31 {offsets = [0, 64], sizes = [128, 32], strides = [1, 1]} : vector<128x384xbf16> to vector<128x32xbf16>
    %81 = vector.shape_cast %80 : vector<128x32xbf16> to vector<8x16x32xbf16>
    %82 = vector.extract_strided_slice %31 {offsets = [0, 192], sizes = [128, 32], strides = [1, 1]} : vector<128x384xbf16> to vector<128x32xbf16>
    %83 = vector.shape_cast %82 : vector<128x32xbf16> to vector<8x16x32xbf16>
    %84 = vector.extract_strided_slice %31 {offsets = [0, 320], sizes = [128, 32], strides = [1, 1]} : vector<128x384xbf16> to vector<128x32xbf16>
    %85 = vector.shape_cast %84 : vector<128x32xbf16> to vector<8x16x32xbf16>
    "tpu.trace_start"() <{level = 10 : i32, message = "bnd,bmd->bnm"}> : () -> ()
    %cst_32 = arith.constant dense<0.000000e+00> : vector<8x16x16xf32>
    %86 = tpu.matmul %81, %83, %cst_32 {dimension_numbers = #tpu.dot_dimension_numbers<[2], [2], [1], [1], [0, 0, 0, 1, 1, 1], [0], [0]>} : vector<8x16x32xbf16>, vector<8x16x32xbf16>, vector<8x16x16xf32> -> vector<8x16x16xf32>
    "tpu.trace_stop"() : () -> ()
    %c2 = arith.constant 2 : index
    %c0_33 = arith.constant 0 : index
    %c0_34 = arith.constant 0 : index
    %c0_35 = arith.constant 0 : index
    %87 = vector.load %arg2[%c2, %c0_33, %c0_34, %c0_35] : memref<4x8x16x16xf32, #tpu.memory_space<vmem>>, vector<1x8x16x16xf32>
    %88 = vector.shape_cast %87 : vector<1x8x16x16xf32> to vector<8x16x16xf32>
    %89 = arith.addf %86, %88 : vector<8x16x16xf32>
    %cst_36 = arith.constant dense<0xFF800000> : vector<8x16xf32>
    %90 = vector.multi_reduction <maximumf>, %89, %cst_36 [2] : vector<8x16x16xf32> to vector<8x16xf32>
    %91 = vector.shape_cast %90 : vector<8x16xf32> to vector<8x16x1xf32>
    %92 = vector.broadcast %91 : vector<8x16x1xf32> to vector<8x16x16xf32>
    %93 = arith.subf %89, %92 : vector<8x16x16xf32>
    %94 = math.exp %93 : vector<8x16x16xf32>
    %cst_37 = arith.constant dense<0.000000e+00> : vector<8x16xf32>
    %95 = vector.multi_reduction <add>, %94, %cst_37 [2] : vector<8x16x16xf32> to vector<8x16xf32>
    %96 = vector.shape_cast %95 : vector<8x16xf32> to vector<8x16x1xf32>
    %97 = tpu.reciprocal %96 {approx = true} : vector<8x16x1xf32> -> vector<8x16x1xf32>
    %98 = vector.broadcast %97 : vector<8x16x1xf32> to vector<8x16x16xf32>
    %99 = arith.mulf %94, %98 : vector<8x16x16xf32>
    %100 = arith.truncf %99 : vector<8x16x16xf32> to vector<8x16x16xbf16>
    "tpu.trace_start"() <{level = 10 : i32, message = "bnm,bmd->bnd"}> : () -> ()
    %cst_38 = arith.constant dense<0.000000e+00> : vector<8x16x32xf32>
    %101 = tpu.matmul %100, %85, %cst_38 {dimension_numbers = #tpu.dot_dimension_numbers<[2], [1], [1], [2], [0, 0, 0, 1, 1, 2], [0], [0]>} : vector<8x16x16xbf16>, vector<8x16x32xbf16>, vector<8x16x32xf32> -> vector<8x16x32xf32>
    "tpu.trace_stop"() : () -> ()
    %102 = vector.shape_cast %101 : vector<8x16x32xf32> to vector<128x32xf32>
    %c0_39 = arith.constant 0 : index
    %c64 = arith.constant 64 : index
    %103 = vector.load %arg10[%c0_39, %c64] : memref<128x128xf32, #tpu.memory_space<vmem>>, vector<128x32xf32>
    tpu.vector_store %arg10[%c0_39, %c64], %102 {strides = array<i32>} : memref<128x128xf32, #tpu.memory_space<vmem>>, vector<128x32xf32>,
    %104 = vector.extract_strided_slice %31 {offsets = [0, 96], sizes = [128, 32], strides = [1, 1]} : vector<128x384xbf16> to vector<128x32xbf16>
    %105 = vector.shape_cast %104 : vector<128x32xbf16> to vector<8x16x32xbf16>
    %106 = vector.extract_strided_slice %31 {offsets = [0, 224], sizes = [128, 32], strides = [1, 1]} : vector<128x384xbf16> to vector<128x32xbf16>
    %107 = vector.shape_cast %106 : vector<128x32xbf16> to vector<8x16x32xbf16>
    %108 = vector.extract_strided_slice %31 {offsets = [0, 352], sizes = [128, 32], strides = [1, 1]} : vector<128x384xbf16> to vector<128x32xbf16>
    %109 = vector.shape_cast %108 : vector<128x32xbf16> to vector<8x16x32xbf16>
    "tpu.trace_start"() <{level = 10 : i32, message = "bnd,bmd->bnm"}> : () -> ()
    %cst_40 = arith.constant dense<0.000000e+00> : vector<8x16x16xf32>
    %110 = tpu.matmul %105, %107, %cst_40 {dimension_numbers = #tpu.dot_dimension_numbers<[2], [2], [1], [1], [0, 0, 0, 1, 1, 1], [0], [0]>} : vector<8x16x32xbf16>, vector<8x16x32xbf16>, vector<8x16x16xf32> -> vector<8x16x16xf32>
    "tpu.trace_stop"() : () -> ()
    %c3 = arith.constant 3 : index
    %c0_41 = arith.constant 0 : index
    %c0_42 = arith.constant 0 : index
    %c0_43 = arith.constant 0 : index
    %111 = vector.load %arg2[%c3, %c0_41, %c0_42, %c0_43] : memref<4x8x16x16xf32, #tpu.memory_space<vmem>>, vector<1x8x16x16xf32>
    %112 = vector.shape_cast %111 : vector<1x8x16x16xf32> to vector<8x16x16xf32>
    %113 = arith.addf %110, %112 : vector<8x16x16xf32>
    %cst_44 = arith.constant dense<0xFF800000> : vector<8x16xf32>
    %114 = vector.multi_reduction <maximumf>, %113, %cst_44 [2] : vector<8x16x16xf32> to vector<8x16xf32>
    %115 = vector.shape_cast %114 : vector<8x16xf32> to vector<8x16x1xf32>
    %116 = vector.broadcast %115 : vector<8x16x1xf32> to vector<8x16x16xf32>
    %117 = arith.subf %113, %116 : vector<8x16x16xf32>
    %118 = math.exp %117 : vector<8x16x16xf32>
    %cst_45 = arith.constant dense<0.000000e+00> : vector<8x16xf32>
    %119 = vector.multi_reduction <add>, %118, %cst_45 [2] : vector<8x16x16xf32> to vector<8x16xf32>
    %120 = vector.shape_cast %119 : vector<8x16xf32> to vector<8x16x1xf32>
    %121 = tpu.reciprocal %120 {approx = true} : vector<8x16x1xf32> -> vector<8x16x1xf32>
    %122 = vector.broadcast %121 : vector<8x16x1xf32> to vector<8x16x16xf32>
    %123 = arith.mulf %118, %122 : vector<8x16x16xf32>
    %124 = arith.truncf %123 : vector<8x16x16xf32> to vector<8x16x16xbf16>
    "tpu.trace_start"() <{level = 10 : i32, message = "bnm,bmd->bnd"}> : () -> ()
    %cst_46 = arith.constant dense<0.000000e+00> : vector<8x16x32xf32>
    %125 = tpu.matmul %124, %109, %cst_46 {dimension_numbers = #tpu.dot_dimension_numbers<[2], [1], [1], [2], [0, 0, 0, 1, 1, 2], [0], [0]>} : vector<8x16x16xbf16>, vector<8x16x32xbf16>, vector<8x16x32xf32> -> vector<8x16x32xf32>
    "tpu.trace_stop"() : () -> ()
    %126 = vector.shape_cast %125 : vector<8x16x32xf32> to vector<128x32xf32>
    %c0_47 = arith.constant 0 : index
    %c96 = arith.constant 96 : index
    %127 = vector.load %arg10[%c0_47, %c96] : memref<128x128xf32, #tpu.memory_space<vmem>>, vector<128x32xf32>
    tpu.vector_store %arg10[%c0_47, %c96], %126 {strides = array<i32>} : memref<128x128xf32, #tpu.memory_space<vmem>>, vector<128x32xf32>,
    %c0_48 = arith.constant 0 : index
    %c0_49 = arith.constant 0 : index
    %128 = vector.load %arg10[%c0_48, %c0_49] : memref<128x128xf32, #tpu.memory_space<vmem>>, vector<128x128xf32>
    %129 = arith.truncf %128 : vector<128x128xf32> to vector<128x128xbf16>
    %c0_50 = arith.constant 0 : index
    %c0_51 = arith.constant 0 : index
    %130 = vector.load %arg7[%c0_50, %c0_51] : memref<128x128xbf16, #tpu.memory_space<vmem>>, vector<128x128xbf16>
    %cst_52 = arith.constant dense<0.000000e+00> : vector<128x128xf32>
    %131 = tpu.matmul %129, %130, %cst_52 {dimension_numbers = #tpu.dot_dimension_numbers<[1], [0], [0], [1], [0, 0, 1, 1], [], []>} : vector<128x128xbf16>, vector<128x128xbf16>, vector<128x128xf32> -> vector<128x128xf32>
    %c0_53 = arith.constant 0 : index
    %c0_54 = arith.constant 0 : index
    %132 = vector.load %arg8[%c0_53, %c0_54] : memref<1x128xf32, #tpu.memory_space<vmem>>, vector<1x128xf32>
    %133 = vector.broadcast %132 : vector<1x128xf32> to vector<128x128xf32>
    %134 = arith.addf %131, %133 : vector<128x128xf32>
    %135 = arith.truncf %134 : vector<128x128xf32> to vector<128x128xbf16>
    %c0_55 = arith.constant 0 : index
    %c0_56 = arith.constant 0 : index
    %136 = vector.load %arg9[%c0_55, %c0_56] : memref<128x128xbf16, #tpu.memory_space<vmem>>, vector<128x128xbf16>
    tpu.vector_store %arg9[%c0_55, %c0_56], %135 {strides = array<i32>} : memref<128x128xbf16, #tpu.memory_space<vmem>>, vector<128x128xbf16>,
    return
  }
  func.func @transform_0(%arg0: i32) -> (i32, i32) {
    %c0_i32 = arith.constant 0 : i32
    %c0_i32_0 = arith.constant 0 : i32
    return %arg0, %c0_i32 : i32, i32
  }
  func.func @transform_1(%arg0: i32) -> (i32, i32, i32, i32) {
    %c0_i32 = arith.constant 0 : i32
    %c0_i32_0 = arith.constant 0 : i32
    %c0_i32_1 = arith.constant 0 : i32
    %c0_i32_2 = arith.constant 0 : i32
    %c0_i32_3 = arith.constant 0 : i32
    return %c0_i32, %c0_i32_0, %c0_i32_1, %c0_i32_2 : i32, i32, i32, i32
  }
  func.func @transform_2(%arg0: i32) -> (i32, i32) {
    %c0_i32 = arith.constant 0 : i32
    %c0_i32_0 = arith.constant 0 : i32
    %c0_i32_1 = arith.constant 0 : i32
    return %c0_i32, %c0_i32_0 : i32, i32
  }
  func.func @transform_3(%arg0: i32) -> (i32, i32) {
    %c0_i32 = arith.constant 0 : i32
    %c0_i32_0 = arith.constant 0 : i32
    %c0_i32_1 = arith.constant 0 : i32
    return %c0_i32, %c0_i32_0 : i32, i32
  }
  func.func @transform_4(%arg0: i32) -> (i32, i32) {
    %c0_i32 = arith.constant 0 : i32
    %c0_i32_0 = arith.constant 0 : i32
    %c0_i32_1 = arith.constant 0 : i32
    return %c0_i32, %c0_i32_0 : i32, i32
  }
  func.func @transform_5(%arg0: i32) -> (i32, i32) {
    %c0_i32 = arith.constant 0 : i32
    %c0_i32_0 = arith.constant 0 : i32
    %c0_i32_1 = arith.constant 0 : i32
    return %c0_i32, %c0_i32_0 : i32, i32
  }
  func.func @transform_6(%arg0: i32) -> (i32, i32) {
    %c0_i32 = arith.constant 0 : i32
    %c0_i32_0 = arith.constant 0 : i32
    %c0_i32_1 = arith.constant 0 : i32
    return %c0_i32, %c0_i32_0 : i32, i32
  }
  func.func @transform_7(%arg0: i32) -> (i32, i32) {
    %c0_i32 = arith.constant 0 : i32
    %c0_i32_0 = arith.constant 0 : i32
    %c0_i32_1 = arith.constant 0 : i32
    return %c0_i32, %c0_i32_0 : i32, i32
  }
  func.func @transform_8(%arg0: i32) -> (i32, i32) {
    %c0_i32 = arith.constant 0 : i32
    %c0_i32_0 = arith.constant 0 : i32
    return %arg0, %c0_i32 : i32, i32
  }
}

module attributes {stable_mosaic.version = 11 : i64} {
  func.func @mlp_residual_kernel(%arg0: i32, %arg1: memref<128x128xf32, #tpu.memory_space<vmem>>, %arg2: memref<128x128xbf16, #tpu.memory_space<vmem>>, %arg3: memref<1x128xf32, #tpu.memory_space<vmem>>, %arg4: memref<1x128xf32, #tpu.memory_space<vmem>>, %arg5: memref<128x512xbf16, #tpu.memory_space<vmem>>, %arg6: memref<1x512xf32, #tpu.memory_space<vmem>>, %arg7: memref<512x128xbf16, #tpu.memory_space<vmem>>, %arg8: memref<1x128xf32, #tpu.memory_space<vmem>>, %arg9: memref<128x128xf32, #tpu.memory_space<vmem>>) attributes {dimension_semantics = [#tpu.dimension_semantics<parallel>], iteration_bounds = array<i64: 2>, scalar_prefetch = 0 : i64, scratch_operands = 0 : i64, tpu.core_type = #tpu.core_type<tc>, window_params = [{transform_indices = @transform_0, window_bounds = array<i64: 128, 128>}, {transform_indices = @transform_1, window_bounds = array<i64: 128, 128>}, {pipeline_mode = #tpu.pipeline_mode<synchronous>, transform_indices = @transform_2, window_bounds = array<i64: 1, 128>}, {pipeline_mode = #tpu.pipeline_mode<synchronous>, transform_indices = @transform_3, window_bounds = array<i64: 1, 128>}, {pipeline_mode = #tpu.pipeline_mode<synchronous>, transform_indices = @transform_4, window_bounds = array<i64: 128, 512>}, {pipeline_mode = #tpu.pipeline_mode<synchronous>, transform_indices = @transform_5, window_bounds = array<i64: 1, 512>}, {pipeline_mode = #tpu.pipeline_mode<synchronous>, transform_indices = @transform_6, window_bounds = array<i64: 512, 128>}, {pipeline_mode = #tpu.pipeline_mode<synchronous>, transform_indices = @transform_7, window_bounds = array<i64: 1, 128>}, {transform_indices = @transform_8, window_bounds = array<i64: 128, 128>}]} {
    %c0 = arith.constant 0 : index
    %c0_0 = arith.constant 0 : index
    %0 = vector.load %arg1[%c0, %c0_0] : memref<128x128xf32, #tpu.memory_space<vmem>>, vector<128x128xf32>
    %c0_1 = arith.constant 0 : index
    %c0_2 = arith.constant 0 : index
    %1 = vector.load %arg2[%c0_1, %c0_2] : memref<128x128xbf16, #tpu.memory_space<vmem>>, vector<128x128xbf16>
    %2 = arith.extf %1 : vector<128x128xbf16> to vector<128x128xf32>
    %3 = arith.addf %0, %2 : vector<128x128xf32>
    %c0_3 = arith.constant 0 : index
    %c0_4 = arith.constant 0 : index
    %4 = vector.load %arg3[%c0_3, %c0_4] : memref<1x128xf32, #tpu.memory_space<vmem>>, vector<1x128xf32>
    %c0_5 = arith.constant 0 : index
    %c0_6 = arith.constant 0 : index
    %5 = vector.load %arg4[%c0_5, %c0_6] : memref<1x128xf32, #tpu.memory_space<vmem>>, vector<1x128xf32>
    %cst = arith.constant dense<0.000000e+00> : vector<128xf32>
    %6 = vector.multi_reduction <add>, %3, %cst [1] : vector<128x128xf32> to vector<128xf32>
    %7 = vector.shape_cast %6 : vector<128xf32> to vector<128x1xf32>
    %cst_7 = arith.constant 1.280000e+02 : f32
    %8 = vector.broadcast %cst_7 : f32 to vector<128x1xf32>
    %9 = arith.divf %7, %8 : vector<128x1xf32>
    %10 = vector.broadcast %9 : vector<128x1xf32> to vector<128x128xf32>
    %11 = arith.subf %3, %10 : vector<128x128xf32>
    %12 = arith.mulf %11, %11 : vector<128x128xf32>
    %cst_8 = arith.constant dense<0.000000e+00> : vector<128xf32>
    %13 = vector.multi_reduction <add>, %12, %cst_8 [1] : vector<128x128xf32> to vector<128xf32>
    %14 = vector.shape_cast %13 : vector<128xf32> to vector<128x1xf32>
    %cst_9 = arith.constant 1.280000e+02 : f32
    %15 = vector.broadcast %cst_9 : f32 to vector<128x1xf32>
    %16 = arith.divf %14, %15 : vector<128x1xf32>
    %17 = vector.broadcast %9 : vector<128x1xf32> to vector<128x128xf32>
    %18 = arith.subf %3, %17 : vector<128x128xf32>
    %cst_10 = arith.constant 9.99999974E-6 : f32
    %19 = vector.broadcast %cst_10 : f32 to vector<128x1xf32>
    %20 = arith.addf %16, %19 : vector<128x1xf32>
    %21 = math.rsqrt %20 : vector<128x1xf32>
    %22 = vector.broadcast %21 : vector<128x1xf32> to vector<128x128xf32>
    %23 = arith.mulf %18, %22 : vector<128x128xf32>
    %24 = vector.broadcast %4 : vector<1x128xf32> to vector<128x128xf32>
    %25 = arith.mulf %23, %24 : vector<128x128xf32>
    %26 = vector.broadcast %5 : vector<1x128xf32> to vector<128x128xf32>
    %27 = arith.addf %25, %26 : vector<128x128xf32>
    %28 = arith.truncf %27 : vector<128x128xf32> to vector<128x128xbf16>
    %c0_11 = arith.constant 0 : index
    %c0_12 = arith.constant 0 : index
    %29 = vector.load %arg5[%c0_11, %c0_12] : memref<128x512xbf16, #tpu.memory_space<vmem>>, vector<128x512xbf16>
    %cst_13 = arith.constant dense<0.000000e+00> : vector<128x512xf32>
    %30 = tpu.matmul %28, %29, %cst_13 {dimension_numbers = #tpu.dot_dimension_numbers<[1], [0], [0], [1], [0, 0, 1, 1], [], []>} : vector<128x128xbf16>, vector<128x512xbf16>, vector<128x512xf32> -> vector<128x512xf32>
    %c0_14 = arith.constant 0 : index
    %c0_15 = arith.constant 0 : index
    %31 = vector.load %arg6[%c0_14, %c0_15] : memref<1x512xf32, #tpu.memory_space<vmem>>, vector<1x512xf32>
    %32 = vector.broadcast %31 : vector<1x512xf32> to vector<128x512xf32>
    %33 = arith.addf %30, %32 : vector<128x512xf32>
    %34 = arith.mulf %33, %33 : vector<128x512xf32>
    %35 = arith.mulf %33, %34 : vector<128x512xf32>
    %cst_16 = arith.constant 4.471500e-02 : f32
    %36 = vector.broadcast %cst_16 : f32 to vector<128x512xf32>
    %37 = arith.mulf %36, %35 : vector<128x512xf32>
    %38 = arith.addf %33, %37 : vector<128x512xf32>
    %cst_17 = arith.constant 0.797884583 : f32
    %39 = vector.broadcast %cst_17 : f32 to vector<128x512xf32>
    %40 = arith.mulf %39, %38 : vector<128x512xf32>
    %41 = math.tanh %40 : vector<128x512xf32>
    %cst_18 = arith.constant 1.000000e+00 : f32
    %42 = vector.broadcast %cst_18 : f32 to vector<128x512xf32>
    %43 = arith.addf %42, %41 : vector<128x512xf32>
    %cst_19 = arith.constant 5.000000e-01 : f32
    %44 = vector.broadcast %cst_19 : f32 to vector<128x512xf32>
    %45 = arith.mulf %44, %43 : vector<128x512xf32>
    %46 = arith.mulf %33, %45 : vector<128x512xf32>
    %47 = arith.truncf %46 : vector<128x512xf32> to vector<128x512xbf16>
    %c0_20 = arith.constant 0 : index
    %c0_21 = arith.constant 0 : index
    %48 = vector.load %arg7[%c0_20, %c0_21] : memref<512x128xbf16, #tpu.memory_space<vmem>>, vector<512x128xbf16>
    %cst_22 = arith.constant dense<0.000000e+00> : vector<128x128xf32>
    %49 = tpu.matmul %47, %48, %cst_22 {dimension_numbers = #tpu.dot_dimension_numbers<[1], [0], [0], [1], [0, 0, 1, 1], [], []>} : vector<128x512xbf16>, vector<512x128xbf16>, vector<128x128xf32> -> vector<128x128xf32>
    %c0_23 = arith.constant 0 : index
    %c0_24 = arith.constant 0 : index
    %50 = vector.load %arg8[%c0_23, %c0_24] : memref<1x128xf32, #tpu.memory_space<vmem>>, vector<1x128xf32>
    %51 = vector.broadcast %50 : vector<1x128xf32> to vector<128x128xf32>
    %52 = arith.addf %49, %51 : vector<128x128xf32>
    %53 = arith.addf %3, %52 : vector<128x128xf32>
    %c0_25 = arith.constant 0 : index
    %c0_26 = arith.constant 0 : index
    %54 = vector.load %arg9[%c0_25, %c0_26] : memref<128x128xf32, #tpu.memory_space<vmem>>, vector<128x128xf32>
    tpu.vector_store %arg9[%c0_25, %c0_26], %53 {strides = array<i32>} : memref<128x128xf32, #tpu.memory_space<vmem>>, vector<128x128xf32>,
    return
  }
  func.func @transform_0(%arg0: i32) -> (i32, i32) {
    %c0_i32 = arith.constant 0 : i32
    %c0_i32_0 = arith.constant 0 : i32
    return %arg0, %c0_i32 : i32, i32
  }
  func.func @transform_1(%arg0: i32) -> (i32, i32) {
    %c0_i32 = arith.constant 0 : i32
    %c0_i32_0 = arith.constant 0 : i32
    return %arg0, %c0_i32 : i32, i32
  }
  func.func @transform_2(%arg0: i32) -> (i32, i32) {
    %c0_i32 = arith.constant 0 : i32
    %c0_i32_0 = arith.constant 0 : i32
    %c0_i32_1 = arith.constant 0 : i32
    return %c0_i32, %c0_i32_0 : i32, i32
  }
  func.func @transform_3(%arg0: i32) -> (i32, i32) {
    %c0_i32 = arith.constant 0 : i32
    %c0_i32_0 = arith.constant 0 : i32
    %c0_i32_1 = arith.constant 0 : i32
    return %c0_i32, %c0_i32_0 : i32, i32
  }
  func.func @transform_4(%arg0: i32) -> (i32, i32) {
    %c0_i32 = arith.constant 0 : i32
    %c0_i32_0 = arith.constant 0 : i32
    %c0_i32_1 = arith.constant 0 : i32
    return %c0_i32, %c0_i32_0 : i32, i32
  }
  func.func @transform_5(%arg0: i32) -> (i32, i32) {
    %c0_i32 = arith.constant 0 : i32
    %c0_i32_0 = arith.constant 0 : i32
    %c0_i32_1 = arith.constant 0 : i32
    return %c0_i32, %c0_i32_0 : i32, i32
  }
  func.func @transform_6(%arg0: i32) -> (i32, i32) {
    %c0_i32 = arith.constant 0 : i32
    %c0_i32_0 = arith.constant 0 : i32
    %c0_i32_1 = arith.constant 0 : i32
    return %c0_i32, %c0_i32_0 : i32, i32
  }
  func.func @transform_7(%arg0: i32) -> (i32, i32) {
    %c0_i32 = arith.constant 0 : i32
    %c0_i32_0 = arith.constant 0 : i32
    %c0_i32_1 = arith.constant 0 : i32
    return %c0_i32, %c0_i32_0 : i32, i32
  }
  func.func @transform_8(%arg0: i32) -> (i32, i32) {
    %c0_i32 = arith.constant 0 : i32
    %c0_i32_0 = arith.constant 0 : i32
    return %arg0, %c0_i32 : i32, i32
  }
}

</mosaic_0001>

<bundles_post_ra>
// kernel: swin_block_forward.3
= control target key start
LH: loop header
LB: loop body
LE: loop exit
PB: predicated region body
PF: predicated region fallthrough
CT: control target
= control target key end

     0   :  { %s2782_s27 = smov 0   ;;  %s4005_s0 = inlined_call_operand.vmem [shape: f32[256,128], index: 0, kind: input, shape index: {}]   ;;  %s4006_s1 = inlined_call_operand.vmem [shape: bf16[256,128], index: 1, kind: input, shape index: {}]   ;;  %s4007_s2 = inlined_call_operand.vmem [shape: f32[1,128], index: 2, kind: input, shape index: {}]   ;;  %s4008_s3 = inlined_call_operand.vmem [shape: f32[1,128], index: 3, kind: input, shape index: {}]   ;;  %s4009_s4 = inlined_call_operand.vmem [shape: bf16[128,512], index: 4, kind: input, shape index: {}]   ;;  %s4010_s5 = inlined_call_operand.vmem [shape: f32[1,512], index: 5, kind: input, shape index: {}]   ;;  %s4011_s6 = inlined_call_operand.vmem [shape: bf16[512,128], index: 6, kind: input, shape index: {}]   ;;  %s4012_s7 = inlined_call_operand.vmem [shape: f32[1,128], index: 7, kind: input, shape index: {}]   ;;  %s4013_s8 = inlined_call_operand.vmem [shape: f32[256,128], index: 8, kind: output, shape index: {}]  }
   0x1 LB: > { %s2232_s28 = sadd.s32 4294967295, %s2734_s27   ;;  %p2236_p0 = scmp.ge.s32.totalorder %s2734_s27, 1  ;;  %s2734_s27 = sphi %s2782_s27, %s18_s27  }
   0x2   : > { %p274_p1 = scmp.lt.s32.totalorder %s2734_s27, 3 }
   0x4   : > { %p275_p2 = pnand %p2236_p0, %p274_p1 }
   0x6   : > { %278 = sbr.rel (%p275_p2) target bundleno = 914 (0x392), region = 52 }
   0xb   : > { %s2237_s29 = sshll.u32 %s2232_s28, 4  ;;  %v2488_v56 = vld [vmem:[%s4009_s4 + $0xe4] ss:$16 sps:$4 sm:$0xff]   ;;  %v2490_v57 = vld [vmem:[%s4009_s4 + $0xec] ss:$16 sps:$4 sm:$0xff]  }
   0xc   : > { %p314_p3 = scmp.lt.s32.totalorder %s2237_s29, 31  ;;  %v2492_v58 = vld [vmem:[%s4009_s4 + $0xe0] ss:$16 sps:$4 sm:$0xff]   ;;  %v2493_v59 = vld [vmem:[%s4009_s4 + $0xe8] ss:$16 sps:$4 sm:$0xff]   ;;  %841 = vmatprep.subr.bf16.mxu0 %v2488_v56  ;;  %954 = vmatprep.subr.bf16.mxu1 %v2490_v57 }
   0xd   : > { %842 = vmatpush1.bf16.msra.mxu0 %v2492_v58  ;;  %955 = vmatpush1.bf16.msra.mxu1 %v2493_v59  ;;  %v2500_v59 = vld [vmem:[%s4009_s4 + $0xa4] ss:$16 sps:$4 sm:$0xff]  }
   0xe   : > { %s4178_s29 = smov (!%p314_p3, %s2237_s29), 31 }
   0xf   : > { %s2238_s30 = sshll.u32 %s4178_s29, 3  ;;  %s2240_s9 = sshll.u32 %s4178_s29, 2 }
  0x10   : > { %s2799_s12 = scalar_lea.vmem %s4005_s0, %s2238_s30  ;;  %s2804_s15 = scalar_lea.vmem %s4006_s1, %s2240_s9 }
  0x11   : > { %v332_v0 = vld [vmem:[%s2799_s12] sm:$0xff]  ;;  %v334_v3 = vld [vmem:[%s2799_s12 + $0x10] sm:$0xff]  ;;  %v2344_v4 = vld [vmem:[%s2804_s15 + $0x8] sm:$0xff]   ;;  %s3953_s21 = scalar_lea.vmem %s4013_s8, %s2238_s30 }
  0x12   : > { %v2313_v1 = vld [vmem:[%s2804_s15] sm:$0xff]   ;;  %v2318_v6 = vunpack.c.l.bf16 %v2344_v4  ;;  %v333_v7 = vld [vmem:[%s2799_s12 + $0x8] sm:$0xff]  ;;  %v2319_v8 = vunpack.c.h.bf16 %v2344_v4  ;;  %v2345_v9 = vld [vmem:[%s2804_s15 + $0x10] sm:$0xff]  }
  0x13   : > { %v2314_v2 = vunpack.c.l.bf16 %v2313_v1  ;;  %v2315_v5 = vunpack.c.h.bf16 %v2313_v1  ;;  %v335_v11 = vld [vmem:[%s2799_s12 + $0x18] sm:$0xff]  ;;  %v2322_v14 = vunpack.c.l.bf16 %v2345_v9  ;;  %v336_v16 = vld [vmem:[%s2799_s12 + $0x20] sm:$0xff]  ;;  %v2323_v17 = vunpack.c.h.bf16 %v2345_v9  ;;  %v337_v19 = vld [vmem:[%s2799_s12 + $0x28] sm:$0xff] }
  0x14   : > { %v2815_v12 = vadd.f32 %v2318_v6, %v334_v3  ;;  %v2821_v15 = vadd.f32 %v2319_v8, %v335_v11  ;;  %v2346_v18 = vld [vmem:[%s2804_s15 + $0x18] sm:$0xff]   ;;  %v338_v20 = vld [vmem:[%s2799_s12 + $0x30] sm:$0xff]  ;;  %v2347_v21 = vld [vmem:[%s2804_s15 + $0x20] sm:$0xff]  }
  0x15   : > { %v2812_v10 = vadd.f32 %v2314_v2, %v332_v0  ;;  %v2818_v13 = vadd.f32 %v2315_v5, %v333_v7  ;;  %v2829_v22 = vadd.f32 %v2322_v14, %v336_v16  ;;  %v2326_v23 = vunpack.c.l.bf16 %v2346_v18  ;;  %v339_v24 = vld [vmem:[%s2799_s12 + $0x38] sm:$0xff]  ;;  %v340_v27 = vld [vmem:[%s2799_s12 + $0x40] sm:$0xff]  ;;  %v2348_v28 = vld [vmem:[%s2804_s15 + $0x28] sm:$0xff]  }
  0x16   : > { %4062 = vst [vmem:[#allocation3_spill] sm:$0xff] %v2815_v12  ;;  %402 = vadd.xlane.f32.xlu1 %v2815_v12  ;;  %4064 = vst [vmem:[#allocation5_spill] sm:$0xff] %v2821_v15  ;;  %v2833_v25 = vadd.f32 %v2323_v17, %v337_v19  ;;  %v2327_v26 = vunpack.c.h.bf16 %v2346_v18  ;;  %v2330_v30 = vunpack.c.l.bf16 %v2347_v21  ;;  %v341_v31 = vld [vmem:[%s2799_s12 + $0x48] sm:$0xff]  ;;  %v2331_v33 = vunpack.c.h.bf16 %v2347_v21  ;;  %v342_v34 = vld [vmem:[%s2799_s12 + $0x50] sm:$0xff] }
  0x17   : > { %4061 = vst [vmem:[#allocation2_spill] sm:$0xff] %v2812_v10  ;;  %398 = vadd.xlane.f32.xlu0 %v2812_v10  ;;  %4063 = vst [vmem:[#allocation4_spill] sm:$0xff] %v2818_v13  ;;  %v2838_v29 = vadd.f32 %v2326_v23, %v338_v20  ;;  %v2349_v35 = vld [vmem:[%s2804_s15 + $0x30] sm:$0xff]   ;;  %v2334_v37 = vunpack.c.l.bf16 %v2348_v28  ;;  %v343_v38 = vld [vmem:[%s2799_s12 + $0x58] sm:$0xff]  ;;  %v2335_v40 = vunpack.c.h.bf16 %v2348_v28 }
  0x18   : > { %4065 = vst [vmem:[#allocation6_spill] sm:$0xff] %v2829_v22  ;;  %4066 = vst [vmem:[#allocation7_spill] sm:$0xff] %v2833_v25  ;;  %v2842_v32 = vadd.f32 %v2327_v26, %v339_v24  ;;  %v2847_v36 = vadd.f32 %v2330_v30, %v340_v27  ;;  %v2851_v39 = vadd.f32 %v2331_v33, %v341_v31  ;;  %v344_v41 = vld [vmem:[%s2799_s12 + $0x60] sm:$0xff]  ;;  %v2350_v42 = vld [vmem:[%s2804_s15 + $0x38] sm:$0xff]   ;;  %v2338_v44 = vunpack.c.l.bf16 %v2349_v35 }
  0x19   : > { %4067 = vst [vmem:[#allocation8_spill] sm:$0xff] %v2838_v29  ;;  %v2856_v43 = vadd.f32 %v2334_v37, %v342_v34  ;;  %v345_v45 = vld [vmem:[%s2799_s12 + $0x68] sm:$0xff]  ;;  %v2860_v46 = vadd.f32 %v2335_v40, %v343_v38  ;;  %v2339_v47 = vunpack.c.h.bf16 %v2349_v35  ;;  %v346_v48 = vld [vmem:[%s2799_s12 + $0x70] sm:$0xff]  ;;  %v2342_v50 = vunpack.c.l.bf16 %v2350_v42  ;;  %v347_v51 = vld [vmem:[%s2799_s12 + $0x78] sm:$0xff] }
  0x1a   : > { %404 = vadd.xlane.f32.xlu1 %v2821_v15  ;;  %4068 = vst [vmem:[#allocation9_spill] sm:$0xff] %v2842_v32  ;;  %4069 = vst [vmem:[#allocation10_spill] sm:$0xff] %v2847_v36  ;;  %v2864_v49 = vadd.f32 %v2338_v44, %v344_v41  ;;  %v2343_v53 = vunpack.c.h.bf16 %v2350_v42  ;;  %v2494_v40 = vld [vmem:[%s4009_s4 + $0xc4] ss:$16 sps:$4 sm:$0xff]   ;;  %v2496_v41 = vld [vmem:[%s4009_s4 + $0xcc] ss:$16 sps:$4 sm:$0xff]  }
  0x1b   : > { %400 = vadd.xlane.f32.xlu0 %v2818_v13  ;;  %4070 = vst [vmem:[#allocation11_spill] sm:$0xff] %v2851_v39  ;;  %4071 = vst [vmem:[#allocation12_spill] sm:$0xff] %v2856_v43  ;;  %v2868_v52 = vadd.f32 %v2339_v47, %v345_v45  ;;  %v2871_v54 = vadd.f32 %v2342_v50, %v346_v48  ;;  %v2498_v44 = vld [vmem:[%s4009_s4 + $0xc0] ss:$16 sps:$4 sm:$0xff]   ;;  %v2499_v45 = vld [vmem:[%s4009_s4 + $0xc8] ss:$16 sps:$4 sm:$0xff]   ;;  %843 = vmatprep.subr.bf16.mxu0 %v2494_v40 }
  0x1c   : > { %4072 = vst [vmem:[#allocation13_spill] sm:$0xff] %v2860_v46  ;;  %4073 = vst [vmem:[#allocation14_spill] sm:$0xff] %v2864_v49  ;;  %v2874_v55 = vadd.f32 %v2343_v53, %v347_v51  ;;  %956 = vmatprep.subr.bf16.mxu1 %v2496_v41  ;;  %844 = vmatpush1.bf16.msra.mxu0 %v2498_v44  ;;  %v2516_v41 = vld [vmem:[%s4009_s4 + $0x60] ss:$16 sps:$4 sm:$0xff]  }
  0x1d   : > { %4074 = vst [vmem:[#allocation15_spill] sm:$0xff] %v2868_v52  ;;  %4075 = vst [vmem:[#allocation16_spill] sm:$0xff] %v2871_v54  ;;  %957 = vmatpush1.bf16.msra.mxu1 %v2499_v45  ;;  %845 = vmatprep.subr.bf16.mxu0 %v2500_v59  ;;  %v2526_v59 = vld [vmem:[%s4009_s4 + $0x2c] ss:$16 sps:$4 sm:$0xff]  }
  0x1e   : > { %408 = vadd.xlane.f32.xlu1 %v2833_v25  ;;  %4076 = vst [vmem:[#allocation17_spill] sm:$0xff] %v2874_v55 }
  0x1f   : > { %406 = vadd.xlane.f32.xlu0 %v2829_v22 }
  0x22   : > { %412 = vadd.xlane.f32.xlu1 %v2842_v32 }
  0x23   : > { %410 = vadd.xlane.f32.xlu0 %v2838_v29 }
  0x26   : > { %416 = vadd.xlane.f32.xlu1 %v2851_v39 }
  0x27   : > { %414 = vadd.xlane.f32.xlu0 %v2847_v36 }
  0x2a   : > { %420 = vadd.xlane.f32.xlu1 %v2860_v46 }
  0x2b   : > { %418 = vadd.xlane.f32.xlu0 %v2856_v43 }
  0x2e   : > { %424 = vadd.xlane.f32.xlu1 %v2868_v52 }
  0x2f   : > { %422 = vadd.xlane.f32.xlu0 %v2864_v49 }
  0x32   : > { %428 = vadd.xlane.f32.xlu1 %v2874_v55 }
  0x33   : > { %426 = vadd.xlane.f32.xlu0 %v2871_v54 }
  0x9f   : > { %v403_v62 = vpop.xlane.xlu1 %402 }
  0xa0   : > { %v399_v60 = vpop.xlane.xlu0 %398  ;;  %v433_v63 = vmul.f32 0.0078125, %v403_v62 }
  0xa1   : > { %v431_v61 = vmul.f32 0.0078125, %v399_v60  ;;  %v2502_v60 = vld [vmem:[%s4009_s4 + $0xac] ss:$16 sps:$4 sm:$0xff]  }
  0xa2   : > { %v2894_v1 = vsub.f32 %v2815_v12, %v433_v63  ;;  %v2504_v63 = vld [vmem:[%s4009_s4 + $0xa0] ss:$16 sps:$4 sm:$0xff]   ;;  %958 = vmatprep.subr.bf16.mxu1 %v2502_v60 }
  0xa3   : > { %v2891_v0 = vsub.f32 %v2812_v10, %v431_v61  ;;  %v405_v5 = vpop.xlane.xlu1 %404  ;;  %846 = vmatpush1.bf16.msra.mxu0 %v2504_v63  ;;  %v2528_v60 = vld [vmem:[%s4009_s4 + $0x20] ss:$16 sps:$4 sm:$0xff]   ;;  %v2530_v63 = vld [vmem:[%s4009_s4 + $0x4] ss:$16 sps:$4 sm:$0xff]  }
  0xa4   : > { %v401_v2 = vpop.xlane.xlu0 %400  ;;  %v434_v6 = vmul.f32 0.0078125, %v405_v5  ;;  %v465_v8 = vmul.f32 %v2894_v1, %v2894_v1 }
  0xa5   : > { %v432_v3 = vmul.f32 0.0078125, %v401_v2  ;;  %v463_v4 = vmul.f32 %v2891_v0, %v2891_v0  ;;  %v2505_v2 = vld [vmem:[%s4009_s4 + $0xa8] ss:$16 sps:$4 sm:$0xff]  }
  0xa6   : > { %v2904_v9 = vsub.f32 %v2821_v15, %v434_v6  ;;  %959 = vmatpush1.bf16.msra.mxu1 %v2505_v2  ;;  %v2532_v2 = vld [vmem:[%s4009_s4 + $0xc] ss:$16 sps:$4 sm:$0xff]  }
  0xa7   : > { %v2899_v7 = vsub.f32 %v2818_v13, %v432_v3  ;;  %479 = vadd.xlane.f32.xlu0 %v463_v4  ;;  %v409_v17 = vpop.xlane.xlu1 %408 }
  0xa8   : > { %v407_v11 = vpop.xlane.xlu0 %406  ;;  %v436_v18 = vmul.f32 0.0078125, %v409_v17  ;;  %v466_v20 = vmul.f32 %v2904_v9, %v2904_v9 }
  0xa9   : > { %v435_v14 = vmul.f32 0.0078125, %v407_v11  ;;  %v464_v16 = vmul.f32 %v2899_v7, %v2899_v7 }
  0xaa   : > { %v2914_v21 = vsub.f32 %v2833_v25, %v436_v18 }
  0xab   : > { %v2909_v19 = vsub.f32 %v2829_v22, %v435_v14  ;;  %483 = vadd.xlane.f32.xlu0 %v465_v8  ;;  %481 = vadd.xlane.f32.xlu1 %v464_v16  ;;  %v413_v27 = vpop.xlane.xlu1 %412  ;;  %v2506_v14 = vld [vmem:[%s4009_s4 + $0x84] ss:$16 sps:$4 sm:$0xff]   ;;  %v2508_v16 = vld [vmem:[%s4009_s4 + $0x8c] ss:$16 sps:$4 sm:$0xff]  }
  0xac   : > { %v411_v23 = vpop.xlane.xlu0 %410  ;;  %v438_v28 = vmul.f32 0.0078125, %v413_v27  ;;  %v468_v31 = vmul.f32 %v2914_v21, %v2914_v21  ;;  %847 = vmatprep.subr.bf16.mxu0 %v2506_v14  ;;  %960 = vmatprep.subr.bf16.mxu1 %v2508_v16 }
  0xad   : > { %v437_v24 = vmul.f32 0.0078125, %v411_v23  ;;  %v467_v26 = vmul.f32 %v2909_v19, %v2909_v19  ;;  %v2511_v23 = vld [vmem:[%s4009_s4 + $0x88] ss:$16 sps:$4 sm:$0xff]  }
  0xae   : > { %v2924_v33 = vsub.f32 %v2842_v32, %v438_v28  ;;  %961 = vmatpush1.bf16.msra.mxu1 %v2511_v23 }
  0xaf   : > { %v2919_v30 = vsub.f32 %v2838_v29, %v437_v24  ;;  %485 = vadd.xlane.f32.xlu1 %v466_v20  ;;  %487 = vadd.xlane.f32.xlu0 %v467_v26  ;;  %v417_v38 = vpop.xlane.xlu1 %416  ;;  %v2510_v20 = vld [vmem:[%s4009_s4 + $0x80] ss:$16 sps:$4 sm:$0xff]  }
  0xb0   : > { %v415_v34 = vpop.xlane.xlu0 %414  ;;  %v440_v42 = vmul.f32 0.0078125, %v417_v38  ;;  %v470_v48 = vmul.f32 %v2924_v33, %v2924_v33  ;;  %848 = vmatpush1.bf16.msra.mxu0 %v2510_v20 }
  0xb1   : > { %v439_v35 = vmul.f32 0.0078125, %v415_v34  ;;  %v469_v37 = vmul.f32 %v2919_v30, %v2919_v30 }
  0xb2   : > { %v2946_v50 = vsub.f32 %v2851_v39, %v440_v42  ;;  %v2517_v42 = vld [vmem:[%s4009_s4 + $0x68] ss:$16 sps:$4 sm:$0xff]  }
  0xb3   : > { %v2941_v47 = vsub.f32 %v2847_v36, %v439_v35  ;;  %489 = vadd.xlane.f32.xlu1 %v468_v31  ;;  %491 = vadd.xlane.f32.xlu0 %v469_v37  ;;  %v421_v57 = vpop.xlane.xlu1 %420  ;;  %v2512_v35 = vld [vmem:[%s4009_s4 + $0x64] ss:$16 sps:$4 sm:$0xff]   ;;  %v2514_v37 = vld [vmem:[%s4009_s4 + $0x6c] ss:$16 sps:$4 sm:$0xff]  }
  0xb4   : > { %v419_v51 = vpop.xlane.xlu0 %418  ;;  %v442_v58 = vmul.f32 0.0078125, %v421_v57  ;;  %v472_v62 = vmul.f32 %v2946_v50, %v2946_v50  ;;  %849 = vmatprep.subr.bf16.mxu0 %v2512_v35  ;;  %962 = vmatprep.subr.bf16.mxu1 %v2514_v37  ;;  %v2523_v57 = vld [vmem:[%s4009_s4 + $0x48] ss:$16 sps:$4 sm:$0xff]  }
  0xb5   : > { %v441_v53 = vmul.f32 0.0078125, %v419_v51  ;;  %v471_v56 = vmul.f32 %v2941_v47, %v2941_v47  ;;  %850 = vmatpush1.bf16.msra.mxu0 %v2516_v41  ;;  %963 = vmatpush1.bf16.msra.mxu1 %v2517_v42  ;;  %v2520_v51 = vld [vmem:[%s4009_s4 + $0x4c] ss:$16 sps:$4 sm:$0xff]  }
  0xb6   : > { %v2968_v3 = vsub.f32 %v2860_v46, %v442_v58  ;;  %964 = vmatprep.subr.bf16.mxu1 %v2520_v51  ;;  %v2524_v58 = vld [vmem:[%s4009_s4 + $0x24] ss:$16 sps:$4 sm:$0xff]  }
  0xb7   : > { %v2957_v61 = vsub.f32 %v2856_v43, %v441_v53  ;;  %493 = vadd.xlane.f32.xlu1 %v470_v48  ;;  %495 = vadd.xlane.f32.xlu0 %v471_v56  ;;  %v425_v8 = vpop.xlane.xlu1 %424  ;;  %v2518_v48 = vld [vmem:[%s4009_s4 + $0x44] ss:$16 sps:$4 sm:$0xff]   ;;  %v2522_v56 = vld [vmem:[%s4009_s4 + $0x40] ss:$16 sps:$4 sm:$0xff]  }
  0xb8   : > { %v423_v4 = vpop.xlane.xlu0 %422  ;;  %v444_v11 = vmul.f32 0.0078125, %v425_v8  ;;  %v474_v18 = vmul.f32 %v2968_v3, %v2968_v3  ;;  %851 = vmatprep.subr.bf16.mxu0 %v2518_v48  ;;  %v2536_v8 = vld [vmem:[%s4011_s6 + $0x78] sm:$0xff]  }
  0xb9   : > { %v443_v5 = vmul.f32 0.0078125, %v423_v4  ;;  %v473_v6 = vmul.f32 %v2957_v61, %v2957_v61  ;;  %852 = vmatpush1.bf16.msra.mxu0 %v2522_v56  ;;  %965 = vmatpush1.bf16.msra.mxu1 %v2523_v57  ;;  %v2534_v4 = vld [vmem:[%s4009_s4] ss:$16 sps:$4 sm:$0xff]  }
  0xba   : > { %v2990_v24 = vsub.f32 %v2868_v52, %v444_v11  ;;  %853 = vmatprep.subr.bf16.mxu0 %v2524_v58  ;;  %966 = vmatprep.subr.bf16.mxu1 %v2526_v59  ;;  %v2538_v11 = vld [vmem:[%s4011_s6 + $0xf8] sm:$0xff]  }
  0xbb   : > { %v2979_v17 = vsub.f32 %v2864_v49, %v443_v5  ;;  %497 = vadd.xlane.f32.xlu1 %v472_v62  ;;  %499 = vadd.xlane.f32.xlu0 %v473_v6  ;;  %v429_v31 = vpop.xlane.xlu1 %428  ;;  %v2529_v62 = vld [vmem:[%s4009_s4 + $0x28] ss:$16 sps:$4 sm:$0xff]   ;;  %v2736_v6 = vmov 0  }
  0xbc   : > { %v427_v26 = vpop.xlane.xlu0 %426  ;;  %v446_v34 = vmul.f32 0.0078125, %v429_v31  ;;  %v476_v40 = vmul.f32 %v2990_v24, %v2990_v24  ;;  %v2535_v5 = vld [vmem:[%s4009_s4 + $0x8] ss:$16 sps:$4 sm:$0xff]   ;;  %873 = vmatprep.mubr.bf16.mxu0 %v2736_v6  ;;  %986 = vmatprep.mubr.bf16.mxu1 %v2736_v6 }
  0xbd   : > { %v445_v27 = vmul.f32 0.0078125, %v427_v26  ;;  %v475_v28 = vmul.f32 %v2979_v17, %v2979_v17  ;;  %854 = vmatpush1.bf16.msra.mxu0 %v2528_v60  ;;  %967 = vmatpush1.bf16.msra.mxu1 %v2529_v62  ;;  %v3066_v62 = vld [vmem:[%s4007_s2] ss:$0 sm:$0xff] }
  0xbe   : > { %v3012_v44 = vsub.f32 %v2874_v55, %v446_v34  ;;  %855 = vmatprep.subr.bf16.mxu0 %v2530_v63  ;;  %968 = vmatprep.subr.bf16.mxu1 %v2532_v2 }
  0xbf   : > { %v3001_v38 = vsub.f32 %v2871_v54, %v445_v27  ;;  %501 = vadd.xlane.f32.xlu1 %v474_v18  ;;  %503 = vadd.xlane.f32.xlu0 %v475_v28 }
  0xc0   : > { %v478_v53 = vmul.f32 %v3012_v44, %v3012_v44 }
  0xc1   : > { %v477_v45 = vmul.f32 %v3001_v38, %v3001_v38  ;;  %856 = vmatpush1.bf16.msra.mxu0 %v2534_v4  ;;  %969 = vmatpush1.bf16.msra.mxu1 %v2535_v5 }
  0xc2   : > { %2351 = vmatprep.subr.bf16.mxu0 %v2536_v8  ;;  %2415 = vmatprep.subr.bf16.mxu1 %v2538_v11 }
  0xc3   : > { %505 = vadd.xlane.f32.xlu1 %v476_v40  ;;  %507 = vadd.xlane.f32.xlu0 %v477_v45 }
  0xc7   : > { %509 = vadd.xlane.f32.xlu1 %v478_v53 }
 0x130   : > { %v480_v14 = vpop.xlane.xlu0 %479 }
 0x131   : > { %v511_v16 = vmul.f32 0.0078125, %v480_v14 }
 0x133   : > { %v527_v18 = vadd.f32 1e-05, %v511_v16 }
 0x134   : > { %v482_v20 = vpop.xlane.xlu1 %481  ;;  %v484_v23 = vpop.xlane.xlu0 %483 }
 0x135   : > { %2568 = vrsqrt.f32 %v527_v18  ;;  %v512_v26 = vmul.f32 0.0078125, %v482_v20  ;;  %v513_v27 = vmul.f32 0.0078125, %v484_v23  ;;  %v3073_v18 = vld [vmem:[%s4008_s3] ss:$0 sm:$0xff] }
 0x137   : > { %v528_v28 = vadd.f32 1e-05, %v512_v26  ;;  %v529_v31 = vadd.f32 1e-05, %v513_v27 }
 0x138   : > { %v486_v34 = vpop.xlane.xlu1 %485  ;;  %v488_v35 = vpop.xlane.xlu0 %487 }
 0x139   : > { %2570 = vrsqrt.f32 %v528_v28  ;;  %v514_v37 = vmul.f32 0.0078125, %v486_v34  ;;  %v515_v41 = vmul.f32 0.0078125, %v488_v35 }
 0x13a   : > { %2572 = vrsqrt.f32 %v529_v31 }
 0x13b   : > { %v530_v40 = vadd.f32 1e-05, %v514_v37  ;;  %v531_v48 = vadd.f32 1e-05, %v515_v41  ;;  %v2537_v37 = vld [vmem:[%s4011_s6 + $0x38] sm:$0xff]  }
 0x13c   : > { %v490_v42 = vpop.xlane.xlu1 %489  ;;  %v492_v53 = vpop.xlane.xlu0 %491 }
 0x13d   : > { %2574 = vrsqrt.f32 %v530_v40  ;;  %v516_v45 = vmul.f32 0.0078125, %v490_v42  ;;  %v517_v59 = vmul.f32 0.0078125, %v492_v53  ;;  %v2539_v40 = vld [vmem:[%s4011_s6 + $0xb8] sm:$0xff]  }
 0x13f   : > { %v532_v51 = vadd.f32 1e-05, %v516_v45  ;;  %v533_v4 = vadd.f32 1e-05, %v517_v59 }
 0x140   : > { %v494_v56 = vpop.xlane.xlu1 %493  ;;  %v496_v8 = vpop.xlane.xlu0 %495 }
 0x141   : > { %2576 = vrsqrt.f32 %v532_v51  ;;  %v518_v57 = vmul.f32 0.0078125, %v494_v56  ;;  %v519_v26 = vmul.f32 0.0078125, %v496_v8 }
 0x142   : > { %v2569_v58 = vpop.eup %2568  ;;  %2578 = vrsqrt.f32 %v531_v48 }
 0x143   : > { %v559_v60 = vmul.f32 %v2569_v58, %v2891_v0  ;;  %v534_v63 = vadd.f32 1e-05, %v518_v57  ;;  %v535_v48 = vadd.f32 1e-05, %v519_v26 }
 0x144   : > { %v498_v5 = vpop.xlane.xlu1 %497  ;;  %v500_v56 = vpop.xlane.xlu0 %499 }
 0x145   : > { %v581_v14 = vmul.f32 %v3066_v62, %v559_v60  ;;  %2580 = vrsqrt.f32 %v534_v63  ;;  %v520_v0 = vmul.f32 0.0078125, %v498_v5  ;;  %v2541_v60 = vld [vmem:[%s4011_s6 + $0x30] sm:$0xff]  }
 0x146   : > { %v2571_v2 = vpop.eup %2570  ;;  %2582 = vrsqrt.f32 %v533_v4  ;;  %v2543_v63 = vld [vmem:[%s4011_s6 + $0xb0] sm:$0xff]   ;;  %v521_v4 = vmul.f32 0.0078125, %v500_v56 }
 0x147   : > { %v560_v11 = vmul.f32 %v2571_v2, %v2899_v7  ;;  %v2573_v16 = vpop.eup %2572  ;;  %v603_v27 = vadd.f32 %v3073_v18, %v581_v14  ;;  %v536_v34 = vadd.f32 1e-05, %v520_v0  ;;  %v2544_v2 = vld [vmem:[%s4011_s6 + $0x68] sm:$0xff]  }
 0x148   : > { %v561_v7 = vmul.f32 %v2573_v16, %v2894_v1  ;;  %v502_v42 = vpop.xlane.xlu1 %501  ;;  %v2540_v1 = vld [vmem:[%s4011_s6 + $0x70] sm:$0xff]   ;;  %v2545_v0 = vld [vmem:[%s4011_s6 + $0x28] sm:$0xff]  }
 0x149   : > { %v582_v20 = vmul.f32 %v3066_v62, %v560_v11  ;;  %2584 = vrsqrt.f32 %v536_v34  ;;  %v522_v57 = vmul.f32 0.0078125, %v502_v42 }
 0x14a   : > { %v2575_v23 = vpop.eup %2574  ;;  %v583_v51 = vmul.f32 %v3066_v62, %v561_v7  ;;  %2586 = vrsqrt.f32 %v535_v48  ;;  %v504_v7 = vpop.xlane.xlu0 %503 }
 0x14b   : > { %v604_v28 = vadd.f32 %v3073_v18, %v582_v20  ;;  %v562_v31 = vmul.f32 %v2575_v23, %v2904_v9  ;;  %v2542_v9 = vld [vmem:[%s4011_s6 + $0xf0] sm:$0xff]   ;;  %v538_v11 = vadd.f32 1e-05, %v522_v57  ;;  %v2547_v20 = vld [vmem:[%s4011_s6 + $0xa8] sm:$0xff]  }
 0x14c   : > { %v605_v5 = vadd.f32 %v3073_v18, %v583_v51  ;;  %v506_v26 = vpop.xlane.xlu1 %505 }
 0x14d   : > { %v619_v35 = vpack.c.bf16 %v604_v28, %v603_v27  ;;  %v584_v45 = vmul.f32 %v3066_v62, %v562_v31  ;;  %2588 = vrsqrt.f32 %v538_v11  ;;  %v524_v31 = vmul.f32 0.0078125, %v506_v26 }
 0x14e   : > { %v2577_v41 = vpop.eup %2576  ;;  %v508_v56 = vpop.xlane.xlu0 %507 }
 0x14f   : > { %874 = vmatmul.mubr.bf16.vlgmr.msra.gmra.mxu0 %v619_v35  ;;  %987 = vmatmul.mubr.bf16.vlgmr.msra.gmra.mxu1 %v619_v35  ;;  %v2579_v53 = vpop.eup %2578  ;;  %v606_v58 = vadd.f32 %v3073_v18, %v584_v45  ;;  %v564_v59 = vmul.f32 %v2577_v41, %v2914_v21  ;;  %v2546_v21 = vld [vmem:[%s4011_s6 + $0xe8] sm:$0xff]   ;;  %v540_v42 = vadd.f32 1e-05, %v524_v31 }
 0x150   : > { %883 = vmatprep.mubr.bf16.mxu0 %v2736_v6  ;;  %996 = vmatprep.mubr.bf16.mxu1 %v2736_v6  ;;  %v563_v8 = vmul.f32 %v2579_v53, %v2909_v19  ;;  %v537_v19 = vadd.f32 1e-05, %v521_v4  ;;  %v510_v48 = vpop.xlane.xlu1 %509 }
 0x151   : > { %2352 = vmatpush3.bf16.msra.mxu0 %v2537_v37  ;;  %2416 = vmatpush3.bf16.msra.mxu1 %v2539_v40  ;;  %v620_v14 = vpack.c.bf16 %v606_v58, %v605_v5  ;;  %v586_v16 = vmul.f32 %v3066_v62, %v564_v59  ;;  %v523_v37 = vmul.f32 0.0078125, %v504_v7  ;;  %v526_v57 = vmul.f32 0.0078125, %v510_v48 }
 0x152   : > { %2353 = vmatprep.subr.bf16.mxu0 %v2540_v1  ;;  %2417 = vmatprep.subr.bf16.mxu1 %v2542_v9  ;;  %v2581_v23 = vpop.eup %2580  ;;  %v585_v28 = vmul.f32 %v3066_v62, %v563_v8  ;;  %2590 = vrsqrt.f32 %v537_v19  ;;  %v525_v59 = vmul.f32 0.0078125, %v508_v56  ;;  %v2553_v56 = vld [vmem:[%s4011_s6 + $0x18] sm:$0xff]  }
 0x153   : > { %v2583_v27 = vpop.eup %2582  ;;  %v608_v34 = vadd.f32 %v3073_v18, %v586_v16  ;;  %v566_v35 = vmul.f32 %v2581_v23, %v2924_v33  ;;  %v539_v51 = vadd.f32 1e-05, %v523_v37  ;;  %2592 = vrsqrt.f32 %v540_v42 }
 0x154   : > { %v607_v40 = vadd.f32 %v3073_v18, %v585_v28  ;;  %v565_v41 = vmul.f32 %v2583_v27, %v2919_v30  ;;  %v541_v8 = vadd.f32 1e-05, %v525_v59  ;;  %v2557_v59 = vld [vmem:[%s4011_s6 + $0x10] sm:$0xff]  }
 0x155   : > { %2354 = vmatpush3.bf16.msra.mxu0 %v2541_v60  ;;  %2418 = vmatpush3.bf16.msra.mxu1 %v2543_v63  ;;  %v588_v1 = vmul.f32 %v3066_v62, %v566_v35  ;;  %2594 = vrsqrt.f32 %v539_v51 }
 0x156   : > { %2355 = vmatprep.subr.bf16.mxu0 %v2544_v2  ;;  %2419 = vmatprep.subr.bf16.mxu1 %v2546_v21  ;;  %v621_v45 = vpack.c.bf16 %v608_v34, %v607_v40  ;;  %v2585_v9 = vpop.eup %2584  ;;  %v587_v53 = vmul.f32 %v3066_v62, %v565_v41  ;;  %v542_v2 = vadd.f32 1e-05, %v526_v57  ;;  %v2555_v57 = vld [vmem:[%s4011_s6 + $0x98] sm:$0xff]  }
 0x157   : > { %884 = vmatmul.mubr.bf16.gmra.mxu0 %v620_v14  ;;  %997 = vmatmul.mubr.bf16.gmra.mxu1 %v620_v14  ;;  %v2587_v33 = vpop.eup %2586  ;;  %v610_v30 = vadd.f32 %v3073_v18, %v588_v1  ;;  %v568_v58 = vmul.f32 %v2585_v9, %v2946_v50 }
 0x158   : > { %893 = vmatprep.mubr.bf16.mxu0 %v2736_v6  ;;  %1006 = vmatprep.mubr.bf16.mxu1 %v2736_v6  ;;  %v609_v60 = vadd.f32 %v3073_v18, %v587_v53  ;;  %v567_v63 = vmul.f32 %v2587_v33, %v2941_v47  ;;  %2596 = vrsqrt.f32 %v542_v2  ;;  %v2550_v53 = vld [vmem:[%s4011_s6 + $0xe0] sm:$0xff]   ;;  %v2554_v33 = vld [vmem:[%s4011_s6 + $0xd8] sm:$0xff]   ;;  %v2562_v2 = vld [vmem:[%s4011_s6 + $0xc8] sm:$0xff]  }
 0x159   : > { %2356 = vmatpush3.bf16.msra.mxu0 %v2545_v0  ;;  %2420 = vmatpush3.bf16.msra.mxu1 %v2547_v20  ;;  %v590_v4 = vmul.f32 %v3066_v62, %v568_v58  ;;  %2598 = vrsqrt.f32 %v541_v8  ;;  %v2558_v58 = vld [vmem:[%s4011_s6 + $0xd0] sm:$0xff]   ;;  %v2566_v8 = vld [vmem:[%s4011_s6 + $0xc0] sm:$0xff]  }
 0x15a   : > { %v622_v21 = vpack.c.bf16 %v610_v30, %v609_v60  ;;  %v2589_v5 = vpop.eup %2588  ;;  %v589_v11 = vmul.f32 %v3066_v62, %v567_v63  ;;  %2421 = vmatprep.subr.bf16.mxu1 %v2550_v53  ;;  %v2556_v30 = vld [vmem:[%s4011_s6 + $0x50] sm:$0xff]   ;;  %v2560_v63 = vld [vmem:[%s4011_s6 + $0x48] sm:$0xff]  }
 0x15b   : > { %v612_v50 = vadd.f32 %v3073_v18, %v590_v4  ;;  %v570_v47 = vmul.f32 %v2589_v5, %v2968_v3  ;;  %v2559_v60 = vld [vmem:[%s4011_s6 + $0x90] sm:$0xff]   ;;  %v2563_v4 = vld [vmem:[%s4011_s6 + $0x88] sm:$0xff]   ;;  %v2564_v5 = vld [vmem:[%s4011_s6 + $0x40] sm:$0xff]  }
 0x15c   : > { %v611_v16 = vadd.f32 %v3073_v18, %v589_v11  ;;  %v2565_v11 = vld [vmem:[%s4011_s6] sm:$0xff]  }
 0x15d   : > { %v592_v23 = vmul.f32 %v3066_v62, %v570_v47 }
 0x15e   : > { %v623_v20 = vpack.c.bf16 %v612_v50, %v611_v16  ;;  %v661_v50 = vlaneseq }
 0x15f   : > { %894 = vmatmul.mubr.bf16.gmra.mxu0 %v621_v45  ;;  %1007 = vmatmul.mubr.bf16.gmra.mxu1 %v621_v45  ;;  %v2591_v14 = vpop.eup %2590  ;;  %v614_v3 = vadd.f32 %v3073_v18, %v592_v23 }
 0x160   : > { %903 = vmatprep.mubr.bf16.mxu0 %v2736_v6  ;;  %1016 = vmatprep.mubr.bf16.mxu1 %v2736_v6  ;;  %v569_v0 = vmul.f32 %v2591_v14, %v2957_v61  ;;  %v2593_v26 = vpop.eup %2592  ;;  %v2567_v14 = vld [vmem:[%s4011_s6 + $0x80] sm:$0xff]   ;;  %v662_v47 = vshrl.u32 %v661_v50, 7 }
 0x161   : > { %v572_v28 = vmul.f32 %v2593_v26, %v2990_v24 }
 0x162   : > { %v591_v27 = vmul.f32 %v3066_v62, %v569_v0  ;;  %v2595_v19 = vpop.eup %2594  ;;  %v663_v16 = vsub.s32 0, %v662_v47  ;;  %v671_v0 = vsub.s32 2, %v662_v47  ;;  %v667_v23 = vsub.s32 1, %v662_v47 }
 0x163   : > { %v571_v61 = vmul.f32 %v2595_v19, %v2979_v17  ;;  %v594_v34 = vmul.f32 %v3066_v62, %v572_v28  ;;  %v675_v26 = vsub.s32 3, %v662_v47 }
 0x164   : > { %v613_v7 = vadd.f32 %v3073_v18, %v591_v27 }
 0x165   : > { %v2597_v35 = vpop.eup %2596  ;;  %v593_v37 = vmul.f32 %v3066_v62, %v571_v61  ;;  %v616_v41 = vadd.f32 %v3073_v18, %v594_v34 }
 0x166   : > { %v624_v31 = vpack.c.bf16 %v614_v3, %v613_v7  ;;  %v2599_v40 = vpop.eup %2598  ;;  %v574_v24 = vmul.f32 %v2597_v35, %v3012_v44 }
 0x167   : > { %904 = vmatmul.mubr.bf16.gmra.mxu0 %v622_v21  ;;  %1017 = vmatmul.mubr.bf16.gmra.mxu1 %v622_v21  ;;  %v615_v42 = vadd.f32 %v3073_v18, %v593_v37  ;;  %v573_v17 = vmul.f32 %v2599_v40, %v3001_v38  ;;  %v2548_v38 = vld [vmem:[%s4011_s6 + $0x60] sm:$0xff]   ;;  %v2561_v21 = vld [vmem:[%s4011_s6 + $0x8] sm:$0xff]  }
 0x168   : > { %913 = vmatprep.mubr.bf16.mxu0 %v2736_v6  ;;  %1026 = vmatprep.mubr.bf16.mxu1 %v2736_v6  ;;  %v596_v1 = vmul.f32 %v3066_v62, %v574_v24 }
 0x169   : > { %v625_v45 = vpack.c.bf16 %v616_v41, %v615_v42  ;;  %v595_v9 = vmul.f32 %v3066_v62, %v573_v17  ;;  %v2549_v62 = vld [vmem:[%s4011_s6 + $0x20] sm:$0xff]   ;;  %2357 = vmatprep.subr.bf16.mxu0 %v2548_v38 }
 0x16a   : > { %v618_v48 = vadd.f32 %v3073_v18, %v596_v1  ;;  %2358 = vmatpush3.bf16.msra.mxu0 %v2549_v62 }
 0x16b   : > { %v617_v51 = vadd.f32 %v3073_v18, %v595_v9  ;;  %v2552_v18 = vld [vmem:[%s4011_s6 + $0x58] sm:$0xff]  }
 0x16c   : > { %2359 = vmatprep.subr.bf16.mxu0 %v2552_v18 }
 0x16d   : > { %v626_v44 = vpack.c.bf16 %v618_v48, %v617_v51 }
 0x16e   : > { %2360 = vmatpush3.bf16.msra.mxu0 %v2553_v56 }
 0x16f   : > { %914 = vmatmul.mubr.bf16.gmra.mxu0 %v623_v20  ;;  %1027 = vmatmul.mubr.bf16.gmra.mxu1 %v623_v20  ;;  %v659_v20 = vld [vmem:[%s4010_s5] sm:$0xf] }
 0x170   : > { %923 = vmatprep.mubr.bf16.mxu0 %v2736_v6  ;;  %1036 = vmatprep.mubr.bf16.mxu1 %v2736_v6  ;;  %v3227_v27 = vrot.slane %v659_v20, %v663_v16  ;;  %v3229_v19 = vrot.slane %v659_v20, %v671_v0  ;;  %v3231_v3 = vrot.slane %v659_v20, %v667_v23 }
 0x171   : > { %2361 = vmatprep.subr.bf16.mxu0 %v2556_v30  ;;  %v3233_v28 = vrot.slane %v659_v20, %v675_v26 }
 0x172   : > { %2362 = vmatpush3.bf16.msra.mxu0 %v2557_v59 }
 0x173   : > { %2363 = vmatprep.subr.bf16.mxu0 %v2560_v63 }
 0x176   : > { %2364 = vmatpush3.bf16.msra.mxu0 %v2561_v21 }
 0x177   : > { %924 = vmatmul.mubr.bf16.gmra.mxu0 %v624_v31  ;;  %1037 = vmatmul.mubr.bf16.gmra.mxu1 %v624_v31 }
 0x178   : > { %933 = vmatprep.mubr.bf16.mxu0 %v2736_v6  ;;  %1046 = vmatprep.mubr.bf16.mxu1 %v2736_v6 }
 0x179   : > { %2365 = vmatprep.subr.bf16.mxu0 %v2564_v5 }
 0x17a   : > { %2366 = vmatpush3.bf16.msra.mxu0 %v2565_v11 }
 0x17f   : > { %934 = vmatmul.mubr.bf16.gmra.mxu0 %v625_v45  ;;  %1047 = vmatmul.mubr.bf16.gmra.mxu1 %v625_v45 }
 0x180   : > { %943 = vmatprep.mubr.bf16.mxu0 %v2736_v6  ;;  %1056 = vmatprep.mubr.bf16.mxu1 %v2736_v6  ;;  %v2551_v6 = vld [vmem:[%s4011_s6 + $0xa0] sm:$0xff]  }
 0x181   : > { %2422 = vmatpush3.bf16.msra.mxu1 %v2551_v6 }
 0x182   : > { %2423 = vmatprep.subr.bf16.mxu1 %v2554_v33 }
 0x185   : > { %2424 = vmatpush3.bf16.msra.mxu1 %v2555_v57 }
 0x186   : > { %2425 = vmatprep.subr.bf16.mxu1 %v2558_v58 }
 0x187   : > { %944 = vmatmul.mubr.bf16.gmra.mxu0 %v626_v44  ;;  %1057 = vmatmul.mubr.bf16.gmra.mxu1 %v626_v44 }
 0x189   : > { %2426 = vmatpush3.bf16.msra.mxu1 %v2559_v60 }
 0x18a   : > { %2427 = vmatprep.subr.bf16.mxu1 %v2562_v2 }
 0x18d   : > { %2428 = vmatpush3.bf16.msra.mxu1 %v2563_v4 }
 0x18e   : > { %2429 = vmatprep.subr.bf16.mxu1 %v2566_v8 }
 0x191   : > { %2430 = vmatpush3.bf16.msra.mxu1 %v2567_v14 }
 0x20f   : > { %v875_v7 = vpop.f32.mrf.mxu0  ;;  %v988_v61 = vpop.f32.mrf.mxu1 }
 0x210   : > { %v3236_v31 = vadd.f32 %v875_v7, %v3227_v27  ;;  %v3239_v34 = vadd.f32 %v988_v61, %v3229_v19 }
 0x211   : > { %v877_v35 = vpop.f32.mrf.mxu0  ;;  %v990_v37 = vpop.f32.mrf.mxu1 }
 0x212   : > { %v1067_v40 = vmul.f32 %v3236_v31, %v3236_v31  ;;  %v1069_v41 = vmul.f32 %v3239_v34, %v3239_v34  ;;  %v3246_v24 = vadd.f32 %v877_v35, %v3231_v3  ;;  %v3249_v42 = vadd.f32 %v990_v37, %v3233_v28 }
 0x213   : > { %v879_v17 = vpop.f32.mrf.mxu0  ;;  %v992_v45 = vpop.f32.mrf.mxu1 }
 0x214   : > { %v1131_v1 = vmul.f32 %v1067_v40, %v3236_v31  ;;  %v1133_v9 = vmul.f32 %v1069_v41, %v3239_v34  ;;  %v1068_v48 = vmul.f32 %v3246_v24, %v3246_v24  ;;  %v1070_v51 = vmul.f32 %v3249_v42, %v3249_v42 }
 0x215   : > { %v3258_v44 = vadd.f32 %v879_v17, %v3227_v27  ;;  %v3261_v38 = vadd.f32 %v992_v45, %v3229_v19  ;;  %v881_v53 = vpop.f32.mrf.mxu0  ;;  %v994_v62 = vpop.f32.mrf.mxu1 }
 0x216   : > { %v1195_v6 = vmul.f32 0.044715, %v1131_v1  ;;  %v1197_v18 = vmul.f32 0.044715, %v1133_v9  ;;  %v1132_v33 = vmul.f32 %v1068_v48, %v3246_v24  ;;  %v1134_v56 = vmul.f32 %v1070_v51, %v3249_v42 }
 0x217   : > { %v1071_v57 = vmul.f32 %v3258_v44, %v3258_v44  ;;  %v1073_v30 = vmul.f32 %v3261_v38, %v3261_v38  ;;  %v3270_v58 = vadd.f32 %v881_v53, %v3231_v3  ;;  %v3273_v59 = vadd.f32 %v994_v62, %v3233_v28  ;;  %v885_v60 = vpop.f32.mrf.mxu0  ;;  %v998_v63 = vpop.f32.mrf.mxu1 }
 0x218   : > { %v1259_v2 = vadd.f32 %v1195_v6, %v3236_v31  ;;  %v1261_v21 = vadd.f32 %v1197_v18, %v3239_v34  ;;  %v1196_v4 = vmul.f32 0.044715, %v1132_v33  ;;  %v1198_v5 = vmul.f32 0.044715, %v1134_v56 }
 0x219   : > { %v1135_v8 = vmul.f32 %v1071_v57, %v3258_v44  ;;  %v1137_v11 = vmul.f32 %v1073_v30, %v3261_v38  ;;  %v1072_v14 = vmul.f32 %v3270_v58, %v3270_v58  ;;  %v1074_v50 = vmul.f32 %v3273_v59, %v3273_v59  ;;  %v887_v47 = vpop.f32.mrf.mxu0  ;;  %v1000_v16 = vpop.f32.mrf.mxu1 }
 0x21a   : > { %v1323_v0 = vmul.f32 0.7978846, %v1259_v2  ;;  %v1325_v20 = vmul.f32 0.7978846, %v1261_v21  ;;  %v1260_v23 = vadd.f32 %v1196_v4, %v3246_v24  ;;  %v1262_v26 = vadd.f32 %v1198_v5, %v3249_v42 }
 0x21b   : > { %v1199_v7 = vmul.f32 0.044715, %v1135_v8  ;;  %v1201_v61 = vmul.f32 0.044715, %v1137_v11  ;;  %v1136_v35 = vmul.f32 %v1072_v14, %v3270_v58  ;;  %v1138_v37 = vmul.f32 %v1074_v50, %v3273_v59  ;;  %v889_v40 = vpop.f32.mrf.mxu0  ;;  %v1002_v1 = vpop.f32.mrf.mxu1 }
 0x21c   : > { %2600 = vtanh.f32 %v1323_v0  ;;  %v1324_v41 = vmul.f32 0.7978846, %v1260_v23  ;;  %v1326_v17 = vmul.f32 0.7978846, %v1262_v26  ;;  %v3288_v45 = vadd.f32 %v885_v60, %v3227_v27 }
 0x21d   : > { %2602 = vtanh.f32 %v1325_v20  ;;  %v1263_v9 = vadd.f32 %v1199_v7, %v3258_v44  ;;  %v1265_v48 = vadd.f32 %v1201_v61, %v3261_v38  ;;  %v1200_v51 = vmul.f32 0.044715, %v1136_v35  ;;  %v891_v57 = vpop.f32.mrf.mxu0  ;;  %v1004_v4 = vpop.f32.mrf.mxu1 }
 0x21e   : > { %2604 = vtanh.f32 %v1324_v41  ;;  %v1202_v53 = vmul.f32 0.044715, %v1138_v37  ;;  %v1075_v62 = vmul.f32 %v3288_v45, %v3288_v45  ;;  %v3295_v6 = vadd.f32 %v998_v63, %v3229_v19 }
 0x21f   : > { %2606 = vtanh.f32 %v1326_v17  ;;  %v1327_v18 = vmul.f32 0.7978846, %v1263_v9  ;;  %v1329_v33 = vmul.f32 0.7978846, %v1265_v48  ;;  %v1264_v56 = vadd.f32 %v1200_v51, %v3270_v58  ;;  %v3322_v61 = vpop.f32.mrf.mxu1 }
 0x220   : > { %v1266_v30 = vadd.f32 %v1202_v53, %v3273_v59  ;;  %v1139_v60 = vmul.f32 %v1075_v62, %v3288_v45  ;;  %v1077_v2 = vmul.f32 %v3295_v6, %v3295_v6  ;;  %v3303_v21 = vadd.f32 %v887_v47, %v3231_v3 }
 0x221   : > { %2608 = vtanh.f32 %v1327_v18  ;;  %v1328_v63 = vmul.f32 0.7978846, %v1264_v56  ;;  %v3306_v5 = vadd.f32 %v1000_v16, %v3233_v28  ;;  %v3309_v8 = vadd.f32 %v889_v40, %v3227_v27  ;;  %v895_v16 = vpop.f32.mrf.mxu0 }
 0x222   : > { %2610 = vtanh.f32 %v1329_v33  ;;  %v1330_v11 = vmul.f32 0.7978846, %v1266_v30  ;;  %v1203_v14 = vmul.f32 0.044715, %v1139_v60  ;;  %v1141_v50 = vmul.f32 %v1077_v2, %v3295_v6  ;;  %v1010_v60 = vpop.f32.mrf.mxu1 }
 0x223   : > { %2612 = vtanh.f32 %v1328_v63  ;;  %v1076_v0 = vmul.f32 %v3303_v21, %v3303_v21  ;;  %v1078_v47 = vmul.f32 %v3306_v5, %v3306_v5  ;;  %v1079_v20 = vmul.f32 %v3309_v8, %v3309_v8  ;;  %v897_v33 = vpop.f32.mrf.mxu0 }
 0x224   : > { %2614 = vtanh.f32 %v1330_v11  ;;  %v1267_v23 = vadd.f32 %v1203_v14, %v3288_v45  ;;  %v1205_v26 = vmul.f32 0.044715, %v1141_v50  ;;  %v3320_v7 = vadd.f32 %v1002_v1, %v3229_v19 }
 0x225   : > { %v1140_v35 = vmul.f32 %v1076_v0, %v3303_v21  ;;  %v1142_v37 = vmul.f32 %v1078_v47, %v3306_v5  ;;  %v1143_v40 = vmul.f32 %v1079_v20, %v3309_v8  ;;  %v3328_v41 = vadd.f32 %v891_v57, %v3231_v3 }
 0x226   : > { %v1331_v17 = vmul.f32 0.7978846, %v1267_v23  ;;  %v1269_v9 = vadd.f32 %v1205_v26, %v3295_v6  ;;  %v1081_v48 = vmul.f32 %v3320_v7, %v3320_v7  ;;  %v3334_v1 = vadd.f32 %v1004_v4, %v3233_v28 }
 0x227   : > { %v1204_v51 = vmul.f32 0.044715, %v1140_v35  ;;  %v1206_v53 = vmul.f32 0.044715, %v1142_v37  ;;  %v1207_v62 = vmul.f32 0.044715, %v1143_v40  ;;  %v1080_v18 = vmul.f32 %v3328_v41, %v3328_v41 }
 0x228   : > { %2616 = vtanh.f32 %v1331_v17  ;;  %v1333_v56 = vmul.f32 0.7978846, %v1269_v9  ;;  %v1145_v57 = vmul.f32 %v1081_v48, %v3320_v7  ;;  %v1082_v30 = vmul.f32 %v3334_v1, %v3334_v1  ;;  %v899_v17 = vpop.f32.mrf.mxu0 }
 0x229   : > { %v2601_v2 = vpop.eup %2600  ;;  %v1268_v63 = vadd.f32 %v1204_v51, %v3303_v21  ;;  %v1270_v4 = vadd.f32 %v1206_v53, %v3306_v5  ;;  %v1271_v11 = vadd.f32 %v1207_v62, %v3309_v8  ;;  %v1144_v14 = vmul.f32 %v1080_v18, %v3328_v41  ;;  %v1012_v18 = vpop.f32.mrf.mxu1 }
 0x22a   : > { %v2603_v50 = vpop.eup %2602  ;;  %v1451_v0 = vadd.f32 1.0, %v2601_v2  ;;  %2618 = vtanh.f32 %v1333_v56  ;;  %v1209_v47 = vmul.f32 0.044715, %v1145_v57  ;;  %v1146_v20 = vmul.f32 %v1082_v30, %v3334_v1 }
 0x22b   : > { %v3346_v23 = vpop.eup %2604  ;;  %v1453_v26 = vadd.f32 1.0, %v2603_v50  ;;  %v1332_v35 = vmul.f32 0.7978846, %v1268_v63  ;;  %v1334_v37 = vmul.f32 0.7978846, %v1270_v4  ;;  %v3349_v40 = vadd.f32 %v895_v16, %v3227_v27 }
 0x22c   : > { %v3351_v9 = vpop.eup %2606  ;;  %v1515_v48 = vmul.f32 0.5, %v1451_v0  ;;  %v1335_v51 = vmul.f32 0.7978846, %v1271_v11  ;;  %v1273_v53 = vadd.f32 %v1209_v47, %v3320_v7  ;;  %v1208_v62 = vmul.f32 0.044715, %v1144_v14  ;;  %v901_v47 = vpop.f32.mrf.mxu0 }
 0x22d   : > { %4077 = vst [vmem:[#allocation18_spill] sm:$0xff] %v3349_v40  ;;  %v1517_v56 = vmul.f32 0.5, %v1453_v26  ;;  %2620 = vtanh.f32 %v1332_v35  ;;  %v1210_v57 = vmul.f32 0.044715, %v1146_v20  ;;  %v1083_v30 = vmul.f32 %v3349_v40, %v3349_v40 }
 0x22e   : > { %v2609_v2 = vpop.eup %2608  ;;  %v3357_v63 = vmul.f32 %v1515_v48, %v3236_v31  ;;  %2622 = vtanh.f32 %v1334_v37  ;;  %v1337_v16 = vmul.f32 0.7978846, %v1273_v53  ;;  %v1272_v4 = vadd.f32 %v1208_v62, %v3328_v41  ;;  %v1014_v37 = vpop.f32.mrf.mxu1 }
 0x22f   : > { %v2611_v50 = vpop.eup %2610  ;;  %v3361_v11 = vmul.f32 %v1517_v56, %v3239_v34  ;;  %v1455_v14 = vadd.f32 1.0, %v2609_v2  ;;  %2624 = vtanh.f32 %v1335_v51  ;;  %v1274_v0 = vadd.f32 %v1210_v57, %v3334_v1 }
 0x230   : > { %v3364_v20 = vpop.eup %2612  ;;  %v1457_v26 = vadd.f32 1.0, %v2611_v50  ;;  %2626 = vtanh.f32 %v1337_v16  ;;  %v1336_v35 = vmul.f32 0.7978846, %v1272_v4  ;;  %v1147_v31 = vmul.f32 %v1083_v30, %v3349_v40  ;;  %v905_v4 = vpop.f32.mrf.mxu0 }
 0x231   : > { %v3367_v48 = vpop.eup %2614  ;;  %v1519_v53 = vmul.f32 0.5, %v1455_v14  ;;  %v1338_v62 = vmul.f32 0.7978846, %v1274_v0  ;;  %v3371_v34 = vadd.f32 %v3322_v61, %v3229_v19  ;;  %v3374_v51 = vadd.f32 %v897_v33, %v3231_v3 }
 0x232   : > { %v1521_v56 = vmul.f32 0.5, %v1457_v26  ;;  %2628 = vtanh.f32 %v1336_v35  ;;  %v1211_v57 = vmul.f32 0.044715, %v1147_v31  ;;  %v3377_v2 = vadd.f32 %v1010_v60, %v3233_v28 }
 0x233   : > { %4078 = vst [vmem:[#allocation19_spill] sm:$0xff] %v3371_v34  ;;  %v3380_v30 = vmul.f32 %v1519_v53, %v3258_v44  ;;  %2630 = vtanh.f32 %v1338_v62  ;;  %v1085_v16 = vmul.f32 %v3371_v34, %v3371_v34  ;;  %v1084_v61 = vmul.f32 %v3374_v51, %v3374_v51  ;;  %v1018_v44 = vpop.f32.mrf.mxu1 }
 0x234   : > { %4079 = vst [vmem:[#allocation20_spill] sm:$0xff] %v3377_v2  ;;  %v3387_v33 = vmul.f32 %v1521_v56, %v3261_v38  ;;  %v1275_v50 = vadd.f32 %v1211_v57, %v3349_v40  ;;  %v1086_v60 = vmul.f32 %v3377_v2, %v3377_v2  ;;  %v3393_v14 = vadd.f32 %v899_v17, %v3227_v27 }
 0x235   : > { %v3395_v0 = vpop.eup %2616  ;;  %v1149_v35 = vmul.f32 %v1085_v16, %v3371_v34  ;;  %v1148_v31 = vmul.f32 %v1084_v61, %v3374_v51  ;;  %v3402_v38 = vadd.f32 %v1012_v18, %v3229_v19  ;;  %v3414_v61 = vadd.f32 %v901_v47, %v3231_v3  ;;  %v907_v18 = vpop.f32.mrf.mxu0 }
 0x236   : > { %4080 = vst [vmem:[#allocation21_spill] sm:$0xff] %v3393_v14  ;;  %v1339_v62 = vmul.f32 0.7978846, %v1275_v50  ;;  %v1150_v17 = vmul.f32 %v1086_v60, %v3377_v2  ;;  %v1087_v56 = vmul.f32 %v3393_v14, %v3393_v14  ;;  %v3418_v60 = vadd.f32 %v1014_v37, %v3233_v28  ;;  %v1020_v53 = vpop.f32.mrf.mxu1 }
 0x237   : > { %4081 = vst [vmem:[#allocation22_spill] sm:$0xff] %v3402_v38  ;;  %v3409_v57 = vpop.eup %2618  ;;  %v1213_v55 = vmul.f32 0.044715, %v1149_v35  ;;  %v1212_v26 = vmul.f32 0.044715, %v1148_v31  ;;  %v1089_v16 = vmul.f32 %v3402_v38, %v3402_v38  ;;  %v1088_v49 = vmul.f32 %v3414_v61, %v3414_v61  ;;  %v909_v39 = vpop.f32.mrf.mxu0 }
 0x238   : > { %2632 = vtanh.f32 %v1339_v62  ;;  %v1214_v54 = vmul.f32 0.044715, %v1150_v17  ;;  %v1151_v50 = vmul.f32 %v1087_v56, %v3393_v14  ;;  %4082 = vst [vmem:[#allocation23_spill] sm:$0xff] %v3418_v60  ;;  %v1090_v56 = vmul.f32 %v3418_v60, %v3418_v60 }
 0x239   : > { %v1277_v52 = vadd.f32 %v1213_v55, %v3371_v34  ;;  %v1276_v35 = vadd.f32 %v1212_v26, %v3374_v51  ;;  %v1153_v31 = vmul.f32 %v1089_v16, %v3402_v38  ;;  %v3431_v37 = vadd.f32 %v905_v4, %v3227_v27  ;;  %v1022_v4 = vpop.f32.mrf.mxu1  ;;  %v911_v12 = vpop.f32.mrf.mxu0 }
 0x23a   : > { %v3425_v47 = vpop.eup %2620  ;;  %v1278_v62 = vadd.f32 %v1214_v54, %v3377_v2  ;;  %v1215_v17 = vmul.f32 0.044715, %v1151_v50  ;;  %v1152_v16 = vmul.f32 %v1088_v49, %v3414_v61  ;;  %v1154_v50 = vmul.f32 %v1090_v56, %v3418_v60 }
 0x23b   : > { %4083 = vst [vmem:[#allocation24_spill] sm:$0xff] %v3431_v37  ;;  %v3433_v46 = vpop.eup %2622  ;;  %v1341_v55 = vmul.f32 0.7978846, %v1277_v52  ;;  %v1340_v26 = vmul.f32 0.7978846, %v1276_v35  ;;  %v1091_v29 = vmul.f32 %v3431_v37, %v3431_v37  ;;  %v3446_v49 = vadd.f32 %v1018_v44, %v3229_v19 }
 0x23c   : > { %v1217_v43 = vmul.f32 0.044715, %v1153_v31  ;;  %v3436_v36 = vpop.eup %2624  ;;  %v1342_v32 = vmul.f32 0.7978846, %v1278_v62  ;;  %v1279_v54 = vadd.f32 %v1215_v17, %v3393_v14  ;;  %v1216_v35 = vmul.f32 0.044715, %v1152_v16 }
 0x23d   : > { %v3442_v25 = vpop.eup %2626  ;;  %2634 = vtanh.f32 %v1341_v55  ;;  %4084 = vst [vmem:[#allocation25_spill] sm:$0xff] %v3446_v49  ;;  %v1218_v62 = vmul.f32 0.044715, %v1154_v50  ;;  %v1155_v17 = vmul.f32 %v1091_v29, %v3431_v37  ;;  %v1093_v55 = vmul.f32 %v3446_v49, %v3446_v49  ;;  %v1024_v29 = vpop.f32.mrf.mxu1 }
 0x23e   : > { %v1281_v52 = vadd.f32 %v1217_v43, %v3402_v38  ;;  %2636 = vtanh.f32 %v1340_v26  ;;  %v1343_v31 = vmul.f32 0.7978846, %v1279_v54  ;;  %v1280_v15 = vadd.f32 %v1216_v35, %v3414_v61 }
 0x23f   : > { %v3449_v22 = vpop.eup %2628  ;;  %2638 = vtanh.f32 %v1342_v32  ;;  %v1282_v44 = vadd.f32 %v1218_v62, %v3418_v60  ;;  %v1219_v26 = vmul.f32 0.044715, %v1155_v17  ;;  %v3458_v16 = vadd.f32 %v907_v18, %v3231_v3 }
 0x240   : > { %v1345_v56 = vmul.f32 0.7978846, %v1281_v52  ;;  %v3454_v43 = vpop.eup %2630  ;;  %2640 = vtanh.f32 %v1343_v31  ;;  %v1344_v54 = vmul.f32 0.7978846, %v1280_v15  ;;  %v1157_v32 = vmul.f32 %v1093_v55, %v3446_v49 }
 0x241   : > { %4085 = vst [vmem:[#allocation26_spill] sm:$0xff] %v3458_v16  ;;  %v3462_v50 = vadd.f32 %v1020_v53, %v3233_v28  ;;  %v1346_v52 = vmul.f32 0.7978846, %v1282_v44  ;;  %v1283_v35 = vadd.f32 %v1219_v26, %v3431_v37  ;;  %v1092_v31 = vmul.f32 %v3458_v16, %v3458_v16  ;;  %v1028_v26 = vpop.f32.mrf.mxu1 }
 0x242   : > { %2642 = vtanh.f32 %v1345_v56  ;;  %v3468_v62 = vadd.f32 %v909_v39, %v3227_v27  ;;  %v1221_v18 = vmul.f32 0.044715, %v1157_v32  ;;  %v3473_v15 = vadd.f32 %v1022_v4, %v3229_v19  ;;  %v915_v56 = vpop.f32.mrf.mxu0 }
 0x243   : > { %4086 = vst [vmem:[#allocation27_spill] sm:$0xff] %v3462_v50  ;;  %2644 = vtanh.f32 %v1344_v54  ;;  %v1094_v17 = vmul.f32 %v3462_v50, %v3462_v50  ;;  %v1347_v53 = vmul.f32 0.7978846, %v1283_v35  ;;  %v1156_v55 = vmul.f32 %v1092_v31, %v3458_v16 }
 0x244   : > { %4087 = vst [vmem:[#allocation28_spill] sm:$0xff] %v3468_v62  ;;  %4088 = vst [vmem:[#allocation29_spill] sm:$0xff] %v3473_v15  ;;  %2646 = vtanh.f32 %v1346_v52  ;;  %v1095_v44 = vmul.f32 %v3468_v62, %v3468_v62  ;;  %v1285_v39 = vadd.f32 %v1221_v18, %v3446_v49  ;;  %v1097_v32 = vmul.f32 %v3473_v15, %v3473_v15 }
 0x245   : > { %v3478_v13 = vpop.eup %2632  ;;  %v1158_v54 = vmul.f32 %v1094_v17, %v3462_v50  ;;  %v3485_v4 = vadd.f32 %v911_v12, %v3231_v3  ;;  %2648 = vtanh.f32 %v1347_v53  ;;  %v1220_v52 = vmul.f32 0.044715, %v1156_v55  ;;  %v917_v17 = vpop.f32.mrf.mxu0 }
 0x246   : > { %4089 = vst [vmem:[#allocation30_spill] sm:$0xff] %v3478_v13  ;;  %v1159_v35 = vmul.f32 %v1095_v44, %v3468_v62  ;;  %v3489_v31 = vadd.f32 %v1024_v29, %v3233_v28  ;;  %v1349_v10 = vmul.f32 0.7978846, %v1285_v39  ;;  %v1161_v38 = vmul.f32 %v1097_v32, %v3473_v15  ;;  %v1030_v55 = vpop.f32.mrf.mxu1 }
 0x247   : > { %4090 = vst [vmem:[#allocation31_spill] sm:$0xff] %v3485_v4  ;;  %v1222_v37 = vmul.f32 0.044715, %v1158_v54  ;;  %v1096_v18 = vmul.f32 %v3485_v4, %v3485_v4  ;;  %v1284_v49 = vadd.f32 %v1220_v52, %v3458_v16  ;;  %v3498_v53 = vadd.f32 %v915_v56, %v3227_v27 }
 0x248   : > { %4091 = vst [vmem:[#allocation32_spill] sm:$0xff] %v3489_v31  ;;  %v1223_v34 = vmul.f32 0.044715, %v1159_v35  ;;  %v1098_v12 = vmul.f32 %v3489_v31, %v3489_v31  ;;  %2650 = vtanh.f32 %v1349_v10  ;;  %v1225_v44 = vmul.f32 0.044715, %v1161_v38 }
 0x249   : > { %4092 = vst [vmem:[#allocation33_spill] sm:$0xff] %v3498_v53  ;;  %v1286_v29 = vadd.f32 %v1222_v37, %v3462_v50  ;;  %v1160_v39 = vmul.f32 %v1096_v18, %v3485_v4  ;;  %v1348_v32 = vmul.f32 0.7978846, %v1284_v49  ;;  %v1099_v35 = vmul.f32 %v3498_v53, %v3498_v53  ;;  %v919_v37 = vpop.f32.mrf.mxu0 }
 0x24a   : > { %v3502_v54 = vpop.eup %2634  ;;  %v1287_v14 = vadd.f32 %v1223_v34, %v3468_v62  ;;  %v1162_v52 = vmul.f32 %v1098_v12, %v3489_v31  ;;  %v1289_v10 = vadd.f32 %v1225_v44, %v3473_v15  ;;  %v3512_v38 = vadd.f32 %v1028_v26, %v3229_v19  ;;  %v1032_v62 = vpop.f32.mrf.mxu1 }
 0x24b   : > { %4093 = vst [vmem:[#allocation34_spill] sm:$0xff] %v3502_v54  ;;  %v3508_v16 = vpop.eup %2636  ;;  %v1350_v56 = vmul.f32 0.7978846, %v1286_v29  ;;  %v1224_v40 = vmul.f32 0.044715, %v1160_v39  ;;  %2652 = vtanh.f32 %v1348_v32  ;;  %v1163_v12 = vmul.f32 %v1099_v35, %v3498_v53 }
 0x24c   : > { %4094 = vst [vmem:[#allocation35_spill] sm:$0xff] %v3512_v38  ;;  %v3514_v18 = vpop.eup %2638  ;;  %v1351_v49 = vmul.f32 0.7978846, %v1287_v14  ;;  %v1226_v34 = vmul.f32 0.044715, %v1162_v52  ;;  %v1101_v44 = vmul.f32 %v3512_v38, %v3512_v38  ;;  %v3526_v14 = vadd.f32 %v917_v17, %v3231_v3  ;;  %v1034_v17 = vpop.f32.mrf.mxu1 }
 0x24d   : > { %v3517_v50 = vpop.eup %2640  ;;  %2654 = vtanh.f32 %v1350_v56  ;;  %v1353_v54 = vmul.f32 0.7978846, %v1289_v10  ;;  %v1288_v29 = vadd.f32 %v1224_v40, %v3485_v4  ;;  %v1227_v32 = vmul.f32 0.044715, %v1163_v12  ;;  %v921_v40 = vpop.f32.mrf.mxu0 }
 0x24e   : > { %4095 = vst [vmem:[#allocation36_spill] sm:$0xff] %v3517_v50  ;;  %2656 = vtanh.f32 %v1351_v49  ;;  %v1290_v39 = vadd.f32 %v1226_v34, %v3489_v31  ;;  %4097 = vst [vmem:[#allocation38_spill] sm:$0xff] %v3526_v14  ;;  %v1165_v35 = vmul.f32 %v1101_v44, %v3512_v38  ;;  %v3530_v56 = vadd.f32 %v1030_v55, %v3233_v28 }
 0x24f   : > { %v3522_v26 = vpop.eup %2642  ;;  %2658 = vtanh.f32 %v1353_v54  ;;  %v1352_v52 = vmul.f32 0.7978846, %v1288_v29  ;;  %v1291_v4 = vadd.f32 %v1227_v32, %v3498_v53  ;;  %v1100_v49 = vmul.f32 %v3526_v14, %v3526_v14 }
 0x250   : > { %4096 = vst [vmem:[#allocation37_spill] sm:$0xff] %v3522_v26  ;;  %4098 = vst [vmem:[#allocation39_spill] sm:$0xff] %v3530_v56  ;;  %v3532_v10 = vpop.eup %2644  ;;  %v1354_v15 = vmul.f32 0.7978846, %v1290_v39  ;;  %v3538_v34 = vadd.f32 %v919_v37, %v3227_v27  ;;  %v1229_v12 = vmul.f32 0.044715, %v1165_v35  ;;  %v1102_v55 = vmul.f32 %v3530_v56, %v3530_v56  ;;  %v1038_v26 = vpop.f32.mrf.mxu1 }
 0x251   : > { %v3540_v54 = vpop.eup %2646  ;;  %2660 = vtanh.f32 %v1352_v52  ;;  %v3545_v29 = vadd.f32 %v1032_v62, %v3229_v19  ;;  %v1355_v44 = vmul.f32 0.7978846, %v1291_v4  ;;  %v1164_v39 = vmul.f32 %v1100_v49, %v3526_v14  ;;  %v925_v62 = vpop.f32.mrf.mxu0 }
 0x252   : > { %4099 = vst [vmem:[#allocation40_spill] sm:$0xff] %v3538_v34  ;;  %2662 = vtanh.f32 %v1354_v15  ;;  %v1103_v32 = vmul.f32 %v3538_v34, %v3538_v34  ;;  %v3550_v37 = vpop.eup %2648  ;;  %v1293_v53 = vadd.f32 %v1229_v12, %v3512_v38  ;;  %v1166_v52 = vmul.f32 %v1102_v55, %v3530_v56 }
 0x253   : > { %4100 = vst [vmem:[#allocation41_spill] sm:$0xff] %v3545_v29  ;;  %4101 = vst [vmem:[#allocation42_spill] sm:$0xff] %v3550_v37  ;;  %v1105_v35 = vmul.f32 %v3545_v29, %v3545_v29  ;;  %v3557_v31 = vadd.f32 %v921_v40, %v3231_v3  ;;  %2664 = vtanh.f32 %v1355_v44  ;;  %v1228_v15 = vmul.f32 0.044715, %v1164_v39 }
 0x254   : > { %v1167_v4 = vmul.f32 %v1103_v32, %v3538_v34  ;;  %v3561_v49 = vadd.f32 %v1034_v17, %v3233_v28  ;;  %v1357_v37 = vmul.f32 0.7978846, %v1293_v53  ;;  %v1230_v50 = vmul.f32 0.044715, %v1166_v52 }
 0x255   : > { %4102 = vst [vmem:[#allocation43_spill] sm:$0xff] %v3557_v31  ;;  %v1169_v12 = vmul.f32 %v1105_v35, %v3545_v29  ;;  %v1104_v55 = vmul.f32 %v3557_v31, %v3557_v31  ;;  %v3566_v38 = vpop.eup %2650  ;;  %v1292_v40 = vadd.f32 %v1228_v15, %v3526_v14  ;;  %v3572_v39 = vadd.f32 %v925_v62, %v3227_v27  ;;  %v1040_v14 = vpop.f32.mrf.mxu1 }
 0x256   : > { %4103 = vst [vmem:[#allocation44_spill] sm:$0xff] %v3561_v49  ;;  %4104 = vst [vmem:[#allocation45_spill] sm:$0xff] %v3566_v38  ;;  %v1231_v60 = vmul.f32 0.044715, %v1167_v4  ;;  %v1106_v44 = vmul.f32 %v3561_v49, %v3561_v49  ;;  %2666 = vtanh.f32 %v1357_v37  ;;  %v1294_v53 = vadd.f32 %v1230_v50, %v3530_v56  ;;  %v927_v4 = vpop.f32.mrf.mxu0 }
 0x257   : > { %4105 = vst [vmem:[#allocation46_spill] sm:$0xff] %v3572_v39  ;;  %v1233_v17 = vmul.f32 0.044715, %v1169_v12  ;;  %v1168_v32 = vmul.f32 %v1104_v55, %v3557_v31  ;;  %v1356_v52 = vmul.f32 0.7978846, %v1292_v40  ;;  %v1107_v15 = vmul.f32 %v3572_v39, %v3572_v39 }
 0x258   : > { %v1295_v35 = vadd.f32 %v1231_v60, %v3538_v34  ;;  %v1170_v38 = vmul.f32 %v1106_v44, %v3561_v49  ;;  %v3580_v2 = vpop.eup %2652  ;;  %v1358_v62 = vmul.f32 0.7978846, %v1294_v53  ;;  %v3584_v50 = vadd.f32 %v1038_v26, %v3229_v19 }
 0x259   : > { %v1297_v37 = vadd.f32 %v1233_v17, %v3545_v29  ;;  %v1232_v13 = vmul.f32 0.044715, %v1168_v32  ;;  %2668 = vtanh.f32 %v1356_v52  ;;  %v1171_v40 = vmul.f32 %v1107_v15, %v3572_v39 }
 0x25a   : > { %4106 = vst [vmem:[#allocation47_spill] sm:$0xff] %v3584_v50  ;;  %v3586_v12 = vpop.eup %2654  ;;  %v1359_v60 = vmul.f32 0.7978846, %v1295_v35  ;;  %v1234_v55 = vmul.f32 0.044715, %v1170_v38  ;;  %2670 = vtanh.f32 %v1358_v62  ;;  %v1109_v53 = vmul.f32 %v3584_v50, %v3584_v50  ;;  %v929_v38 = vpop.f32.mrf.mxu0 }
 0x25b   : > { %v3589_v44 = vpop.eup %2656  ;;  %v1361_v34 = vmul.f32 0.7978846, %v1297_v37  ;;  %v1296_v56 = vadd.f32 %v1232_v13, %v3557_v31  ;;  %v1235_v32 = vmul.f32 0.044715, %v1171_v40  ;;  %v1452_v52 = vadd.f32 1.0, %v3346_v23  ;;  %v1042_v35 = vpop.f32.mrf.mxu1 }
 0x25c   : > { %4107 = vst [vmem:[#allocation48_spill] sm:$0xff] %v3589_v44  ;;  %v3594_v17 = vpop.eup %2658  ;;  %2672 = vtanh.f32 %v1359_v60  ;;  %v1298_v26 = vadd.f32 %v1234_v55, %v3561_v49  ;;  %v1173_v62 = vmul.f32 %v1109_v53, %v3584_v50  ;;  %v1456_v37 = vadd.f32 1.0, %v3364_v20  ;;  %v931_v49 = vpop.f32.mrf.mxu0 }
 0x25d   : > { %4108 = vst [vmem:[#allocation49_spill] sm:$0xff] %v3594_v17  ;;  %2674 = vtanh.f32 %v1361_v34  ;;  %v1360_v15 = vmul.f32 0.7978846, %v1296_v56  ;;  %v1299_v31 = vadd.f32 %v1235_v32, %v3572_v39  ;;  %v1516_v17 = vmul.f32 0.5, %v1452_v52  ;;  %v1044_v44 = vpop.f32.mrf.mxu1 }
 0x25e   : > { %v3600_v13 = vpop.eup %2660  ;;  %v1362_v29 = vmul.f32 0.7978846, %v1298_v26  ;;  %v1454_v60 = vadd.f32 1.0, %v3351_v9  ;;  %v1237_v23 = vmul.f32 0.044715, %v1173_v62  ;;  %v1520_v40 = vmul.f32 0.5, %v1456_v37 }
 0x25f   : > { %v3604_v55 = vpop.eup %2662  ;;  %2676 = vtanh.f32 %v1360_v15  ;;  %v1458_v34 = vadd.f32 1.0, %v3367_v48  ;;  %v1363_v56 = vmul.f32 0.7978846, %v1299_v31  ;;  %v1580_v53 = vmul.f32 %v1516_v17, %v3246_v24 }
 0x260   : > { %2678 = vtanh.f32 %v1362_v29  ;;  %v1518_v20 = vmul.f32 0.5, %v1454_v60  ;;  %v3608_v26 = vpop.eup %2664  ;;  %v1301_v32 = vadd.f32 %v1237_v23, %v3584_v50  ;;  %v1584_v9 = vmul.f32 %v1520_v40, %v3270_v58  ;;  %v935_v60 = vpop.f32.mrf.mxu0 }
 0x261   : > { %v1522_v52 = vmul.f32 0.5, %v1458_v34  ;;  %v3613_v15 = vadd.f32 %v927_v4, %v3231_v3  ;;  %2680 = vtanh.f32 %v1363_v56  ;;  %v3617_v31 = vadd.f32 %v1040_v14, %v3233_v28  ;;  %v1048_v23 = vpop.f32.mrf.mxu1 }
 0x262   : > { %v1582_v48 = vmul.f32 %v1518_v20, %v3249_v42  ;;  %v3620_v24 = vadd.f32 %v929_v38, %v3227_v27  ;;  %v1365_v29 = vmul.f32 0.7978846, %v1301_v32  ;;  %v1644_v17 = vpack.c.bf16 %v1584_v9, %v1580_v53 }
 0x263   : > { %4109 = vst [vmem:[#allocation50_spill] sm:$0xff] %v3613_v15  ;;  %v1586_v62 = vmul.f32 %v1522_v52, %v3273_v59  ;;  %v1108_v58 = vmul.f32 %v3613_v15, %v3613_v15  ;;  %v3625_v37 = vpop.eup %2666  ;;  %v1110_v4 = vmul.f32 %v3617_v31, %v3617_v31  ;;  %v3632_v14 = vadd.f32 %v1042_v35, %v3229_v19 }
 0x264   : > { %v1111_v42 = vmul.f32 %v3620_v24, %v3620_v24  ;;  %v3635_v38 = vadd.f32 %v931_v49, %v3231_v3  ;;  %2682 = vtanh.f32 %v1365_v29  ;;  %1970 = vmatprep.mubr.bf16.mxu0 %v1644_v17  ;;  %v3639_v34 = vadd.f32 %v1044_v44, %v3233_v28 }
 0x265   : > { %v1646_v59 = vpack.c.bf16 %v1586_v62, %v1582_v48  ;;  %v1172_v40 = vmul.f32 %v1108_v58, %v3613_v15  ;;  %v1174_v56 = vmul.f32 %v1110_v4, %v3617_v31  ;;  %v4110_v53 = vpack.c.bf16 %v3380_v30, %v3357_v63 }
 0x266   : > { %v1175_v35 = vmul.f32 %v1111_v42, %v3620_v24  ;;  %v1113_v49 = vmul.f32 %v3632_v14, %v3632_v14  ;;  %v1112_v20 = vmul.f32 %v3635_v38, %v3635_v38  ;;  %v3650_v32 = vpop.eup %2668  ;;  %v1114_v44 = vmul.f32 %v3639_v34, %v3639_v34 }
 0x267   : > { %1971 = vmatmul.mubr.bf16.vlgmr.msra.gmra.mxu0 %v4110_v53  ;;  %2067 = vmatprep.mubr.bf16.mxu1 %v1646_v59  ;;  %v1236_v9 = vmul.f32 0.044715, %v1172_v40  ;;  %v3655_v52 = vadd.f32 %v935_v60, %v3227_v27  ;;  %v3658_v63 = vadd.f32 %v1048_v23, %v3229_v19  ;;  %v3660_v30 = vpop.eup %2670  ;;  %v1238_v48 = vmul.f32 0.044715, %v1174_v56 }
 0x268   : > { %v4112_v29 = vpack.c.bf16 %v3387_v33, %v3361_v11  ;;  %v1239_v17 = vmul.f32 0.044715, %v1175_v35  ;;  %v1177_v62 = vmul.f32 %v1113_v49, %v3632_v14  ;;  %v1176_v58 = vmul.f32 %v1112_v20, %v3635_v38 }
 0x269   : > { %4111 = vst [vmem:[#allocation51_spill] sm:$0xff] %v3658_v63  ;;  %v3667_v4 = vpop.eup %2672  ;;  %v1300_v42 = vadd.f32 %v1236_v9, %v3613_v15  ;;  %v1178_v60 = vmul.f32 %v1114_v44, %v3639_v34  ;;  %v1115_v23 = vmul.f32 %v3655_v52, %v3655_v52  ;;  %v1117_v59 = vmul.f32 %v3658_v63, %v3658_v63 }
 0x26a   : > { %2068 = vmatmul.mubr.bf16.vlgmr.msra.gmra.mxu1 %v4112_v29  ;;  %v3675_v40 = vpop.eup %2674  ;;  %v1302_v11 = vadd.f32 %v1238_v48, %v3617_v31  ;;  %v1303_v33 = vadd.f32 %v1239_v17, %v3620_v24  ;;  %v1241_v56 = vmul.f32 0.044715, %v1177_v62  ;;  %v1240_v53 = vmul.f32 0.044715, %v1176_v58 }
 0x26b   : > { %4113 = vst [vmem:[#allocation52_spill] sm:$0xff] %v3675_v40  ;;  %v1364_v35 = vmul.f32 0.7978846, %v1300_v42  ;;  %v1242_v49 = vmul.f32 0.044715, %v1178_v60  ;;  %v1179_v20 = vmul.f32 %v1115_v23, %v3655_v52  ;;  %v1181_v9 = vmul.f32 %v1117_v59, %v3658_v63  ;;  %v937_v23 = vpop.f32.mrf.mxu0 }
 0x26c   : > { %v3681_v44 = vpop.eup %2676  ;;  %v1366_v29 = vmul.f32 0.7978846, %v1302_v11  ;;  %v1367_v50 = vmul.f32 0.7978846, %v1303_v33  ;;  %v1305_v39 = vadd.f32 %v1241_v56, %v3632_v14  ;;  %v1304_v15 = vadd.f32 %v1240_v53, %v3635_v38  ;;  %v1050_v53 = vpop.f32.mrf.mxu1 }
 0x26d   : > { %v3685_v40 = vpop.eup %2678  ;;  %2684 = vtanh.f32 %v1364_v35  ;;  %v1306_v48 = vadd.f32 %v1242_v49, %v3639_v34  ;;  %v1243_v17 = vmul.f32 0.044715, %v1179_v20  ;;  %v1245_v62 = vmul.f32 0.044715, %v1181_v9 }
 0x26e   : > { %2686 = vtanh.f32 %v1366_v29  ;;  %v1369_v58 = vmul.f32 0.7978846, %v1305_v39  ;;  %v1368_v42 = vmul.f32 0.7978846, %v1304_v15  ;;  %v1460_v60 = vadd.f32 1.0, %v3425_v47  ;;  %v3689_v59 = vpop.eup %2680 }
 0x26f   : > { %2688 = vtanh.f32 %v1367_v50  ;;  %v1370_v11 = vmul.f32 0.7978846, %v1306_v48  ;;  %v1307_v33 = vadd.f32 %v1243_v17, %v3655_v52  ;;  %v1309_v56 = vadd.f32 %v1245_v62, %v3658_v63  ;;  %v939_v17 = vpop.f32.mrf.mxu0 }
 0x270   : > { %2690 = vtanh.f32 %v1369_v58  ;;  %v1464_v35 = vadd.f32 1.0, %v3449_v22  ;;  %v1524_v49 = vmul.f32 0.5, %v1460_v60  ;;  %v1462_v20 = vadd.f32 1.0, %v3433_v46  ;;  %v1052_v58 = vpop.f32.mrf.mxu1 }
 0x271   : > { %2692 = vtanh.f32 %v1368_v42  ;;  %v1371_v39 = vmul.f32 0.7978846, %v1307_v33  ;;  %v1373_v15 = vmul.f32 0.7978846, %v1309_v56  ;;  %v1466_v47 = vadd.f32 1.0, %v3454_v43  ;;  %v3696_v9 = vpop.eup %2682 }
 0x272   : > { %2694 = vtanh.f32 %v1370_v11  ;;  %v1528_v50 = vmul.f32 0.5, %v1464_v35  ;;  %v1588_v29 = vmul.f32 %v1524_v49, %v3303_v21  ;;  %v1526_v48 = vmul.f32 0.5, %v1462_v20  ;;  %v941_v49 = vpop.f32.mrf.mxu0 }
 0x273   : > { %2696 = vtanh.f32 %v1371_v39  ;;  %v1530_v62 = vmul.f32 0.5, %v1466_v47  ;;  %v3700_v22 = vadd.f32 %v937_v23, %v3231_v3  ;;  %v3703_v46 = vadd.f32 %v1050_v53, %v3233_v28  ;;  %v1054_v39 = vpop.f32.mrf.mxu1 }
 0x274   : > { %2698 = vtanh.f32 %v1373_v15  ;;  %v1592_v43 = vmul.f32 %v1528_v50, %v3328_v41  ;;  %v1590_v42 = vmul.f32 %v1526_v48, %v3306_v5  ;;  %v1459_v60 = vadd.f32 1.0, %v3395_v0 }
 0x275   : > { %v1594_v21 = vmul.f32 %v1530_v62, %v3334_v1  ;;  %v1116_v11 = vmul.f32 %v3700_v22, %v3700_v22  ;;  %v1118_v23 = vmul.f32 %v3703_v46, %v3703_v46  ;;  %v1463_v33 = vadd.f32 1.0, %v3436_v36 }
 0x276   : > { %v1648_v56 = vpack.c.bf16 %v1592_v43, %v1588_v29  ;;  %v1523_v53 = vmul.f32 0.5, %v1459_v60  ;;  %v1461_v35 = vadd.f32 1.0, %v3409_v57  ;;  %v1465_v41 = vadd.f32 1.0, %v3442_v25  ;;  %v945_v60 = vpop.f32.mrf.mxu0 }
 0x277   : > { %v1650_v5 = vpack.c.bf16 %v1594_v21, %v1590_v42  ;;  %v1180_v0 = vmul.f32 %v1116_v11, %v3700_v22  ;;  %v1182_v1 = vmul.f32 %v1118_v23, %v3703_v46  ;;  %v1527_v20 = vmul.f32 0.5, %v1463_v33 }
 0x278   : > { %1978 = vmatprep.mubr.bf16.mxu0 %v1648_v56  ;;  %v1587_v15 = vmul.f32 %v1523_v53, %v3288_v45  ;;  %v1525_v47 = vmul.f32 0.5, %v1461_v35  ;;  %v1529_v50 = vmul.f32 0.5, %v1465_v41  ;;  %v3720_v36 = vadd.f32 %v939_v17, %v3227_v27  ;;  %v947_v63 = vpop.f32.mrf.mxu0 }
 0x279   : > { %2075 = vmatprep.mubr.bf16.mxu1 %v1650_v5  ;;  %v1244_v57 = vmul.f32 0.044715, %v1180_v0  ;;  %v1246_v29 = vmul.f32 0.044715, %v1182_v1  ;;  %v1591_v25 = vmul.f32 %v1527_v20, %v3309_v8  ;;  %v3724_v48 = vadd.f32 %v1052_v58, %v3229_v19 }
 0x27a   : > { %v3726_v62 = vpop.eup %2684  ;;  %v1589_v43 = vmul.f32 %v1525_v47, %v3295_v6  ;;  %v1593_v42 = vmul.f32 %v1529_v50, %v3320_v7  ;;  %v1119_v45 = vmul.f32 %v3720_v36, %v3720_v36  ;;  %v3733_v17 = vadd.f32 %v941_v49, %v3231_v3  ;;  %v1058_v6 = vpop.f32.mrf.mxu1 }
 0x27b   : > { %4114 = vst [vmem:[#allocation53_spill] sm:$0xff] %v3724_v48  ;;  %v3735_v21 = vpop.eup %2686  ;;  %v1308_v8 = vadd.f32 %v1244_v57, %v3700_v22  ;;  %v1310_v58 = vadd.f32 %v1246_v29, %v3703_v46  ;;  %v1647_v11 = vpack.c.bf16 %v1591_v25, %v1587_v15  ;;  %v1121_v23 = vmul.f32 %v3724_v48, %v3724_v48 }
 0x27c   : > { %v3741_v33 = vpop.eup %2688  ;;  %v1649_v7 = vpack.c.bf16 %v1593_v42, %v1589_v43  ;;  %v1183_v56 = vmul.f32 %v1119_v45, %v3720_v36  ;;  %v1120_v53 = vmul.f32 %v3733_v17, %v3733_v17  ;;  %v3747_v35 = vadd.f32 %v1054_v39, %v3233_v28 }
 0x27d   : > { %v3749_v41 = vpop.eup %2690  ;;  %v1372_v49 = vmul.f32 0.7978846, %v1308_v8  ;;  %v1374_v5 = vmul.f32 0.7978846, %v1310_v58  ;;  %1979 = vmatmul.mubr.bf16.gmra.mxu0 %v1647_v11  ;;  %v1185_v0 = vmul.f32 %v1121_v23, %v3724_v48  ;;  %v3753_v1 = vadd.f32 %v945_v60, %v3227_v27 }
 0x27e   : > { %v3755_v20 = vpop.eup %2692  ;;  %2076 = vmatmul.mubr.bf16.gmra.mxu1 %v1649_v7  ;;  %v1247_v15 = vmul.f32 0.044715, %v1183_v56  ;;  %v1184_v47 = vmul.f32 %v1120_v53, %v3733_v17  ;;  %v1122_v39 = vmul.f32 %v3747_v35, %v3747_v35  ;;  %v3761_v50 = vadd.f32 %v1058_v6, %v3229_v19 }
 0x27f   : > { %4115 = vst [vmem:[#allocation54_spill] sm:$0xff] %v3753_v1  ;;  %v3763_v57 = vpop.eup %2694  ;;  %2700 = vtanh.f32 %v1372_v49  ;;  %v1249_v29 = vmul.f32 0.044715, %v1185_v0  ;;  %v1123_v25 = vmul.f32 %v3753_v1, %v3753_v1  ;;  %v1468_v43 = vadd.f32 1.0, %v3508_v16 }
 0x280   : > { %4116 = vst [vmem:[#allocation55_spill] sm:$0xff] %v3761_v50  ;;  %v3768_v42 = vpop.eup %2696  ;;  %2702 = vtanh.f32 %v1374_v5  ;;  %v1311_v45 = vadd.f32 %v1247_v15, %v3720_v36  ;;  %v1248_v60 = vmul.f32 0.044715, %v1184_v47  ;;  %v1186_v8 = vmul.f32 %v1122_v39, %v3747_v35 }
 0x281   : > { %v3772_v58 = vpop.eup %2698  ;;  %v1313_v11 = vadd.f32 %v1249_v29, %v3724_v48  ;;  %v1187_v23 = vmul.f32 %v1123_v25, %v3753_v1  ;;  %v1125_v6 = vmul.f32 %v3761_v50, %v3761_v50  ;;  %v1472_v7 = vadd.f32 1.0, %v3532_v10 }
 0x282   : > { %v1375_v16 = vmul.f32 0.7978846, %v1311_v45  ;;  %v1312_v56 = vadd.f32 %v1248_v60, %v3733_v17  ;;  %v1250_v53 = vmul.f32 0.044715, %v1186_v8  ;;  %v1532_v49 = vmul.f32 0.5, %v1468_v43  ;;  %v1060_v8 = vpop.f32.mrf.mxu1 }
 0x283   : > { %v1377_v5 = vmul.f32 0.7978846, %v1313_v11  ;;  %v1251_v0 = vmul.f32 0.044715, %v1187_v23  ;;  %v1189_v15 = vmul.f32 %v1125_v6, %v3761_v50  ;;  %v1536_v47 = vmul.f32 0.5, %v1472_v7 }
 0x284   : > { %2704 = vtanh.f32 %v1375_v16  ;;  %v1376_v39 = vmul.f32 0.7978846, %v1312_v56  ;;  %v1314_v29 = vadd.f32 %v1250_v53, %v3747_v35  ;;  %v1596_v25 = vmul.f32 %v1532_v49, %v3374_v51 }
 0x285   : > { %2706 = vtanh.f32 %v1377_v5  ;;  %v1315_v10 = vadd.f32 %v1251_v0, %v3753_v1  ;;  %v1253_v45 = vmul.f32 0.044715, %v1189_v15  ;;  %v1600_v60 = vmul.f32 %v1536_v47, %v3414_v61  ;;  %v949_v61 = vpop.f32.mrf.mxu0  ;;  %v4118_v15 = vld [vmem:[#allocation20_spill] sm:$0xff] }
 0x286   : > { %2708 = vtanh.f32 %v1376_v39  ;;  %v1378_v43 = vmul.f32 0.7978846, %v1314_v29  ;;  %v1470_v11 = vadd.f32 1.0, %v3514_v18  ;;  %v1474_v23 = vadd.f32 1.0, %v3540_v54  ;;  %v4117_v54 = vld [vmem:[#allocation30_spill] sm:$0xff]  ;;  %v4119_v39 = vld [vmem:[#allocation23_spill] sm:$0xff] }
 0x287   : > { %v1379_v6 = vmul.f32 0.7978846, %v1315_v10  ;;  %v1317_v7 = vadd.f32 %v1253_v45, %v3761_v50  ;;  %v1652_v16 = vpack.c.bf16 %v1600_v60, %v1596_v25  ;;  %v3789_v51 = vadd.f32 %v947_v63, %v3231_v3  ;;  %v4120_v25 = vld [vmem:[#allocation36_spill] sm:$0xff]  ;;  %v1062_v45 = vpop.f32.mrf.mxu1 }
 0x288   : > { %2710 = vtanh.f32 %v1378_v43  ;;  %v1534_v56 = vmul.f32 0.5, %v1470_v11  ;;  %v1538_v53 = vmul.f32 0.5, %v1474_v23  ;;  %v3792_v49 = vadd.f32 %v1060_v8, %v3233_v28  ;;  %v4121_v43 = vld [vmem:[#allocation34_spill] sm:$0xff] }
 0x289   : > { %2712 = vtanh.f32 %v1379_v6  ;;  %v1381_v5 = vmul.f32 0.7978846, %v1317_v7  ;;  %1986 = vmatprep.mubr.bf16.mxu0 %v1652_v16  ;;  %v1124_v18 = vmul.f32 %v3789_v51, %v3789_v51  ;;  %v1467_v0 = vadd.f32 1.0, %v4117_v54  ;;  %v951_v54 = vpop.f32.mrf.mxu0 }
 0x28a   : > { %v1598_v47 = vmul.f32 %v1534_v56, %v4118_v15  ;;  %v1602_v63 = vmul.f32 %v1538_v53, %v4119_v39  ;;  %v1126_v29 = vmul.f32 %v3792_v49, %v3792_v49  ;;  %v1471_v10 = vadd.f32 1.0, %v4120_v25  ;;  %v4122_v56 = vld [vmem:[#allocation37_spill] sm:$0xff]  ;;  %v4123_v25 = vld [vmem:[#allocation18_spill] sm:$0xff] }
 0x28b   : > { %2714 = vtanh.f32 %v1381_v5  ;;  %v1188_v60 = vmul.f32 %v1124_v18, %v3789_v51  ;;  %v1531_v8 = vmul.f32 0.5, %v1467_v0  ;;  %v1469_v11 = vadd.f32 1.0, %v4121_v43  ;;  %v4125_v43 = vld [vmem:[#allocation21_spill] sm:$0xff] }
 0x28c   : > { %v3804_v23 = vpop.eup %2700  ;;  %v1654_v6 = vpack.c.bf16 %v1602_v63, %v1598_v47  ;;  %v1190_v7 = vmul.f32 %v1126_v29, %v3792_v49  ;;  %v1535_v16 = vmul.f32 0.5, %v1471_v10  ;;  %v1473_v53 = vadd.f32 1.0, %v4122_v56  ;;  %v1064_v29 = vpop.f32.mrf.mxu1  ;;  %v4127_v56 = vld [vmem:[#allocation19_spill] sm:$0xff] }
 0x28d   : > { %v3808_v15 = vpop.eup %2702  ;;  %v1252_v39 = vmul.f32 0.044715, %v1188_v60  ;;  %v1595_v50 = vmul.f32 %v1531_v8, %v4123_v25  ;;  %v1533_v5 = vmul.f32 0.5, %v1469_v11  ;;  %v3812_v18 = vadd.f32 %v949_v61, %v3227_v27  ;;  %v4128_v11 = vld [vmem:[#allocation22_spill] sm:$0xff] }
 0x28e   : > { %2083 = vmatprep.mubr.bf16.mxu1 %v1654_v6  ;;  %v1254_v0 = vmul.f32 0.044715, %v1190_v7  ;;  %v1599_v1 = vmul.f32 %v1535_v16, %v4125_v43  ;;  %v1537_v47 = vmul.f32 0.5, %v1473_v53  ;;  %v3816_v63 = vadd.f32 %v1062_v45, %v3229_v19 }
 0x28f   : > { %4124 = vst [vmem:[#allocation30_spill] sm:$0xff] %v3812_v18  ;;  %v1316_v10 = vadd.f32 %v1252_v39, %v3789_v51  ;;  %v1597_v48 = vmul.f32 %v1533_v5, %v4127_v56  ;;  %v1127_v60 = vmul.f32 %v3812_v18, %v3812_v18  ;;  %v3823_v8 = vadd.f32 %v951_v54, %v3231_v3 }
 0x290   : > { %4126 = vst [vmem:[#allocation20_spill] sm:$0xff] %v3816_v63  ;;  %v1318_v27 = vadd.f32 %v1254_v0, %v3792_v49  ;;  %v1651_v61 = vpack.c.bf16 %v1599_v1, %v1595_v50  ;;  %v1601_v6 = vmul.f32 %v1537_v47, %v4128_v11  ;;  %v1129_v19 = vmul.f32 %v3816_v63, %v3816_v63 }
 0x291   : > { %v3829_v45 = vpop.eup %2704  ;;  %v1380_v7 = vmul.f32 0.7978846, %v1316_v10  ;;  %v1191_v16 = vmul.f32 %v1127_v60, %v3812_v18  ;;  %v1128_v53 = vmul.f32 %v3823_v8, %v3823_v8  ;;  %v3835_v39 = vadd.f32 %v1064_v29, %v3233_v28 }
 0x292   : > { %v3837_v3 = vpop.eup %2706  ;;  %v1382_v54 = vmul.f32 0.7978846, %v1318_v27  ;;  %1987 = vmatmul.mubr.bf16.gmra.mxu0 %v1651_v61  ;;  %v1653_v1 = vpack.c.bf16 %v1601_v6, %v1597_v48  ;;  %v1193_v50 = vmul.f32 %v1129_v19, %v3816_v63  ;;  %v1476_v25 = vadd.f32 1.0, %v3580_v2  ;;  %v4129_v19 = vld [vmem:[#allocation26_spill] sm:$0xff] }
 0x293   : > { %v3841_v5 = vpop.eup %2708  ;;  %2716 = vtanh.f32 %v1380_v7  ;;  %v1255_v0 = vmul.f32 0.044715, %v1191_v16  ;;  %v1192_v43 = vmul.f32 %v1128_v53, %v3823_v8  ;;  %v1130_v47 = vmul.f32 %v3835_v39, %v3835_v39 }
 0x294   : > { %2718 = vtanh.f32 %v1382_v54  ;;  %2084 = vmatmul.mubr.bf16.gmra.mxu1 %v1653_v1  ;;  %v1257_v28 = vmul.f32 0.044715, %v1193_v50  ;;  %v1480_v29 = vadd.f32 1.0, %v3600_v13  ;;  %v1540_v10 = vmul.f32 0.5, %v1476_v25 }
 0x295   : > { %v3847_v48 = vpop.eup %2710  ;;  %v1319_v56 = vadd.f32 %v1255_v0, %v3812_v18  ;;  %v1256_v2 = vmul.f32 0.044715, %v1192_v43  ;;  %v1194_v60 = vmul.f32 %v1130_v47, %v3835_v39  ;;  %v1478_v27 = vadd.f32 1.0, %v3586_v12  ;;  %v4131_v0 = vld [vmem:[#allocation31_spill] sm:$0xff]  ;;  %v4132_v47 = vld [vmem:[#allocation42_spill] sm:$0xff] }
 0x296   : > { %v3852_v61 = vpop.eup %2712  ;;  %v1321_v11 = vadd.f32 %v1257_v28, %v3816_v63  ;;  %v1544_v6 = vmul.f32 0.5, %v1480_v29  ;;  %v1604_v7 = vmul.f32 %v1540_v10, %v4129_v19  ;;  %v1482_v16 = vadd.f32 1.0, %v3604_v55  ;;  %v4133_v10 = vld [vmem:[#allocation27_spill] sm:$0xff] }
 0x297   : > { %v1383_v13 = vmul.f32 0.7978846, %v1319_v56  ;;  %v1320_v53 = vadd.f32 %v1256_v2, %v3823_v8  ;;  %v1258_v54 = vmul.f32 0.044715, %v1194_v60  ;;  %v1542_v1 = vmul.f32 0.5, %v1478_v27  ;;  %v4134_v56 = vld [vmem:[#allocation32_spill] sm:$0xff] }
 0x298   : > { %v3858_v50 = vpop.eup %2714  ;;  %v1385_v25 = vmul.f32 0.7978846, %v1321_v11  ;;  %v1608_v43 = vmul.f32 %v1544_v6, %v4131_v0  ;;  %v1546_v12 = vmul.f32 0.5, %v1482_v16  ;;  %v1475_v18 = vadd.f32 1.0, %v4132_v47  ;;  %v4135_v60 = vld [vmem:[#allocation48_spill] sm:$0xff] }
 0x299   : > { %4130 = vst [vmem:[#allocation23_spill] sm:$0xff] %v3858_v50  ;;  %2720 = vtanh.f32 %v1383_v13  ;;  %v1384_v28 = vmul.f32 0.7978846, %v1320_v53  ;;  %v1322_v29 = vadd.f32 %v1258_v54, %v3835_v39  ;;  %v1606_v19 = vmul.f32 %v1542_v1, %v4133_v10  ;;  %v4136_v50 = vld [vmem:[#allocation45_spill] sm:$0xff]  ;;  %v4138_v1 = vld [vmem:[#allocation24_spill] sm:$0xff] }
 0x29a   : > { %2722 = vtanh.f32 %v1385_v25  ;;  %v1656_v55 = vpack.c.bf16 %v1608_v43, %v1604_v7  ;;  %v1610_v2 = vmul.f32 %v1546_v12, %v4134_v56  ;;  %v1479_v27 = vadd.f32 1.0, %v4135_v60  ;;  %v4137_v13 = vld [vmem:[#allocation49_spill] sm:$0xff]  ;;  %v4139_v12 = vld [vmem:[#allocation28_spill] sm:$0xff] }
 0x29b   : > { %2724 = vtanh.f32 %v1384_v28  ;;  %v1386_v63 = vmul.f32 0.7978846, %v1322_v29  ;;  %v1539_v11 = vmul.f32 0.5, %v1475_v18  ;;  %v1477_v6 = vadd.f32 1.0, %v4136_v50  ;;  %v4140_v29 = vld [vmem:[#allocation25_spill] sm:$0xff] }
 0x29c   : > { %1994 = vmatprep.mubr.bf16.mxu0 %v1656_v55  ;;  %v1658_v16 = vpack.c.bf16 %v1610_v2, %v1606_v19  ;;  %v1543_v0 = vmul.f32 0.5, %v1479_v27  ;;  %v1481_v53 = vadd.f32 1.0, %v4137_v13  ;;  %v1484_v54 = vadd.f32 1.0, %v3650_v32  ;;  %v4141_v2 = vld [vmem:[#allocation29_spill] sm:$0xff] }
 0x29d   : > { %2726 = vtanh.f32 %v1386_v63  ;;  %v1603_v25 = vmul.f32 %v1539_v11, %v4138_v1  ;;  %v1541_v7 = vmul.f32 0.5, %v1477_v6  ;;  %v1488_v43 = vadd.f32 1.0, %v3681_v44  ;;  %v4142_v44 = vld [vmem:[#allocation38_spill] sm:$0xff] }
 0x29e   : > { %2091 = vmatprep.mubr.bf16.mxu1 %v1658_v16  ;;  %v1607_v47 = vmul.f32 %v1543_v0, %v4139_v12  ;;  %v1545_v28 = vmul.f32 0.5, %v1481_v53  ;;  %v1548_v18 = vmul.f32 0.5, %v1484_v54  ;;  %v1486_v50 = vadd.f32 1.0, %v3660_v30  ;;  %v4143_v16 = vld [vmem:[#allocation43_spill] sm:$0xff]  ;;  %v4146_v12 = vld [vmem:[#allocation44_spill] sm:$0xff] }
 0x29f   : > { %v1605_v10 = vmul.f32 %v1541_v7, %v4140_v29  ;;  %v1552_v19 = vmul.f32 0.5, %v1488_v43  ;;  %v1490_v55 = vadd.f32 1.0, %v3685_v40  ;;  %v1483_v32 = vadd.f32 1.0, %v3608_v26  ;;  %v4144_v54 = vld [vmem:[#allocation39_spill] sm:$0xff] }
 0x2a0   : > { %v3876_v63 = vpop.eup %2716  ;;  %v1655_v56 = vpack.c.bf16 %v1607_v47, %v1603_v25  ;;  %v1609_v60 = vmul.f32 %v1545_v28, %v4141_v2  ;;  %v1612_v27 = vmul.f32 %v1548_v18, %v4142_v44  ;;  %v1550_v11 = vmul.f32 0.5, %v1486_v50  ;;  %v4145_v25 = vld [vmem:[#allocation52_spill] sm:$0xff]  ;;  %v4147_v18 = vld [vmem:[#allocation33_spill] sm:$0xff]  ;;  %v4149_v44 = vld [vmem:[#allocation35_spill] sm:$0xff] }
 0x2a1   : > { %v3880_v6 = vpop.eup %2718  ;;  %v1616_v0 = vmul.f32 %v1552_v19, %v4143_v16  ;;  %v1554_v30 = vmul.f32 0.5, %v1490_v55  ;;  %v1487_v13 = vadd.f32 1.0, %v3667_v4  ;;  %v1547_v53 = vmul.f32 0.5, %v1483_v32  ;;  %v4148_v32 = vld [vmem:[#allocation40_spill] sm:$0xff] }
 0x2a2   : > { %1995 = vmatmul.mubr.bf16.gmra.mxu0 %v1655_v56  ;;  %v1657_v40 = vpack.c.bf16 %v1609_v60, %v1605_v10  ;;  %v1614_v26 = vmul.f32 %v1550_v11, %v4144_v54  ;;  %v1485_v1 = vadd.f32 1.0, %v3625_v37  ;;  %v1489_v7 = vadd.f32 1.0, %v4145_v25  ;;  %v4150_v11 = vld [vmem:[#allocation41_spill] sm:$0xff] }
 0x2a3   : > { %v1660_v43 = vpack.c.bf16 %v1616_v0, %v1612_v27  ;;  %v1618_v47 = vmul.f32 %v1554_v30, %v4146_v12  ;;  %v1551_v28 = vmul.f32 0.5, %v1487_v13  ;;  %v1611_v50 = vmul.f32 %v1547_v53, %v4147_v18 }
 0x2a4   : > { %2092 = vmatmul.mubr.bf16.gmra.mxu1 %v1657_v40  ;;  %v1549_v29 = vmul.f32 0.5, %v1485_v1  ;;  %v1553_v19 = vmul.f32 0.5, %v1489_v7  ;;  %v1492_v4 = vadd.f32 1.0, %v3726_v62  ;;  %v1496_v55 = vadd.f32 1.0, %v3755_v20 }
 0x2a5   : > { %2002 = vmatprep.mubr.bf16.mxu0 %v1660_v43  ;;  %v1662_v10 = vpack.c.bf16 %v1618_v47, %v1614_v26  ;;  %v1615_v56 = vmul.f32 %v1551_v28, %v4148_v32  ;;  %v1494_v37 = vadd.f32 1.0, %v3735_v21  ;;  %v1498_v2 = vadd.f32 1.0, %v3763_v57  ;;  %v4151_v26 = vld [vmem:[#allocation50_spill] sm:$0xff] }
 0x2a6   : > { %v3894_v60 = vpop.eup %2720  ;;  %v1613_v27 = vmul.f32 %v1549_v29, %v4149_v44  ;;  %v1617_v16 = vmul.f32 %v1553_v19, %v4150_v11  ;;  %v1556_v0 = vmul.f32 0.5, %v1492_v4  ;;  %v1560_v30 = vmul.f32 0.5, %v1496_v55  ;;  %v4152_v4 = vld [vmem:[#allocation46_spill] sm:$0xff] }
 0x2a7   : > { %v3898_v13 = vpop.eup %2722  ;;  %2099 = vmatprep.mubr.bf16.mxu1 %v1662_v10  ;;  %v1659_v62 = vpack.c.bf16 %v1615_v56, %v1611_v50  ;;  %v1558_v20 = vmul.f32 0.5, %v1494_v37  ;;  %v1562_v53 = vmul.f32 0.5, %v1498_v2  ;;  %v1491_v40 = vadd.f32 1.0, %v3689_v59  ;;  %v4153_v37 = vld [vmem:[#allocation47_spill] sm:$0xff] }
 0x2a8   : > { %v2725_v54 = vpop.eup %2724  ;;  %v1661_v21 = vpack.c.bf16 %v1617_v16, %v1613_v27  ;;  %v1620_v57 = vmul.f32 %v1556_v0, %v4151_v26  ;;  %v1624_v1 = vmul.f32 %v1560_v30, %v3635_v38  ;;  %v1495_v25 = vadd.f32 1.0, %v3741_v33 }
 0x2a9   : > { %v1622_v7 = vmul.f32 %v1558_v20, %v3617_v31  ;;  %v1626_v43 = vmul.f32 %v1562_v53, %v3639_v34  ;;  %v1555_v12 = vmul.f32 0.5, %v1491_v40  ;;  %v1493_v47 = vadd.f32 1.0, %v3696_v9 }
 0x2aa   : > { %v2727_v28 = vpop.eup %2726  ;;  %2003 = vmatmul.mubr.bf16.gmra.mxu0 %v1659_v62  ;;  %v1664_v18 = vpack.c.bf16 %v1624_v1, %v1620_v57  ;;  %v1559_v50 = vmul.f32 0.5, %v1495_v25  ;;  %v1497_v59 = vadd.f32 1.0, %v3749_v41  ;;  %v1500_v29 = vadd.f32 1.0, %v3804_v23 }
 0x2ab   : > { %v1666_v19 = vpack.c.bf16 %v1626_v43, %v1622_v7  ;;  %v1619_v38 = vmul.f32 %v1555_v12, %v4152_v4  ;;  %v1557_v55 = vmul.f32 0.5, %v1493_v47  ;;  %v1504_v33 = vadd.f32 1.0, %v3841_v5  ;;  %v4155_v12 = vld [vmem:[#allocation51_spill] sm:$0xff] }
 0x2ac   : > { %2100 = vmatmul.mubr.bf16.gmra.mxu1 %v1661_v21  ;;  %2010 = vmatprep.mubr.bf16.mxu0 %v1664_v18  ;;  %v1623_v31 = vmul.f32 %v1559_v50, %v3620_v24  ;;  %v1561_v34 = vmul.f32 0.5, %v1497_v59  ;;  %v1564_v9 = vmul.f32 0.5, %v1500_v29  ;;  %v1502_v10 = vadd.f32 1.0, %v3808_v15  ;;  %v4156_v59 = vld [vmem:[#allocation23_spill] sm:$0xff] }
 0x2ad   : > { %2107 = vmatprep.mubr.bf16.mxu1 %v1666_v19  ;;  %v1568_v32 = vmul.f32 0.5, %v1504_v33  ;;  %v1506_v41 = vadd.f32 1.0, %v3847_v48  ;;  %v1499_v23 = vadd.f32 1.0, %v3768_v42  ;;  %v1621_v2 = vmul.f32 %v1557_v55, %v4153_v37 }
 0x2ae   : > { %v1663_v56 = vpack.c.bf16 %v1623_v31, %v1619_v38  ;;  %v1625_v44 = vmul.f32 %v1561_v34, %v3632_v14  ;;  %v1566_v5 = vmul.f32 0.5, %v1502_v10  ;;  %v1628_v27 = vmul.f32 %v1564_v9, %v3700_v22  ;;  %v4160_v9 = vld [vmem:[#allocation55_spill] sm:$0xff] }
 0x2af   : > { %v1632_v24 = vmul.f32 %v1568_v32, %v3733_v17  ;;  %v1570_v11 = vmul.f32 0.5, %v1506_v41  ;;  %v1503_v16 = vadd.f32 1.0, %v3829_v45  ;;  %v1563_v0 = vmul.f32 0.5, %v1499_v23  ;;  %v3945_v23 = vld [vmem:[%s4012_s7] ss:$0 sm:$0xff] }
 0x2b0   : > { %v1665_v15 = vpack.c.bf16 %v1625_v44, %v1621_v2  ;;  %v1501_v30 = vadd.f32 1.0, %v3772_v58  ;;  %v1505_v48 = vadd.f32 1.0, %v3837_v3  ;;  %v1630_v62 = vmul.f32 %v1566_v5, %v3703_v46 }
 0x2b1   : > { %v1668_v42 = vpack.c.bf16 %v1632_v24, %v1628_v27  ;;  %v1634_v20 = vmul.f32 %v1570_v11, %v3747_v35  ;;  %v1567_v14 = vmul.f32 0.5, %v1503_v16  ;;  %v1508_v17 = vadd.f32 1.0, %v3876_v63  ;;  %v4154_v35 = vld [vmem:[#allocation53_spill] sm:$0xff] }
 0x2b2   : > { %2011 = vmatmul.mubr.bf16.gmra.mxu0 %v1663_v56  ;;  %v1565_v53 = vmul.f32 0.5, %v1501_v30  ;;  %v1569_v22 = vmul.f32 0.5, %v1505_v48  ;;  %v1512_v40 = vadd.f32 1.0, %v2725_v54  ;;  %v1510_v58 = vadd.f32 1.0, %v3880_v6  ;;  %v4161_v30 = vld [vmem:[#allocation2_spill] sm:$0xff] }
 0x2b3   : > { %2018 = vmatprep.mubr.bf16.mxu0 %v1668_v42  ;;  %v1670_v45 = vpack.c.bf16 %v1634_v20, %v1630_v62  ;;  %v1631_v21 = vmul.f32 %v1567_v14, %v3720_v36  ;;  %v1514_v26 = vadd.f32 1.0, %v2727_v28  ;;  %v1572_v3 = vmul.f32 0.5, %v1508_v17  ;;  %v4162_v14 = vld [vmem:[#allocation4_spill] sm:$0xff] }
 0x2b4   : > { %2108 = vmatmul.mubr.bf16.gmra.mxu1 %v1665_v15  ;;  %v1576_v57 = vmul.f32 0.5, %v1512_v40  ;;  %v1627_v46 = vmul.f32 %v1563_v0, %v3655_v52  ;;  %v1633_v1 = vmul.f32 %v1569_v22, %v4154_v35  ;;  %v1574_v25 = vmul.f32 0.5, %v1510_v58 }
 0x2b5   : > { %2115 = vmatprep.mubr.bf16.mxu1 %v1670_v45  ;;  %v1578_v7 = vmul.f32 0.5, %v1514_v26  ;;  %v1636_v63 = vmul.f32 %v1572_v3, %v3789_v51  ;;  %v1507_v43 = vadd.f32 1.0, %v3852_v61  ;;  %v1511_v36 = vadd.f32 1.0, %v3894_v60  ;;  %v4157_v60 = vld [vmem:[#allocation30_spill] sm:$0xff] }
 0x2b6   : > { %v1640_v54 = vmul.f32 %v1576_v57, %v3823_v8  ;;  %v1667_v6 = vpack.c.bf16 %v1631_v21, %v1627_v46  ;;  %v1629_v47 = vmul.f32 %v1565_v53, %v4155_v12  ;;  %v1638_v28 = vmul.f32 %v1574_v25, %v3792_v49  ;;  %v4158_v49 = vld [vmem:[#allocation54_spill] sm:$0xff] }
 0x2b7   : > { %v1642_v18 = vmul.f32 %v1578_v7, %v3835_v39  ;;  %v1575_v50 = vmul.f32 0.5, %v1511_v36  ;;  %v1509_v29 = vadd.f32 1.0, %v4156_v59  ;;  %v1513_v19 = vadd.f32 1.0, %v3898_v13  ;;  %v4159_v39 = vld [vmem:[#allocation20_spill] sm:$0xff]  ;;  %v4163_v7 = vld [vmem:[#allocation3_spill] sm:$0xff] }
 0x2b8   : > { %v1672_v52 = vpack.c.bf16 %v1640_v54, %v1636_v63  ;;  %v1669_v8 = vpack.c.bf16 %v1633_v1, %v1629_v47  ;;  %v1571_v4 = vmul.f32 0.5, %v1507_v43 }
 0x2b9   : > { %v1674_v51 = vpack.c.bf16 %v1642_v18, %v1638_v28  ;;  %v1577_v61 = vmul.f32 0.5, %v1513_v19  ;;  %v1639_v38 = vmul.f32 %v1575_v50, %v4157_v60  ;;  %v1573_v55 = vmul.f32 0.5, %v1509_v29 }
 0x2ba   : > { %2019 = vmatmul.mubr.bf16.gmra.mxu0 %v1667_v6  ;;  %v1635_v33 = vmul.f32 %v1571_v4, %v4158_v49  ;;  %v4164_v6 = vld [vmem:[#allocation5_spill] sm:$0xff] }
 0x2bb   : > { %2026 = vmatprep.mubr.bf16.mxu0 %v1672_v52  ;;  %v1641_v31 = vmul.f32 %v1577_v61, %v4159_v39  ;;  %v1637_v10 = vmul.f32 %v1573_v55, %v4160_v9 }
 0x2bc   : > { %2116 = vmatmul.mubr.bf16.gmra.mxu1 %v1669_v8  ;;  %v1671_v34 = vpack.c.bf16 %v1639_v38, %v1635_v33  ;;  %v4165_v38 = vld [vmem:[#allocation6_spill] sm:$0xff] }
 0x2bd   : > { %2123 = vmatprep.mubr.bf16.mxu1 %v1674_v51  ;;  %v1673_v13 = vpack.c.bf16 %v1641_v31, %v1637_v10  ;;  %v4166_v31 = vld [vmem:[#allocation7_spill] sm:$0xff] }
 0x2c2   : > { %2027 = vmatmul.mubr.bf16.gmra.mxu0 %v1671_v34 }
 0x2c4   : > { %2124 = vmatmul.mubr.bf16.gmra.mxu1 %v1673_v13 }
 0x327   : > { %v2367_v32 = vpop.f32.mrf.mxu0 }
 0x329   : > { %v2368_v56 = vpop.f32.mrf.mxu0 }
 0x32a   : > { %v2431_v41 = vpop.f32.mrf.mxu1  ;;  %v2369_v37 = vadd.f32 %v2368_v56, %v2367_v32 }
 0x32b   : > { %v2370_v44 = vpop.f32.mrf.mxu0 }
 0x32c   : > { %v2432_v2 = vpop.f32.mrf.mxu1  ;;  %v1973_v5 = vadd.f32 %v2369_v37, %v3945_v23 }
 0x32d   : > { %v2433_v27 = vadd.f32 %v2432_v2, %v2431_v41  ;;  %v2371_v11 = vpop.f32.mrf.mxu0 }
 0x32e   : > { %v2434_v24 = vpop.f32.mrf.mxu1  ;;  %v2372_v15 = vadd.f32 %v2371_v11, %v2370_v44 }
 0x32f   : > { %v2070_v16 = vadd.f32 %v2433_v27, %v1973_v5 }
 0x330   : > { %v2435_v0 = vpop.f32.mrf.mxu1  ;;  %v1976_v42 = vadd.f32 %v2372_v15, %v3945_v23  ;;  %v4167_v15 = vld [vmem:[#allocation8_spill] sm:$0xff] }
 0x331   : > { %v2132_v48 = vadd.f32 %v2070_v16, %v4161_v30  ;;  %v2436_v62 = vadd.f32 %v2435_v0, %v2434_v24 }
 0x333   : > { %2148 = vst [vmem:[%s3953_s21] sm:$0xff] %v2132_v48  ;;  %v2073_v20 = vadd.f32 %v2436_v62, %v1976_v42 }
 0x335   : > { %v2133_v53 = vadd.f32 %v2073_v20, %v4162_v14 }
 0x337   : > { %2149 = vst [vmem:[%s3953_s21 + $0x8] sm:$0xff] %v2133_v53 }
 0x33d   : > { %v2373_v22 = vpop.f32.mrf.mxu0 }
 0x33e   : > { %v2437_v17 = vpop.f32.mrf.mxu1 }
 0x33f   : > { %v2374_v40 = vpop.f32.mrf.mxu0 }
 0x340   : > { %v2375_v45 = vadd.f32 %v2374_v40, %v2373_v22  ;;  %v2438_v21 = vpop.f32.mrf.mxu1 }
 0x341   : > { %v2376_v58 = vpop.f32.mrf.mxu0  ;;  %v2439_v3 = vadd.f32 %v2438_v21, %v2437_v17  ;;  %v4168_v17 = vld [vmem:[#allocation9_spill] sm:$0xff] }
 0x342   : > { %v1981_v26 = vadd.f32 %v2375_v45, %v3945_v23  ;;  %v2440_v57 = vpop.f32.mrf.mxu1 }
 0x343   : > { %v2377_v46 = vpop.f32.mrf.mxu0 }
 0x344   : > { %v2078_v35 = vadd.f32 %v2439_v3, %v1981_v26  ;;  %v2378_v1 = vadd.f32 %v2377_v46, %v2376_v58  ;;  %v2441_v25 = vpop.f32.mrf.mxu1 }
 0x345   : > { %v2442_v43 = vadd.f32 %v2441_v25, %v2440_v57 }
 0x346   : > { %v2134_v63 = vadd.f32 %v2078_v35, %v4163_v7  ;;  %v1984_v54 = vadd.f32 %v2378_v1, %v3945_v23  ;;  %v4169_v1 = vld [vmem:[#allocation10_spill] sm:$0xff] }
 0x348   : > { %2150 = vst [vmem:[%s3953_s21 + $0x10] sm:$0xff] %v2134_v63  ;;  %v2081_v36 = vadd.f32 %v2442_v43, %v1984_v54 }
 0x34a   : > { %v2135_v12 = vadd.f32 %v2081_v36, %v4164_v6 }
 0x34c   : > { %2151 = vst [vmem:[%s3953_s21 + $0x18] sm:$0xff] %v2135_v12 }
 0x352   : > { %v2379_v47 = vpop.f32.mrf.mxu0 }
 0x354   : > { %v2443_v28 = vpop.f32.mrf.mxu1  ;;  %v2380_v18 = vpop.f32.mrf.mxu0 }
 0x355   : > { %v2381_v52 = vadd.f32 %v2380_v18, %v2379_v47 }
 0x356   : > { %v2444_v50 = vpop.f32.mrf.mxu1  ;;  %v2382_v59 = vpop.f32.mrf.mxu0 }
 0x357   : > { %v1989_v29 = vadd.f32 %v2381_v52, %v3945_v23  ;;  %v2445_v19 = vadd.f32 %v2444_v50, %v2443_v28  ;;  %v4170_v28 = vld [vmem:[#allocation11_spill] sm:$0xff] }
 0x358   : > { %v2446_v51 = vpop.f32.mrf.mxu1  ;;  %v2383_v8 = vpop.f32.mrf.mxu0 }
 0x359   : > { %v2086_v4 = vadd.f32 %v2445_v19, %v1989_v29  ;;  %v2384_v61 = vadd.f32 %v2383_v8, %v2382_v59 }
 0x35a   : > { %v2447_v60 = vpop.f32.mrf.mxu1 }
 0x35b   : > { %v2136_v55 = vadd.f32 %v2086_v4, %v4165_v38  ;;  %v1992_v49 = vadd.f32 %v2384_v61, %v3945_v23  ;;  %v2448_v33 = vadd.f32 %v2447_v60, %v2446_v51  ;;  %v4171_v61 = vld [vmem:[#allocation12_spill] sm:$0xff] }
 0x35d   : > { %2152 = vst [vmem:[%s3953_s21 + $0x20] sm:$0xff] %v2136_v55  ;;  %v2089_v39 = vadd.f32 %v2448_v33, %v1992_v49 }
 0x35f   : > { %v2137_v34 = vadd.f32 %v2089_v39, %v4166_v31 }
 0x361   : > { %2153 = vst [vmem:[%s3953_s21 + $0x28] sm:$0xff] %v2137_v34 }
 0x362   : > { %v2385_v9 = vpop.f32.mrf.mxu0 }
 0x364   : > { %v2449_v10 = vpop.f32.mrf.mxu1  ;;  %v2386_v13 = vpop.f32.mrf.mxu0 }
 0x365   : > { %v2387_v32 = vadd.f32 %v2386_v13, %v2385_v9 }
 0x366   : > { %v2450_v41 = vpop.f32.mrf.mxu1  ;;  %v2388_v56 = vpop.f32.mrf.mxu0 }
 0x367   : > { %v1997_v37 = vadd.f32 %v2387_v32, %v3945_v23  ;;  %v2451_v2 = vadd.f32 %v2450_v41, %v2449_v10  ;;  %v4172_v10 = vld [vmem:[#allocation13_spill] sm:$0xff] }
 0x368   : > { %v2452_v44 = vpop.f32.mrf.mxu1  ;;  %v2389_v5 = vpop.f32.mrf.mxu0 }
 0x369   : > { %v2094_v27 = vadd.f32 %v2451_v2, %v1997_v37  ;;  %v2390_v24 = vadd.f32 %v2389_v5, %v2388_v56 }
 0x36a   : > { %v2453_v11 = vpop.f32.mrf.mxu1  ;;  %v2391_v16 = vpop.f32.mrf.mxu0 }
 0x36b   : > { %v2138_v0 = vadd.f32 %v2094_v27, %v4167_v15  ;;  %v2000_v30 = vadd.f32 %v2390_v24, %v3945_v23  ;;  %v2454_v48 = vadd.f32 %v2453_v11, %v2452_v44  ;;  %v4173_v24 = vld [vmem:[#allocation14_spill] sm:$0xff] }
 0x36c   : > { %v2455_v42 = vpop.f32.mrf.mxu1  ;;  %v2392_v62 = vpop.f32.mrf.mxu0 }
 0x36d   : > { %2154 = vst [vmem:[%s3953_s21 + $0x30] sm:$0xff] %v2138_v0  ;;  %v2097_v20 = vadd.f32 %v2454_v48, %v2000_v30  ;;  %v2393_v14 = vadd.f32 %v2392_v62, %v2391_v16 }
 0x36e   : > { %v2456_v53 = vpop.f32.mrf.mxu1  ;;  %v2394_v22 = vpop.f32.mrf.mxu0 }
 0x36f   : > { %v2139_v40 = vadd.f32 %v2097_v20, %v4168_v17  ;;  %v2005_v45 = vadd.f32 %v2393_v14, %v3945_v23  ;;  %v2457_v21 = vadd.f32 %v2456_v53, %v2455_v42  ;;  %v4174_v14 = vld [vmem:[#allocation15_spill] sm:$0xff] }
 0x370   : > { %v2458_v58 = vpop.f32.mrf.mxu1  ;;  %v2395_v26 = vpop.f32.mrf.mxu0 }
 0x371   : > { %2155 = vst [vmem:[%s3953_s21 + $0x38] sm:$0xff] %v2139_v40  ;;  %v2102_v3 = vadd.f32 %v2457_v21, %v2005_v45  ;;  %v2396_v57 = vadd.f32 %v2395_v26, %v2394_v22 }
 0x372   : > { %v2459_v46 = vpop.f32.mrf.mxu1  ;;  %v2397_v35 = vpop.f32.mrf.mxu0 }
 0x373   : > { %v2140_v25 = vadd.f32 %v2102_v3, %v4169_v1  ;;  %v2008_v7 = vadd.f32 %v2396_v57, %v3945_v23  ;;  %v2460_v63 = vadd.f32 %v2459_v46, %v2458_v58  ;;  %v4175_v3 = vld [vmem:[#allocation16_spill] sm:$0xff] }
 0x374   : > { %v2461_v54 = vpop.f32.mrf.mxu1  ;;  %v2398_v43 = vpop.f32.mrf.mxu0 }
 0x375   : > { %2156 = vst [vmem:[%s3953_s21 + $0x40] sm:$0xff] %v2140_v25  ;;  %v2105_v36 = vadd.f32 %v2460_v63, %v2008_v7  ;;  %v2399_v6 = vadd.f32 %v2398_v43, %v2397_v35  ;;  %v4176_v25 = vld [vmem:[#allocation17_spill] sm:$0xff] }
 0x376   : > { %v2462_v12 = vpop.f32.mrf.mxu1  ;;  %v2400_v47 = vpop.f32.mrf.mxu0 }
 0x377   : > { %v2141_v18 = vadd.f32 %v2105_v36, %v4170_v28  ;;  %v2013_v52 = vadd.f32 %v2399_v6, %v3945_v23  ;;  %v2463_v50 = vadd.f32 %v2462_v12, %v2461_v54 }
 0x378   : > { %v2464_v59 = vpop.f32.mrf.mxu1  ;;  %v2401_v29 = vpop.f32.mrf.mxu0 }
 0x379   : > { %2157 = vst [vmem:[%s3953_s21 + $0x48] sm:$0xff] %v2141_v18  ;;  %v2110_v19 = vadd.f32 %v2463_v50, %v2013_v52  ;;  %v2402_v51 = vadd.f32 %v2401_v29, %v2400_v47 }
 0x37a   : > { %v2465_v8 = vpop.f32.mrf.mxu1  ;;  %v2403_v4 = vpop.f32.mrf.mxu0 }
 0x37b   : > { %v2142_v60 = vadd.f32 %v2110_v19, %v4171_v61  ;;  %v2016_v38 = vadd.f32 %v2402_v51, %v3945_v23  ;;  %v2466_v55 = vadd.f32 %v2465_v8, %v2464_v59 }
 0x37c   : > { %v2467_v49 = vpop.f32.mrf.mxu1  ;;  %v2404_v33 = vpop.f32.mrf.mxu0 }
 0x37d   : > { %2158 = vst [vmem:[%s3953_s21 + $0x50] sm:$0xff] %v2142_v60  ;;  %v2113_v39 = vadd.f32 %v2466_v55, %v2016_v38  ;;  %v2405_v31 = vadd.f32 %v2404_v33, %v2403_v4 }
 0x37e   : > { %v2468_v34 = vpop.f32.mrf.mxu1  ;;  %v2406_v9 = vpop.f32.mrf.mxu0 }
 0x37f   : > { %v2143_v13 = vadd.f32 %v2113_v39, %v4172_v10  ;;  %v2021_v32 = vadd.f32 %v2405_v31, %v3945_v23  ;;  %v2469_v41 = vadd.f32 %v2468_v34, %v2467_v49 }
 0x380   : > { %v2470_v56 = vpop.f32.mrf.mxu1  ;;  %v2407_v37 = vpop.f32.mrf.mxu0 }
 0x381   : > { %2159 = vst [vmem:[%s3953_s21 + $0x58] sm:$0xff] %v2143_v13  ;;  %v2118_v2 = vadd.f32 %v2469_v41, %v2021_v32  ;;  %v2408_v44 = vadd.f32 %v2407_v37, %v2406_v9 }
 0x382   : > { %v2471_v5 = vpop.f32.mrf.mxu1  ;;  %v2409_v27 = vpop.f32.mrf.mxu0 }
 0x383   : > { %v2144_v11 = vadd.f32 %v2118_v2, %v4173_v24  ;;  %v2024_v16 = vadd.f32 %v2408_v44, %v3945_v23  ;;  %v2472_v15 = vadd.f32 %v2471_v5, %v2470_v56 }
 0x384   : > { %v2473_v0 = vpop.f32.mrf.mxu1  ;;  %v2410_v30 = vpop.f32.mrf.mxu0 }
 0x385   : > { %2160 = vst [vmem:[%s3953_s21 + $0x60] sm:$0xff] %v2144_v11  ;;  %v2121_v48 = vadd.f32 %v2472_v15, %v2024_v16  ;;  %v2411_v42 = vadd.f32 %v2410_v30, %v2409_v27 }
 0x386   : > { %v2474_v62 = vpop.f32.mrf.mxu1  ;;  %v2412_v20 = vpop.f32.mrf.mxu0 }
 0x387   : > { %v2145_v53 = vadd.f32 %v2121_v48, %v4174_v14  ;;  %v2029_v22 = vadd.f32 %v2411_v42, %v3945_v23  ;;  %v2475_v17 = vadd.f32 %v2474_v62, %v2473_v0 }
 0x388   : > { %v2476_v40 = vpop.f32.mrf.mxu1  ;;  %v2413_v45 = vpop.f32.mrf.mxu0 }
 0x389   : > { %2161 = vst [vmem:[%s3953_s21 + $0x68] sm:$0xff] %v2145_v53  ;;  %v2126_v21 = vadd.f32 %v2475_v17, %v2029_v22  ;;  %v2414_v58 = vadd.f32 %v2413_v45, %v2412_v20 }
 0x38a   : > { %v2477_v26 = vpop.f32.mrf.mxu1 }
 0x38b   : > { %v2146_v57 = vadd.f32 %v2126_v21, %v4175_v3  ;;  %v2032_v46 = vadd.f32 %v2414_v58, %v3945_v23  ;;  %v2478_v35 = vadd.f32 %v2477_v26, %v2476_v40 }
 0x38d   : > { %2162 = vst [vmem:[%s3953_s21 + $0x70] sm:$0xff] %v2146_v57  ;;  %v2129_v1 = vadd.f32 %v2478_v35, %v2032_v46 }
 0x38f   : > { %v2147_v7 = vadd.f32 %v2129_v1, %v4176_v25 }
 0x391   : > { %2163 = vst [vmem:[%s3953_s21 + $0x78] sm:$0xff] %v2147_v7 }
 0x392 PF: > { %s18_s27 = sadd.s32 1, %s2734_s27  }
 0x393   : > { %p15_p4 = scmp.ge.s32.totalorder %s18_s27, 4  }
 0x395   :  { %17 = sbr.rel (!%p15_p4) target bundleno = 1 (0x1), region = 85 }

// kernel: swin_block_forward.2
= control target key start
LH: loop header
LB: loop body
LE: loop exit
PB: predicated region body
PF: predicated region fallthrough
CT: control target
= control target key end

     0   :  { %s6726_s27 = smov 0   ;;  %s8670_s0 = inlined_call_operand.vmem [shape: f32[256,128], index: 0, kind: input, shape index: {}]   ;;  %s8671_s1 = inlined_call_operand.vmem [shape: f32[4,8,16,16], index: 1, kind: input, shape index: {}]   ;;  %s8672_s2 = inlined_call_operand.vmem [shape: f32[1,128], index: 2, kind: input, shape index: {}]   ;;  %s8673_s3 = inlined_call_operand.vmem [shape: f32[1,128], index: 3, kind: input, shape index: {}]   ;;  %s8674_s4 = inlined_call_operand.vmem [shape: bf16[128,384], index: 4, kind: input, shape index: {}]   ;;  %s8675_s5 = inlined_call_operand.vmem [shape: f32[1,384], index: 5, kind: input, shape index: {}]   ;;  %s8676_s6 = inlined_call_operand.vmem [shape: bf16[128,128], index: 6, kind: input, shape index: {}]   ;;  %s8677_s7 = inlined_call_operand.vmem [shape: f32[1,128], index: 7, kind: input, shape index: {}]   ;;  %s8678_s8 = inlined_call_operand.vmem [shape: bf16[256,128], index: 8, kind: output, shape index: {}]  }
   0x1 LB: > { %s5464_s28 = sadd.s32 4294967295, %s6673_s27   ;;  %p5468_p0 = scmp.ge.s32.totalorder %s6673_s27, 1  ;;  %s6673_s27 = sphi %s6726_s27, %s18_s27  }
   0x2   : > { %p263_p1 = scmp.lt.s32.totalorder %s6673_s27, 3 }
   0x4   : > { %p264_p2 = pnand %p5468_p0, %p263_p1 }
   0x6   : > { %267 = sbr.rel (%p264_p2) target bundleno = 3499 (0xdab), region = 52 }
   0xb   : > { %s5469_s29 = sshll.u32 %s5464_s28, 4  ;;  %v6339_v16 = vld [vmem:[%s8674_s4 + $0xac] ss:$12 sps:$4 sm:$0xff]   ;;  %v6341_v17 = vld [vmem:[%s8674_s4 + $0xa8] ss:$12 sps:$4 sm:$0xff]   ;;  %vm6677_vm0 = vmmov 0  }
   0xc   : > { %p298_p3 = scmp.lt.s32.totalorder %s5469_s29, 31  ;;  %734 = vmatprep.subr.bf16.mxu0 %v6339_v16  ;;  %v6342_v53 = vld [vmem:[%s8674_s4 + $0x94] ss:$12 sps:$4 sm:$0xff]   ;;  %v6344_v54 = vld [vmem:[%s8674_s4 + $0xb0] ss:$12 sps:$4 sm:$0xff]   ;;  %vm984_vm1 = vcmask 261120  }
   0xd   : > { %735 = vmatpush1.bf16.msra.mxu0 %v6341_v17  ;;  %v6345_v55 = vld [vmem:[%s8674_s4 + $0x90] ss:$12 sps:$4 sm:$0xff]   ;;  %5861 = vmatprep.subr.bf16.mxu1 %v6344_v54  ;;  %vm1361_vm2 = vcmask 130048   ;;  %s6678_s18 = smov 96   ;;  %s6679_s12 = smov 64   ;;  %vm2987_vm3 = vcmask 523520  }
   0xe   : > { %s8695_s29 = smov (!%p298_p3, %s5469_s29), 31  ;;  %736 = vmatprep.subr.bf16.mxu0 %v6342_v53  ;;  %5862 = vmatpush3.bf16.msra.mxu1 %v6344_v54  ;;  %vm4053_vm4 = vcmask 785920   ;;  %vm5119_vm5 = vcmask 1048320  }
   0xf   : > { %s5470_s30 = sshll.u32 %s8695_s29, 3  ;;  %s5472_s24 = sshll.u32 %s8695_s29, 2 }
  0x10   : > { %s301_s11 = scalar_lea.vmem %s8670_s0, %s5470_s30  ;;  %s6680_s30 = smov 32  }
  0x11   : > { %v310_v0 = vld [vmem:[%s301_s11] sm:$0xff]  ;;  %v312_v1 = vld [vmem:[%s301_s11 + $0x10] sm:$0xff]  ;;  %v311_v2 = vld [vmem:[%s301_s11 + $0x8] sm:$0xff]  ;;  %737 = vmatpush1.bf16.msra.mxu0 %v6345_v55 }
  0x12   : > { %328 = vadd.xlane.f32.xlu0 %v310_v0  ;;  %332 = vadd.xlane.f32.xlu1 %v312_v1  ;;  %v313_v3 = vld [vmem:[%s301_s11 + $0x18] sm:$0xff]  ;;  %v314_v4 = vld [vmem:[%s301_s11 + $0x20] sm:$0xff]  ;;  %v315_v5 = vld [vmem:[%s301_s11 + $0x28] sm:$0xff] }
  0x13   : > { %v316_v6 = vld [vmem:[%s301_s11 + $0x30] sm:$0xff]  ;;  %v317_v7 = vld [vmem:[%s301_s11 + $0x38] sm:$0xff]  ;;  %v6740_v8 = vld [vmem:[%s301_s11 + $0x40] sm:$0xff] }
  0x14   : > { %v6742_v9 = vld [vmem:[%s301_s11 + $0x48] sm:$0xff]  ;;  %v6746_v10 = vld [vmem:[%s301_s11 + $0x50] sm:$0xff]  ;;  %v6748_v11 = vld [vmem:[%s301_s11 + $0x58] sm:$0xff] }
  0x15   : > { %v6752_v12 = vld [vmem:[%s301_s11 + $0x60] sm:$0xff]  ;;  %v6754_v13 = vld [vmem:[%s301_s11 + $0x68] sm:$0xff]  ;;  %v6758_v14 = vld [vmem:[%s301_s11 + $0x70] sm:$0xff] }
  0x16   : > { %330 = vadd.xlane.f32.xlu0 %v311_v2  ;;  %334 = vadd.xlane.f32.xlu1 %v313_v3  ;;  %v6760_v15 = vld [vmem:[%s301_s11 + $0x78] sm:$0xff] }
  0x1a   : > { %336 = vadd.xlane.f32.xlu0 %v314_v4  ;;  %338 = vadd.xlane.f32.xlu1 %v315_v5 }
  0x1e   : > { %340 = vadd.xlane.f32.xlu0 %v316_v6  ;;  %342 = vadd.xlane.f32.xlu1 %v317_v7 }
  0x22   : > { %344 = vadd.xlane.f32.xlu0 %v6740_v8  ;;  %346 = vadd.xlane.f32.xlu1 %v6742_v9 }
  0x26   : > { %348 = vadd.xlane.f32.xlu0 %v6746_v10  ;;  %350 = vadd.xlane.f32.xlu1 %v6748_v11 }
  0x2a   : > { %352 = vadd.xlane.f32.xlu0 %v6752_v12  ;;  %354 = vadd.xlane.f32.xlu1 %v6754_v13 }
  0x2e   : > { %356 = vadd.xlane.f32.xlu0 %v6758_v14  ;;  %358 = vadd.xlane.f32.xlu1 %v6760_v15 }
  0x9b   : > { %v329_v18 = vpop.xlane.xlu0 %328  ;;  %v333_v19 = vpop.xlane.xlu1 %332 }
  0x9c   : > { %v361_v20 = vmul.f32 0.0078125, %v329_v18  ;;  %v363_v21 = vmul.f32 0.0078125, %v333_v19 }
  0x9e   : > { %v6770_v22 = vsub.f32 %v310_v0, %v361_v20  ;;  %v6772_v23 = vsub.f32 %v312_v1, %v363_v21  ;;  %v6346_v0 = vld [vmem:[%s8674_s4 + $0x7c] ss:$12 sps:$4 sm:$0xff]   ;;  %v6348_v1 = vld [vmem:[%s8674_s4 + $0x98] ss:$12 sps:$4 sm:$0xff]   ;;  %v6353_v20 = vld [vmem:[%s8674_s4 + $0x60] ss:$12 sps:$4 sm:$0xff]  }
  0x9f   : > { %v331_v24 = vpop.xlane.xlu0 %330  ;;  %v335_v25 = vpop.xlane.xlu1 %334  ;;  %738 = vmatprep.subr.bf16.mxu0 %v6346_v0  ;;  %5863 = vmatprep.subr.bf16.mxu1 %v6348_v1 }
  0xa0   : > { %v362_v26 = vmul.f32 0.0078125, %v331_v24  ;;  %v393_v27 = vmul.f32 %v6770_v22, %v6770_v22  ;;  %v364_v28 = vmul.f32 0.0078125, %v335_v25  ;;  %v395_v29 = vmul.f32 %v6772_v23, %v6772_v23  ;;  %5864 = vmatpush3.bf16.msra.mxu1 %v6348_v1 }
  0xa2   : > { %409 = vadd.xlane.f32.xlu0 %v393_v27  ;;  %v6778_v30 = vsub.f32 %v311_v2, %v362_v26  ;;  %v6780_v31 = vsub.f32 %v313_v3, %v364_v28 }
  0xa3   : > { %v337_v32 = vpop.xlane.xlu0 %336  ;;  %v339_v33 = vpop.xlane.xlu1 %338 }
  0xa4   : > { %v365_v34 = vmul.f32 0.0078125, %v337_v32  ;;  %v394_v35 = vmul.f32 %v6778_v30, %v6778_v30  ;;  %v366_v36 = vmul.f32 0.0078125, %v339_v33  ;;  %v396_v37 = vmul.f32 %v6780_v31, %v6780_v31  ;;  %v6357_v33 = vld [vmem:[%s8674_s4 + $0x48] ss:$12 sps:$4 sm:$0xff]  }
  0xa6   : > { %413 = vadd.xlane.f32.xlu0 %v395_v29  ;;  %411 = vadd.xlane.f32.xlu1 %v394_v35  ;;  %v6786_v38 = vsub.f32 %v314_v4, %v365_v34  ;;  %v6788_v39 = vsub.f32 %v315_v5, %v366_v36  ;;  %v6349_v5 = vld [vmem:[%s8674_s4 + $0x78] ss:$12 sps:$4 sm:$0xff]   ;;  %v6358_v35 = vld [vmem:[%s8674_s4 + $0x34] ss:$12 sps:$4 sm:$0xff]   ;;  %v6361_v36 = vld [vmem:[%s8674_s4 + $0x30] ss:$12 sps:$4 sm:$0xff]  }
  0xa7   : > { %v341_v40 = vpop.xlane.xlu0 %340  ;;  %v343_v41 = vpop.xlane.xlu1 %342  ;;  %739 = vmatpush1.bf16.msra.mxu0 %v6349_v5 }
  0xa8   : > { %v367_v42 = vmul.f32 0.0078125, %v341_v40  ;;  %v397_v43 = vmul.f32 %v6786_v38, %v6786_v38  ;;  %v368_v44 = vmul.f32 0.0078125, %v343_v41  ;;  %v398_v45 = vmul.f32 %v6788_v39, %v6788_v39  ;;  %v6364_v40 = vld [vmem:[%s8674_s4 + $0x38] ss:$12 sps:$4 sm:$0xff]  }
  0xa9   : > { %v6365_v41 = vld [vmem:[%s8674_s4 + $0x18] ss:$12 sps:$4 sm:$0xff]  }
  0xaa   : > { %415 = vadd.xlane.f32.xlu1 %v396_v37  ;;  %417 = vadd.xlane.f32.xlu0 %v397_v43  ;;  %v6794_v46 = vsub.f32 %v316_v6, %v367_v42  ;;  %v6796_v47 = vsub.f32 %v317_v7, %v368_v44  ;;  %v6362_v37 = vld [vmem:[%s8674_s4 + $0x1c] ss:$12 sps:$4 sm:$0xff]   ;;  %v6366_v42 = vld [vmem:[%s8674_s4 + $0x4] ss:$12 sps:$4 sm:$0xff]   ;;  %v6368_v43 = vld [vmem:[%s8674_s4 + $0x20] ss:$12 sps:$4 sm:$0xff]  }
  0xab   : > { %v345_v48 = vpop.xlane.xlu0 %344  ;;  %v347_v49 = vpop.xlane.xlu1 %346  ;;  %v6369_v44 = vld [vmem:[%s8674_s4] ss:$12 sps:$4 sm:$0xff]  }
  0xac   : > { %v369_v50 = vmul.f32 0.0078125, %v345_v48  ;;  %v399_v51 = vmul.f32 %v6794_v46, %v6794_v46  ;;  %v370_v52 = vmul.f32 0.0078125, %v347_v49  ;;  %v400_v56 = vmul.f32 %v6796_v47, %v6796_v47 }
  0xad   : > { %v6675_v48 = vmov 0  }
  0xae   : > { %419 = vadd.xlane.f32.xlu1 %v398_v45  ;;  %421 = vadd.xlane.f32.xlu0 %v399_v51  ;;  %v6812_v57 = vsub.f32 %v6740_v8, %v369_v50  ;;  %v6815_v58 = vsub.f32 %v6742_v9, %v370_v52  ;;  %v6370_v45 = vld [vmem:[%s8674_s4 + $0x8] ss:$12 sps:$4 sm:$0xff]  }
  0xaf   : > { %v349_v59 = vpop.xlane.xlu0 %348  ;;  %v351_v60 = vpop.xlane.xlu1 %350  ;;  %766 = vmatprep.mubr.bf16.mxu0 %v6675_v48 }
  0xb0   : > { %v371_v61 = vmul.f32 0.0078125, %v349_v59  ;;  %v401_v62 = vmul.f32 %v6812_v57, %v6812_v57  ;;  %v372_v63 = vmul.f32 0.0078125, %v351_v60  ;;  %v402_v2 = vmul.f32 %v6815_v58, %v6815_v58 }
  0xb2   : > { %423 = vadd.xlane.f32.xlu1 %v400_v56  ;;  %425 = vadd.xlane.f32.xlu0 %v401_v62  ;;  %v6828_v3 = vsub.f32 %v6746_v10, %v371_v61  ;;  %v6831_v4 = vsub.f32 %v6748_v11, %v372_v63  ;;  %v6350_v10 = vld [vmem:[%s8674_s4 + $0x64] ss:$12 sps:$4 sm:$0xff]   ;;  %v6352_v11 = vld [vmem:[%s8674_s4 + $0x80] ss:$12 sps:$4 sm:$0xff]  }
  0xb3   : > { %v353_v6 = vpop.xlane.xlu0 %352  ;;  %v355_v7 = vpop.xlane.xlu1 %354  ;;  %740 = vmatprep.subr.bf16.mxu0 %v6350_v10  ;;  %5865 = vmatprep.subr.bf16.mxu1 %v6352_v11 }
  0xb4   : > { %v373_v8 = vmul.f32 0.0078125, %v353_v6  ;;  %v403_v9 = vmul.f32 %v6828_v3, %v6828_v3  ;;  %v374_v16 = vmul.f32 0.0078125, %v355_v7  ;;  %v404_v17 = vmul.f32 %v6831_v4, %v6831_v4  ;;  %741 = vmatpush1.bf16.msra.mxu0 %v6353_v20  ;;  %5866 = vmatpush3.bf16.msra.mxu1 %v6352_v11 }
  0xb6   : > { %427 = vadd.xlane.f32.xlu1 %v402_v2  ;;  %429 = vadd.xlane.f32.xlu0 %v403_v9  ;;  %v6847_v18 = vsub.f32 %v6752_v12, %v373_v8  ;;  %v6850_v19 = vsub.f32 %v6754_v13, %v374_v16  ;;  %v6354_v12 = vld [vmem:[%s8674_s4 + $0x4c] ss:$12 sps:$4 sm:$0xff]   ;;  %v6356_v13 = vld [vmem:[%s8674_s4 + $0x68] ss:$12 sps:$4 sm:$0xff]  }
  0xb7   : > { %v357_v21 = vpop.xlane.xlu0 %356  ;;  %v359_v24 = vpop.xlane.xlu1 %358  ;;  %742 = vmatprep.subr.bf16.mxu0 %v6354_v12  ;;  %5867 = vmatprep.subr.bf16.mxu1 %v6356_v13 }
  0xb8   : > { %v375_v25 = vmul.f32 0.0078125, %v357_v21  ;;  %v405_v26 = vmul.f32 %v6847_v18, %v6847_v18  ;;  %v376_v27 = vmul.f32 0.0078125, %v359_v24  ;;  %v406_v28 = vmul.f32 %v6850_v19, %v6850_v19  ;;  %743 = vmatpush1.bf16.msra.mxu0 %v6357_v33  ;;  %5868 = vmatpush3.bf16.msra.mxu1 %v6356_v13 }
  0xb9   : > { %744 = vmatprep.subr.bf16.mxu0 %v6358_v35 }
  0xba   : > { %431 = vadd.xlane.f32.xlu1 %v404_v17  ;;  %433 = vadd.xlane.f32.xlu0 %v405_v26  ;;  %v6866_v29 = vsub.f32 %v6758_v14, %v375_v25  ;;  %v6869_v32 = vsub.f32 %v6760_v15, %v376_v27  ;;  %v6360_v14 = vld [vmem:[%s8674_s4 + $0x50] ss:$12 sps:$4 sm:$0xff]   ;;  %v6912_v25 = vld [vmem:[%s8672_s2] ss:$0 sm:$0xff] }
  0xbb   : > { %5869 = vmatprep.subr.bf16.mxu1 %v6360_v14 }
  0xbc   : > { %v407_v34 = vmul.f32 %v6866_v29, %v6866_v29  ;;  %v408_v15 = vmul.f32 %v6869_v32, %v6869_v32  ;;  %745 = vmatpush1.bf16.msra.mxu0 %v6361_v36  ;;  %5870 = vmatpush3.bf16.msra.mxu1 %v6360_v14  ;;  %v6919_v36 = vld [vmem:[%s8673_s3] ss:$0 sm:$0xff] }
  0xbd   : > { %746 = vmatprep.subr.bf16.mxu0 %v6362_v37  ;;  %5871 = vmatprep.subr.bf16.mxu1 %v6364_v40 }
  0xbe   : > { %435 = vadd.xlane.f32.xlu1 %v406_v28  ;;  %437 = vadd.xlane.f32.xlu0 %v407_v34 }
  0xc0   : > { %747 = vmatpush1.bf16.msra.mxu0 %v6365_v41  ;;  %5872 = vmatpush3.bf16.msra.mxu1 %v6364_v40 }
  0xc1   : > { %748 = vmatprep.subr.bf16.mxu0 %v6366_v42  ;;  %5873 = vmatprep.subr.bf16.mxu1 %v6368_v43 }
  0xc2   : > { %439 = vadd.xlane.f32.xlu1 %v408_v15 }
  0xc4   : > { %749 = vmatpush1.bf16.msra.mxu0 %v6369_v44  ;;  %5874 = vmatpush3.bf16.msra.mxu1 %v6368_v43 }
  0xc5   : > { %5875 = vmatprep.subr.bf16.mxu1 %v6370_v45 }
  0xc8   : > { %5876 = vmatpush3.bf16.msra.mxu1 %v6370_v45 }
 0x12b   : > { %v410_v49 = vpop.xlane.xlu0 %409 }
 0x12c   : > { %v441_v50 = vmul.f32 0.0078125, %v410_v49 }
 0x12e   : > { %v457_v51 = vadd.f32 1e-05, %v441_v50 }
 0x12f   : > { %v412_v52 = vpop.xlane.xlu1 %411  ;;  %v414_v53 = vpop.xlane.xlu0 %413 }
 0x130   : > { %6379 = vrsqrt.f32 %v457_v51  ;;  %v442_v54 = vmul.f32 0.0078125, %v412_v52  ;;  %v443_v55 = vmul.f32 0.0078125, %v414_v53 }
 0x132   : > { %v458_v56 = vadd.f32 1e-05, %v442_v54  ;;  %v459_v59 = vadd.f32 1e-05, %v443_v55 }
 0x133   : > { %v416_v60 = vpop.xlane.xlu1 %415  ;;  %v418_v61 = vpop.xlane.xlu0 %417 }
 0x134   : > { %6381 = vrsqrt.f32 %v458_v56  ;;  %v444_v62 = vmul.f32 0.0078125, %v416_v60  ;;  %v445_v63 = vmul.f32 0.0078125, %v418_v61 }
 0x135   : > { %6383 = vrsqrt.f32 %v459_v59 }
 0x136   : > { %v460_v0 = vadd.f32 1e-05, %v444_v62  ;;  %v461_v1 = vadd.f32 1e-05, %v445_v63 }
 0x137   : > { %v420_v2 = vpop.xlane.xlu1 %419  ;;  %v422_v5 = vpop.xlane.xlu0 %421 }
 0x138   : > { %6385 = vrsqrt.f32 %v460_v0  ;;  %v446_v6 = vmul.f32 0.0078125, %v420_v2  ;;  %v447_v7 = vmul.f32 0.0078125, %v422_v5 }
 0x139   : > { %6387 = vrsqrt.f32 %v461_v1 }
 0x13a   : > { %v462_v8 = vadd.f32 1e-05, %v446_v6  ;;  %v463_v9 = vadd.f32 1e-05, %v447_v7 }
 0x13b   : > { %v424_v16 = vpop.xlane.xlu1 %423  ;;  %v426_v10 = vpop.xlane.xlu0 %425 }
 0x13c   : > { %6389 = vrsqrt.f32 %v462_v8  ;;  %v448_v11 = vmul.f32 0.0078125, %v424_v16  ;;  %v449_v17 = vmul.f32 0.0078125, %v426_v10 }
 0x13d   : > { %v6380_v20 = vpop.eup %6379  ;;  %6391 = vrsqrt.f32 %v463_v9 }
 0x13e   : > { %v464_v21 = vadd.f32 1e-05, %v448_v11  ;;  %v465_v24 = vadd.f32 1e-05, %v449_v17  ;;  %v489_v26 = vmul.f32 %v6380_v20, %v6770_v22 }
 0x13f   : > { %v428_v27 = vpop.xlane.xlu1 %427  ;;  %v430_v12 = vpop.xlane.xlu0 %429 }
 0x140   : > { %6393 = vrsqrt.f32 %v464_v21  ;;  %v450_v13 = vmul.f32 0.0078125, %v428_v27  ;;  %v451_v28 = vmul.f32 0.0078125, %v430_v12  ;;  %v511_v34 = vmul.f32 %v6912_v25, %v489_v26 }
 0x141   : > { %v6382_v33 = vpop.eup %6381  ;;  %6395 = vrsqrt.f32 %v465_v24 }
 0x142   : > { %v6384_v35 = vpop.eup %6383  ;;  %v466_v14 = vadd.f32 1e-05, %v450_v13  ;;  %v467_v15 = vadd.f32 1e-05, %v451_v28  ;;  %v490_v37 = vmul.f32 %v6382_v33, %v6778_v30  ;;  %v533_v49 = vadd.f32 %v6919_v36, %v511_v34 }
 0x143   : > { %v432_v22 = vpop.xlane.xlu1 %431  ;;  %v434_v40 = vpop.xlane.xlu0 %433  ;;  %v491_v41 = vmul.f32 %v6384_v35, %v6772_v23 }
 0x144   : > { %6397 = vrsqrt.f32 %v466_v14  ;;  %v452_v42 = vmul.f32 0.0078125, %v432_v22  ;;  %v453_v43 = vmul.f32 0.0078125, %v434_v40  ;;  %v512_v44 = vmul.f32 %v6912_v25, %v490_v37 }
 0x145   : > { %v6386_v45 = vpop.eup %6385  ;;  %6399 = vrsqrt.f32 %v467_v15  ;;  %v513_v23 = vmul.f32 %v6912_v25, %v491_v41 }
 0x146   : > { %v6388_v50 = vpop.eup %6387  ;;  %v468_v51 = vadd.f32 1e-05, %v452_v42  ;;  %v469_v52 = vadd.f32 1e-05, %v453_v43  ;;  %v534_v53 = vadd.f32 %v6919_v36, %v512_v44  ;;  %v492_v30 = vmul.f32 %v6386_v45, %v6780_v31 }
 0x147   : > { %v436_v54 = vpop.xlane.xlu1 %435  ;;  %v438_v55 = vpop.xlane.xlu0 %437  ;;  %v493_v56 = vmul.f32 %v6388_v50, %v6786_v38  ;;  %v535_v38 = vadd.f32 %v6919_v36, %v513_v23 }
 0x148   : > { %6401 = vrsqrt.f32 %v468_v51  ;;  %v454_v59 = vmul.f32 0.0078125, %v436_v54  ;;  %v455_v60 = vmul.f32 0.0078125, %v438_v55  ;;  %v549_v61 = vpack.c.bf16 %v534_v53, %v533_v49 }
 0x149   : > { %v6390_v62 = vpop.eup %6389  ;;  %6403 = vrsqrt.f32 %v469_v52  ;;  %v514_v63 = vmul.f32 %v6912_v25, %v492_v30  ;;  %v515_v5 = vmul.f32 %v6912_v25, %v493_v56 }
 0x14a   : > { %v6392_v0 = vpop.eup %6391  ;;  %v470_v1 = vadd.f32 1e-05, %v454_v59  ;;  %v471_v2 = vadd.f32 1e-05, %v455_v60  ;;  %767 = vmatmul.mubr.bf16.vlgmr.msra.gmra.mxu0 %v549_v61  ;;  %5877 = vmatprep.mubr.bf16.mxu1 %v549_v61  ;;  %v494_v31 = vmul.f32 %v6390_v62, %v6788_v39 }
 0x14b   : > { %v440_v6 = vpop.xlane.xlu1 %439  ;;  %v536_v7 = vadd.f32 %v6919_v36, %v514_v63  ;;  %776 = vmatprep.mubr.bf16.mxu0 %v6675_v48  ;;  %v495_v8 = vmul.f32 %v6392_v0, %v6794_v46  ;;  %v537_v21 = vadd.f32 %v6919_v36, %v515_v5 }
 0x14c   : > { %6405 = vrsqrt.f32 %v470_v1  ;;  %v456_v9 = vmul.f32 0.0078125, %v440_v6  ;;  %v516_v16 = vmul.f32 %v6912_v25, %v494_v31 }
 0x14d   : > { %v6394_v10 = vpop.eup %6393  ;;  %6407 = vrsqrt.f32 %v471_v2  ;;  %v550_v11 = vpack.c.bf16 %v536_v7, %v535_v38  ;;  %v517_v39 = vmul.f32 %v6912_v25, %v495_v8 }
 0x14e   : > { %v6396_v17 = vpop.eup %6395  ;;  %v472_v20 = vadd.f32 1e-05, %v456_v9  ;;  %v538_v24 = vadd.f32 %v6919_v36, %v516_v16  ;;  %v496_v26 = vmul.f32 %v6394_v10, %v6796_v47 }
 0x14f   : > { %5878 = vmatmul.mubr.bf16.vlgmr.msra.gmra.mxu1 %v550_v11  ;;  %v497_v46 = vmul.f32 %v6396_v17, %v6812_v57  ;;  %v539_v28 = vadd.f32 %v6919_v36, %v517_v39 }
 0x150   : > { %6409 = vrsqrt.f32 %v472_v20  ;;  %v551_v27 = vpack.c.bf16 %v538_v24, %v537_v21  ;;  %v518_v12 = vmul.f32 %v6912_v25, %v496_v26 }
 0x151   : > { %v6398_v13 = vpop.eup %6397  ;;  %v519_v14 = vmul.f32 %v6912_v25, %v497_v46 }
 0x152   : > { %v6400_v33 = vpop.eup %6399  ;;  %777 = vmatmul.mubr.bf16.gmra.mxu0 %v550_v11  ;;  %5881 = vmatprep.mubr.bf16.mxu1 %v551_v27  ;;  %v540_v34 = vadd.f32 %v6919_v36, %v518_v12  ;;  %v498_v35 = vmul.f32 %v6398_v13, %v6815_v58 }
 0x153   : > { %786 = vmatprep.mubr.bf16.mxu0 %v6675_v48  ;;  %v499_v47 = vmul.f32 %v6400_v33, %v6828_v3  ;;  %v541_v41 = vadd.f32 %v6919_v36, %v519_v14 }
 0x154   : > { %v552_v57 = vpack.c.bf16 %v540_v34, %v539_v28  ;;  %v520_v15 = vmul.f32 %v6912_v25, %v498_v35 }
 0x155   : > { %v6402_v37 = vpop.eup %6401  ;;  %v521_v22 = vmul.f32 %v6912_v25, %v499_v47 }
 0x156   : > { %v6404_v40 = vpop.eup %6403  ;;  %v542_v42 = vadd.f32 %v6919_v36, %v520_v15  ;;  %v500_v43 = vmul.f32 %v6402_v37, %v6831_v4 }
 0x157   : > { %5882 = vmatmul.mubr.bf16.gmra.mxu1 %v552_v57  ;;  %v501_v58 = vmul.f32 %v6404_v40, %v6847_v18  ;;  %v543_v49 = vadd.f32 %v6919_v36, %v521_v22 }
 0x158   : > { %v553_v44 = vpack.c.bf16 %v542_v42, %v541_v41  ;;  %v522_v45 = vmul.f32 %v6912_v25, %v500_v43 }
 0x159   : > { %v6406_v3 = vpop.eup %6405  ;;  %v523_v53 = vmul.f32 %v6912_v25, %v501_v58 }
 0x15a   : > { %v6408_v50 = vpop.eup %6407  ;;  %787 = vmatmul.mubr.bf16.gmra.mxu0 %v551_v27  ;;  %5885 = vmatprep.mubr.bf16.mxu1 %v553_v44  ;;  %v544_v51 = vadd.f32 %v6919_v36, %v522_v45  ;;  %v502_v52 = vmul.f32 %v6406_v3, %v6850_v19 }
 0x15b   : > { %796 = vmatprep.mubr.bf16.mxu0 %v6675_v48  ;;  %v503_v4 = vmul.f32 %v6408_v50, %v6866_v29  ;;  %v545_v55 = vadd.f32 %v6919_v36, %v523_v53 }
 0x15c   : > { %v554_v18 = vpack.c.bf16 %v544_v51, %v543_v49  ;;  %v524_v30 = vmul.f32 %v6912_v25, %v502_v52 }
 0x15d   : > { %v6410_v54 = vpop.eup %6409  ;;  %v525_v59 = vmul.f32 %v6912_v25, %v503_v4 }
 0x15e   : > { %v546_v23 = vadd.f32 %v6919_v36, %v524_v30  ;;  %v504_v56 = vmul.f32 %v6410_v54, %v6869_v32  ;;  %v8679_v32 = vmov 0.0  }
 0x15f   : > { %5886 = vmatmul.mubr.bf16.gmra.mxu1 %v554_v18  ;;  %v547_v29 = vadd.f32 %v6919_v36, %v525_v59  ;;  %5893 = vmatprep.subr.bf16.mxu1 %v8679_v32 }
 0x160   : > { %v555_v19 = vpack.c.bf16 %v546_v23, %v545_v55  ;;  %v526_v60 = vmul.f32 %v6912_v25, %v504_v56  ;;  %5917 = vmatprep.subr.bf16.mxu0 %v8679_v32  ;;  %v591_v25 = vlaneseq }
 0x162   : > { %797 = vmatmul.mubr.bf16.gmra.mxu0 %v552_v57  ;;  %5889 = vmatprep.mubr.bf16.mxu1 %v555_v19  ;;  %v548_v61 = vadd.f32 %v6919_v36, %v526_v60  ;;  %v592_v36 = vshrl.u32 %v591_v25, 7 }
 0x163   : > { %806 = vmatprep.mubr.bf16.mxu0 %v6675_v48 }
 0x164   : > { %v556_v62 = vpack.c.bf16 %v548_v61, %v547_v29  ;;  %v597_v63 = vsub.s32 1, %v592_v36  ;;  %v593_v38 = vsub.s32 0, %v592_v36  ;;  %v601_v16 = vsub.s32 2, %v592_v36 }
 0x167   : > { %5890 = vmatmul.mubr.bf16.gmra.mxu1 %v556_v62 }
 0x168   : > { %5895 = vmatprep.mubr.msk.bf16.mxu1 %vm6677_vm0, %v8679_v32 }
 0x16a   : > { %807 = vmatmul.mubr.bf16.gmra.mxu0 %v553_v44 }
 0x16b   : > { %816 = vmatprep.mubr.bf16.mxu0 %v6675_v48 }
 0x172   : > { %817 = vmatmul.mubr.bf16.gmra.mxu0 %v554_v18 }
 0x173   : > { %826 = vmatprep.mubr.bf16.mxu0 %v6675_v48 }
 0x17a   : > { %827 = vmatmul.mubr.bf16.gmra.mxu0 %v555_v19 }
 0x17b   : > { %836 = vmatprep.mubr.bf16.mxu0 %v6675_v48  ;;  %v589_v48 = vld [vmem:[%s8675_s5] sm:$0x7] }
 0x17c   : > { %v6983_v2 = vrot.slane %v589_v48, %v597_v63  ;;  %v6995_v20 = vrot.slane %v589_v48, %v593_v38  ;;  %v7001_v26 = vrot.slane %v589_v48, %v601_v16 }
 0x182   : > { %837 = vmatmul.mubr.bf16.gmra.mxu0 %v556_v62 }
 0x183   : > { %5919 = vmatprep.mubr.msk.bf16.mxu0 %vm6677_vm0, %v8679_v32 }
 0x20a   : > { %v768_v0 = vpop.f32.mrf.mxu0 }
 0x20b   : > { %v769_v33 = vadd.f32 %v768_v0, %v6995_v20 }
 0x20c   : > { %v770_v1 = vpop.f32.mrf.mxu0 }
 0x20d   : > { %v771_v7 = vadd.f32 %v770_v1, %v6983_v2 }
 0x20e   : > { %v772_v31 = vpop.f32.mrf.mxu0 }
 0x20f   : > { %v6985_v5 = vpop.f32.mrf.mxu1  ;;  %v773_v27 = vadd.f32 %v772_v31, %v6995_v20 }
 0x210   : > { %v774_v6 = vpop.f32.mrf.mxu0 }
 0x211   : > { %v775_v8 = vadd.f32 %v774_v6, %v6983_v2  ;;  %v6989_v9 = vpop.f32.mrf.mxu1  ;;  %v7010_v15 = vpack.c.bf16 %v773_v27, %v769_v33 }
 0x212   : > { %v778_v10 = vpop.f32.mrf.mxu0 }
 0x213   : > { %v6991_v11 = vpack.c.bf16 %v775_v8, %v771_v7  ;;  %v6993_v39 = vpop.f32.mrf.mxu1  ;;  %v779_v53 = vadd.f32 %v778_v10, %v6995_v20 }
 0x214   : > { %v780_v17 = vpop.f32.mrf.mxu0 }
 0x215   : > { %v6997_v21 = vpop.f32.mrf.mxu1  ;;  %v989_v24 = vsel %vm984_vm1, %v6991_v11, 0  ;;  %v781_v34 = vadd.f32 %v780_v17, %v6983_v2 }
 0x216   : > { %v782_v46 = vpop.f32.mrf.mxu0  ;;  %5894 = vmatpush3.bf16.xpose.msra.mxu1 %v989_v24 }
 0x217   : > { %v5883_v12 = vpop.f32.mrf.mxu1  ;;  %5899 = vmatprep.subr.bf16.mxu1 %v8679_v32  ;;  %v783_v3 = vadd.f32 %v782_v46, %v6995_v20 }
 0x218   : > { %v906_v13 = vadd.f32 %v5883_v12, %v7001_v26  ;;  %v784_v28 = vpop.f32.mrf.mxu0 }
 0x219   : > { %v785_v35 = vadd.f32 %v784_v28, %v6983_v2  ;;  %v897_v14 = vpop.f32.mrf.mxu1  ;;  %v7033_v23 = vpack.c.bf16 %v783_v3, %v779_v53 }
 0x21a   : > { %v898_v47 = vadd.f32 %v897_v14, %v7001_v26  ;;  %v788_v57 = vpop.f32.mrf.mxu0 }
 0x21b   : > { %v7012_v37 = vpack.c.bf16 %v785_v35, %v781_v34  ;;  %v5884_v22 = vpop.f32.mrf.mxu1  ;;  %v789_v6 = vadd.f32 %v788_v57, %v6995_v20 }
 0x21c   : > { %v909_v40 = vadd.f32 %v5884_v22, %v7001_v26  ;;  %v790_v41 = vpop.f32.mrf.mxu0 }
 0x21d   : > { %v900_v42 = vpop.f32.mrf.mxu1  ;;  %5896 = vmatmul.mubr.msk.bf16.vlgmr.msra.gmra.mxu1 %vm984_vm1, %v7010_v15  ;;  %v1036_v43 = vsel %vm984_vm1, %v7012_v37, 0  ;;  %v791_v4 = vadd.f32 %v790_v41, %v6983_v2 }
 0x21e   : > { %v7019_v58 = vpack.c.bf16 %v909_v40, %v906_v13  ;;  %v901_v44 = vadd.f32 %v900_v42, %v7001_v26  ;;  %v792_v45 = vpop.f32.mrf.mxu0  ;;  %5900 = vmatpush3.bf16.xpose.msra.mxu1 %v1036_v43  ;;  %5901 = vmatprep.mubr.msk.bf16.mxu1 %vm6677_vm0, %v8679_v32 }
 0x21f   : > { %v5887_v49 = vpop.f32.mrf.mxu1  ;;  %5905 = vmatprep.subr.bf16.mxu1 %v8679_v32  ;;  %v793_v63 = vadd.f32 %v792_v45, %v6995_v20 }
 0x220   : > { %v7026_v50 = vpack.c.bf16 %v901_v44, %v898_v47  ;;  %v922_v51 = vadd.f32 %v5887_v49, %v7001_v26  ;;  %v794_v52 = vpop.f32.mrf.mxu0 }
 0x221   : > { %v795_v18 = vadd.f32 %v794_v52, %v6983_v2  ;;  %v913_v30 = vpop.f32.mrf.mxu1  ;;  %v7056_v17 = vpack.c.bf16 %v793_v63, %v789_v6 }
 0x222   : > { %v914_v54 = vadd.f32 %v913_v30, %v7001_v26  ;;  %v798_v55 = vpop.f32.mrf.mxu0 }
 0x223   : > { %v7035_v56 = vpack.c.bf16 %v795_v18, %v791_v4  ;;  %v5888_v59 = vpop.f32.mrf.mxu1  ;;  %v799_v22 = vadd.f32 %v798_v55, %v6995_v20 }
 0x224   : > { %v925_v19 = vadd.f32 %v5888_v59, %v7001_v26  ;;  %v800_v60 = vpop.f32.mrf.mxu0 }
 0x225   : > { %v916_v29 = vpop.f32.mrf.mxu1  ;;  %5902 = vmatmul.mubr.msk.bf16.vlgmr.msra.gmra.mxu1 %vm984_vm1, %v7033_v23  ;;  %v1083_v61 = vsel %vm984_vm1, %v7035_v56, 0  ;;  %v801_v38 = vadd.f32 %v800_v60, %v6983_v2 }
 0x226   : > { %v7042_v62 = vpack.c.bf16 %v925_v19, %v922_v51  ;;  %v917_v25 = vadd.f32 %v916_v29, %v7001_v26  ;;  %v802_v36 = vpop.f32.mrf.mxu0  ;;  %5906 = vmatpush3.bf16.xpose.msra.mxu1 %v1083_v61  ;;  %5907 = vmatprep.mubr.msk.bf16.mxu1 %vm6677_vm0, %v8679_v32 }
 0x227   : > { %v5891_v0 = vpop.f32.mrf.mxu1  ;;  %5911 = vmatprep.subr.bf16.mxu1 %v8679_v32  ;;  %v803_v14 = vadd.f32 %v802_v36, %v6995_v20 }
 0x228   : > { %v7049_v48 = vpack.c.bf16 %v917_v25, %v914_v54  ;;  %v938_v1 = vadd.f32 %v5891_v0, %v7001_v26  ;;  %v804_v31 = vpop.f32.mrf.mxu0 }
 0x229   : > { %v805_v7 = vadd.f32 %v804_v31, %v6983_v2  ;;  %v929_v8 = vpop.f32.mrf.mxu1  ;;  %v7077_v43 = vpack.c.bf16 %v803_v14, %v799_v22 }
 0x22a   : > { %v930_v16 = vadd.f32 %v929_v8, %v7001_v26  ;;  %v808_v10 = vpop.f32.mrf.mxu0 }
 0x22b   : > { %v7058_v24 = vpack.c.bf16 %v805_v7, %v801_v38  ;;  %v5892_v46 = vpop.f32.mrf.mxu1  ;;  %v809_v53 = vadd.f32 %v808_v10, %v6995_v20 }
 0x22c   : > { %v941_v27 = vadd.f32 %v5892_v46, %v7001_v26  ;;  %v810_v12 = vpop.f32.mrf.mxu0 }
 0x22d   : > { %v932_v13 = vpop.f32.mrf.mxu1  ;;  %5908 = vmatmul.mubr.msk.bf16.vlgmr.msra.gmra.mxu1 %vm984_vm1, %v7056_v17  ;;  %v1130_v28 = vsel %vm984_vm1, %v7058_v24, 0  ;;  %v811_v40 = vadd.f32 %v810_v12, %v6983_v2 }
 0x22e   : > { %v7065_v33 = vpack.c.bf16 %v941_v27, %v938_v1  ;;  %v933_v34 = vadd.f32 %v932_v13, %v7001_v26  ;;  %v812_v35 = vpop.f32.mrf.mxu0  ;;  %5912 = vmatpush3.bf16.xpose.msra.mxu1 %v1130_v28  ;;  %5913 = vmatprep.mubr.msk.bf16.mxu1 %vm6677_vm0, %v8679_v32  ;;  %v882_v13 = vadd.f32 %v6989_v9, %v7001_v26 }
 0x22f   : > { %5923 = vmatprep.subr.bf16.mxu1 %v8679_v32  ;;  %v813_v51 = vadd.f32 %v812_v35, %v6995_v20  ;;  %v893_v9 = vadd.f32 %v6993_v39, %v7001_v26  ;;  %v968_v39 = vld [vmem:[%s8671_s1] sm:$0xff] }
 0x230   : > { %v7072_v47 = vpack.c.bf16 %v933_v34, %v930_v16  ;;  %v814_v57 = vpop.f32.mrf.mxu0  ;;  %v885_v16 = vadd.f32 %v6997_v21, %v7001_v26 }
 0x231   : > { %v815_v41 = vadd.f32 %v814_v57, %v6983_v2  ;;  %v7092_v54 = vpack.c.bf16 %v813_v51, %v809_v53  ;;  %v890_v57 = vadd.f32 %v6985_v5, %v7001_v26  ;;  %v970_v51 = vld [vmem:[%s8671_s1 + $0x10] sm:$0xff] }
 0x232   : > { %v818_v42 = vpop.f32.mrf.mxu0  ;;  %v7130_v35 = vpack.c.bf16 %v885_v16, %v882_v13 }
 0x233   : > { %v7079_v44 = vpack.c.bf16 %v815_v41, %v811_v40  ;;  %v819_v25 = vadd.f32 %v818_v42, %v6995_v20  ;;  %v7149_v40 = vpack.c.bf16 %v893_v9, %v890_v57  ;;  %v969_v41 = vld [vmem:[%s8671_s1 + $0x8] sm:$0xff] }
 0x234   : > { %v820_v45 = vpop.f32.mrf.mxu0 }
 0x235   : > { %5914 = vmatmul.mubr.msk.bf16.vlgmr.msra.gmra.mxu1 %vm984_vm1, %v7077_v43  ;;  %v1177_v3 = vsel %vm984_vm1, %v7079_v44, 0  ;;  %v821_v4 = vadd.f32 %v820_v45, %v6983_v2 }
 0x236   : > { %v822_v49 = vpop.f32.mrf.mxu0  ;;  %5918 = vmatpush3.bf16.xpose.msra.mxu0 %v1177_v3  ;;  %5925 = vmatprep.mubr.msk.bf16.mxu1 %vm6677_vm0, %v8679_v32 }
 0x237   : > { %5929 = vmatprep.subr.bf16.mxu0 %v8679_v32  ;;  %v823_v29 = vadd.f32 %v822_v49, %v6995_v20 }
 0x238   : > { %v824_v52 = vpop.f32.mrf.mxu0 }
 0x239   : > { %v825_v18 = vadd.f32 %v824_v52, %v6983_v2  ;;  %v7107_v1 = vpack.c.bf16 %v823_v29, %v819_v25 }
 0x23a   : > { %v828_v30 = vpop.f32.mrf.mxu0 }
 0x23b   : > { %v7094_v55 = vpack.c.bf16 %v825_v18, %v821_v4  ;;  %v829_v46 = vadd.f32 %v828_v30, %v6995_v20  ;;  %v971_v30 = vld [vmem:[%s8671_s1 + $0x18] sm:$0xff] }
 0x23c   : > { %v830_v59 = vpop.f32.mrf.mxu0 }
 0x23d   : > { %5920 = vmatmul.mubr.msk.bf16.vlgmr.msra.gmra.mxu0 %vm984_vm1, %v7092_v54  ;;  %v1224_v19 = vsel %vm984_vm1, %v7094_v55, 0  ;;  %v831_v36 = vadd.f32 %v830_v59, %v6983_v2 }
 0x23e   : > { %v832_v60 = vpop.f32.mrf.mxu0  ;;  %5924 = vmatpush3.bf16.xpose.msra.mxu1 %v1224_v19  ;;  %5931 = vmatprep.mubr.msk.bf16.mxu0 %vm6677_vm0, %v8679_v32 }
 0x23f   : > { %5935 = vmatprep.subr.bf16.mxu1 %v8679_v32  ;;  %v833_v8 = vadd.f32 %v832_v60, %v6995_v20 }
 0x240   : > { %v834_v61 = vpop.f32.mrf.mxu0 }
 0x241   : > { %v835_v63 = vadd.f32 %v834_v61, %v6983_v2  ;;  %v7126_v28 = vpack.c.bf16 %v833_v8, %v829_v46  ;;  %v972_v61 = vld [vmem:[%s8671_s1 + $0x20] sm:$0xff] }
 0x242   : > { %v838_v0 = vpop.f32.mrf.mxu0 }
 0x243   : > { %v7109_v31 = vpack.c.bf16 %v835_v63, %v831_v36  ;;  %v839_v14 = vadd.f32 %v838_v0, %v6995_v20 }
 0x244   : > { %v840_v6 = vpop.f32.mrf.mxu0 }
 0x245   : > { %5926 = vmatmul.mubr.msk.bf16.vlgmr.msra.gmra.mxu1 %vm984_vm1, %v7107_v1  ;;  %v1271_v38 = vsel %vm984_vm1, %v7109_v31, 0  ;;  %v841_v27 = vadd.f32 %v840_v6, %v6983_v2  ;;  %v973_v6 = vld [vmem:[%s8671_s1 + $0x28] sm:$0xff] }
 0x246   : > { %v842_v7 = vpop.f32.mrf.mxu0  ;;  %5930 = vmatpush3.bf16.xpose.msra.mxu0 %v1271_v38  ;;  %5937 = vmatprep.mubr.msk.bf16.mxu1 %vm6677_vm0, %v8679_v32 }
 0x247   : > { %5941 = vmatprep.subr.bf16.mxu0 %v8679_v32 }
 0x248   : > { %v844_v10 = vpop.f32.mrf.mxu0 }
 0x249   : > { %v845_v12 = vadd.f32 %v844_v10, %v6983_v2  ;;  %v843_v2 = vadd.f32 %v842_v7, %v6995_v20  ;;  %v974_v10 = vld [vmem:[%s8671_s1 + $0x30] sm:$0xff] }
 0x24b   : > { %v7128_v34 = vpack.c.bf16 %v845_v12, %v841_v27  ;;  %v7147_v22 = vpack.c.bf16 %v843_v2, %v839_v14 }
 0x24d   : > { %5932 = vmatmul.mubr.msk.bf16.vlgmr.msra.gmra.mxu0 %vm984_vm1, %v7126_v28  ;;  %v1318_v21 = vsel %vm984_vm1, %v7128_v34, 0 }
 0x24e   : > { %5936 = vmatpush3.bf16.xpose.msra.mxu1 %v1318_v21  ;;  %5942 = vmatpush3.bf16.msra.mxu0 %v7130_v35  ;;  %v975_v21 = vld [vmem:[%s8671_s1 + $0x38] sm:$0xff] }
 0x24f   : > { %5947 = vmatprep.subr.bf16.mxu1 %v8679_v32  ;;  %5943 = vmatprep.mubr.msk.bf16.mxu0 %vm6677_vm0, %v8679_v32 }
 0x250   : > { %5953 = vmatprep.subr.bf16.mxu0 %v8679_v32 }
 0x255   : > { %5938 = vmatmul.mubr.msk.bf16.vlgmr.msra.gmra.mxu1 %vm984_vm1, %v7147_v22 }
 0x256   : > { %5948 = vmatpush3.bf16.msra.mxu1 %v7149_v40  ;;  %5949 = vmatprep.mubr.msk.bf16.mxu1 %vm6677_vm0, %v8679_v32 }
 0x257   : > { %5959 = vmatprep.subr.bf16.mxu1 %v8679_v32 }
 0x2dd   : > { %v1025_v20 = vpop.f32.mrf.mxu1 }
 0x2de   : > { %v7160_v5 = vadd.f32 %v1025_v20, %v968_v39  ;;  %v976_v39 = vld [vmem:[%s8671_s1 + $0x40] sm:$0xff] }
 0x2df   : > { %v5897_v26 = vpop.f32.mrf.mxu1 }
 0x2e0   : > { %v1362_v42 = vsel %vm1361_vm2, %v7160_v5, -inf }
 0x2e1   : > { %1363 = vmax.xlane.f32.xlu0 %v1362_v42  ;;  %v1028_v45 = vpop.f32.mrf.mxu1 }
 0x2e2   : > { %v7167_v3 = vadd.f32 %v1028_v45, %v969_v41  ;;  %v977_v45 = vld [vmem:[%s8671_s1 + $0x48] sm:$0xff] }
 0x2e3   : > { %v5898_v49 = vpop.f32.mrf.mxu1 }
 0x2e4   : > { %v1365_v52 = vsel %vm1361_vm2, %v7167_v3, -inf }
 0x2e5   : > { %1366 = vmax.xlane.f32.xlu1 %v1365_v52  ;;  %v1072_v53 = vpop.f32.mrf.mxu1 }
 0x2e6   : > { %v7174_v4 = vadd.f32 %v1072_v53, %v970_v51 }
 0x2e7   : > { %v5903_v18 = vpop.f32.mrf.mxu1 }
 0x2e8   : > { %v1368_v59 = vsel %vm1361_vm2, %v7174_v4, -inf  ;;  %v978_v18 = vld [vmem:[%s8671_s1 + $0x50] sm:$0xff] }
 0x2e9   : > { %1369 = vmax.xlane.f32.xlu0 %v1368_v59  ;;  %v1075_v19 = vpop.f32.mrf.mxu1 }
 0x2ea   : > { %v7181_v60 = vadd.f32 %v1075_v19, %v971_v30 }
 0x2eb   : > { %v5904_v29 = vpop.f32.mrf.mxu1 }
 0x2ec   : > { %v1371_v25 = vsel %vm1361_vm2, %v7181_v60, -inf }
 0x2ed   : > { %1372 = vmax.xlane.f32.xlu1 %v1371_v25  ;;  %v1119_v36 = vpop.f32.mrf.mxu1 }
 0x2ee   : > { %v7188_v63 = vadd.f32 %v1119_v36, %v972_v61  ;;  %v979_v61 = vld [vmem:[%s8671_s1 + $0x58] sm:$0xff] }
 0x2ef   : > { %v5909_v0 = vpop.f32.mrf.mxu1 }
 0x2f0   : > { %v1374_v38 = vsel %vm1361_vm2, %v7188_v63, -inf }
 0x2f1   : > { %1375 = vmax.xlane.f32.xlu0 %v1374_v38  ;;  %v1122_v7 = vpop.f32.mrf.mxu1  ;;  %v980_v38 = vld [vmem:[%s8671_s1 + $0x60] sm:$0xff] }
 0x2f2   : > { %v7195_v8 = vadd.f32 %v1122_v7, %v973_v6 }
 0x2f3   : > { %v5910_v16 = vpop.f32.mrf.mxu1 }
 0x2f4   : > { %v1377_v46 = vsel %vm1361_vm2, %v7195_v8, -inf }
 0x2f5   : > { %1378 = vmax.xlane.f32.xlu1 %v1377_v46  ;;  %v1166_v27 = vpop.f32.mrf.mxu1 }
 0x2f6   : > { %v7202_v12 = vadd.f32 %v1166_v27, %v974_v10  ;;  %v981_v27 = vld [vmem:[%s8671_s1 + $0x68] sm:$0xff] }
 0x2f7   : > { %v5915_v13 = vpop.f32.mrf.mxu1 }
 0x2f8   : > { %v1380_v2 = vsel %vm1361_vm2, %v7202_v12, -inf }
 0x2f9   : > { %1381 = vmax.xlane.f32.xlu0 %v1380_v2  ;;  %v1169_v9 = vpop.f32.mrf.mxu1 }
 0x2fa   : > { %v7209_v14 = vadd.f32 %v1169_v9, %v975_v21 }
 0x2fb   : > { %v5916_v57 = vpop.f32.mrf.mxu1 }
 0x2fc   : > { %v1383_v20 = vsel %vm1361_vm2, %v7209_v14, -inf  ;;  %v982_v57 = vld [vmem:[%s8671_s1 + $0x70] sm:$0xff] }
 0x2fd   : > { %1384 = vmax.xlane.f32.xlu1 %v1383_v20  ;;  %v1213_v26 = vpop.f32.mrf.mxu0 }
 0x2fe   : > { %v7216_v41 = vadd.f32 %v1213_v26, %v976_v39 }
 0x2ff   : > { %v5921_v42 = vpop.f32.mrf.mxu0 }
 0x300   : > { %v1386_v49 = vsel %vm1361_vm2, %v7216_v41, -inf }
 0x301   : > { %1387 = vmax.xlane.f32.xlu0 %v1386_v49  ;;  %v1216_v51 = vpop.f32.mrf.mxu0 }
 0x302   : > { %v7223_v52 = vadd.f32 %v1216_v51, %v977_v45  ;;  %v983_v45 = vld [vmem:[%s8671_s1 + $0x78] sm:$0xff] }
 0x303   : > { %v5922_v53 = vpop.f32.mrf.mxu0 }
 0x304   : > { %v1389_v30 = vsel %vm1361_vm2, %v7223_v52, -inf }
 0x305   : > { %v1260_v59 = vpop.f32.mrf.mxu1  ;;  %1390 = vmax.xlane.f32.xlu1 %v1389_v30 }
 0x306   : > { %v7230_v19 = vadd.f32 %v1260_v59, %v978_v18 }
 0x307   : > { %v5927_v29 = vpop.f32.mrf.mxu1 }
 0x308   : > { %v1392_v25 = vsel %vm1361_vm2, %v7230_v19, -inf }
 0x309   : > { %v1263_v36 = vpop.f32.mrf.mxu1  ;;  %1393 = vmax.xlane.f32.xlu0 %v1392_v25 }
 0x30a   : > { %v7237_v0 = vadd.f32 %v1263_v36, %v979_v61 }
 0x30b   : > { %v5928_v6 = vpop.f32.mrf.mxu1 }
 0x30c   : > { %v1395_v7 = vsel %vm1361_vm2, %v7237_v0, -inf }
 0x30d   : > { %1396 = vmax.xlane.f32.xlu1 %v1395_v7  ;;  %v1307_v16 = vpop.f32.mrf.mxu0 }
 0x30e   : > { %v7244_v10 = vadd.f32 %v1307_v16, %v980_v38 }
 0x30f   : > { %v5933_v46 = vpop.f32.mrf.mxu0 }
 0x310   : > { %v1398_v13 = vsel %vm1361_vm2, %v7244_v10, -inf }
 0x311   : > { %1399 = vmax.xlane.f32.xlu0 %v1398_v13  ;;  %v1310_v21 = vpop.f32.mrf.mxu0 }
 0x312   : > { %v7251_v2 = vadd.f32 %v1310_v21, %v981_v27 }
 0x313   : > { %v5934_v9 = vpop.f32.mrf.mxu0 }
 0x314   : > { %v1401_v39 = vsel %vm1361_vm2, %v7251_v2, -inf }
 0x315   : > { %1402 = vmax.xlane.f32.xlu1 %v1401_v39  ;;  %v1354_v20 = vpop.f32.mrf.mxu1 }
 0x316   : > { %v7258_v26 = vadd.f32 %v1354_v20, %v982_v57 }
 0x317   : > { %v5939_v42 = vpop.f32.mrf.mxu1 }
 0x318   : > { %v1404_v49 = vsel %vm1361_vm2, %v7258_v26, -inf }
 0x319   : > { %1405 = vmax.xlane.f32.xlu0 %v1404_v49  ;;  %v1357_v51 = vpop.f32.mrf.mxu1 }
 0x31a   : > { %v7265_v53 = vadd.f32 %v1357_v51, %v983_v45 }
 0x31b   : > { %v5940_v18 = vpop.f32.mrf.mxu1 }
 0x31c   : > { %v1407_v30 = vsel %vm1361_vm2, %v7265_v53, -inf }
 0x31d   : > { %1408 = vmax.xlane.f32.xlu1 %v1407_v30 }
 0x36a   : > { %v1364_v59 = vpop.xlane.xlu0 %1363 }
 0x36b   : > { %v1410_v29 = vsub.f32 %v7160_v5, %v1364_v59 }
 0x36d   : > { %v1426_v61 = vmul.f32 1.442695, %v1410_v29 }
 0x36e   : > { %v1367_v25 = vpop.xlane.xlu1 %1366 }
 0x36f   : > { %6411 = vpow2.f32 %v1426_v61  ;;  %v1411_v36 = vsub.f32 %v7167_v3, %v1367_v25 }
 0x371   : > { %v1428_v6 = vmul.f32 1.442695, %v1411_v36 }
 0x372   : > { %v1370_v38 = vpop.xlane.xlu0 %1369 }
 0x373   : > { %6413 = vpow2.f32 %v1428_v6  ;;  %v1412_v7 = vsub.f32 %v7174_v4, %v1370_v38 }
 0x375   : > { %v1430_v16 = vmul.f32 1.442695, %v1412_v7 }
 0x376   : > { %v1373_v46 = vpop.xlane.xlu1 %1372 }
 0x377   : > { %6415 = vpow2.f32 %v1430_v16  ;;  %v1413_v27 = vsub.f32 %v7181_v60, %v1373_v46 }
 0x379   : > { %v1432_v13 = vmul.f32 1.442695, %v1413_v27 }
 0x37a   : > { %v1376_v21 = vpop.xlane.xlu0 %1375 }
 0x37b   : > { %6417 = vpow2.f32 %v1432_v13  ;;  %v1414_v5 = vsub.f32 %v7188_v63, %v1376_v21 }
 0x37c   : > { %v7274_v9 = vpop.eup %6411 }
 0x37d   : > { %v1434_v57 = vmul.f32 1.442695, %v1414_v5  ;;  %v1458_v3 = vsel %vm1361_vm2, %v7274_v9, 0.0 }
 0x37e   : > { %v1379_v39 = vpop.xlane.xlu1 %1378  ;;  %1459 = vadd.xlane.f32.xlu0 %v1458_v3 }
 0x37f   : > { %6419 = vpow2.f32 %v1434_v57  ;;  %v1415_v4 = vsub.f32 %v7195_v8, %v1379_v39 }
 0x380   : > { %v7279_v20 = vpop.eup %6413 }
 0x381   : > { %v1436_v42 = vmul.f32 1.442695, %v1415_v4  ;;  %v1461_v60 = vsel %vm1361_vm2, %v7279_v20, 0.0 }
 0x382   : > { %v1382_v45 = vpop.xlane.xlu0 %1381  ;;  %1462 = vadd.xlane.f32.xlu1 %v1461_v60 }
 0x383   : > { %6421 = vpow2.f32 %v1436_v42  ;;  %v1416_v63 = vsub.f32 %v7202_v12, %v1382_v45 }
 0x384   : > { %v7284_v49 = vpop.eup %6415 }
 0x385   : > { %v1438_v51 = vmul.f32 1.442695, %v1416_v63  ;;  %v1464_v18 = vsel %vm1361_vm2, %v7284_v49, 0.0 }
 0x386   : > { %v1385_v30 = vpop.xlane.xlu1 %1384  ;;  %1465 = vadd.xlane.f32.xlu0 %v1464_v18 }
 0x387   : > { %6423 = vpow2.f32 %v1438_v51  ;;  %v1417_v8 = vsub.f32 %v7209_v14, %v1385_v30 }
 0x388   : > { %v7289_v59 = vpop.eup %6417 }
 0x389   : > { %v1440_v29 = vmul.f32 1.442695, %v1417_v8  ;;  %v1467_v61 = vsel %vm1361_vm2, %v7289_v59, 0.0 }
 0x38a   : > { %v1388_v25 = vpop.xlane.xlu0 %1387  ;;  %1468 = vadd.xlane.f32.xlu1 %v1467_v61 }
 0x38b   : > { %6425 = vpow2.f32 %v1440_v29  ;;  %v1418_v12 = vsub.f32 %v7216_v41, %v1388_v25 }
 0x38c   : > { %v7294_v36 = vpop.eup %6419 }
 0x38d   : > { %v1442_v6 = vmul.f32 1.442695, %v1418_v12  ;;  %v1470_v38 = vsel %vm1361_vm2, %v7294_v36, 0.0 }
 0x38e   : > { %v1391_v7 = vpop.xlane.xlu1 %1390  ;;  %1471 = vadd.xlane.f32.xlu0 %v1470_v38 }
 0x38f   : > { %6427 = vpow2.f32 %v1442_v6  ;;  %v1419_v14 = vsub.f32 %v7223_v52, %v1391_v7 }
 0x390   : > { %v7299_v16 = vpop.eup %6421 }
 0x391   : > { %v1444_v46 = vmul.f32 1.442695, %v1419_v14  ;;  %v1473_v27 = vsel %vm1361_vm2, %v7299_v16, 0.0 }
 0x392   : > { %v1394_v13 = vpop.xlane.xlu0 %1393  ;;  %1474 = vadd.xlane.f32.xlu1 %v1473_v27 }
 0x393   : > { %6429 = vpow2.f32 %v1444_v46  ;;  %v1420_v41 = vsub.f32 %v7230_v19, %v1394_v13 }
 0x394   : > { %v7304_v21 = vpop.eup %6423 }
 0x395   : > { %v1446_v5 = vmul.f32 1.442695, %v1420_v41  ;;  %v1476_v57 = vsel %vm1361_vm2, %v7304_v21, 0.0 }
 0x396   : > { %v1397_v3 = vpop.xlane.xlu1 %1396  ;;  %1477 = vadd.xlane.f32.xlu0 %v1476_v57 }
 0x397   : > { %6431 = vpow2.f32 %v1446_v5  ;;  %v1421_v52 = vsub.f32 %v7237_v0, %v1397_v3 }
 0x398   : > { %v7309_v39 = vpop.eup %6425 }
 0x399   : > { %v1448_v4 = vmul.f32 1.442695, %v1421_v52  ;;  %v1479_v42 = vsel %vm1361_vm2, %v7309_v39, 0.0 }
 0x39a   : > { %v1400_v60 = vpop.xlane.xlu0 %1399  ;;  %1480 = vadd.xlane.f32.xlu1 %v1479_v42 }
 0x39b   : > { %6433 = vpow2.f32 %v1448_v4  ;;  %v1422_v19 = vsub.f32 %v7244_v10, %v1400_v60 }
 0x39c   : > { %v7314_v45 = vpop.eup %6427 }
 0x39d   : > { %v1450_v63 = vmul.f32 1.442695, %v1422_v19  ;;  %v1482_v51 = vsel %vm1361_vm2, %v7314_v45, 0.0 }
 0x39e   : > { %v1403_v18 = vpop.xlane.xlu1 %1402  ;;  %1483 = vadd.xlane.f32.xlu0 %v1482_v51 }
 0x39f   : > { %6435 = vpow2.f32 %v1450_v63  ;;  %v1423_v0 = vsub.f32 %v7251_v2, %v1403_v18 }
 0x3a0   : > { %v7319_v30 = vpop.eup %6429 }
 0x3a1   : > { %v1452_v8 = vmul.f32 1.442695, %v1423_v0  ;;  %v1485_v29 = vsel %vm1361_vm2, %v7319_v30, 0.0 }
 0x3a2   : > { %v1406_v61 = vpop.xlane.xlu0 %1405  ;;  %1486 = vadd.xlane.f32.xlu1 %v1485_v29 }
 0x3a3   : > { %6437 = vpow2.f32 %v1452_v8  ;;  %v1424_v10 = vsub.f32 %v7258_v26, %v1406_v61 }
 0x3a4   : > { %v7324_v25 = vpop.eup %6431 }
 0x3a5   : > { %v1454_v12 = vmul.f32 1.442695, %v1424_v10  ;;  %v1488_v6 = vsel %vm1361_vm2, %v7324_v25, 0.0 }
 0x3a6   : > { %1489 = vadd.xlane.f32.xlu0 %v1488_v6  ;;  %v1409_v41 = vpop.xlane.xlu1 %1408 }
 0x3a7   : > { %6439 = vpow2.f32 %v1454_v12  ;;  %v1425_v5 = vsub.f32 %v7265_v53, %v1409_v41 }
 0x3a8   : > { %v7328_v2 = vpop.eup %6433 }
 0x3a9   : > { %v1491_v38 = vsel %vm1361_vm2, %v7328_v2, 0.0  ;;  %v1456_v57 = vmul.f32 1.442695, %v1425_v5 }
 0x3aa   : > { %1492 = vadd.xlane.f32.xlu1 %v1491_v38 }
 0x3ab   : > { %6441 = vpow2.f32 %v1456_v57 }
 0x3ac   : > { %v7332_v7 = vpop.eup %6435 }
 0x3ad   : > { %v1494_v14 = vsel %vm1361_vm2, %v7332_v7, 0.0 }
 0x3ae   : > { %1495 = vadd.xlane.f32.xlu0 %v1494_v14 }
 0x3b0   : > { %v7336_v26 = vpop.eup %6437 }
 0x3b1   : > { %v1497_v46 = vsel %vm1361_vm2, %v7336_v26, 0.0 }
 0x3b2   : > { %1498 = vadd.xlane.f32.xlu1 %v1497_v46 }
 0x3b4   : > { %v7340_v27 = vpop.eup %6439 }
 0x3b5   : > { %v1500_v13 = vsel %vm1361_vm2, %v7340_v27, 0.0 }
 0x3b6   : > { %1501 = vadd.xlane.f32.xlu0 %v1500_v13 }
 0x3b8   : > { %v7363_v3 = vpop.eup %6441 }
 0x3b9   : > { %v1503_v53 = vsel %vm1361_vm2, %v7363_v3, 0.0 }
 0x3c3   : > { %1988 = vrot.lane.b32.xlu1 %v7012_v37, %s6678_s18 }
 0x3c7   : > { %1932 = vrot.lane.b32.xlu1 %v7010_v15, %s6678_s18 }
 0x3cc   : > { %1935 = vrot.lane.b32.xlu0 %v6991_v11, %s6678_s18 }
 0x3d0   : > { %1985 = vrot.lane.b32.xlu0 %v7033_v23, %s6678_s18 }
 0x3d4   : > { %2038 = vrot.lane.b32.xlu0 %v7056_v17, %s6678_s18 }
 0x3d8   : > { %2091 = vrot.lane.b32.xlu0 %v7077_v43, %s6678_s18 }
 0x3dc   : > { %2144 = vrot.lane.b32.xlu0 %v7092_v54, %s6678_s18 }
 0x3e0   : > { %2197 = vrot.lane.b32.xlu0 %v7107_v1, %s6678_s18 }
 0x3e4   : > { %2250 = vrot.lane.b32.xlu0 %v7126_v28, %s6678_s18 }
 0x3eb   : > { %1504 = vadd.xlane.f32.xlu1 %v1503_v53 }
 0x3fc   : > { %2041 = vrot.lane.b32.xlu1 %v7035_v56, %s6678_s18 }
 0x400   : > { %2094 = vrot.lane.b32.xlu1 %v7058_v24, %s6678_s18 }
 0x404   : > { %2147 = vrot.lane.b32.xlu1 %v7079_v44, %s6678_s18 }
 0x407   : > { %v1460_v52 = vpop.xlane.xlu0 %1459 }
 0x408   : > { %2200 = vrot.lane.b32.xlu1 %v7094_v55, %s6678_s18  ;;  %6443 = vrcp.f32 %v1460_v52 }
 0x40b   : > { %v1463_v4 = vpop.xlane.xlu1 %1462 }
 0x40c   : > { %6445 = vrcp.f32 %v1463_v4  ;;  %2253 = vrot.lane.b32.xlu1 %v7109_v31, %s6678_s18 }
 0x40f   : > { %v1466_v42 = vpop.xlane.xlu0 %1465 }
 0x410   : > { %2306 = vrot.lane.b32.xlu1 %v7128_v34, %s6678_s18  ;;  %6447 = vrcp.f32 %v1466_v42 }
 0x413   : > { %v1469_v60 = vpop.xlane.xlu1 %1468 }
 0x414   : > { %6449 = vrcp.f32 %v1469_v60  ;;  %2303 = vrot.lane.b32.xlu1 %v7147_v22, %s6678_s18 }
 0x415   : > { %v6444_v19 = vpop.eup %6443 }
 0x416   : > { %v1522_v18 = vmul.f32 %v6444_v19, %v7274_v9 }
 0x417   : > { %v1472_v63 = vpop.xlane.xlu0 %1471 }
 0x418   : > { %6451 = vrcp.f32 %v1472_v63 }
 0x419   : > { %v6446_v51 = vpop.eup %6445 }
 0x41a   : > { %v1523_v0 = vmul.f32 %v6446_v51, %v7279_v20 }
 0x41b   : > { %v1475_v8 = vpop.xlane.xlu1 %1474 }
 0x41c   : > { %6453 = vrcp.f32 %v1475_v8  ;;  %v1538_v29 = vpack.c.bf16 %v1523_v0, %v1522_v18 }
 0x41d   : > { %v6448_v61 = vpop.eup %6447 }
 0x41e   : > { %5944 = vmatmul.mubr.msk.bf16.vlgmr.msra.gmra.mxu0 %vm1361_vm2, %v1538_v29  ;;  %v1524_v9 = vmul.f32 %v6448_v61, %v7284_v49 }
 0x41f   : > { %5954 = vmatpush3.bf16.msra.mxu0 %v7026_v50  ;;  %v1478_v10 = vpop.xlane.xlu0 %1477  ;;  %5955 = vmatprep.mubr.msk.bf16.mxu0 %vm6677_vm0, %v8679_v32 }
 0x420   : > { %5965 = vmatprep.subr.bf16.mxu0 %v8679_v32  ;;  %6455 = vrcp.f32 %v1478_v10 }
 0x421   : > { %v6450_v12 = vpop.eup %6449 }
 0x422   : > { %v1525_v20 = vmul.f32 %v6450_v12, %v7289_v59 }
 0x423   : > { %v1481_v6 = vpop.xlane.xlu1 %1480 }
 0x424   : > { %6457 = vrcp.f32 %v1481_v6  ;;  %v1539_v38 = vpack.c.bf16 %v1525_v20, %v1524_v9 }
 0x425   : > { %v6452_v14 = vpop.eup %6451 }
 0x426   : > { %5950 = vmatmul.mubr.msk.bf16.vlgmr.msra.gmra.mxu1 %vm1361_vm2, %v1539_v38  ;;  %v1526_v49 = vmul.f32 %v6452_v14, %v7294_v36 }
 0x427   : > { %5960 = vmatpush3.bf16.msra.mxu1 %v7019_v58  ;;  %v1484_v46 = vpop.xlane.xlu0 %1483  ;;  %5961 = vmatprep.mubr.msk.bf16.mxu1 %vm6677_vm0, %v8679_v32 }
 0x428   : > { %5971 = vmatprep.subr.bf16.mxu1 %v8679_v32  ;;  %6459 = vrcp.f32 %v1484_v46 }
 0x429   : > { %v6454_v13 = vpop.eup %6453 }
 0x42a   : > { %v1527_v59 = vmul.f32 %v6454_v13, %v7299_v16 }
 0x42b   : > { %v1487_v41 = vpop.xlane.xlu1 %1486 }
 0x42c   : > { %6461 = vrcp.f32 %v1487_v41  ;;  %v1540_v5 = vpack.c.bf16 %v1527_v59, %v1526_v49 }
 0x42d   : > { %v6456_v57 = vpop.eup %6455 }
 0x42e   : > { %5956 = vmatmul.mubr.msk.bf16.vlgmr.msra.gmra.mxu0 %vm1361_vm2, %v1540_v5  ;;  %v1528_v36 = vmul.f32 %v6456_v57, %v7304_v21 }
 0x42f   : > { %5966 = vmatpush3.bf16.msra.mxu0 %v7049_v48  ;;  %v1490_v53 = vpop.xlane.xlu0 %1489  ;;  %5967 = vmatprep.mubr.msk.bf16.mxu0 %vm6677_vm0, %v8679_v32 }
 0x430   : > { %5977 = vmatprep.subr.bf16.mxu0 %v8679_v32  ;;  %6463 = vrcp.f32 %v1490_v53 }
 0x431   : > { %v6458_v52 = vpop.eup %6457 }
 0x432   : > { %v1529_v16 = vmul.f32 %v6458_v52, %v7309_v39 }
 0x433   : > { %v1493_v4 = vpop.xlane.xlu1 %1492 }
 0x434   : > { %6465 = vrcp.f32 %v1493_v4  ;;  %v1541_v42 = vpack.c.bf16 %v1529_v16, %v1528_v36 }
 0x435   : > { %v6460_v60 = vpop.eup %6459 }
 0x436   : > { %5962 = vmatmul.mubr.msk.bf16.vlgmr.msra.gmra.mxu1 %vm1361_vm2, %v1541_v42  ;;  %v1530_v21 = vmul.f32 %v6460_v60, %v7314_v45 }
 0x437   : > { %5972 = vmatpush3.bf16.msra.mxu1 %v7042_v62  ;;  %v1496_v19 = vpop.xlane.xlu0 %1495  ;;  %5973 = vmatprep.mubr.msk.bf16.mxu1 %vm6677_vm0, %v8679_v32 }
 0x438   : > { %5983 = vmatprep.subr.bf16.mxu1 %v8679_v32  ;;  %6467 = vrcp.f32 %v1496_v19 }
 0x439   : > { %v6462_v63 = vpop.eup %6461 }
 0x43a   : > { %v1531_v39 = vmul.f32 %v6462_v63, %v7319_v30 }
 0x43b   : > { %v1499_v51 = vpop.xlane.xlu1 %1498 }
 0x43c   : > { %6469 = vrcp.f32 %v1499_v51  ;;  %v1542_v18 = vpack.c.bf16 %v1531_v39, %v1530_v21 }
 0x43d   : > { %v6464_v0 = vpop.eup %6463 }
 0x43e   : > { %5968 = vmatmul.mubr.msk.bf16.vlgmr.msra.gmra.mxu0 %vm1361_vm2, %v1542_v18  ;;  %v1532_v29 = vmul.f32 %v6464_v0, %v7324_v25 }
 0x43f   : > { %5978 = vmatpush3.bf16.msra.mxu0 %v7072_v47  ;;  %5979 = vmatprep.mubr.msk.bf16.mxu0 %vm6677_vm0, %v8679_v32  ;;  %v1502_v30 = vpop.xlane.xlu0 %1501  ;;  %v1989_v38 = vpop.permute.xlu1 %1988 }
 0x440   : > { %5989 = vmatprep.subr.bf16.mxu0 %v8679_v32  ;;  %6471 = vrcp.f32 %v1502_v30  ;;  %v1994_v19 = vsel %vm984_vm1, %v1989_v38, 0 }
 0x441   : > { %v6466_v8 = vpop.eup %6465 }
 0x442   : > { %v1533_v45 = vmul.f32 %v6466_v8, %v7328_v2 }
 0x443   : > { %v1936_v25 = vpop.permute.xlu0 %1935  ;;  %v1933_v14 = vpop.permute.xlu1 %1932 }
 0x444   : > { %v1543_v61 = vpack.c.bf16 %v1533_v45, %v1532_v29  ;;  %v1941_v2 = vsel %vm984_vm1, %v1936_v25, 0 }
 0x445   : > { %v6468_v10 = vpop.eup %6467 }
 0x446   : > { %5974 = vmatmul.mubr.msk.bf16.vlgmr.msra.gmra.mxu1 %vm1361_vm2, %v1543_v61  ;;  %v1534_v9 = vmul.f32 %v6468_v10, %v7332_v7 }
 0x447   : > { %5984 = vmatpush3.bf16.msra.mxu1 %v7065_v33  ;;  %5985 = vmatprep.mubr.msk.bf16.mxu1 %vm6677_vm0, %v8679_v32  ;;  %v1986_v7 = vpop.permute.xlu0 %1985 }
 0x448   : > { %5995 = vmatprep.subr.bf16.mxu1 %v8679_v32 }
 0x449   : > { %v6470_v12 = vpop.eup %6469 }
 0x44a   : > { %v1535_v20 = vmul.f32 %v6470_v12, %v7336_v26 }
 0x44b   : > { %v2039_v46 = vpop.permute.xlu0 %2038 }
 0x44c   : > { %v1544_v6 = vpack.c.bf16 %v1535_v20, %v1534_v9 }
 0x44d   : > { %v6472_v5 = vpop.eup %6471 }
 0x44e   : > { %5980 = vmatmul.mubr.msk.bf16.vlgmr.msra.gmra.mxu0 %vm1361_vm2, %v1544_v6  ;;  %v1536_v36 = vmul.f32 %v6472_v5, %v7340_v27 }
 0x44f   : > { %5990 = vmatpush3.bf16.xpose.msra.mxu0 %v1941_v2  ;;  %5991 = vmatprep.mubr.msk.bf16.mxu0 %vm6677_vm0, %v8679_v32  ;;  %v2092_v41 = vpop.permute.xlu0 %2091 }
 0x450   : > { %6001 = vmatprep.subr.bf16.mxu0 %v8679_v32 }
 0x453   : > { %v2145_v4 = vpop.permute.xlu0 %2144 }
 0x456   : > { %5992 = vmatmul.mubr.msk.bf16.vlgmr.msra.gmra.mxu0 %vm984_vm1, %v1933_v14 }
 0x457   : > { %6003 = vmatprep.mubr.msk.bf16.mxu0 %vm6677_vm0, %v8679_v32  ;;  %v2198_v27 = vpop.permute.xlu0 %2197 }
 0x45b   : > { %v2251_v39 = vpop.permute.xlu0 %2250 }
 0x474   : > { %v1505_v26 = vpop.xlane.xlu1 %1504 }
 0x475   : > { %6473 = vrcp.f32 %v1505_v26 }
 0x478   : > { %v2042_v13 = vpop.permute.xlu1 %2041 }
 0x479   : > { %v2047_v49 = vsel %vm984_vm1, %v2042_v13, 0 }
 0x47a   : > { %6002 = vmatpush3.bf16.xpose.msra.mxu0 %v2047_v49 }
 0x47b   : > { %6013 = vmatprep.subr.bf16.mxu0 %v8679_v32 }
 0x47c   : > { %v2095_v59 = vpop.permute.xlu1 %2094 }
 0x480   : > { %v2148_v57 = vpop.permute.xlu1 %2147 }
 0x481   : > { %v2153_v53 = vsel %vm984_vm1, %v2148_v57, 0  ;;  %6004 = vmatmul.mubr.msk.bf16.vlgmr.msra.gmra.mxu0 %vm984_vm1, %v2039_v46 }
 0x482   : > { %v6474_v52 = vpop.eup %6473  ;;  %6014 = vmatpush3.bf16.xpose.msra.mxu0 %v2153_v53  ;;  %6015 = vmatprep.mubr.msk.bf16.mxu0 %vm6677_vm0, %v8679_v32 }
 0x483   : > { %v1537_v16 = vmul.f32 %v6474_v52, %v7363_v3  ;;  %6025 = vmatprep.subr.bf16.mxu0 %v8679_v32  ;;  %v2100_v3 = vsel %vm984_vm1, %v2095_v59, 0 }
 0x484   : > { %v2201_v42 = vpop.permute.xlu1 %2200 }
 0x485   : > { %v1545_v60 = vpack.c.bf16 %v1537_v16, %v1536_v36  ;;  %v2206_v51 = vsel %vm984_vm1, %v2201_v42, 0 }
 0x487   : > { %5986 = vmatmul.mubr.msk.bf16.vlgmr.msra.gmra.mxu1 %vm1361_vm2, %v1545_v60  ;;  %v5515_v60 = vld [vmem:[%s8671_s1 + $0x80] sm:$0xff] }
 0x488   : > { %5996 = vmatpush3.bf16.xpose.msra.mxu1 %v1994_v19  ;;  %v2254_v63 = vpop.permute.xlu1 %2253  ;;  %5997 = vmatprep.mubr.msk.bf16.mxu1 %vm6677_vm0, %v8679_v32 }
 0x489   : > { %v2259_v21 = vsel %vm984_vm1, %v2254_v63, 0  ;;  %6016 = vmatmul.mubr.msk.bf16.vlgmr.msra.gmra.mxu0 %vm984_vm1, %v2145_v4  ;;  %6007 = vmatprep.subr.bf16.mxu1 %v8679_v32 }
 0x48a   : > { %6026 = vmatpush3.bf16.xpose.msra.mxu0 %v2259_v21  ;;  %6027 = vmatprep.mubr.msk.bf16.mxu0 %vm6677_vm0, %v8679_v32 }
 0x48b   : > { %6037 = vmatprep.subr.bf16.mxu0 %v8679_v32 }
 0x48c   : > { %v2307_v18 = vpop.permute.xlu1 %2306 }
 0x48d   : > { %v2312_v0 = vsel %vm984_vm1, %v2307_v18, 0 }
 0x48f   : > { %5998 = vmatmul.mubr.msk.bf16.vlgmr.msra.gmra.mxu1 %vm984_vm1, %v1986_v7 }
 0x490   : > { %6008 = vmatpush3.bf16.xpose.msra.mxu1 %v2100_v3  ;;  %6009 = vmatprep.mubr.msk.bf16.mxu1 %vm6677_vm0, %v8679_v32  ;;  %v2304_v8 = vpop.permute.xlu1 %2303 }
 0x491   : > { %6028 = vmatmul.mubr.msk.bf16.vlgmr.msra.gmra.mxu0 %vm984_vm1, %v2251_v39  ;;  %6019 = vmatprep.subr.bf16.mxu1 %v8679_v32 }
 0x492   : > { %6039 = vmatprep.mubr.msk.bf16.mxu0 %vm6677_vm0, %v8679_v32 }
 0x497   : > { %6010 = vmatmul.mubr.msk.bf16.vlgmr.msra.gmra.mxu1 %vm984_vm1, %v2092_v41 }
 0x498   : > { %6020 = vmatpush3.bf16.xpose.msra.mxu1 %v2206_v51  ;;  %6021 = vmatprep.mubr.msk.bf16.mxu1 %vm6677_vm0, %v8679_v32 }
 0x499   : > { %6031 = vmatprep.subr.bf16.mxu1 %v8679_v32 }
 0x49f   : > { %6022 = vmatmul.mubr.msk.bf16.vlgmr.msra.gmra.mxu1 %vm984_vm1, %v2198_v27  ;;  %v5516_v27 = vld [vmem:[%s8671_s1 + $0x88] sm:$0xff] }
 0x4a0   : > { %6032 = vmatpush3.bf16.xpose.msra.mxu1 %v2312_v0  ;;  %6033 = vmatprep.mubr.msk.bf16.mxu1 %vm6677_vm0, %v8679_v32 }
 0x4a1   : > { %6043 = vmatprep.subr.bf16.mxu1 %v8679_v32 }
 0x4a7   : > { %6034 = vmatmul.mubr.msk.bf16.vlgmr.msra.gmra.mxu1 %vm984_vm1, %v2304_v8 }
 0x4a8   : > { %6045 = vmatprep.mubr.msk.bf16.mxu1 %vm6677_vm0, %v8679_v32 }
 0x4de   : > { %v1583_v29 = vpop.f32.mrf.mxu0 }
 0x4df   : > { %1898 = vst.msk [vmem:[#allocation2] sm:$0xff] %vm984_vm1, %v1583_v29 }
 0x4e0   : > { %v5945_v45 = vpop.f32.mrf.mxu0 }
 0x4e1   : > { %v5520_v45 = vld [vmem:[%s8671_s1 + $0xa8] sm:$0xff] }
 0x4e2   : > { %v1586_v61 = vpop.f32.mrf.mxu0 }
 0x4e3   : > { %1899 = vst.msk [vmem:[#allocation2 + $0x8] sm:$0xff] %vm984_vm1, %v1586_v61 }
 0x4e4   : > { %v5946_v30 = vpop.f32.mrf.mxu0 }
 0x4e6   : > { %v1627_v10 = vpop.f32.mrf.mxu1 }
 0x4e7   : > { %1900 = vst.msk [vmem:[#allocation2 + $0x10] sm:$0xff] %vm984_vm1, %v1627_v10 }
 0x4e8   : > { %v5951_v12 = vpop.f32.mrf.mxu1 }
 0x4ea   : > { %v1630_v9 = vpop.f32.mrf.mxu1 }
 0x4eb   : > { %1901 = vst.msk [vmem:[#allocation2 + $0x18] sm:$0xff] %vm984_vm1, %v1630_v9 }
 0x4ec   : > { %v5952_v20 = vpop.f32.mrf.mxu1 }
 0x4ee   : > { %v1671_v25 = vpop.f32.mrf.mxu0 }
 0x4ef   : > { %1902 = vst.msk [vmem:[#allocation2 + $0x20] sm:$0xff] %vm984_vm1, %v1671_v25 }
 0x4f0   : > { %v5957_v6 = vpop.f32.mrf.mxu0 }
 0x4f2   : > { %v1674_v2 = vpop.f32.mrf.mxu0 }
 0x4f3   : > { %1903 = vst.msk [vmem:[#allocation2 + $0x28] sm:$0xff] %vm984_vm1, %v1674_v2 }
 0x4f4   : > { %v5958_v38 = vpop.f32.mrf.mxu0 }
 0x4f6   : > { %v1715_v14 = vpop.f32.mrf.mxu1 }
 0x4f7   : > { %1904 = vst.msk [vmem:[#allocation2 + $0x30] sm:$0xff] %vm984_vm1, %v1715_v14 }
 0x4f8   : > { %v5963_v7 = vpop.f32.mrf.mxu1 }
 0x4f9   : > { %v5517_v7 = vld [vmem:[%s8671_s1 + $0x90] sm:$0xff] }
 0x4fa   : > { %v1718_v26 = vpop.f32.mrf.mxu1 }
 0x4fb   : > { %1905 = vst.msk [vmem:[#allocation2 + $0x38] sm:$0xff] %vm984_vm1, %v1718_v26 }
 0x4fc   : > { %v5964_v46 = vpop.f32.mrf.mxu1 }
 0x4fe   : > { %v1759_v13 = vpop.f32.mrf.mxu0 }
 0x4ff   : > { %1906 = vst.msk [vmem:[#allocation2 + $0x40] sm:$0xff] %vm984_vm1, %v1759_v13 }
 0x500   : > { %v5969_v49 = vpop.f32.mrf.mxu0 }
 0x502   : > { %v1762_v59 = vpop.f32.mrf.mxu0 }
 0x503   : > { %1907 = vst.msk [vmem:[#allocation2 + $0x48] sm:$0xff] %vm984_vm1, %v1762_v59 }
 0x504   : > { %v5970_v41 = vpop.f32.mrf.mxu0 }
 0x505   : > { %v5518_v41 = vld [vmem:[%s8671_s1 + $0x98] sm:$0xff] }
 0x506   : > { %v1803_v5 = vpop.f32.mrf.mxu1 }
 0x507   : > { %1908 = vst.msk [vmem:[#allocation2 + $0x50] sm:$0xff] %vm984_vm1, %v1803_v5 }
 0x508   : > { %v5975_v57 = vpop.f32.mrf.mxu1 }
 0x509   : > { %v5519_v57 = vld [vmem:[%s8671_s1 + $0xa0] sm:$0xff] }
 0x50a   : > { %v1806_v53 = vpop.f32.mrf.mxu1 }
 0x50b   : > { %1909 = vst.msk [vmem:[#allocation2 + $0x58] sm:$0xff] %vm984_vm1, %v1806_v53 }
 0x50c   : > { %v5976_v52 = vpop.f32.mrf.mxu1 }
 0x50e   : > { %v1847_v36 = vpop.f32.mrf.mxu0 }
 0x50f   : > { %1910 = vst.msk [vmem:[#allocation2 + $0x60] sm:$0xff] %vm984_vm1, %v1847_v36 }
 0x510   : > { %v5981_v16 = vpop.f32.mrf.mxu0 }
 0x512   : > { %v1850_v4 = vpop.f32.mrf.mxu0 }
 0x513   : > { %1911 = vst.msk [vmem:[#allocation2 + $0x68] sm:$0xff] %vm984_vm1, %v1850_v4 }
 0x514   : > { %v5982_v42 = vpop.f32.mrf.mxu0 }
 0x516   : > { %v1977_v19 = vpop.f32.mrf.mxu0 }
 0x517   : > { %v7490_v63 = vadd.f32 %v5515_v60, %v1977_v19 }
 0x518   : > { %v5993_v21 = vpop.f32.mrf.mxu0 }
 0x519   : > { %v2355_v3 = vsel %vm1361_vm2, %v7490_v63, -inf  ;;  %v5521_v21 = vld [vmem:[%s8671_s1 + $0xb0] sm:$0xff] }
 0x51a   : > { %2356 = vmax.xlane.f32.xlu0 %v2355_v3  ;;  %v1980_v39 = vpop.f32.mrf.mxu0 }
 0x51b   : > { %v7497_v51 = vadd.f32 %v5516_v27, %v1980_v39  ;;  %v5522_v39 = vld [vmem:[%s8671_s1 + $0xb8] sm:$0xff] }
 0x51c   : > { %v5994_v18 = vpop.f32.mrf.mxu0 }
 0x51d   : > { %v2358_v0 = vsel %vm1361_vm2, %v7497_v51, -inf }
 0x51e   : > { %2359 = vmax.xlane.f32.xlu1 %v2358_v0 }
 0x541   : > { %v2083_v8 = vpop.f32.mrf.mxu0 }
 0x542   : > { %v7525_v42 = vadd.f32 %v5519_v57, %v2083_v8  ;;  %v5523_v8 = vld [vmem:[%s8671_s1 + $0xc0] sm:$0xff] }
 0x543   : > { %v6005_v29 = vpop.f32.mrf.mxu0 }
 0x544   : > { %v2367_v0 = vsel %vm1361_vm2, %v7525_v42, -inf  ;;  %v5524_v29 = vld [vmem:[%s8671_s1 + $0xc8] sm:$0xff] }
 0x545   : > { %v2086_v61 = vpop.f32.mrf.mxu0 }
 0x546   : > { %v7504_v30 = vadd.f32 %v5520_v45, %v2086_v61 }
 0x547   : > { %v1891_v10 = vpop.f32.mrf.mxu1  ;;  %v6006_v12 = vpop.f32.mrf.mxu0 }
 0x548   : > { %1912 = vst.msk [vmem:[#allocation2 + $0x70] sm:$0xff] %vm984_vm1, %v1891_v10  ;;  %v2370_v9 = vsel %vm1361_vm2, %v7504_v30, -inf }
 0x549   : > { %2371 = vmax.xlane.f32.xlu1 %v2370_v9  ;;  %v5987_v20 = vpop.f32.mrf.mxu1  ;;  %v2189_v25 = vpop.f32.mrf.mxu0 }
 0x54a   : > { %v7547_v12 = vadd.f32 %v5523_v8, %v2189_v25  ;;  %v5526_v25 = vld [vmem:[%s8671_s1 + $0xd8] sm:$0xff] }
 0x54b   : > { %v1894_v6 = vpop.f32.mrf.mxu1  ;;  %v6017_v2 = vpop.f32.mrf.mxu0 }
 0x54c   : > { %1913 = vst.msk [vmem:[#allocation2 + $0x78] sm:$0xff] %vm984_vm1, %v1894_v6  ;;  %v5525_v2 = vld [vmem:[%s8671_s1 + $0xd0] sm:$0xff] }
 0x54d   : > { %v5988_v38 = vpop.f32.mrf.mxu1  ;;  %v2192_v14 = vpop.f32.mrf.mxu0 }
 0x54e   : > { %v7549_v9 = vadd.f32 %v5524_v29, %v2192_v14 }
 0x54f   : > { %v2030_v26 = vpop.f32.mrf.mxu1  ;;  %v6018_v46 = vpop.f32.mrf.mxu0 }
 0x550   : > { %v7513_v13 = vadd.f32 %v5517_v7, %v2030_v26  ;;  %v2379_v26 = vsel %vm1361_vm2, %v7547_v12, -inf  ;;  %v2382_v46 = vsel %vm1361_vm2, %v7549_v9, -inf }
 0x551   : > { %v5999_v49 = vpop.f32.mrf.mxu1  ;;  %v2295_v59 = vpop.f32.mrf.mxu0 }
 0x552   : > { %v2361_v5 = vsel %vm1361_vm2, %v7513_v13, -inf  ;;  %v5527_v49 = vld [vmem:[%s8671_s1 + $0xe0] sm:$0xff] }
 0x553   : > { %v6029_v53 = vpop.f32.mrf.mxu0  ;;  %2362 = vmax.xlane.f32.xlu0 %v2361_v5  ;;  %v2033_v52 = vpop.f32.mrf.mxu1 }
 0x554   : > { %v7523_v36 = vadd.f32 %v5518_v41, %v2033_v52  ;;  %v5528_v41 = vld [vmem:[%s8671_s1 + $0xe8] sm:$0xff]  ;;  %v7575_v52 = vadd.f32 %v5527_v49, %v2295_v59 }
 0x555   : > { %v6000_v16 = vpop.f32.mrf.mxu1  ;;  %v2298_v4 = vpop.f32.mrf.mxu0 }
 0x556   : > { %v2364_v60 = vsel %vm1361_vm2, %v7523_v36, -inf  ;;  %v7577_v16 = vadd.f32 %v5528_v41, %v2298_v4  ;;  %v2391_v59 = vsel %vm1361_vm2, %v7575_v52, -inf }
 0x557   : > { %v6030_v19 = vpop.f32.mrf.mxu0  ;;  %2365 = vmax.xlane.f32.xlu0 %v2364_v60  ;;  %v2136_v27 = vpop.f32.mrf.mxu1 }
 0x558   : > { %v7535_v18 = vadd.f32 %v5521_v21, %v2136_v27  ;;  %v5529_v21 = vld [vmem:[%s8671_s1 + $0xf0] sm:$0xff]  ;;  %v2394_v4 = vsel %vm1361_vm2, %v7577_v16, -inf }
 0x559   : > { %v6011_v3 = vpop.f32.mrf.mxu1 }
 0x55a   : > { %v2373_v20 = vsel %vm1361_vm2, %v7535_v18, -inf }
 0x55b   : > { %2368 = vmax.xlane.f32.xlu0 %v2367_v0  ;;  %v2139_v45 = vpop.f32.mrf.mxu1 }
 0x55c   : > { %v7545_v61 = vadd.f32 %v5522_v39, %v2139_v45 }
 0x55d   : > { %v6012_v10 = vpop.f32.mrf.mxu1 }
 0x55e   : > { %v2376_v6 = vsel %vm1361_vm2, %v7545_v61, -inf  ;;  %v5530_v10 = vld [vmem:[%s8671_s1 + $0xf8] sm:$0xff] }
 0x55f   : > { %2374 = vmax.xlane.f32.xlu0 %v2373_v20  ;;  %2377 = vmax.xlane.f32.xlu1 %v2376_v6  ;;  %v2242_v38 = vpop.f32.mrf.mxu1 }
 0x560   : > { %v7561_v14 = vadd.f32 %v5525_v2, %v2242_v38 }
 0x561   : > { %v6023_v7 = vpop.f32.mrf.mxu1 }
 0x562   : > { %v2385_v60 = vsel %vm1361_vm2, %v7561_v14, -inf }
 0x563   : > { %2380 = vmax.xlane.f32.xlu0 %v2379_v26  ;;  %2383 = vmax.xlane.f32.xlu1 %v2382_v46  ;;  %v2245_v5 = vpop.f32.mrf.mxu1 }
 0x564   : > { %v7573_v57 = vadd.f32 %v5526_v25, %v2245_v5 }
 0x565   : > { %v6024_v53 = vpop.f32.mrf.mxu1 }
 0x566   : > { %v2388_v19 = vsel %vm1361_vm2, %v7573_v57, -inf }
 0x567   : > { %2386 = vmax.xlane.f32.xlu0 %v2385_v60  ;;  %2389 = vmax.xlane.f32.xlu1 %v2388_v19  ;;  %v2348_v27 = vpop.f32.mrf.mxu1 }
 0x568   : > { %v7586_v39 = vadd.f32 %v5529_v21, %v2348_v27 }
 0x569   : > { %v6035_v3 = vpop.f32.mrf.mxu1 }
 0x56a   : > { %v2397_v29 = vsel %vm1361_vm2, %v7586_v39, -inf }
 0x56b   : > { %2392 = vmax.xlane.f32.xlu0 %v2391_v59  ;;  %2395 = vmax.xlane.f32.xlu1 %v2394_v4  ;;  %v2351_v0 = vpop.f32.mrf.mxu1 }
 0x56c   : > { %v7612_v2 = vadd.f32 %v5530_v10, %v2351_v0 }
 0x56d   : > { %v6036_v8 = vpop.f32.mrf.mxu1 }
 0x56e   : > { %v2400_v38 = vsel %vm1361_vm2, %v7612_v2, -inf }
 0x56f   : > { %2398 = vmax.xlane.f32.xlu0 %v2397_v29 }
 0x57c   : > { %2588 = vrot.lane.b32.xlu1 %v7149_v40, %s6678_s18 }
 0x580   : > { %2636 = vrot.lane.b32.xlu1 %v7026_v50, %s6678_s18 }
 0x584   : > { %2684 = vrot.lane.b32.xlu1 %v7019_v58, %s6678_s18 }
 0x585   : > { %2540 = vrot.lane.b32.xlu0 %v7130_v35, %s6678_s18 }
 0x588   : > { %2780 = vrot.lane.b32.xlu1 %v7042_v62, %s6678_s18 }
 0x589   : > { %2732 = vrot.lane.b32.xlu0 %v7049_v48, %s6678_s18 }
 0x58d   : > { %2828 = vrot.lane.b32.xlu0 %v7072_v47, %s6678_s18 }
 0x5a3   : > { %v2357_v45 = vpop.xlane.xlu0 %2356 }
 0x5a4   : > { %v2403_v20 = vsub.f32 %v7490_v63, %v2357_v45 }
 0x5a6   : > { %v2419_v6 = vmul.f32 1.442695, %v2403_v20 }
 0x5a7   : > { %v2360_v26 = vpop.xlane.xlu1 %2359 }
 0x5a8   : > { %6475 = vpow2.f32 %v2419_v6  ;;  %v2404_v63 = vsub.f32 %v7497_v51, %v2360_v26 }
 0x5aa   : > { %v2421_v46 = vmul.f32 1.442695, %v2404_v63 }
 0x5ac   : > { %2401 = vmax.xlane.f32.xlu1 %v2400_v38  ;;  %6477 = vpow2.f32 %v2421_v46 }
 0x5b5   : > { %v7616_v7 = vpop.eup %6475 }
 0x5b6   : > { %v2451_v25 = vsel %vm1361_vm2, %v7616_v7, 0.0 }
 0x5b7   : > { %2452 = vadd.xlane.f32.xlu0 %v2451_v25 }
 0x5b9   : > { %v7623_v5 = vpop.eup %6477 }
 0x5ba   : > { %v2454_v27 = vsel %vm1361_vm2, %v7623_v5, 0.0 }
 0x5bd   : > { %2876 = vrot.lane.b32.xlu1 %v7065_v33, %s6678_s18 }
 0x5d2   : > { %v2372_v49 = vpop.xlane.xlu1 %2371 }
 0x5d3   : > { %v2408_v60 = vsub.f32 %v7504_v30, %v2372_v49 }
 0x5d5   : > { %v2429_v51 = vmul.f32 1.442695, %v2408_v60 }
 0x5dc   : > { %v2363_v41 = vpop.xlane.xlu0 %2362 }
 0x5dd   : > { %v2405_v53 = vsub.f32 %v7513_v13, %v2363_v41 }
 0x5df   : > { %v2423_v19 = vmul.f32 1.442695, %v2405_v53 }
 0x5e0   : > { %v2366_v21 = vpop.xlane.xlu0 %2365 }
 0x5e1   : > { %6479 = vpow2.f32 %v2423_v19  ;;  %v2406_v3 = vsub.f32 %v7523_v36, %v2366_v21  ;;  %2455 = vadd.xlane.f32.xlu1 %v2454_v27 }
 0x5e3   : > { %v2425_v59 = vmul.f32 1.442695, %v2406_v3 }
 0x5e4   : > { %v2369_v4 = vpop.xlane.xlu0 %2368 }
 0x5e5   : > { %6481 = vpow2.f32 %v2425_v59  ;;  %v2407_v0 = vsub.f32 %v7525_v42, %v2369_v4 }
 0x5e6   : > { %6483 = vpow2.f32 %v2429_v51 }
 0x5e7   : > { %v2427_v8 = vmul.f32 1.442695, %v2407_v0 }
 0x5e8   : > { %v2375_v13 = vpop.xlane.xlu0 %2374  ;;  %v2378_v29 = vpop.xlane.xlu1 %2377 }
 0x5e9   : > { %6485 = vpow2.f32 %v2427_v8  ;;  %v2409_v30 = vsub.f32 %v7535_v18, %v2375_v13  ;;  %v2410_v45 = vsub.f32 %v7545_v61, %v2378_v29 }
 0x5eb   : > { %v2431_v10 = vmul.f32 1.442695, %v2409_v30  ;;  %v2433_v20 = vmul.f32 1.442695, %v2410_v45 }
 0x5ec   : > { %v2381_v6 = vpop.xlane.xlu0 %2380  ;;  %v2384_v36 = vpop.xlane.xlu1 %2383 }
 0x5ed   : > { %6487 = vpow2.f32 %v2431_v10  ;;  %v2411_v38 = vsub.f32 %v7547_v12, %v2381_v6  ;;  %v2412_v25 = vsub.f32 %v7549_v9, %v2384_v36 }
 0x5ee   : > { %v7635_v26 = vpop.eup %6479  ;;  %6489 = vpow2.f32 %v2433_v20 }
 0x5ef   : > { %v2435_v42 = vmul.f32 1.442695, %v2411_v38  ;;  %v2437_v63 = vmul.f32 1.442695, %v2412_v25  ;;  %v2457_v46 = vsel %vm1361_vm2, %v7635_v26, 0.0 }
 0x5f0   : > { %v2387_v18 = vpop.xlane.xlu0 %2386  ;;  %v2390_v49 = vpop.xlane.xlu1 %2389  ;;  %2458 = vadd.xlane.f32.xlu0 %v2457_v46 }
 0x5f1   : > { %6491 = vpow2.f32 %v2435_v42  ;;  %v2413_v61 = vsub.f32 %v7561_v14, %v2387_v18  ;;  %v2414_v41 = vsub.f32 %v7573_v57, %v2390_v49 }
 0x5f2   : > { %v7641_v53 = vpop.eup %6481  ;;  %6493 = vpow2.f32 %v2437_v63 }
 0x5f3   : > { %v2439_v12 = vmul.f32 1.442695, %v2413_v61  ;;  %v2441_v9 = vmul.f32 1.442695, %v2414_v41  ;;  %v2460_v60 = vsel %vm1361_vm2, %v7641_v53, 0.0  ;;  %v7645_v19 = vpop.eup %6483 }
 0x5f4   : > { %v2393_v21 = vpop.xlane.xlu0 %2392  ;;  %v2396_v27 = vpop.xlane.xlu1 %2395  ;;  %2461 = vadd.xlane.f32.xlu1 %v2460_v60  ;;  %v2466_v0 = vsel %vm1361_vm2, %v7645_v19, 0.0 }
 0x5f5   : > { %6495 = vpow2.f32 %v2439_v12  ;;  %v2415_v3 = vsub.f32 %v7575_v52, %v2393_v21  ;;  %v2416_v14 = vsub.f32 %v7577_v16, %v2396_v27 }
 0x5f6   : > { %v7649_v51 = vpop.eup %6485  ;;  %6497 = vpow2.f32 %v2441_v9 }
 0x5f7   : > { %v2443_v57 = vmul.f32 1.442695, %v2415_v3  ;;  %v2445_v59 = vmul.f32 1.442695, %v2416_v14  ;;  %v2463_v4 = vsel %vm1361_vm2, %v7649_v51, 0.0 }
 0x5f8   : > { %v2589_v8 = vpop.permute.xlu1 %2588  ;;  %2464 = vadd.xlane.f32.xlu0 %v2463_v4  ;;  %v2399_v13 = vpop.xlane.xlu0 %2398  ;;  %2467 = vadd.xlane.f32.xlu1 %v2466_v0 }
 0x5f9   : > { %6499 = vpow2.f32 %v2443_v57  ;;  %v2417_v52 = vsub.f32 %v7586_v39, %v2399_v13  ;;  %6044 = vmatpush3.bf16.msra.mxu1 %v2589_v8 }
 0x5fa   : > { %v7656_v16 = vpop.eup %6487  ;;  %6501 = vpow2.f32 %v2445_v59  ;;  %6055 = vmatprep.subr.bf16.mxu1 %v8679_v32 }
 0x5fb   : > { %v7659_v29 = vpop.eup %6489  ;;  %v2447_v30 = vmul.f32 1.442695, %v2417_v52  ;;  %v2469_v45 = vsel %vm1361_vm2, %v7656_v16, 0.0 }
 0x5fc   : > { %2470 = vadd.xlane.f32.xlu0 %v2469_v45  ;;  %v2541_v10 = vpop.permute.xlu0 %2540  ;;  %v2472_v20 = vsel %vm1361_vm2, %v7659_v29, 0.0  ;;  %v2637_v60 = vpop.permute.xlu1 %2636 }
 0x5fd   : > { %6503 = vpow2.f32 %v2447_v30  ;;  %2473 = vadd.xlane.f32.xlu1 %v2472_v20  ;;  %6038 = vmatpush3.bf16.msra.mxu0 %v2541_v10 }
 0x5fe   : > { %v7665_v39 = vpop.eup %6491  ;;  %6049 = vmatprep.subr.bf16.mxu0 %v8679_v32 }
 0x5ff   : > { %v7668_v6 = vpop.eup %6493  ;;  %v2475_v36 = vsel %vm1361_vm2, %v7665_v39, 0.0 }
 0x600   : > { %2476 = vadd.xlane.f32.xlu0 %v2475_v36  ;;  %v2478_v38 = vsel %vm1361_vm2, %v7668_v6, 0.0  ;;  %v7702_v21 = vpop.permute.xlu1 %2684 }
 0x601   : > { %2479 = vadd.xlane.f32.xlu1 %v2478_v38 }
 0x602   : > { %v7674_v25 = vpop.eup %6495 }
 0x603   : > { %v7676_v42 = vpop.eup %6497  ;;  %v2481_v63 = vsel %vm1361_vm2, %v7674_v25, 0.0 }
 0x604   : > { %2482 = vadd.xlane.f32.xlu0 %v2481_v63  ;;  %v2484_v46 = vsel %vm1361_vm2, %v7676_v42, 0.0  ;;  %v7706_v27 = vpop.permute.xlu1 %2780 }
 0x605   : > { %2485 = vadd.xlane.f32.xlu1 %v2484_v46 }
 0x606   : > { %v7682_v18 = vpop.eup %6499 }
 0x607   : > { %v7684_v49 = vpop.eup %6501  ;;  %v2487_v61 = vsel %vm1361_vm2, %v7682_v18, 0.0 }
 0x608   : > { %2488 = vadd.xlane.f32.xlu0 %v2487_v61  ;;  %v2490_v41 = vsel %vm1361_vm2, %v7684_v49, 0.0 }
 0x609   : > { %2491 = vadd.xlane.f32.xlu1 %v2490_v41 }
 0x60a   : > { %v7690_v12 = vpop.eup %6503 }
 0x60b   : > { %v2493_v9 = vsel %vm1361_vm2, %v7690_v12, 0.0 }
 0x60c   : > { %2494 = vadd.xlane.f32.xlu0 %v2493_v9 }
 0x61a   : > { %3074 = vrot.lane.b32.xlu1 %v7012_v37, %s6679_s12 }
 0x622   : > { %3023 = vrot.lane.b32.xlu0 %v6991_v11, %s6679_s12 }
 0x626   : > { %3021 = vrot.lane.b32.xlu0 %v7010_v15, %s6679_s12 }
 0x62a   : > { %3072 = vrot.lane.b32.xlu0 %v7033_v23, %s6679_s12 }
 0x62e   : > { %3123 = vrot.lane.b32.xlu0 %v7056_v17, %s6679_s12 }
 0x632   : > { %3174 = vrot.lane.b32.xlu0 %v7077_v43, %s6679_s12 }
 0x635   : > { %v2402_v3 = vpop.xlane.xlu1 %2401 }
 0x636   : > { %v2418_v14 = vsub.f32 %v7612_v2, %v2402_v3  ;;  %3225 = vrot.lane.b32.xlu0 %v7092_v54, %s6679_s12  ;;  %v7723_v2 = vpop.permute.xlu0 %2732 }
 0x638   : > { %v2449_v57 = vmul.f32 1.442695, %v2418_v14 }
 0x639   : > { %v7731_v8 = vpop.permute.xlu1 %2876 }
 0x63a   : > { %6505 = vpow2.f32 %v2449_v57  ;;  %3276 = vrot.lane.b32.xlu0 %v7107_v1, %s6679_s12  ;;  %v7727_v0 = vpop.permute.xlu0 %2828 }
 0x63e   : > { %3327 = vrot.lane.b32.xlu0 %v7126_v28, %s6679_s12 }
 0x640   : > { %v2453_v13 = vpop.xlane.xlu0 %2452 }
 0x641   : > { %6507 = vrcp.f32 %v2453_v13 }
 0x647   : > { %v7717_v59 = vpop.eup %6505 }
 0x648   : > { %v2496_v4 = vsel %vm1361_vm2, %v7717_v59, 0.0 }
 0x649   : > { %2497 = vadd.xlane.f32.xlu1 %v2496_v4 }
 0x64e   : > { %v6508_v30 = vpop.eup %6507 }
 0x64f   : > { %v2515_v20 = vmul.f32 %v6508_v30, %v7616_v7 }
 0x65a   : > { %3125 = vrot.lane.b32.xlu1 %v7035_v56, %s6679_s12 }
 0x65e   : > { %3176 = vrot.lane.b32.xlu1 %v7058_v24, %s6679_s12 }
 0x662   : > { %3227 = vrot.lane.b32.xlu1 %v7079_v44, %s6679_s12 }
 0x666   : > { %3278 = vrot.lane.b32.xlu1 %v7094_v55, %s6679_s12 }
 0x66a   : > { %3329 = vrot.lane.b32.xlu1 %v7109_v31, %s6679_s12  ;;  %v2456_v52 = vpop.xlane.xlu1 %2455 }
 0x66b   : > { %6509 = vrcp.f32 %v2456_v52 }
 0x66e   : > { %3380 = vrot.lane.b32.xlu1 %v7128_v34, %s6679_s12 }
 0x672   : > { %3378 = vrot.lane.b32.xlu1 %v7147_v22, %s6679_s12 }
 0x678   : > { %v6510_v45 = vpop.eup %6509 }
 0x679   : > { %v2459_v10 = vpop.xlane.xlu0 %2458  ;;  %v2516_v36 = vmul.f32 %v6510_v45, %v7623_v5 }
 0x67a   : > { %6511 = vrcp.f32 %v2459_v10 }
 0x67b   : > { %v2531_v38 = vpack.c.bf16 %v2516_v36, %v2515_v20 }
 0x67d   : > { %6040 = vmatmul.mubr.msk.bf16.vlgmr.msra.gmra.mxu0 %vm1361_vm2, %v2531_v38  ;;  %v2462_v63 = vpop.xlane.xlu1 %2461 }
 0x67e   : > { %6050 = vmatpush3.bf16.msra.mxu0 %v2637_v60  ;;  %6513 = vrcp.f32 %v2462_v63  ;;  %6051 = vmatprep.mubr.msk.bf16.mxu0 %vm6677_vm0, %v8679_v32 }
 0x67f   : > { %6061 = vmatprep.subr.bf16.mxu0 %v8679_v32 }
 0x681   : > { %v2465_v46 = vpop.xlane.xlu0 %2464  ;;  %v2468_v61 = vpop.xlane.xlu1 %2467 }
 0x682   : > { %6515 = vrcp.f32 %v2465_v46 }
 0x683   : > { %6517 = vrcp.f32 %v2468_v61 }
 0x685   : > { %v2471_v41 = vpop.xlane.xlu0 %2470 }
 0x686   : > { %6519 = vrcp.f32 %v2471_v41  ;;  %v2474_v7 = vpop.xlane.xlu1 %2473 }
 0x687   : > { %6521 = vrcp.f32 %v2474_v7  ;;  %v6512_v5 = vpop.eup %6511 }
 0x688   : > { %v2517_v60 = vmul.f32 %v6512_v5, %v7635_v26 }
 0x689   : > { %v2477_v9 = vpop.xlane.xlu0 %2476 }
 0x68a   : > { %6523 = vrcp.f32 %v2477_v9  ;;  %v2480_v3 = vpop.xlane.xlu1 %2479 }
 0x68b   : > { %v6514_v14 = vpop.eup %6513  ;;  %6525 = vrcp.f32 %v2480_v3 }
 0x68c   : > { %v2518_v57 = vmul.f32 %v6514_v14, %v7641_v53 }
 0x68d   : > { %v2483_v4 = vpop.xlane.xlu0 %2482 }
 0x68e   : > { %6527 = vrcp.f32 %v2483_v4  ;;  %v2486_v13 = vpop.xlane.xlu1 %2485  ;;  %v2532_v52 = vpack.c.bf16 %v2518_v57, %v2517_v60 }
 0x68f   : > { %v6516_v30 = vpop.eup %6515  ;;  %6529 = vrcp.f32 %v2486_v13 }
 0x690   : > { %v6518_v45 = vpop.eup %6517  ;;  %6046 = vmatmul.mubr.msk.bf16.vlgmr.msra.gmra.mxu1 %vm1361_vm2, %v2532_v52  ;;  %v2519_v10 = vmul.f32 %v6516_v30, %v7649_v51 }
 0x691   : > { %6056 = vmatpush3.bf16.msra.mxu1 %v7702_v21  ;;  %v2489_v20 = vpop.xlane.xlu0 %2488  ;;  %v2520_v36 = vmul.f32 %v6518_v45, %v7645_v19  ;;  %6057 = vmatprep.mubr.msk.bf16.mxu1 %vm6677_vm0, %v8679_v32 }
 0x692   : > { %6531 = vrcp.f32 %v2489_v20  ;;  %v2492_v26 = vpop.xlane.xlu1 %2491  ;;  %6067 = vmatprep.subr.bf16.mxu1 %v8679_v32 }
 0x693   : > { %v6520_v53 = vpop.eup %6519  ;;  %6533 = vrcp.f32 %v2492_v26  ;;  %v2533_v38 = vpack.c.bf16 %v2520_v36, %v2519_v10 }
 0x694   : > { %v6522_v63 = vpop.eup %6521  ;;  %v2521_v46 = vmul.f32 %v6520_v53, %v7656_v16 }
 0x695   : > { %6052 = vmatmul.mubr.msk.bf16.vlgmr.msra.gmra.mxu0 %vm1361_vm2, %v2533_v38  ;;  %v2522_v51 = vmul.f32 %v6522_v63, %v7659_v29  ;;  %v2495_v5 = vpop.xlane.xlu0 %2494 }
 0x696   : > { %6062 = vmatpush3.bf16.msra.mxu0 %v7723_v2  ;;  %6063 = vmatprep.mubr.msk.bf16.mxu0 %vm6677_vm0, %v8679_v32  ;;  %6535 = vrcp.f32 %v2495_v5 }
 0x697   : > { %v6524_v19 = vpop.eup %6523  ;;  %v2534_v21 = vpack.c.bf16 %v2522_v51, %v2521_v46  ;;  %6073 = vmatprep.subr.bf16.mxu0 %v8679_v32 }
 0x698   : > { %v6526_v61 = vpop.eup %6525  ;;  %v2523_v41 = vmul.f32 %v6524_v19, %v7665_v39 }
 0x699   : > { %6058 = vmatmul.mubr.msk.bf16.vlgmr.msra.gmra.mxu1 %vm1361_vm2, %v2534_v21  ;;  %v2524_v16 = vmul.f32 %v6526_v61, %v7668_v6  ;;  %v3024_v60 = vpop.permute.xlu0 %3023 }
 0x69a   : > { %6068 = vmatpush3.bf16.msra.mxu1 %v7706_v27  ;;  %6069 = vmatprep.mubr.msk.bf16.mxu1 %vm6677_vm0, %v8679_v32 }
 0x69b   : > { %v6528_v29 = vpop.eup %6527  ;;  %v2535_v2 = vpack.c.bf16 %v2524_v16, %v2523_v41  ;;  %6079 = vmatprep.subr.bf16.mxu1 %v8679_v32 }
 0x69c   : > { %v6530_v7 = vpop.eup %6529  ;;  %v2525_v9 = vmul.f32 %v6528_v29, %v7674_v25 }
 0x69d   : > { %6064 = vmatmul.mubr.msk.bf16.vlgmr.msra.gmra.mxu0 %vm1361_vm2, %v2535_v2  ;;  %v2526_v39 = vmul.f32 %v6530_v7, %v7676_v42 }
 0x69e   : > { %6074 = vmatpush3.bf16.msra.mxu0 %v7727_v0  ;;  %6075 = vmatprep.mubr.msk.bf16.mxu0 %vm6677_vm0, %v8679_v32  ;;  %v3029_v0 = vsel %vm984_vm1, %v3024_v60, 0 }
 0x69f   : > { %v6532_v6 = vpop.eup %6531  ;;  %v2536_v27 = vpack.c.bf16 %v2526_v39, %v2525_v9  ;;  %6085 = vmatprep.subr.bf16.mxu0 %v8679_v32 }
 0x6a0   : > { %v6534_v3 = vpop.eup %6533  ;;  %v2527_v14 = vmul.f32 %v6532_v6, %v7682_v18  ;;  %v3022_v18 = vpop.permute.xlu0 %3021 }
 0x6a1   : > { %6070 = vmatmul.mubr.msk.bf16.vlgmr.msra.gmra.mxu1 %vm1361_vm2, %v2536_v27  ;;  %v2528_v25 = vmul.f32 %v6534_v3, %v7684_v49  ;;  %v3075_v49 = vpop.permute.xlu1 %3074 }
 0x6a2   : > { %6080 = vmatpush3.bf16.msra.mxu1 %v7731_v8  ;;  %6081 = vmatprep.mubr.msk.bf16.mxu1 %vm6677_vm0, %v8679_v32  ;;  %v3080_v19 = vsel %vm984_vm1, %v3075_v49, 0 }
 0x6a3   : > { %v2537_v42 = vpack.c.bf16 %v2528_v25, %v2527_v14  ;;  %6091 = vmatprep.subr.bf16.mxu1 %v8679_v32  ;;  %v6536_v10 = vpop.eup %6535 }
 0x6a4   : > { %v3073_v8 = vpop.permute.xlu0 %3072  ;;  %v2529_v53 = vmul.f32 %v6536_v10, %v7690_v12 }
 0x6a5   : > { %6076 = vmatmul.mubr.msk.bf16.vlgmr.msra.gmra.mxu0 %vm1361_vm2, %v2537_v42 }
 0x6a6   : > { %6086 = vmatpush3.bf16.xpose.msra.mxu0 %v3029_v0  ;;  %6087 = vmatprep.mubr.msk.bf16.mxu0 %vm6677_vm0, %v8679_v32 }
 0x6a7   : > { %6097 = vmatprep.subr.bf16.mxu0 %v8679_v32 }
 0x6a8   : > { %v3124_v4 = vpop.permute.xlu0 %3123 }
 0x6ac   : > { %v3175_v45 = vpop.permute.xlu0 %3174 }
 0x6ad   : > { %6088 = vmatmul.mubr.msk.bf16.vlgmr.msra.gmra.mxu0 %vm984_vm1, %v3022_v18 }
 0x6ae   : > { %6099 = vmatprep.mubr.msk.bf16.mxu0 %vm6677_vm0, %v8679_v32 }
 0x6b0   : > { %v3226_v63 = vpop.permute.xlu0 %3225 }
 0x6b4   : > { %v3277_v12 = vpop.permute.xlu0 %3276 }
 0x6b8   : > { %v3328_v41 = vpop.permute.xlu0 %3327 }
 0x6d2   : > { %v2498_v57 = vpop.xlane.xlu1 %2497 }
 0x6d3   : > { %6537 = vrcp.f32 %v2498_v57 }
 0x6d6   : > { %v3126_v13 = vpop.permute.xlu1 %3125 }
 0x6d7   : > { %v3131_v52 = vsel %vm984_vm1, %v3126_v13, 0 }
 0x6d8   : > { %6098 = vmatpush3.bf16.xpose.msra.mxu0 %v3131_v52 }
 0x6d9   : > { %6109 = vmatprep.subr.bf16.mxu0 %v8679_v32 }
 0x6da   : > { %v3177_v30 = vpop.permute.xlu1 %3176 }
 0x6de   : > { %v3228_v20 = vpop.permute.xlu1 %3227 }
 0x6df   : > { %v3233_v36 = vsel %vm984_vm1, %v3228_v20, 0  ;;  %6100 = vmatmul.mubr.msk.bf16.vlgmr.msra.gmra.mxu0 %vm984_vm1, %v3124_v4 }
 0x6e0   : > { %v6538_v26 = vpop.eup %6537  ;;  %6110 = vmatpush3.bf16.xpose.msra.mxu0 %v3233_v36  ;;  %6111 = vmatprep.mubr.msk.bf16.mxu0 %vm6677_vm0, %v8679_v32 }
 0x6e1   : > { %v2530_v38 = vmul.f32 %v6538_v26, %v7717_v59  ;;  %6121 = vmatprep.subr.bf16.mxu0 %v8679_v32  ;;  %v3182_v59 = vsel %vm984_vm1, %v3177_v30, 0 }
 0x6e2   : > { %v3279_v46 = vpop.permute.xlu1 %3278 }
 0x6e3   : > { %v2538_v51 = vpack.c.bf16 %v2530_v38, %v2529_v53  ;;  %v3284_v16 = vsel %vm984_vm1, %v3279_v46, 0 }
 0x6e5   : > { %6082 = vmatmul.mubr.msk.bf16.vlgmr.msra.gmra.mxu1 %vm1361_vm2, %v2538_v51  ;;  %v5547_v51 = vld [vmem:[%s8671_s1 + $0x100] sm:$0xff] }
 0x6e6   : > { %6092 = vmatpush3.bf16.xpose.msra.mxu1 %v3080_v19  ;;  %v3330_v21 = vpop.permute.xlu1 %3329  ;;  %6093 = vmatprep.mubr.msk.bf16.mxu1 %vm6677_vm0, %v8679_v32 }
 0x6e7   : > { %v3335_v61 = vsel %vm984_vm1, %v3330_v21, 0  ;;  %6112 = vmatmul.mubr.msk.bf16.vlgmr.msra.gmra.mxu0 %vm984_vm1, %v3226_v63  ;;  %6103 = vmatprep.subr.bf16.mxu1 %v8679_v32 }
 0x6e8   : > { %6122 = vmatpush3.bf16.xpose.msra.mxu0 %v3335_v61  ;;  %6123 = vmatprep.mubr.msk.bf16.mxu0 %vm6677_vm0, %v8679_v32 }
 0x6e9   : > { %6133 = vmatprep.subr.bf16.mxu0 %v8679_v32 }
 0x6ea   : > { %v3381_v29 = vpop.permute.xlu1 %3380 }
 0x6eb   : > { %v3386_v2 = vsel %vm984_vm1, %v3381_v29, 0 }
 0x6ed   : > { %6094 = vmatmul.mubr.msk.bf16.vlgmr.msra.gmra.mxu1 %vm984_vm1, %v3073_v8 }
 0x6ee   : > { %6104 = vmatpush3.bf16.xpose.msra.mxu1 %v3182_v59  ;;  %6105 = vmatprep.mubr.msk.bf16.mxu1 %vm6677_vm0, %v8679_v32  ;;  %v3379_v7 = vpop.permute.xlu1 %3378 }
 0x6ef   : > { %6124 = vmatmul.mubr.msk.bf16.vlgmr.msra.gmra.mxu0 %vm984_vm1, %v3328_v41  ;;  %6115 = vmatprep.subr.bf16.mxu1 %v8679_v32 }
 0x6f0   : > { %6135 = vmatprep.mubr.msk.bf16.mxu0 %vm6677_vm0, %v8679_v32 }
 0x6f5   : > { %6106 = vmatmul.mubr.msk.bf16.vlgmr.msra.gmra.mxu1 %vm984_vm1, %v3175_v45 }
 0x6f6   : > { %6116 = vmatpush3.bf16.xpose.msra.mxu1 %v3284_v16  ;;  %6117 = vmatprep.mubr.msk.bf16.mxu1 %vm6677_vm0, %v8679_v32 }
 0x6f7   : > { %6127 = vmatprep.subr.bf16.mxu1 %v8679_v32 }
 0x6fd   : > { %6118 = vmatmul.mubr.msk.bf16.vlgmr.msra.gmra.mxu1 %vm984_vm1, %v3277_v12  ;;  %v5548_v12 = vld [vmem:[%s8671_s1 + $0x108] sm:$0xff] }
 0x6fe   : > { %6128 = vmatpush3.bf16.xpose.msra.mxu1 %v3386_v2  ;;  %6129 = vmatprep.mubr.msk.bf16.mxu1 %vm6677_vm0, %v8679_v32 }
 0x6ff   : > { %6139 = vmatprep.subr.bf16.mxu1 %v8679_v32 }
 0x705   : > { %6130 = vmatmul.mubr.msk.bf16.vlgmr.msra.gmra.mxu1 %vm984_vm1, %v3379_v7 }
 0x706   : > { %6141 = vmatprep.mubr.msk.bf16.mxu1 %vm6677_vm0, %v8679_v32 }
 0x73d   : > { %v7832_v5 = vpop.f32.mrf.mxu0 }
 0x73f   : > { %v6041_v9 = vpop.f32.mrf.mxu0 }
 0x741   : > { %v7834_v39 = vpop.f32.mrf.mxu0 }
 0x743   : > { %v6042_v6 = vpop.f32.mrf.mxu0 }
 0x744   : > { %v5552_v6 = vld [vmem:[%s8671_s1 + $0x128] sm:$0xff] }
 0x750   : > { %v7836_v27 = vpop.f32.mrf.mxu1 }
 0x752   : > { %v6047_v3 = vpop.f32.mrf.mxu1 }
 0x754   : > { %v7838_v14 = vpop.f32.mrf.mxu1 }
 0x755   : > { %8681 = vst [vmem:[#allocation3_spill] sm:$0xff] %v7838_v14  ;;  %v7840_v25 = vpop.f32.mrf.mxu0 }
 0x756   : > { %v6048_v60 = vpop.f32.mrf.mxu1 }
 0x757   : > { %v6053_v42 = vpop.f32.mrf.mxu0 }
 0x759   : > { %v7842_v0 = vpop.f32.mrf.mxu0  ;;  %v7844_v18 = vpop.f32.mrf.mxu1 }
 0x75a   : > { %8682 = vst [vmem:[#allocation4_spill] sm:$0xff] %v7842_v0 }
 0x75b   : > { %v6054_v49 = vpop.f32.mrf.mxu0  ;;  %v6059_v8 = vpop.f32.mrf.mxu1 }
 0x75d   : > { %v7846_v57 = vpop.f32.mrf.mxu1  ;;  %v7848_v4 = vpop.f32.mrf.mxu0 }
 0x75e   : > { %8683 = vst [vmem:[#allocation5_spill] sm:$0xff] %v7846_v57 }
 0x75f   : > { %v6060_v13 = vpop.f32.mrf.mxu1  ;;  %v6065_v52 = vpop.f32.mrf.mxu0 }
 0x761   : > { %v7850_v30 = vpop.f32.mrf.mxu0  ;;  %v7852_v45 = vpop.f32.mrf.mxu1 }
 0x763   : > { %v6066_v10 = vpop.f32.mrf.mxu0  ;;  %v6071_v20 = vpop.f32.mrf.mxu1 }
 0x765   : > { %v7854_v36 = vpop.f32.mrf.mxu1  ;;  %v7856_v26 = vpop.f32.mrf.mxu0 }
 0x766   : > { %8684 = vst [vmem:[#allocation6_spill] sm:$0xff] %v7854_v36 }
 0x767   : > { %v6072_v53 = vpop.f32.mrf.mxu1  ;;  %v6077_v38 = vpop.f32.mrf.mxu0 }
 0x769   : > { %v7858_v63 = vpop.f32.mrf.mxu0 }
 0x76a   : > { %8685 = vst [vmem:[#allocation7_spill] sm:$0xff] %v7858_v63 }
 0x76b   : > { %v6078_v46 = vpop.f32.mrf.mxu0 }
 0x76c   : > { %v5549_v46 = vld [vmem:[%s8671_s1 + $0x110] sm:$0xff] }
 0x76d   : > { %v3065_v19 = vpop.f32.mrf.mxu0 }
 0x76e   : > { %v7863_v21 = vadd.f32 %v5547_v51, %v3065_v19 }
 0x76f   : > { %v6089_v61 = vpop.f32.mrf.mxu0 }
 0x770   : > { %v3429_v59 = vsel %vm1361_vm2, %v7863_v21, -inf }
 0x771   : > { %3430 = vmax.xlane.f32.xlu0 %v3429_v59  ;;  %v3068_v41 = vpop.f32.mrf.mxu0 }
 0x772   : > { %v7870_v16 = vadd.f32 %v5548_v12, %v3068_v41  ;;  %v5550_v41 = vld [vmem:[%s8671_s1 + $0x118] sm:$0xff] }
 0x773   : > { %v6090_v29 = vpop.f32.mrf.mxu0 }
 0x774   : > { %v3432_v2 = vsel %vm1361_vm2, %v7870_v16, -inf }
 0x775   : > { %3433 = vmax.xlane.f32.xlu1 %v3432_v2  ;;  %v5551_v2 = vld [vmem:[%s8671_s1 + $0x120] sm:$0xff] }
 0x79f   : > { %v3167_v7 = vpop.f32.mrf.mxu0 }
 0x7a1   : > { %v6101_v9 = vpop.f32.mrf.mxu0 }
 0x7a3   : > { %v3170_v3 = vpop.f32.mrf.mxu0 }
 0x7a4   : > { %v7877_v60 = vadd.f32 %v5552_v6, %v3170_v3 }
 0x7a5   : > { %v7879_v42 = vpop.f32.mrf.mxu1  ;;  %v6102_v49 = vpop.f32.mrf.mxu0 }
 0x7a6   : > { %v3444_v8 = vsel %vm1361_vm2, %v7877_v60, -inf }
 0x7a7   : > { %3445 = vmax.xlane.f32.xlu1 %v3444_v8  ;;  %v6083_v13 = vpop.f32.mrf.mxu1  ;;  %v3269_v52 = vpop.f32.mrf.mxu0 }
 0x7a8   : > { %v7900_v13 = vadd.f32 %v5551_v2, %v3167_v7  ;;  %v5556_v2 = vld [vmem:[%s8671_s1 + $0x148] sm:$0xff] }
 0x7a9   : > { %v7883_v10 = vpop.f32.mrf.mxu1  ;;  %v6113_v20 = vpop.f32.mrf.mxu0 }
 0x7aa   : > { %8686 = vst [vmem:[#allocation8_spill] sm:$0xff] %v7883_v10  ;;  %v3441_v7 = vsel %vm1361_vm2, %v7900_v13, -inf }
 0x7ab   : > { %v6084_v53 = vpop.f32.mrf.mxu1  ;;  %v3272_v38 = vpop.f32.mrf.mxu0 }
 0x7ad   : > { %v3116_v51 = vpop.f32.mrf.mxu1  ;;  %v6114_v19 = vpop.f32.mrf.mxu0 }
 0x7ae   : > { %v7888_v61 = vadd.f32 %v5549_v46, %v3116_v51  ;;  %v5553_v46 = vld [vmem:[%s8671_s1 + $0x130] sm:$0xff] }
 0x7af   : > { %v6095_v12 = vpop.f32.mrf.mxu1  ;;  %v3371_v59 = vpop.f32.mrf.mxu0 }
 0x7b0   : > { %v3435_v29 = vsel %vm1361_vm2, %v7888_v61, -inf  ;;  %v5554_v12 = vld [vmem:[%s8671_s1 + $0x138] sm:$0xff] }
 0x7b1   : > { %v6125_v9 = vpop.f32.mrf.mxu0  ;;  %3436 = vmax.xlane.f32.xlu0 %v3435_v29  ;;  %v3119_v6 = vpop.f32.mrf.mxu1  ;;  %v5555_v29 = vld [vmem:[%s8671_s1 + $0x140] sm:$0xff] }
 0x7b2   : > { %v7898_v3 = vadd.f32 %v5550_v41, %v3119_v6 }
 0x7b3   : > { %v6096_v49 = vpop.f32.mrf.mxu1  ;;  %v3374_v8 = vpop.f32.mrf.mxu0 }
 0x7b4   : > { %v3438_v20 = vsel %vm1361_vm2, %v7898_v3, -inf }
 0x7b5   : > { %v6126_v53 = vpop.f32.mrf.mxu0  ;;  %3439 = vmax.xlane.f32.xlu0 %v3438_v20  ;;  %v3218_v51 = vpop.f32.mrf.mxu1  ;;  %v7922_v20 = vadd.f32 %v5555_v29, %v3269_v52  ;;  %v5558_v52 = vld [vmem:[%s8671_s1 + $0x158] sm:$0xff] }
 0x7b6   : > { %v7910_v41 = vadd.f32 %v5553_v46, %v3218_v51  ;;  %v7924_v53 = vadd.f32 %v5556_v2, %v3272_v38 }
 0x7b7   : > { %v6107_v19 = vpop.f32.mrf.mxu1  ;;  %v3453_v29 = vsel %vm1361_vm2, %v7922_v20, -inf }
 0x7b8   : > { %v3447_v46 = vsel %vm1361_vm2, %v7910_v41, -inf  ;;  %v5557_v19 = vld [vmem:[%s8671_s1 + $0x150] sm:$0xff]  ;;  %v3456_v2 = vsel %vm1361_vm2, %v7924_v53, -inf }
 0x7b9   : > { %3442 = vmax.xlane.f32.xlu0 %v3441_v7  ;;  %v3221_v9 = vpop.f32.mrf.mxu1 }
 0x7ba   : > { %v7920_v6 = vadd.f32 %v5554_v12, %v3221_v9  ;;  %v5559_v9 = vld [vmem:[%s8671_s1 + $0x160] sm:$0xff] }
 0x7bb   : > { %v6108_v49 = vpop.f32.mrf.mxu1 }
 0x7bc   : > { %v3450_v51 = vsel %vm1361_vm2, %v7920_v6, -inf  ;;  %v5560_v49 = vld [vmem:[%s8671_s1 + $0x168] sm:$0xff] }
 0x7bd   : > { %3448 = vmax.xlane.f32.xlu0 %v3447_v46  ;;  %3451 = vmax.xlane.f32.xlu1 %v3450_v51  ;;  %v3320_v7 = vpop.f32.mrf.mxu1 }
 0x7be   : > { %v7936_v38 = vadd.f32 %v5557_v19, %v3320_v7  ;;  %v7950_v7 = vadd.f32 %v5559_v9, %v3371_v59 }
 0x7bf   : > { %v6119_v12 = vpop.f32.mrf.mxu1 }
 0x7c0   : > { %v7952_v12 = vadd.f32 %v5560_v49, %v3374_v8  ;;  %v3459_v32 = vsel %vm1361_vm2, %v7936_v38, -inf  ;;  %v3465_v59 = vsel %vm1361_vm2, %v7950_v7, -inf }
 0x7c1   : > { %3454 = vmax.xlane.f32.xlu0 %v3453_v29  ;;  %3457 = vmax.xlane.f32.xlu1 %v3456_v2  ;;  %v3323_v46 = vpop.f32.mrf.mxu1  ;;  %v5561_v29 = vld [vmem:[%s8671_s1 + $0x170] sm:$0xff] }
 0x7c2   : > { %v7948_v51 = vadd.f32 %v5558_v52, %v3323_v46  ;;  %v3468_v8 = vsel %vm1361_vm2, %v7952_v12, -inf }
 0x7c3   : > { %v6120_v19 = vpop.f32.mrf.mxu1 }
 0x7c4   : > { %v3462_v10 = vsel %vm1361_vm2, %v7948_v51, -inf }
 0x7c5   : > { %3460 = vmax.xlane.f32.xlu0 %v3459_v32  ;;  %3463 = vmax.xlane.f32.xlu1 %v3462_v10  ;;  %v3422_v2 = vpop.f32.mrf.mxu1 }
 0x7c6   : > { %v7961_v46 = vadd.f32 %v5561_v29, %v3422_v2  ;;  %v5562_v2 = vld [vmem:[%s8671_s1 + $0x178] sm:$0xff] }
 0x7c7   : > { %v6131_v52 = vpop.f32.mrf.mxu1 }
 0x7c8   : > { %v3471_v32 = vsel %vm1361_vm2, %v7961_v46, -inf }
 0x7c9   : > { %3466 = vmax.xlane.f32.xlu0 %v3465_v59  ;;  %3469 = vmax.xlane.f32.xlu1 %v3468_v8  ;;  %v3425_v9 = vpop.f32.mrf.mxu1 }
 0x7ca   : > { %v7987_v52 = vadd.f32 %v5562_v2, %v3425_v9 }
 0x7cb   : > { %v6132_v49 = vpop.f32.mrf.mxu1 }
 0x7cc   : > { %v3474_v59 = vsel %vm1361_vm2, %v7987_v52, -inf }
 0x7cd   : > { %3472 = vmax.xlane.f32.xlu0 %v3471_v32 }
 0x7da   : > { %3660 = vrot.lane.b32.xlu1 %v7149_v40, %s6679_s12 }
 0x7de   : > { %3707 = vrot.lane.b32.xlu1 %v7026_v50, %s6679_s12 }
 0x7e2   : > { %3754 = vrot.lane.b32.xlu1 %v7019_v58, %s6679_s12 }
 0x7e3   : > { %3613 = vrot.lane.b32.xlu0 %v7130_v35, %s6679_s12 }
 0x7e6   : > { %3848 = vrot.lane.b32.xlu1 %v7042_v62, %s6679_s12 }
 0x7e7   : > { %3801 = vrot.lane.b32.xlu0 %v7049_v48, %s6679_s12 }
 0x7eb   : > { %3895 = vrot.lane.b32.xlu0 %v7072_v47, %s6679_s12 }
 0x7fa   : > { %v3431_v10 = vpop.xlane.xlu0 %3430 }
 0x7fb   : > { %v3477_v19 = vsub.f32 %v7863_v21, %v3431_v10 }
 0x7fd   : > { %v3493_v29 = vmul.f32 1.442695, %v3477_v19 }
 0x7fe   : > { %v3434_v21 = vpop.xlane.xlu1 %3433 }
 0x7ff   : > { %6539 = vpow2.f32 %v3493_v29  ;;  %v3478_v32 = vsub.f32 %v7870_v16, %v3434_v21 }
 0x801   : > { %v3495_v10 = vmul.f32 1.442695, %v3478_v32 }
 0x803   : > { %6541 = vpow2.f32 %v3495_v10 }
 0x80a   : > { %3475 = vmax.xlane.f32.xlu1 %v3474_v59 }
 0x80c   : > { %v7991_v8 = vpop.eup %6539 }
 0x80d   : > { %v3525_v49 = vsel %vm1361_vm2, %v7991_v8, 0.0 }
 0x80e   : > { %3526 = vadd.xlane.f32.xlu0 %v3525_v49 }
 0x810   : > { %v7998_v29 = vpop.eup %6541 }
 0x811   : > { %v3528_v49 = vsel %vm1361_vm2, %v7998_v29, 0.0 }
 0x81b   : > { %3942 = vrot.lane.b32.xlu1 %v7065_v33, %s6679_s12 }
 0x830   : > { %v3446_v9 = vpop.xlane.xlu1 %3445 }
 0x831   : > { %v3482_v59 = vsub.f32 %v7877_v60, %v3446_v9 }
 0x833   : > { %v3503_v16 = vmul.f32 1.442695, %v3482_v59 }
 0x83a   : > { %v3437_v19 = vpop.xlane.xlu0 %3436 }
 0x83b   : > { %v3479_v2 = vsub.f32 %v7888_v61, %v3437_v19 }
 0x83d   : > { %v3497_v57 = vmul.f32 1.442695, %v3479_v2 }
 0x83e   : > { %v3440_v63 = vpop.xlane.xlu0 %3439 }
 0x83f   : > { %6543 = vpow2.f32 %v3497_v57  ;;  %v3480_v0 = vsub.f32 %v7898_v3, %v3440_v63  ;;  %3529 = vadd.xlane.f32.xlu1 %v3528_v49 }
 0x841   : > { %v3499_v21 = vmul.f32 1.442695, %v3480_v0 }
 0x842   : > { %v3443_v32 = vpop.xlane.xlu0 %3442 }
 0x843   : > { %6545 = vpow2.f32 %v3499_v21  ;;  %v3481_v10 = vsub.f32 %v7900_v13, %v3443_v32 }
 0x844   : > { %6547 = vpow2.f32 %v3503_v16 }
 0x845   : > { %v3501_v36 = vmul.f32 1.442695, %v3481_v10 }
 0x846   : > { %v3449_v61 = vpop.xlane.xlu0 %3448  ;;  %v3452_v19 = vpop.xlane.xlu1 %3451 }
 0x847   : > { %6549 = vpow2.f32 %v3501_v36  ;;  %v3483_v60 = vsub.f32 %v7910_v41, %v3449_v61  ;;  %v3484_v9 = vsub.f32 %v7920_v6, %v3452_v19 }
 0x849   : > { %v3505_v2 = vmul.f32 1.442695, %v3483_v60  ;;  %v3507_v57 = vmul.f32 1.442695, %v3484_v9 }
 0x84a   : > { %v3455_v14 = vpop.xlane.xlu0 %3454  ;;  %v3458_v63 = vpop.xlane.xlu1 %3457 }
 0x84b   : > { %6551 = vpow2.f32 %v3505_v2  ;;  %v3485_v0 = vsub.f32 %v7922_v20, %v3455_v14  ;;  %v3486_v3 = vsub.f32 %v7924_v53, %v3458_v63 }
 0x84c   : > { %v8010_v59 = vpop.eup %6543  ;;  %6553 = vpow2.f32 %v3507_v57 }
 0x84d   : > { %v3509_v13 = vmul.f32 1.442695, %v3485_v0  ;;  %v3511_v49 = vmul.f32 1.442695, %v3486_v3  ;;  %v3531_v36 = vsel %vm1361_vm2, %v8010_v59, 0.0 }
 0x84e   : > { %v3461_v41 = vpop.xlane.xlu0 %3460  ;;  %v3464_v16 = vpop.xlane.xlu1 %3463  ;;  %3532 = vadd.xlane.f32.xlu0 %v3531_v36 }
 0x84f   : > { %6555 = vpow2.f32 %v3509_v13  ;;  %v3487_v6 = vsub.f32 %v7936_v38, %v3461_v41  ;;  %v3488_v21 = vsub.f32 %v7948_v51, %v3464_v16  ;;  %v8687_v13 = vmov 0.0  }
 0x850   : > { %v8016_v32 = vpop.eup %6545  ;;  %6557 = vpow2.f32 %v3511_v49 }
 0x851   : > { %v3513_v14 = vmul.f32 1.442695, %v3487_v6  ;;  %v3515_v20 = vmul.f32 1.442695, %v3488_v21  ;;  %v3534_v53 = vsel %vm1361_vm2, %v8016_v32, 0.0  ;;  %v8020_v10 = vpop.eup %6547 }
 0x852   : > { %v3467_v61 = vpop.xlane.xlu0 %3466  ;;  %v3470_v19 = vpop.xlane.xlu1 %3469  ;;  %3535 = vadd.xlane.f32.xlu1 %v3534_v53  ;;  %v3540_v63 = vsel %vm1361_vm2, %v8020_v10, 0.0 }
 0x853   : > { %6559 = vpow2.f32 %v3513_v14  ;;  %v3489_v60 = vsub.f32 %v7950_v7, %v3467_v61  ;;  %v3490_v38 = vsub.f32 %v7952_v12, %v3470_v19 }
 0x854   : > { %v8024_v9 = vpop.eup %6549  ;;  %6561 = vpow2.f32 %v3515_v20 }
 0x855   : > { %v3517_v51 = vmul.f32 1.442695, %v3489_v60  ;;  %v3519_v2 = vmul.f32 1.442695, %v3490_v38  ;;  %v3537_v57 = vsel %vm1361_vm2, %v8024_v9, 0.0 }
 0x856   : > { %v3661_v0 = vpop.permute.xlu1 %3660  ;;  %3538 = vadd.xlane.f32.xlu0 %v3537_v57  ;;  %v3473_v3 = vpop.xlane.xlu0 %3472  ;;  %3541 = vadd.xlane.f32.xlu1 %v3540_v63 }
 0x857   : > { %6563 = vpow2.f32 %v3517_v51  ;;  %v3491_v7 = vsub.f32 %v7961_v46, %v3473_v3  ;;  %6140 = vmatpush3.bf16.msra.mxu1 %v3661_v0 }
 0x858   : > { %v8031_v12 = vpop.eup %6551  ;;  %6565 = vpow2.f32 %v3519_v2  ;;  %6151 = vmatprep.subr.bf16.mxu1 %v8687_v13 }
 0x859   : > { %v8034_v49 = vpop.eup %6553  ;;  %v3521_v36 = vmul.f32 1.442695, %v3491_v7  ;;  %v3543_v41 = vsel %vm1361_vm2, %v8031_v12, 0.0 }
 0x85a   : > { %3544 = vadd.xlane.f32.xlu0 %v3543_v41  ;;  %v3614_v16 = vpop.permute.xlu0 %3613  ;;  %v3546_v6 = vsel %vm1361_vm2, %v8034_v49, 0.0  ;;  %v3708_v3 = vpop.permute.xlu1 %3707 }
 0x85b   : > { %6567 = vpow2.f32 %v3521_v36  ;;  %3547 = vadd.xlane.f32.xlu1 %v3546_v6  ;;  %6134 = vmatpush3.bf16.msra.mxu0 %v3614_v16 }
 0x85c   : > { %v8040_v46 = vpop.eup %6555  ;;  %6145 = vmatprep.subr.bf16.mxu0 %v8687_v13 }
 0x85d   : > { %v8043_v21 = vpop.eup %6557  ;;  %v3549_v14 = vsel %vm1361_vm2, %v8040_v46, 0.0 }
 0x85e   : > { %3550 = vadd.xlane.f32.xlu0 %v3549_v14  ;;  %v3552_v20 = vsel %vm1361_vm2, %v8043_v21, 0.0  ;;  %v8077_v7 = vpop.permute.xlu1 %3754 }
 0x85f   : > { %3553 = vadd.xlane.f32.xlu1 %v3552_v20 }
 0x860   : > { %v8049_v53 = vpop.eup %6559 }
 0x861   : > { %v8051_v61 = vpop.eup %6561  ;;  %v3555_v19 = vsel %vm1361_vm2, %v8049_v53, 0.0 }
 0x862   : > { %3556 = vadd.xlane.f32.xlu0 %v3555_v19  ;;  %v3558_v60 = vsel %vm1361_vm2, %v8051_v61, 0.0  ;;  %v8081_v36 = vpop.permute.xlu1 %3848 }
 0x863   : > { %3559 = vadd.xlane.f32.xlu1 %v3558_v60 }
 0x864   : > { %v8057_v38 = vpop.eup %6563 }
 0x865   : > { %v8059_v51 = vpop.eup %6565  ;;  %v3561_v2 = vsel %vm1361_vm2, %v8057_v38, 0.0 }
 0x866   : > { %3562 = vadd.xlane.f32.xlu0 %v3561_v2  ;;  %v3564_v57 = vsel %vm1361_vm2, %v8059_v51, 0.0 }
 0x867   : > { %3565 = vadd.xlane.f32.xlu1 %v3564_v57 }
 0x868   : > { %v8065_v63 = vpop.eup %6567 }
 0x869   : > { %v3567_v0 = vsel %vm1361_vm2, %v8065_v63, 0.0 }
 0x86a   : > { %3568 = vadd.xlane.f32.xlu0 %v3567_v0 }
 0x878   : > { %4140 = vrot.lane.b32.xlu1 %v7012_v37, %s6680_s30 }
 0x880   : > { %4089 = vrot.lane.b32.xlu0 %v6991_v11, %s6680_s30 }
 0x884   : > { %4087 = vrot.lane.b32.xlu0 %v7010_v15, %s6680_s30 }
 0x888   : > { %4138 = vrot.lane.b32.xlu0 %v7033_v23, %s6680_s30 }
 0x88c   : > { %4189 = vrot.lane.b32.xlu0 %v7056_v17, %s6680_s30 }
 0x890   : > { %4240 = vrot.lane.b32.xlu0 %v7077_v43, %s6680_s30  ;;  %v8098_v43 = vpop.permute.xlu0 %3801 }
 0x893   : > { %v3476_v37 = vpop.xlane.xlu1 %3475 }
 0x894   : > { %v3492_v11 = vsub.f32 %v7987_v52, %v3476_v37  ;;  %4291 = vrot.lane.b32.xlu0 %v7092_v54, %s6680_s30  ;;  %v8102_v54 = vpop.permute.xlu0 %3895 }
 0x896   : > { %v3523_v15 = vmul.f32 1.442695, %v3492_v11 }
 0x898   : > { %6569 = vpow2.f32 %v3523_v15  ;;  %4342 = vrot.lane.b32.xlu0 %v7107_v1, %s6680_s30  ;;  %v3527_v1 = vpop.xlane.xlu0 %3526 }
 0x899   : > { %6571 = vrcp.f32 %v3527_v1 }
 0x89c   : > { %4393 = vrot.lane.b32.xlu0 %v7126_v28, %s6680_s30  ;;  %v8106_v28 = vpop.permute.xlu1 %3942 }
 0x8a5   : > { %v8092_v23 = vpop.eup %6569 }
 0x8a6   : > { %v3570_v17 = vsel %vm1361_vm2, %v8092_v23, 0.0 }
 0x8a7   : > { %3571 = vadd.xlane.f32.xlu1 %v3570_v17 }
 0x8b8   : > { %4191 = vrot.lane.b32.xlu1 %v7035_v56, %s6680_s30 }
 0x8bc   : > { %4242 = vrot.lane.b32.xlu1 %v7058_v24, %s6680_s30  ;;  %v6572_v24 = vpop.eup %6571 }
 0x8bd   : > { %v3589_v41 = vmul.f32 %v6572_v24, %v7991_v8 }
 0x8c0   : > { %4293 = vrot.lane.b32.xlu1 %v7079_v44, %s6680_s30 }
 0x8c4   : > { %4344 = vrot.lane.b32.xlu1 %v7094_v55, %s6680_s30 }
 0x8c8   : > { %4395 = vrot.lane.b32.xlu1 %v7109_v31, %s6680_s30  ;;  %v3530_v56 = vpop.xlane.xlu1 %3529 }
 0x8c9   : > { %6573 = vrcp.f32 %v3530_v56 }
 0x8cc   : > { %4446 = vrot.lane.b32.xlu1 %v7128_v34, %s6680_s30 }
 0x8d0   : > { %4444 = vrot.lane.b32.xlu1 %v7147_v22, %s6680_s30 }
 0x8d6   : > { %v6574_v44 = vpop.eup %6573 }
 0x8d7   : > { %v3533_v52 = vpop.xlane.xlu0 %3532  ;;  %v3590_v16 = vmul.f32 %v6574_v44, %v7998_v29 }
 0x8d8   : > { %6575 = vrcp.f32 %v3533_v52 }
 0x8d9   : > { %v3605_v55 = vpack.c.bf16 %v3590_v16, %v3589_v41 }
 0x8db   : > { %6136 = vmatmul.mubr.msk.bf16.vlgmr.msra.gmra.mxu0 %vm1361_vm2, %v3605_v55  ;;  %v3536_v31 = vpop.xlane.xlu1 %3535 }
 0x8dc   : > { %6146 = vmatpush3.bf16.msra.mxu0 %v3708_v3  ;;  %6577 = vrcp.f32 %v3536_v31  ;;  %6147 = vmatprep.mubr.msk.bf16.mxu0 %vm6677_vm0, %v8687_v13 }
 0x8dd   : > { %6157 = vmatprep.subr.bf16.mxu0 %v8687_v13 }
 0x8df   : > { %v3539_v34 = vpop.xlane.xlu0 %3538  ;;  %v3542_v22 = vpop.xlane.xlu1 %3541 }
 0x8e0   : > { %6579 = vrcp.f32 %v3539_v34 }
 0x8e1   : > { %6581 = vrcp.f32 %v3542_v22 }
 0x8e3   : > { %v3545_v6 = vpop.xlane.xlu0 %3544 }
 0x8e4   : > { %6583 = vrcp.f32 %v3545_v6  ;;  %v3548_v8 = vpop.xlane.xlu1 %3547 }
 0x8e5   : > { %6585 = vrcp.f32 %v3548_v8  ;;  %v6576_v29 = vpop.eup %6575 }
 0x8e6   : > { %v3591_v60 = vmul.f32 %v6576_v29, %v8010_v59 }
 0x8e7   : > { %v3551_v14 = vpop.xlane.xlu0 %3550 }
 0x8e8   : > { %6587 = vrcp.f32 %v3551_v14  ;;  %v3554_v20 = vpop.xlane.xlu1 %3553 }
 0x8e9   : > { %v6578_v19 = vpop.eup %6577  ;;  %6589 = vrcp.f32 %v3554_v20 }
 0x8ea   : > { %v3592_v2 = vmul.f32 %v6578_v19, %v8016_v32 }
 0x8eb   : > { %v3557_v57 = vpop.xlane.xlu0 %3556 }
 0x8ec   : > { %6591 = vrcp.f32 %v3557_v57  ;;  %v3560_v0 = vpop.xlane.xlu1 %3559  ;;  %v3606_v3 = vpack.c.bf16 %v3592_v2, %v3591_v60 }
 0x8ed   : > { %v6580_v37 = vpop.eup %6579  ;;  %6593 = vrcp.f32 %v3560_v0 }
 0x8ee   : > { %v6582_v11 = vpop.eup %6581  ;;  %6142 = vmatmul.mubr.msk.bf16.vlgmr.msra.gmra.mxu1 %vm1361_vm2, %v3606_v3  ;;  %v3593_v15 = vmul.f32 %v6580_v37, %v8024_v9 }
 0x8ef   : > { %6152 = vmatpush3.bf16.msra.mxu1 %v8077_v7  ;;  %v3563_v17 = vpop.xlane.xlu0 %3562  ;;  %v3594_v1 = vmul.f32 %v6582_v11, %v8020_v10  ;;  %6153 = vmatprep.mubr.msk.bf16.mxu1 %vm6677_vm0, %v8687_v13 }
 0x8f0   : > { %6595 = vrcp.f32 %v3563_v17  ;;  %v3566_v59 = vpop.xlane.xlu1 %3565  ;;  %6163 = vmatprep.subr.bf16.mxu1 %v8687_v13 }
 0x8f1   : > { %v6584_v32 = vpop.eup %6583  ;;  %6597 = vrcp.f32 %v3566_v59  ;;  %v3607_v56 = vpack.c.bf16 %v3594_v1, %v3593_v15 }
 0x8f2   : > { %v6586_v24 = vpop.eup %6585  ;;  %v3595_v44 = vmul.f32 %v6584_v32, %v8031_v12 }
 0x8f3   : > { %6148 = vmatmul.mubr.msk.bf16.vlgmr.msra.gmra.mxu0 %vm1361_vm2, %v3607_v56  ;;  %v3596_v9 = vmul.f32 %v6586_v24, %v8034_v49  ;;  %v3569_v31 = vpop.xlane.xlu0 %3568 }
 0x8f4   : > { %6158 = vmatpush3.bf16.msra.mxu0 %v8098_v43  ;;  %6159 = vmatprep.mubr.msk.bf16.mxu0 %vm6677_vm0, %v8687_v13  ;;  %6599 = vrcp.f32 %v3569_v31 }
 0x8f5   : > { %v6588_v10 = vpop.eup %6587  ;;  %v3608_v7 = vpack.c.bf16 %v3596_v9, %v3595_v44  ;;  %6169 = vmatprep.subr.bf16.mxu0 %v8687_v13 }
 0x8f6   : > { %v6590_v52 = vpop.eup %6589  ;;  %v3597_v41 = vmul.f32 %v6588_v10, %v8040_v46 }
 0x8f7   : > { %v3598_v16 = vmul.f32 %v6590_v52, %v8043_v21  ;;  %6154 = vmatmul.mubr.msk.bf16.vlgmr.msra.gmra.mxu1 %vm1361_vm2, %v3608_v7 }
 0x8f8   : > { %6164 = vmatpush3.bf16.msra.mxu1 %v8081_v36  ;;  %6165 = vmatprep.mubr.msk.bf16.mxu1 %vm6677_vm0, %v8687_v13 }
 0x8f9   : > { %v6592_v12 = vpop.eup %6591  ;;  %v3609_v49 = vpack.c.bf16 %v3598_v16, %v3597_v41  ;;  %6175 = vmatprep.subr.bf16.mxu1 %v8687_v13 }
 0x8fa   : > { %v6594_v43 = vpop.eup %6593  ;;  %v3599_v55 = vmul.f32 %v6592_v12, %v8049_v53  ;;  %v4090_v53 = vpop.permute.xlu0 %4089 }
 0x8fb   : > { %v3600_v34 = vmul.f32 %v6594_v43, %v8051_v61  ;;  %6160 = vmatmul.mubr.msk.bf16.vlgmr.msra.gmra.mxu0 %vm1361_vm2, %v3609_v49 }
 0x8fc   : > { %6170 = vmatpush3.bf16.msra.mxu0 %v8102_v54  ;;  %6171 = vmatprep.mubr.msk.bf16.mxu0 %vm6677_vm0, %v8687_v13  ;;  %v4095_v54 = vsel %vm984_vm1, %v4090_v53, 0 }
 0x8fd   : > { %v6596_v46 = vpop.eup %6595  ;;  %v3610_v21 = vpack.c.bf16 %v3600_v34, %v3599_v55  ;;  %6181 = vmatprep.subr.bf16.mxu0 %v8687_v13 }
 0x8fe   : > { %v6598_v36 = vpop.eup %6597  ;;  %v3601_v22 = vmul.f32 %v6596_v46, %v8057_v38  ;;  %v4088_v38 = vpop.permute.xlu0 %4087 }
 0x8ff   : > { %v3602_v6 = vmul.f32 %v6598_v36, %v8059_v51  ;;  %6166 = vmatmul.mubr.msk.bf16.vlgmr.msra.gmra.mxu1 %vm1361_vm2, %v3610_v21  ;;  %v4141_v51 = vpop.permute.xlu1 %4140 }
 0x900   : > { %6176 = vmatpush3.bf16.msra.mxu1 %v8106_v28  ;;  %6177 = vmatprep.mubr.msk.bf16.mxu1 %vm6677_vm0, %v8687_v13  ;;  %v4146_v59 = vsel %vm984_vm1, %v4141_v51, 0 }
 0x901   : > { %v3611_v61 = vpack.c.bf16 %v3602_v6, %v3601_v22  ;;  %6187 = vmatprep.subr.bf16.mxu1 %v8687_v13  ;;  %v6600_v2 = vpop.eup %6599 }
 0x902   : > { %v4139_v28 = vpop.permute.xlu0 %4138  ;;  %v3603_v37 = vmul.f32 %v6600_v2, %v8065_v63 }
 0x903   : > { %6172 = vmatmul.mubr.msk.bf16.vlgmr.msra.gmra.mxu0 %vm1361_vm2, %v3611_v61 }
 0x904   : > { %6182 = vmatpush3.bf16.xpose.msra.mxu0 %v4095_v54  ;;  %6183 = vmatprep.mubr.msk.bf16.mxu0 %vm6677_vm0, %v8687_v13 }
 0x905   : > { %6193 = vmatprep.subr.bf16.mxu0 %v8687_v13 }
 0x906   : > { %v4190_v29 = vpop.permute.xlu0 %4189 }
 0x90a   : > { %v4241_v60 = vpop.permute.xlu0 %4240 }
 0x90b   : > { %6184 = vmatmul.mubr.msk.bf16.vlgmr.msra.gmra.mxu0 %vm984_vm1, %v4088_v38 }
 0x90c   : > { %6195 = vmatprep.mubr.msk.bf16.mxu0 %vm6677_vm0, %v8687_v13 }
 0x90e   : > { %v4292_v15 = vpop.permute.xlu0 %4291 }
 0x912   : > { %v4343_v63 = vpop.permute.xlu0 %4342 }
 0x916   : > { %v4394_v24 = vpop.permute.xlu0 %4393 }
 0x930   : > { %v3572_v8 = vpop.xlane.xlu1 %3571 }
 0x931   : > { %6601 = vrcp.f32 %v3572_v8 }
 0x934   : > { %v4192_v14 = vpop.permute.xlu1 %4191 }
 0x935   : > { %v4197_v20 = vsel %vm984_vm1, %v4192_v14, 0 }
 0x936   : > { %6194 = vmatpush3.bf16.xpose.msra.mxu0 %v4197_v20 }
 0x937   : > { %6205 = vmatprep.subr.bf16.mxu0 %v8687_v13 }
 0x938   : > { %v4243_v19 = vpop.permute.xlu1 %4242 }
 0x93c   : > { %v4294_v57 = vpop.permute.xlu1 %4293 }
 0x93d   : > { %v4299_v0 = vsel %vm984_vm1, %v4294_v57, 0  ;;  %6196 = vmatmul.mubr.msk.bf16.vlgmr.msra.gmra.mxu0 %vm984_vm1, %v4190_v29 }
 0x93e   : > { %v6602_v3 = vpop.eup %6601  ;;  %6206 = vmatpush3.bf16.xpose.msra.mxu0 %v4299_v0  ;;  %6207 = vmatprep.mubr.msk.bf16.mxu0 %vm6677_vm0, %v8687_v13  ;;  %v5579_v0 = vld [vmem:[%s8671_s1 + $0x180] sm:$0xff] }
 0x93f   : > { %v3604_v11 = vmul.f32 %v6602_v3, %v8092_v23  ;;  %6217 = vmatprep.subr.bf16.mxu0 %v8687_v13  ;;  %v4248_v23 = vsel %vm984_vm1, %v4243_v19, 0 }
 0x940   : > { %v4345_v17 = vpop.permute.xlu1 %4344 }
 0x941   : > { %v3612_v1 = vpack.c.bf16 %v3604_v11, %v3603_v37  ;;  %v4350_v44 = vsel %vm984_vm1, %v4345_v17, 0 }
 0x943   : > { %6178 = vmatmul.mubr.msk.bf16.vlgmr.msra.gmra.mxu1 %vm1361_vm2, %v3612_v1 }
 0x944   : > { %6188 = vmatpush3.bf16.xpose.msra.mxu1 %v4146_v59  ;;  %v4396_v32 = vpop.permute.xlu1 %4395  ;;  %6189 = vmatprep.mubr.msk.bf16.mxu1 %vm6677_vm0, %v8687_v13 }
 0x945   : > { %v4401_v56 = vsel %vm984_vm1, %v4396_v32, 0  ;;  %6208 = vmatmul.mubr.msk.bf16.vlgmr.msra.gmra.mxu0 %vm984_vm1, %v4292_v15  ;;  %6199 = vmatprep.subr.bf16.mxu1 %v8687_v13  ;;  %v5580_v15 = vld [vmem:[%s8671_s1 + $0x188] sm:$0xff] }
 0x946   : > { %6218 = vmatpush3.bf16.xpose.msra.mxu0 %v4401_v56  ;;  %6219 = vmatprep.mubr.msk.bf16.mxu0 %vm6677_vm0, %v8687_v13 }
 0x947   : > { %6229 = vmatprep.subr.bf16.mxu0 %v8687_v13 }
 0x948   : > { %v4447_v9 = vpop.permute.xlu1 %4446 }
 0x949   : > { %v4452_v10 = vsel %vm984_vm1, %v4447_v9, 0 }
 0x94b   : > { %6190 = vmatmul.mubr.msk.bf16.vlgmr.msra.gmra.mxu1 %vm984_vm1, %v4139_v28 }
 0x94c   : > { %6200 = vmatpush3.bf16.xpose.msra.mxu1 %v4248_v23  ;;  %6201 = vmatprep.mubr.msk.bf16.mxu1 %vm6677_vm0, %v8687_v13  ;;  %v4445_v7 = vpop.permute.xlu1 %4444 }
 0x94d   : > { %6220 = vmatmul.mubr.msk.bf16.vlgmr.msra.gmra.mxu0 %vm984_vm1, %v4394_v24  ;;  %6211 = vmatprep.subr.bf16.mxu1 %v8687_v13  ;;  %v5584_v24 = vld [vmem:[%s8671_s1 + $0x1a8] sm:$0xff] }
 0x94e   : > { %6231 = vmatprep.mubr.msk.bf16.mxu0 %vm6677_vm0, %v8687_v13 }
 0x953   : > { %6202 = vmatmul.mubr.msk.bf16.vlgmr.msra.gmra.mxu1 %vm984_vm1, %v4241_v60 }
 0x954   : > { %6212 = vmatpush3.bf16.xpose.msra.mxu1 %v4350_v44  ;;  %6213 = vmatprep.mubr.msk.bf16.mxu1 %vm6677_vm0, %v8687_v13 }
 0x955   : > { %6223 = vmatprep.subr.bf16.mxu1 %v8687_v13 }
 0x95b   : > { %6214 = vmatmul.mubr.msk.bf16.vlgmr.msra.gmra.mxu1 %vm984_vm1, %v4343_v63 }
 0x95c   : > { %6224 = vmatpush3.bf16.xpose.msra.mxu1 %v4452_v10  ;;  %6225 = vmatprep.mubr.msk.bf16.mxu1 %vm6677_vm0, %v8687_v13 }
 0x95d   : > { %6235 = vmatprep.subr.bf16.mxu1 %v8687_v13 }
 0x963   : > { %6226 = vmatmul.mubr.msk.bf16.vlgmr.msra.gmra.mxu1 %vm984_vm1, %v4445_v7 }
 0x964   : > { %6237 = vmatprep.mubr.msk.bf16.mxu1 %vm6677_vm0, %v8687_v13 }
 0x99b   : > { %v8207_v52 = vpop.f32.mrf.mxu0 }
 0x99d   : > { %v6137_v41 = vpop.f32.mrf.mxu0 }
 0x99f   : > { %v8209_v16 = vpop.f32.mrf.mxu0 }
 0x9a1   : > { %v6138_v12 = vpop.f32.mrf.mxu0 }
 0x9ae   : > { %v8211_v49 = vpop.f32.mrf.mxu1 }
 0x9b0   : > { %v6143_v43 = vpop.f32.mrf.mxu1 }
 0x9b2   : > { %v8213_v55 = vpop.f32.mrf.mxu1 }
 0x9b3   : > { %v8215_v31 = vpop.f32.mrf.mxu0 }
 0x9b4   : > { %v6144_v34 = vpop.f32.mrf.mxu1 }
 0x9b5   : > { %v6149_v46 = vpop.f32.mrf.mxu0 }
 0x9b7   : > { %v8217_v21 = vpop.f32.mrf.mxu0  ;;  %v8219_v36 = vpop.f32.mrf.mxu1 }
 0x9b9   : > { %v6150_v22 = vpop.f32.mrf.mxu0  ;;  %v6155_v6 = vpop.f32.mrf.mxu1 }
 0x9bb   : > { %v8221_v53 = vpop.f32.mrf.mxu1  ;;  %v8223_v61 = vpop.f32.mrf.mxu0 }
 0x9bd   : > { %v6156_v54 = vpop.f32.mrf.mxu1  ;;  %v6161_v38 = vpop.f32.mrf.mxu0 }
 0x9be   : > { %v5581_v54 = vld [vmem:[%s8671_s1 + $0x190] sm:$0xff] }
 0x9bf   : > { %v8225_v51 = vpop.f32.mrf.mxu0  ;;  %v8227_v28 = vpop.f32.mrf.mxu1 }
 0x9c1   : > { %v6162_v8 = vpop.f32.mrf.mxu0  ;;  %v6167_v29 = vpop.f32.mrf.mxu1 }
 0x9c3   : > { %v8229_v14 = vpop.f32.mrf.mxu1  ;;  %v8231_v20 = vpop.f32.mrf.mxu0 }
 0x9c5   : > { %v6168_v19 = vpop.f32.mrf.mxu1  ;;  %v6173_v60 = vpop.f32.mrf.mxu0 }
 0x9c7   : > { %v8233_v2 = vpop.f32.mrf.mxu0 }
 0x9c9   : > { %v6174_v57 = vpop.f32.mrf.mxu0 }
 0x9ca   : > { %v5582_v57 = vld [vmem:[%s8671_s1 + $0x198] sm:$0xff] }
 0x9cb   : > { %v4131_v3 = vpop.f32.mrf.mxu0 }
 0x9cc   : > { %v8238_v37 = vadd.f32 %v5579_v0, %v4131_v3  ;;  %v5583_v3 = vld [vmem:[%s8671_s1 + $0x1a0] sm:$0xff] }
 0x9cd   : > { %v6185_v11 = vpop.f32.mrf.mxu0 }
 0x9ce   : > { %v4495_v17 = vsel %vm1361_vm2, %v8238_v37, -inf }
 0x9cf   : > { %4496 = vmax.xlane.f32.xlu0 %v4495_v17  ;;  %v4134_v1 = vpop.f32.mrf.mxu0 }
 0x9d0   : > { %v8245_v59 = vadd.f32 %v5580_v15, %v4134_v1 }
 0x9d1   : > { %v6186_v32 = vpop.f32.mrf.mxu0 }
 0x9d2   : > { %v4498_v56 = vsel %vm1361_vm2, %v8245_v59, -inf }
 0x9d3   : > { %4499 = vmax.xlane.f32.xlu1 %v4498_v56 }
 0x9fd   : > { %v4233_v63 = vpop.f32.mrf.mxu0 }
 0x9fe   : > { %v8275_v56 = vadd.f32 %v5583_v3, %v4233_v63 }
 0x9ff   : > { %v6197_v23 = vpop.f32.mrf.mxu0 }
 0xa00   : > { %v4507_v63 = vsel %vm1361_vm2, %v8275_v56, -inf }
 0xa01   : > { %v4236_v44 = vpop.f32.mrf.mxu0 }
 0xa02   : > { %v8252_v9 = vadd.f32 %v5584_v24, %v4236_v44  ;;  %v5585_v44 = vld [vmem:[%s8671_s1 + $0x1b0] sm:$0xff] }
 0xa03   : > { %v8254_v10 = vpop.f32.mrf.mxu1  ;;  %v6198_v7 = vpop.f32.mrf.mxu0 }
 0xa04   : > { %v4510_v41 = vsel %vm1361_vm2, %v8252_v9, -inf }
 0xa05   : > { %4511 = vmax.xlane.f32.xlu1 %v4510_v41  ;;  %v6179_v12 = vpop.f32.mrf.mxu1  ;;  %v4335_v43 = vpop.f32.mrf.mxu0 }
 0xa06   : > { %v5586_v12 = vld [vmem:[%s8671_s1 + $0x1b8] sm:$0xff] }
 0xa07   : > { %v8258_v34 = vpop.f32.mrf.mxu1  ;;  %v6209_v46 = vpop.f32.mrf.mxu0 }
 0xa09   : > { %v6180_v22 = vpop.f32.mrf.mxu1  ;;  %v4338_v6 = vpop.f32.mrf.mxu0 }
 0xa0a   : > { %v5587_v22 = vld [vmem:[%s8671_s1 + $0x1c0] sm:$0xff] }
 0xa0b   : > { %v4182_v38 = vpop.f32.mrf.mxu1  ;;  %v6210_v8 = vpop.f32.mrf.mxu0 }
 0xa0c   : > { %v8263_v29 = vadd.f32 %v5581_v54, %v4182_v38  ;;  %v5588_v54 = vld [vmem:[%s8671_s1 + $0x1c8] sm:$0xff] }
 0xa0d   : > { %v6191_v19 = vpop.f32.mrf.mxu1  ;;  %v4437_v60 = vpop.f32.mrf.mxu0 }
 0xa0e   : > { %v4501_v0 = vsel %vm1361_vm2, %v8263_v29, -inf }
 0xa0f   : > { %v6221_v11 = vpop.f32.mrf.mxu0  ;;  %4502 = vmax.xlane.f32.xlu0 %v4501_v0  ;;  %v4185_v15 = vpop.f32.mrf.mxu1  ;;  %v8299_v0 = vadd.f32 %v5588_v54, %v4338_v6 }
 0xa10   : > { %v8273_v17 = vadd.f32 %v5582_v57, %v4185_v15  ;;  %v8297_v57 = vadd.f32 %v5587_v22, %v4335_v43  ;;  %v5589_v15 = vld [vmem:[%s8671_s1 + $0x1d0] sm:$0xff]  ;;  %v5590_v43 = vld [vmem:[%s8671_s1 + $0x1d8] sm:$0xff] }
 0xa11   : > { %v6192_v1 = vpop.f32.mrf.mxu1  ;;  %v4440_v32 = vpop.f32.mrf.mxu0 }
 0xa12   : > { %v4504_v23 = vsel %vm1361_vm2, %v8273_v17, -inf }
 0xa13   : > { %v6222_v24 = vpop.f32.mrf.mxu0  ;;  %4505 = vmax.xlane.f32.xlu0 %v4504_v23  ;;  %v4284_v7 = vpop.f32.mrf.mxu1 }
 0xa14   : > { %v8285_v46 = vadd.f32 %v5585_v44, %v4284_v7  ;;  %v4519_v24 = vsel %vm1361_vm2, %v8297_v57, -inf  ;;  %v4522_v44 = vsel %vm1361_vm2, %v8299_v0, -inf  ;;  %v5591_v7 = vld [vmem:[%s8671_s1 + $0x1e0] sm:$0xff] }
 0xa15   : > { %v6203_v41 = vpop.f32.mrf.mxu1  ;;  %v8325_v54 = vadd.f32 %v5591_v7, %v4437_v60 }
 0xa16   : > { %v4513_v3 = vsel %vm1361_vm2, %v8285_v46, -inf  ;;  %v5592_v41 = vld [vmem:[%s8671_s1 + $0x1e8] sm:$0xff] }
 0xa17   : > { %4508 = vmax.xlane.f32.xlu0 %v4507_v63  ;;  %v4287_v38 = vpop.f32.mrf.mxu1  ;;  %v4531_v60 = vsel %vm1361_vm2, %v8325_v54, -inf }
 0xa18   : > { %v8295_v8 = vadd.f32 %v5586_v12, %v4287_v38  ;;  %v8327_v38 = vadd.f32 %v5592_v41, %v4440_v32 }
 0xa19   : > { %v6204_v19 = vpop.f32.mrf.mxu1 }
 0xa1a   : > { %v4516_v11 = vsel %vm1361_vm2, %v8295_v8, -inf  ;;  %v4534_v32 = vsel %vm1361_vm2, %v8327_v38, -inf }
 0xa1b   : > { %4514 = vmax.xlane.f32.xlu0 %v4513_v3  ;;  %4517 = vmax.xlane.f32.xlu1 %v4516_v11  ;;  %v4386_v1 = vpop.f32.mrf.mxu1  ;;  %v5593_v11 = vld [vmem:[%s8671_s1 + $0x1f0] sm:$0xff] }
 0xa1c   : > { %v8311_v6 = vadd.f32 %v5589_v15, %v4386_v1 }
 0xa1d   : > { %v6215_v23 = vpop.f32.mrf.mxu1 }
 0xa1e   : > { %v4525_v19 = vsel %vm1361_vm2, %v8311_v6, -inf }
 0xa1f   : > { %4520 = vmax.xlane.f32.xlu0 %v4519_v24  ;;  %4523 = vmax.xlane.f32.xlu1 %v4522_v44  ;;  %v4389_v12 = vpop.f32.mrf.mxu1 }
 0xa20   : > { %v8323_v63 = vadd.f32 %v5590_v43, %v4389_v12 }
 0xa21   : > { %v6216_v22 = vpop.f32.mrf.mxu1 }
 0xa22   : > { %v4528_v3 = vsel %vm1361_vm2, %v8323_v63, -inf }
 0xa23   : > { %4526 = vmax.xlane.f32.xlu0 %v4525_v19  ;;  %4529 = vmax.xlane.f32.xlu1 %v4528_v3  ;;  %v4488_v15 = vpop.f32.mrf.mxu1 }
 0xa24   : > { %v8336_v23 = vadd.f32 %v5593_v11, %v4488_v15 }
 0xa25   : > { %v6227_v1 = vpop.f32.mrf.mxu1 }
 0xa26   : > { %v4537_v44 = vsel %vm1361_vm2, %v8336_v23, -inf }
 0xa27   : > { %4532 = vmax.xlane.f32.xlu0 %v4531_v60  ;;  %4535 = vmax.xlane.f32.xlu1 %v4534_v32  ;;  %v4491_v43 = vpop.f32.mrf.mxu1 }
 0xa29   : > { %v6228_v24 = vpop.f32.mrf.mxu1 }
 0xa2b   : > { %4538 = vmax.xlane.f32.xlu0 %v4537_v44 }
 0xa38   : > { %4726 = vrot.lane.b32.xlu1 %v7149_v40, %s6680_s30  ;;  %v5594_v40 = vld [vmem:[%s8671_s1 + $0x1f8] sm:$0xff] }
 0xa39   : > { %v8358_v22 = vadd.f32 %v5594_v40, %v4491_v43 }
 0xa3c   : > { %4773 = vrot.lane.b32.xlu1 %v7026_v50, %s6680_s30 }
 0xa40   : > { %4820 = vrot.lane.b32.xlu1 %v7019_v58, %s6680_s30  ;;  %v4540_v58 = vsel %vm1361_vm2, %v8358_v22, -inf }
 0xa41   : > { %4679 = vrot.lane.b32.xlu0 %v7130_v35, %s6680_s30 }
 0xa45   : > { %4867 = vrot.lane.b32.xlu0 %v7049_v48, %s6680_s30 }
 0xa58   : > { %v4497_v7 = vpop.xlane.xlu0 %4496 }
 0xa59   : > { %v4543_v41 = vsub.f32 %v8238_v37, %v4497_v7 }
 0xa5b   : > { %v4559_v12 = vmul.f32 1.442695, %v4543_v41 }
 0xa5c   : > { %v4500_v35 = vpop.xlane.xlu1 %4499 }
 0xa5d   : > { %6603 = vpow2.f32 %v4559_v12  ;;  %v4544_v37 = vsub.f32 %v8245_v59, %v4500_v35 }
 0xa5f   : > { %v4561_v19 = vmul.f32 1.442695, %v4544_v37 }
 0xa61   : > { %6605 = vpow2.f32 %v4561_v19 }
 0xa64   : > { %4541 = vmax.xlane.f32.xlu1 %v4540_v58 }
 0xa6a   : > { %v8362_v50 = vpop.eup %6603 }
 0xa6b   : > { %v4591_v48 = vsel %vm1361_vm2, %v8362_v50, 0.0 }
 0xa6c   : > { %4592 = vadd.xlane.f32.xlu0 %v4591_v48 }
 0xa6e   : > { %v8369_v3 = vpop.eup %6605 }
 0xa6f   : > { %v4594_v1 = vsel %vm1361_vm2, %v8369_v3, 0.0 }
 0xa75   : > { %4914 = vrot.lane.b32.xlu1 %v7042_v62, %s6680_s30 }
 0xa8e   : > { %v4512_v11 = vpop.xlane.xlu1 %4511 }
 0xa8f   : > { %v4548_v32 = vsub.f32 %v8252_v9, %v4512_v11 }
 0xa91   : > { %v4569_v59 = vmul.f32 1.442695, %v4548_v32 }
 0xa98   : > { %v4503_v15 = vpop.xlane.xlu0 %4502 }
 0xa99   : > { %v4545_v60 = vsub.f32 %v8263_v29, %v4503_v15  ;;  %4595 = vadd.xlane.f32.xlu1 %v4594_v1 }
 0xa9b   : > { %v4563_v43 = vmul.f32 1.442695, %v4545_v60 }
 0xa9c   : > { %v4506_v24 = vpop.xlane.xlu0 %4505 }
 0xa9d   : > { %6607 = vpow2.f32 %v4563_v43  ;;  %v4546_v62 = vsub.f32 %v8273_v17, %v4506_v24 }
 0xa9f   : > { %v4565_v44 = vmul.f32 1.442695, %v4546_v62 }
 0xaa0   : > { %v4509_v7 = vpop.xlane.xlu0 %4508 }
 0xaa1   : > { %6609 = vpow2.f32 %v4565_v44  ;;  %v4547_v41 = vsub.f32 %v8275_v56, %v4509_v7 }
 0xaa2   : > { %6611 = vpow2.f32 %v4569_v59 }
 0xaa3   : > { %v4567_v12 = vmul.f32 1.442695, %v4547_v41 }
 0xaa4   : > { %v4515_v40 = vpop.xlane.xlu0 %4514  ;;  %v4518_v58 = vpop.xlane.xlu1 %4517 }
 0xaa5   : > { %6613 = vpow2.f32 %v4567_v12  ;;  %v4549_v29 = vsub.f32 %v8285_v46, %v4515_v40  ;;  %v4550_v9 = vsub.f32 %v8295_v8, %v4518_v58 }
 0xaa7   : > { %v4571_v48 = vmul.f32 1.442695, %v4549_v29  ;;  %v4573_v35 = vmul.f32 1.442695, %v4550_v9 }
 0xaa8   : > { %v4521_v37 = vpop.xlane.xlu0 %4520  ;;  %v4524_v19 = vpop.xlane.xlu1 %4523 }
 0xaa9   : > { %6615 = vpow2.f32 %v4571_v48  ;;  %v4551_v17 = vsub.f32 %v8297_v57, %v4521_v37  ;;  %v4552_v11 = vsub.f32 %v8299_v0, %v4524_v19 }
 0xaaa   : > { %v8381_v15 = vpop.eup %6607  ;;  %6617 = vpow2.f32 %v4573_v35 }
 0xaab   : > { %v4575_v56 = vmul.f32 1.442695, %v4551_v17  ;;  %v4577_v1 = vmul.f32 1.442695, %v4552_v11  ;;  %v4597_v60 = vsel %vm1361_vm2, %v8381_v15, 0.0 }
 0xaac   : > { %v4527_v46 = vpop.xlane.xlu0 %4526  ;;  %v4530_v32 = vpop.xlane.xlu1 %4529  ;;  %4598 = vadd.xlane.f32.xlu0 %v4597_v60 }
 0xaad   : > { %6619 = vpow2.f32 %v4575_v56  ;;  %v4553_v8 = vsub.f32 %v8311_v6, %v4527_v46  ;;  %v4554_v43 = vsub.f32 %v8323_v63, %v4530_v32 }
 0xaae   : > { %v8387_v24 = vpop.eup %6609  ;;  %6621 = vpow2.f32 %v4577_v1 }
 0xaaf   : > { %v4579_v57 = vmul.f32 1.442695, %v4553_v8  ;;  %v4581_v0 = vmul.f32 1.442695, %v4554_v43  ;;  %v4600_v62 = vsel %vm1361_vm2, %v8387_v24, 0.0  ;;  %v8391_v59 = vpop.eup %6611 }
 0xab0   : > { %v4533_v44 = vpop.xlane.xlu0 %4532  ;;  %v4536_v7 = vpop.xlane.xlu1 %4535  ;;  %4601 = vadd.xlane.f32.xlu1 %v4600_v62  ;;  %v4606_v29 = vsel %vm1361_vm2, %v8391_v59, 0.0 }
 0xab1   : > { %6623 = vpow2.f32 %v4579_v57  ;;  %v4555_v41 = vsub.f32 %v8325_v54, %v4533_v44  ;;  %v4556_v6 = vsub.f32 %v8327_v38, %v4536_v7 }
 0xab2   : > { %v8395_v12 = vpop.eup %6613  ;;  %6625 = vpow2.f32 %v4581_v0 }
 0xab3   : > { %v4583_v63 = vmul.f32 1.442695, %v4555_v41  ;;  %v4585_v40 = vmul.f32 1.442695, %v4556_v6  ;;  %v4603_v58 = vsel %vm1361_vm2, %v8395_v12, 0.0 }
 0xab4   : > { %v4727_v9 = vpop.permute.xlu1 %4726  ;;  %4604 = vadd.xlane.f32.xlu0 %v4603_v58  ;;  %v4539_v48 = vpop.xlane.xlu0 %4538  ;;  %4607 = vadd.xlane.f32.xlu1 %v4606_v29 }
 0xab5   : > { %6627 = vpow2.f32 %v4583_v63  ;;  %v4557_v54 = vsub.f32 %v8336_v23, %v4539_v48  ;;  %6236 = vmatpush3.bf16.msra.mxu1 %v4727_v9 }
 0xab6   : > { %v8402_v38 = vpop.eup %6615  ;;  %6629 = vpow2.f32 %v4585_v40  ;;  %6247 = vmatprep.subr.bf16.mxu1 %v8687_v13 }
 0xab7   : > { %v8405_v35 = vpop.eup %6617  ;;  %v4587_v37 = vmul.f32 1.442695, %v4557_v54  ;;  %v4609_v19 = vsel %vm1361_vm2, %v8402_v38, 0.0 }
 0xab8   : > { %4610 = vadd.xlane.f32.xlu0 %v4609_v19  ;;  %v4680_v17 = vpop.permute.xlu0 %4679  ;;  %v4612_v11 = vsel %vm1361_vm2, %v8405_v35, 0.0  ;;  %v4774_v6 = vpop.permute.xlu1 %4773 }
 0xab9   : > { %6631 = vpow2.f32 %v4587_v37  ;;  %4613 = vadd.xlane.f32.xlu1 %v4612_v11  ;;  %6230 = vmatpush3.bf16.msra.mxu0 %v4680_v17 }
 0xaba   : > { %v8411_v23 = vpop.eup %6619  ;;  %6241 = vmatprep.subr.bf16.mxu0 %v8687_v13 }
 0xabb   : > { %v8414_v56 = vpop.eup %6621  ;;  %v4615_v1 = vsel %vm1361_vm2, %v8411_v23, 0.0 }
 0xabc   : > { %4616 = vadd.xlane.f32.xlu0 %v4615_v1  ;;  %v4618_v60 = vsel %vm1361_vm2, %v8414_v56, 0.0  ;;  %v8446_v63 = vpop.permute.xlu1 %4820 }
 0xabd   : > { %4619 = vadd.xlane.f32.xlu1 %v4618_v60 }
 0xabe   : > { %v8420_v46 = vpop.eup %6623 }
 0xabf   : > { %v8422_v32 = vpop.eup %6625  ;;  %v4621_v8 = vsel %vm1361_vm2, %v8420_v46, 0.0 }
 0xac0   : > { %4622 = vadd.xlane.f32.xlu0 %v4621_v8  ;;  %v4624_v43 = vsel %vm1361_vm2, %v8422_v32, 0.0 }
 0xac1   : > { %4625 = vadd.xlane.f32.xlu1 %v4624_v43 }
 0xac2   : > { %v8428_v57 = vpop.eup %6627 }
 0xac3   : > { %v8430_v0 = vpop.eup %6629  ;;  %v4627_v62 = vsel %vm1361_vm2, %v8428_v57, 0.0 }
 0xac4   : > { %4628 = vadd.xlane.f32.xlu0 %v4627_v62  ;;  %v4630_v44 = vsel %vm1361_vm2, %v8430_v0, 0.0 }
 0xac5   : > { %4631 = vadd.xlane.f32.xlu1 %v4630_v44 }
 0xac6   : > { %v8436_v7 = vpop.eup %6631 }
 0xac7   : > { %v4633_v41 = vsel %vm1361_vm2, %v8436_v7, 0.0 }
 0xac8   : > { %4634 = vadd.xlane.f32.xlu0 %v4633_v41 }
 0xade   : > { %4961 = vrot.lane.b32.xlu0 %v7072_v47, %s6680_s30 }
 0xae2   : > { %2939 = vrot.lane.b32.xlu0 %v7832_v5, %s6680_s30 }
 0xae6   : > { %2955 = vrot.lane.b32.xlu0 %v7848_v4, %s6680_s30 }
 0xaea   : > { %2943 = vrot.lane.b32.xlu0 %v7836_v27, %s6680_s30  ;;  %v8481_v27 = vpop.permute.xlu0 %4867 }
 0xaed   : > { %v4542_v40 = vpop.xlane.xlu1 %4541 }
 0xaee   : > { %v4558_v58 = vsub.f32 %v8358_v22, %v4542_v40  ;;  %2959 = vrot.lane.b32.xlu0 %v7852_v45, %s6680_s30 }
 0xaf0   : > { %v4589_v29 = vmul.f32 1.442695, %v4558_v58 }
 0xaf2   : > { %6633 = vpow2.f32 %v4589_v29  ;;  %4005 = vrot.lane.b32.xlu0 %v8207_v52, %s6679_s12 }
 0xaf6   : > { %4021 = vrot.lane.b32.xlu0 %v8223_v61, %s6679_s12 }
 0xafa   : > { %4009 = vrot.lane.b32.xlu0 %v8211_v49, %s6679_s12 }
 0xafe   : > { %4025 = vrot.lane.b32.xlu0 %v8227_v28, %s6679_s12 }
 0xaff   : > { %v8461_v47 = vpop.eup %6633 }
 0xb00   : > { %v4636_v5 = vsel %vm1361_vm2, %v8461_v47, 0.0 }
 0xb01   : > { %4637 = vadd.xlane.f32.xlu1 %v4636_v5 }
 0xb02   : > { %2947 = vrot.lane.b32.xlu0 %v7840_v25, %s6680_s30  ;;  %v8487_v25 = vpop.permute.xlu1 %4914 }
 0xb06   : > { %2963 = vrot.lane.b32.xlu0 %v7856_v26, %s6680_s30 }
 0xb0a   : > { %2951 = vrot.lane.b32.xlu0 %v7844_v18, %s6680_s30  ;;  %v4593_v18 = vpop.xlane.xlu0 %4592 }
 0xb0b   : > { %6635 = vrcp.f32 %v4593_v18 }
 0xb0e   : > { %2967 = vrot.lane.b32.xlu0 %v7879_v42, %s6680_s30 }
 0xb12   : > { %4013 = vrot.lane.b32.xlu0 %v8215_v31, %s6679_s12  ;;  %5008 = vrot.lane.b32.xlu1 %v7065_v33, %s6680_s30  ;;  %v8688_v33 = vld [vmem:[#allocation3_spill] sm:$0xff] }
 0xb13   : > { %v8691_v31 = vld [vmem:[#allocation7_spill] sm:$0xff] }
 0xb16   : > { %4029 = vrot.lane.b32.xlu0 %v8231_v20, %s6679_s12  ;;  %2941 = vrot.lane.b32.xlu1 %v7834_v39, %s6680_s30  ;;  %v8689_v39 = vld [vmem:[#allocation6_spill] sm:$0xff]  ;;  %v8693_v20 = vld [vmem:[#allocation8_spill] sm:$0xff] }
 0xb1a   : > { %4017 = vrot.lane.b32.xlu0 %v8219_v36, %s6679_s12  ;;  %2957 = vrot.lane.b32.xlu1 %v7850_v30, %s6680_s30  ;;  %v6636_v30 = vpop.eup %6635 }
 0xb1b   : > { %v4655_v26 = vmul.f32 %v6636_v30, %v8362_v50 }
 0xb1e   : > { %4033 = vrot.lane.b32.xlu0 %v8254_v10, %s6679_s12  ;;  %2945 = vrot.lane.b32.xlu1 %v8688_v33, %s6680_s30 }
 0xb22   : > { %2961 = vrot.lane.b32.xlu1 %v8689_v39, %s6680_s30  ;;  %v4596_v4 = vpop.xlane.xlu1 %4595 }
 0xb23   : > { %6637 = vrcp.f32 %v4596_v4 }
 0xb26   : > { %4007 = vrot.lane.b32.xlu1 %v8209_v16, %s6679_s12  ;;  %v8690_v16 = vld [vmem:[#allocation4_spill] sm:$0xff] }
 0xb2a   : > { %4023 = vrot.lane.b32.xlu1 %v8225_v51, %s6679_s12  ;;  %v8692_v51 = vld [vmem:[#allocation5_spill] sm:$0xff] }
 0xb2e   : > { %4011 = vrot.lane.b32.xlu1 %v8213_v55, %s6679_s12 }
 0xb30   : > { %v6638_v45 = vpop.eup %6637 }
 0xb31   : > { %v4656_v42 = vmul.f32 %v6638_v45, %v8369_v3 }
 0xb32   : > { %4027 = vrot.lane.b32.xlu1 %v8229_v14, %s6679_s12 }
 0xb33   : > { %v4671_v52 = vpack.c.bf16 %v4656_v42, %v4655_v26 }
 0xb35   : > { %v4599_v49 = vpop.xlane.xlu0 %4598  ;;  %6232 = vmatmul.mubr.msk.bf16.vlgmr.msra.gmra.mxu0 %vm1361_vm2, %v4671_v52 }
 0xb36   : > { %6242 = vmatpush3.bf16.msra.mxu0 %v4774_v6  ;;  %2949 = vrot.lane.b32.xlu1 %v8690_v16, %s6680_s30  ;;  %6639 = vrcp.f32 %v4599_v49 }
 0xb37   : > { %6243 = vmatprep.mubr.msk.bf16.mxu0 %vm6677_vm0, %v8687_v13  ;;  %6253 = vmatprep.subr.bf16.mxu0 %v8687_v13 }
 0xb39   : > { %v4602_v55 = vpop.xlane.xlu1 %4601 }
 0xb3a   : > { %6641 = vrcp.f32 %v4602_v55  ;;  %2965 = vrot.lane.b32.xlu1 %v8691_v31, %s6680_s30 }
 0xb3d   : > { %v4605_v36 = vpop.xlane.xlu0 %4604  ;;  %v4608_v61 = vpop.xlane.xlu1 %4607 }
 0xb3e   : > { %6643 = vrcp.f32 %v4605_v36  ;;  %2953 = vrot.lane.b32.xlu1 %v8692_v51, %s6680_s30 }
 0xb3f   : > { %6645 = vrcp.f32 %v4608_v61 }
 0xb41   : > { %v4611_v28 = vpop.xlane.xlu0 %4610 }
 0xb42   : > { %6647 = vrcp.f32 %v4611_v28  ;;  %v4614_v14 = vpop.xlane.xlu1 %4613  ;;  %2969 = vrot.lane.b32.xlu1 %v8693_v20, %s6680_s30  ;;  %s8657_s30 = scalar_lea.vmem %s8678_s8, %s5472_s24 }
 0xb43   : > { %6649 = vrcp.f32 %v4614_v14  ;;  %v6640_v10 = vpop.eup %6639 }
 0xb44   : > { %v4657_v9 = vmul.f32 %v6640_v10, %v8381_v15 }
 0xb45   : > { %v4617_v22 = vpop.xlane.xlu0 %4616 }
 0xb46   : > { %6651 = vrcp.f32 %v4617_v22  ;;  %v4620_v50 = vpop.xlane.xlu1 %4619  ;;  %4015 = vrot.lane.b32.xlu1 %v8217_v21, %s6679_s12 }
 0xb47   : > { %v6642_v3 = vpop.eup %6641  ;;  %6653 = vrcp.f32 %v4620_v50 }
 0xb48   : > { %v4658_v48 = vmul.f32 %v6642_v3, %v8387_v24 }
 0xb49   : > { %v4623_v54 = vpop.xlane.xlu0 %4622 }
 0xb4a   : > { %v4672_v37 = vpack.c.bf16 %v4658_v48, %v4657_v9  ;;  %6655 = vrcp.f32 %v4623_v54  ;;  %v4626_v19 = vpop.xlane.xlu1 %4625  ;;  %4031 = vrot.lane.b32.xlu1 %v8233_v2, %s6679_s12 }
 0xb4b   : > { %v6644_v17 = vpop.eup %6643  ;;  %6657 = vrcp.f32 %v4626_v19 }
 0xb4c   : > { %v6646_v11 = vpop.eup %6645  ;;  %v4659_v1 = vmul.f32 %v6644_v17, %v8395_v12  ;;  %6238 = vmatmul.mubr.msk.bf16.vlgmr.msra.gmra.mxu1 %vm1361_vm2, %v4672_v37 }
 0xb4d   : > { %v4660_v21 = vmul.f32 %v6646_v11, %v8391_v59  ;;  %6248 = vmatpush3.bf16.msra.mxu1 %v8446_v63  ;;  %v4629_v15 = vpop.xlane.xlu0 %4628  ;;  %6249 = vmatprep.mubr.msk.bf16.mxu1 %vm6677_vm0, %v8687_v13 }
 0xb4e   : > { %6659 = vrcp.f32 %v4629_v15  ;;  %v4632_v24 = vpop.xlane.xlu1 %4631  ;;  %4019 = vrot.lane.b32.xlu1 %v8221_v53, %s6679_s12  ;;  %6259 = vmatprep.subr.bf16.mxu1 %v8687_v13  ;;  %v6371_v15 = vld [vmem:[%s8676_s6 + $0x38] sm:$0xff]  }
 0xb4f   : > { %v6648_v2 = vpop.eup %6647  ;;  %v4673_v60 = vpack.c.bf16 %v4660_v21, %v4659_v1  ;;  %6661 = vrcp.f32 %v4632_v24  ;;  %v6372_v24 = vld [vmem:[%s8676_s6 + $0x30] sm:$0xff]  }
 0xb50   : > { %v6650_v12 = vpop.eup %6649  ;;  %v4661_v8 = vmul.f32 %v6648_v2, %v8402_v38  ;;  %v6373_v2 = vld [vmem:[%s8676_s6 + $0x28] sm:$0xff]  }
 0xb51   : > { %v4662_v59 = vmul.f32 %v6650_v12, %v8405_v35  ;;  %6244 = vmatmul.mubr.msk.bf16.vlgmr.msra.gmra.mxu0 %vm1361_vm2, %v4673_v60  ;;  %v4635_v43 = vpop.xlane.xlu0 %4634 }
 0xb52   : > { %6254 = vmatpush3.bf16.msra.mxu0 %v8481_v27  ;;  %4035 = vrot.lane.b32.xlu1 %v8258_v34, %s6679_s12  ;;  %6663 = vrcp.f32 %v4635_v43  ;;  %v6375_v43 = vld [vmem:[%s8676_s6 + $0x18] sm:$0xff]  }
 0xb53   : > { %v6652_v62 = vpop.eup %6651  ;;  %v4674_v53 = vpack.c.bf16 %v4662_v59, %v4661_v8  ;;  %6255 = vmatprep.mubr.msk.bf16.mxu0 %vm6677_vm0, %v8687_v13  ;;  %6265 = vmatprep.subr.bf16.mxu0 %v8687_v13  ;;  %v6374_v8 = vld [vmem:[%s8676_s6 + $0x20] sm:$0xff]  }
 0xb54   : > { %v6654_v44 = vpop.eup %6653  ;;  %v4663_v38 = vmul.f32 %v6652_v62, %v8411_v23 }
 0xb55   : > { %v4664_v35 = vmul.f32 %v6654_v44, %v8414_v56  ;;  %6250 = vmatmul.mubr.msk.bf16.vlgmr.msra.gmra.mxu1 %vm1361_vm2, %v4674_v53  ;;  %v4962_v41 = vpop.permute.xlu0 %4961  ;;  %v6376_v53 = vld [vmem:[%s8676_s6 + $0x10] sm:$0xff]   ;;  %v6377_v44 = vld [vmem:[%s8676_s6 + $0x8] sm:$0xff]  }
 0xb56   : > { %6260 = vmatpush3.bf16.msra.mxu1 %v8487_v25  ;;  %6261 = vmatprep.mubr.msk.bf16.mxu1 %vm6677_vm0, %v8687_v13 }
 0xb57   : > { %v6656_v34 = vpop.eup %6655  ;;  %v4675_v6 = vpack.c.bf16 %v4664_v35, %v4663_v38  ;;  %6271 = vmatprep.subr.bf16.mxu1 %v8687_v13  ;;  %v6378_v38 = vld [vmem:[%s8676_s6] sm:$0xff]  }
 0xb58   : > { %v6658_v63 = vpop.eup %6657  ;;  %v4665_v40 = vmul.f32 %v6656_v34, %v8420_v46 }
 0xb59   : > { %v4666_v23 = vmul.f32 %v6658_v63, %v8422_v32  ;;  %6256 = vmatmul.mubr.msk.bf16.vlgmr.msra.gmra.mxu0 %vm1361_vm2, %v4675_v6  ;;  %v2940_v56 = vpop.permute.xlu0 %2939 }
 0xb5a   : > { %6266 = vmatpush3.bf16.msra.mxu0 %v4962_v41  ;;  %2988 = vst.msk [vmem:[#allocation2] sm:$0xff] %vm2987_vm3, %v2940_v56  ;;  %6267 = vmatprep.mubr.msk.bf16.mxu0 %vm6677_vm0, %v8687_v13 }
 0xb5b   : > { %v6660_v58 = vpop.eup %6659  ;;  %v4676_v29 = vpack.c.bf16 %v4666_v23, %v4665_v40  ;;  %6277 = vmatprep.subr.bf16.mxu0 %v6371_v15 }
 0xb5c   : > { %v6662_v5 = vpop.eup %6661  ;;  %v4667_v27 = vmul.f32 %v6660_v58, %v8428_v57 }
 0xb5d   : > { %v4668_v25 = vmul.f32 %v6662_v5, %v8430_v0  ;;  %6262 = vmatmul.mubr.msk.bf16.vlgmr.msra.gmra.mxu1 %vm1361_vm2, %v4676_v29  ;;  %v2956_v46 = vpop.permute.xlu0 %2955 }
 0xb5e   : > { %2996 = vst.msk [vmem:[#allocation2 + $0x40] sm:$0xff] %vm2987_vm3, %v2956_v46  ;;  %6273 = vmatprep.mubr.msk.bf16.mxu1 %vm6677_vm0, %v8687_v13 }
 0xb5f   : > { %v4677_v32 = vpack.c.bf16 %v4668_v25, %v4667_v27  ;;  %v6664_v61 = vpop.eup %6663 }
 0xb60   : > { %v4669_v14 = vmul.f32 %v6664_v61, %v8436_v7 }
 0xb61   : > { %6268 = vmatmul.mubr.msk.bf16.vlgmr.msra.gmra.mxu0 %vm1361_vm2, %v4677_v32  ;;  %v2944_v18 = vpop.permute.xlu0 %2943 }
 0xb62   : > { %2990 = vst.msk [vmem:[#allocation2 + $0x10] sm:$0xff] %vm2987_vm3, %v2944_v18  ;;  %6278 = vmatpush3.bf16.msra.mxu0 %v6371_v15 }
 0xb63   : > { %6279 = vmatprep.subr.bf16.mxu0 %v6372_v24 }
 0xb65   : > { %v2960_v33 = vpop.permute.xlu0 %2959 }
 0xb66   : > { %2998 = vst.msk [vmem:[#allocation2 + $0x50] sm:$0xff] %vm2987_vm3, %v2960_v33  ;;  %6280 = vmatpush3.bf16.msra.mxu0 %v6372_v24 }
 0xb67   : > { %6281 = vmatprep.subr.bf16.mxu0 %v6373_v2 }
 0xb69   : > { %v4006_v57 = vpop.permute.xlu0 %4005 }
 0xb6a   : > { %4054 = vst.msk [vmem:[#allocation2] sm:$0xff] %vm4053_vm4, %v4006_v57  ;;  %6282 = vmatpush3.bf16.msra.mxu0 %v6373_v2 }
 0xb6b   : > { %6283 = vmatprep.subr.bf16.mxu0 %v6374_v8 }
 0xb6d   : > { %v4022_v0 = vpop.permute.xlu0 %4021 }
 0xb6e   : > { %4062 = vst.msk [vmem:[#allocation2 + $0x40] sm:$0xff] %vm4053_vm4, %v4022_v0  ;;  %6284 = vmatpush3.bf16.msra.mxu0 %v6374_v8 }
 0xb6f   : > { %6285 = vmatprep.subr.bf16.mxu0 %v6375_v43 }
 0xb71   : > { %v4010_v39 = vpop.permute.xlu0 %4009 }
 0xb72   : > { %4056 = vst.msk [vmem:[#allocation2 + $0x10] sm:$0xff] %vm4053_vm4, %v4010_v39  ;;  %6286 = vmatpush3.bf16.msra.mxu0 %v6375_v43 }
 0xb73   : > { %6287 = vmatprep.subr.bf16.mxu0 %v6376_v53 }
 0xb75   : > { %v4026_v13 = vpop.permute.xlu0 %4025 }
 0xb76   : > { %4064 = vst.msk [vmem:[#allocation2 + $0x50] sm:$0xff] %vm4053_vm4, %v4026_v13  ;;  %6288 = vmatpush3.bf16.msra.mxu0 %v6376_v53 }
 0xb77   : > { %6289 = vmatprep.subr.bf16.mxu0 %v6377_v44 }
 0xb79   : > { %v2948_v4 = vpop.permute.xlu0 %2947 }
 0xb7a   : > { %2992 = vst.msk [vmem:[#allocation2 + $0x20] sm:$0xff] %vm2987_vm3, %v2948_v4  ;;  %6290 = vmatpush3.bf16.msra.mxu0 %v6377_v44 }
 0xb7b   : > { %6291 = vmatprep.subr.bf16.mxu0 %v6378_v38 }
 0xb7d   : > { %v2964_v30 = vpop.permute.xlu0 %2963 }
 0xb7e   : > { %3000 = vst.msk [vmem:[#allocation2 + $0x60] sm:$0xff] %vm2987_vm3, %v2964_v30  ;;  %6292 = vmatpush3.bf16.msra.mxu0 %v6378_v38 }
 0xb81   : > { %v2952_v45 = vpop.permute.xlu0 %2951 }
 0xb82   : > { %2994 = vst.msk [vmem:[#allocation2 + $0x30] sm:$0xff] %vm2987_vm3, %v2952_v45 }
 0xb85   : > { %v2968_v26 = vpop.permute.xlu0 %2967 }
 0xb86   : > { %3002 = vst.msk [vmem:[#allocation2 + $0x70] sm:$0xff] %vm2987_vm3, %v2968_v26 }
 0xb89   : > { %v4014_v42 = vpop.permute.xlu0 %4013 }
 0xb8a   : > { %4058 = vst.msk [vmem:[#allocation2 + $0x20] sm:$0xff] %vm4053_vm4, %v4014_v42  ;;  %v4638_v52 = vpop.xlane.xlu1 %4637 }
 0xb8b   : > { %6665 = vrcp.f32 %v4638_v52 }
 0xb8d   : > { %v4030_v49 = vpop.permute.xlu0 %4029 }
 0xb8e   : > { %4066 = vst.msk [vmem:[#allocation2 + $0x60] sm:$0xff] %vm4053_vm4, %v4030_v49  ;;  %v5009_v16 = vpop.permute.xlu1 %5008 }
 0xb8f   : > { %6272 = vmatpush3.bf16.msra.mxu1 %v5009_v16 }
 0xb90   : > { %6309 = vmatprep.subr.bf16.mxu1 %v6371_v15 }
 0xb91   : > { %v4018_v55 = vpop.permute.xlu0 %4017 }
 0xb92   : > { %4060 = vst.msk [vmem:[#allocation2 + $0x30] sm:$0xff] %vm4053_vm4, %v4018_v55  ;;  %v2942_v31 = vpop.permute.xlu1 %2941 }
 0xb93   : > { %2989 = vst.msk [vmem:[#allocation2 + $0x8] sm:$0xff] %vm2987_vm3, %v2942_v31 }
 0xb95   : > { %v4034_v36 = vpop.permute.xlu0 %4033 }
 0xb96   : > { %4068 = vst.msk [vmem:[#allocation2 + $0x70] sm:$0xff] %vm4053_vm4, %v4034_v36  ;;  %v2958_v51 = vpop.permute.xlu1 %2957 }
 0xb97   : > { %2997 = vst.msk [vmem:[#allocation2 + $0x48] sm:$0xff] %vm2987_vm3, %v2958_v51 }
 0xb98   : > { %v6666_v28 = vpop.eup %6665 }
 0xb99   : > { %v4670_v20 = vmul.f32 %v6666_v28, %v8461_v47 }
 0xb9a   : > { %v2946_v10 = vpop.permute.xlu1 %2945 }
 0xb9b   : > { %v4678_v22 = vpack.c.bf16 %v4670_v20, %v4669_v14  ;;  %2991 = vst.msk [vmem:[#allocation2 + $0x18] sm:$0xff] %vm2987_vm3, %v2946_v10 }
 0xb9d   : > { %6274 = vmatmul.mubr.msk.bf16.vlgmr.msra.gmra.mxu1 %vm1361_vm2, %v4678_v22 }
 0xb9e   : > { %v2962_v50 = vpop.permute.xlu1 %2961  ;;  %6317 = vmatpush3.bf16.msra.mxu1 %v6371_v15 }
 0xb9f   : > { %2999 = vst.msk [vmem:[#allocation2 + $0x58] sm:$0xff] %vm2987_vm3, %v2962_v50  ;;  %6310 = vmatprep.subr.bf16.mxu1 %v6372_v24 }
 0xba2   : > { %v4008_v3 = vpop.permute.xlu1 %4007  ;;  %6318 = vmatpush3.bf16.msra.mxu1 %v6372_v24 }
 0xba3   : > { %4055 = vst.msk [vmem:[#allocation2 + $0x8] sm:$0xff] %vm4053_vm4, %v4008_v3  ;;  %6311 = vmatprep.subr.bf16.mxu1 %v6373_v2 }
 0xba6   : > { %v4024_v9 = vpop.permute.xlu1 %4023  ;;  %6319 = vmatpush3.bf16.msra.mxu1 %v6373_v2 }
 0xba7   : > { %4063 = vst.msk [vmem:[#allocation2 + $0x48] sm:$0xff] %vm4053_vm4, %v4024_v9  ;;  %6312 = vmatprep.subr.bf16.mxu1 %v6374_v8 }
 0xbaa   : > { %v4012_v48 = vpop.permute.xlu1 %4011  ;;  %6320 = vmatpush3.bf16.msra.mxu1 %v6374_v8 }
 0xbab   : > { %4057 = vst.msk [vmem:[#allocation2 + $0x18] sm:$0xff] %vm4053_vm4, %v4012_v48  ;;  %6313 = vmatprep.subr.bf16.mxu1 %v6375_v43 }
 0xbae   : > { %v4028_v7 = vpop.permute.xlu1 %4027  ;;  %6321 = vmatpush3.bf16.msra.mxu1 %v6375_v43 }
 0xbaf   : > { %4065 = vst.msk [vmem:[#allocation2 + $0x58] sm:$0xff] %vm4053_vm4, %v4028_v7  ;;  %6314 = vmatprep.subr.bf16.mxu1 %v6376_v53 }
 0xbb2   : > { %v2950_v47 = vpop.permute.xlu1 %2949  ;;  %6322 = vmatpush3.bf16.msra.mxu1 %v6376_v53 }
 0xbb3   : > { %2993 = vst.msk [vmem:[#allocation2 + $0x28] sm:$0xff] %vm2987_vm3, %v2950_v47  ;;  %6315 = vmatprep.subr.bf16.mxu1 %v6377_v44 }
 0xbb6   : > { %v2966_v54 = vpop.permute.xlu1 %2965  ;;  %6323 = vmatpush3.bf16.msra.mxu1 %v6377_v44 }
 0xbb7   : > { %3001 = vst.msk [vmem:[#allocation2 + $0x68] sm:$0xff] %vm2987_vm3, %v2966_v54  ;;  %6316 = vmatprep.subr.bf16.mxu1 %v6378_v38 }
 0xbba   : > { %v2954_v37 = vpop.permute.xlu1 %2953  ;;  %6324 = vmatpush3.bf16.msra.mxu1 %v6378_v38 }
 0xbbb   : > { %2995 = vst.msk [vmem:[#allocation2 + $0x38] sm:$0xff] %vm2987_vm3, %v2954_v37 }
 0xbbe   : > { %v2970_v19 = vpop.permute.xlu1 %2969 }
 0xbbf   : > { %3003 = vst.msk [vmem:[#allocation2 + $0x78] sm:$0xff] %vm2987_vm3, %v2970_v19 }
 0xbc2   : > { %v4016_v17 = vpop.permute.xlu1 %4015 }
 0xbc3   : > { %4059 = vst.msk [vmem:[#allocation2 + $0x28] sm:$0xff] %vm4053_vm4, %v4016_v17 }
 0xbc6   : > { %v4032_v11 = vpop.permute.xlu1 %4031 }
 0xbc7   : > { %4067 = vst.msk [vmem:[#allocation2 + $0x68] sm:$0xff] %vm4053_vm4, %v4032_v11 }
 0xbca   : > { %v4020_v1 = vpop.permute.xlu1 %4019 }
 0xbcb   : > { %4061 = vst.msk [vmem:[#allocation2 + $0x38] sm:$0xff] %vm4053_vm4, %v4020_v1 }
 0xbce   : > { %v4036_v21 = vpop.permute.xlu1 %4035 }
 0xbcf   : > { %4069 = vst.msk [vmem:[#allocation2 + $0x78] sm:$0xff] %vm4053_vm4, %v4036_v21 }
 0xbf5   : > { %v4719_v60 = vpop.f32.mrf.mxu0 }
 0xbf6   : > { %5071 = vrot.lane.b32.xlu0 %v4719_v60, %s6678_s18 }
 0xbf7   : > { %v6233_v12 = vpop.f32.mrf.mxu0 }
 0xbf9   : > { %v4722_v59 = vpop.f32.mrf.mxu0 }
 0xbfa   : > { %5073 = vrot.lane.b32.xlu1 %v4722_v59, %s6678_s18 }
 0xbfb   : > { %v6234_v62 = vpop.f32.mrf.mxu0 }
 0xc0c   : > { %v4766_v35 = vpop.f32.mrf.mxu1 }
 0xc0d   : > { %5075 = vrot.lane.b32.xlu0 %v4766_v35, %s6678_s18 }
 0xc0e   : > { %v6239_v41 = vpop.f32.mrf.mxu1 }
 0xc10   : > { %v4769_v34 = vpop.f32.mrf.mxu1 }
 0xc11   : > { %v4813_v6 = vpop.f32.mrf.mxu0  ;;  %5077 = vrot.lane.b32.xlu1 %v4769_v34, %s6678_s18 }
 0xc12   : > { %5079 = vrot.lane.b32.xlu0 %v4813_v6, %s6678_s18  ;;  %v6240_v63 = vpop.f32.mrf.mxu1 }
 0xc13   : > { %v6245_v40 = vpop.f32.mrf.mxu0 }
 0xc14   : > { %v5611_v40 = vld [vmem:[%s8677_s7] ss:$0 sm:$0xff] }
 0xc15   : > { %v4816_v23 = vpop.f32.mrf.mxu0  ;;  %v4860_v56 = vpop.f32.mrf.mxu1 }
 0xc16   : > { %5081 = vrot.lane.b32.xlu1 %v4816_v23, %s6678_s18 }
 0xc17   : > { %v6246_v58 = vpop.f32.mrf.mxu0  ;;  %v6251_v29 = vpop.f32.mrf.mxu1 }
 0xc19   : > { %v4863_v5 = vpop.f32.mrf.mxu1  ;;  %v4907_v27 = vpop.f32.mrf.mxu0 }
 0xc1a   : > { %5087 = vrot.lane.b32.xlu0 %v4907_v27, %s6678_s18 }
 0xc1b   : > { %v6252_v25 = vpop.f32.mrf.mxu1  ;;  %v6257_v46 = vpop.f32.mrf.mxu0 }
 0xc1d   : > { %v4910_v32 = vpop.f32.mrf.mxu0  ;;  %v4954_v18 = vpop.f32.mrf.mxu1 }
 0xc1e   : > { %5089 = vrot.lane.b32.xlu1 %v4910_v32, %s6678_s18  ;;  %5083 = vrot.lane.b32.xlu0 %v4860_v56, %s6678_s18 }
 0xc1f   : > { %v6258_v33 = vpop.f32.mrf.mxu0  ;;  %v6263_v57 = vpop.f32.mrf.mxu1 }
 0xc21   : > { %v4957_v0 = vpop.f32.mrf.mxu1  ;;  %v5001_v39 = vpop.f32.mrf.mxu0 }
 0xc22   : > { %5085 = vrot.lane.b32.xlu1 %v4863_v5, %s6678_s18  ;;  %5091 = vrot.lane.b32.xlu0 %v4954_v18, %s6678_s18 }
 0xc23   : > { %v6264_v13 = vpop.f32.mrf.mxu1  ;;  %v6269_v4 = vpop.f32.mrf.mxu0 }
 0xc25   : > { %v5004_v30 = vpop.f32.mrf.mxu0 }
 0xc26   : > { %5095 = vrot.lane.b32.xlu0 %v5001_v39, %s6678_s18  ;;  %5093 = vrot.lane.b32.xlu1 %v4957_v0, %s6678_s18 }
 0xc27   : > { %v6270_v45 = vpop.f32.mrf.mxu0 }
 0xc2a   : > { %5097 = vrot.lane.b32.xlu1 %v5004_v30, %s6678_s18 }
 0xc5d   : > { %v5048_v26 = vpop.f32.mrf.mxu1 }
 0xc5e   : > { %5099 = vrot.lane.b32.xlu0 %v5048_v26, %s6678_s18 }
 0xc5f   : > { %v6275_v42 = vpop.f32.mrf.mxu1 }
 0xc61   : > { %v5051_v52 = vpop.f32.mrf.mxu1 }
 0xc62   : > { %5101 = vrot.lane.b32.xlu1 %v5051_v52, %s6678_s18 }
 0xc63   : > { %v6276_v49 = vpop.f32.mrf.mxu1 }
 0xc68   : > { %v5072_v16 = vpop.permute.xlu0 %5071 }
 0xc69   : > { %5120 = vst.msk [vmem:[#allocation2] sm:$0xff] %vm5119_vm5, %v5072_v16 }
 0xc6c   : > { %v5074_v55 = vpop.permute.xlu1 %5073 }
 0xc6d   : > { %5121 = vst.msk [vmem:[#allocation2 + $0x8] sm:$0xff] %vm5119_vm5, %v5074_v55 }
 0xc70   : > { %v5136_v31 = vld [vmem:[#allocation2] sm:$0xff] }
 0xc74   : > { %v5137_v36 = vld [vmem:[#allocation2 + $0x8] sm:$0xff] }
 0xc75   : > { %v5152_v61 = vpack.c.bf16 %v5137_v36, %v5136_v31 }
 0xc77   : > { %6293 = vmatprep.mubr.bf16.mxu0 %v5152_v61 }
 0xc7f   : > { %v5076_v51 = vpop.permute.xlu0 %5075 }
 0xc80   : > { %5122 = vst.msk [vmem:[#allocation2 + $0x10] sm:$0xff] %vm5119_vm5, %v5076_v51 }
 0xc83   : > { %v5078_v28 = vpop.permute.xlu1 %5077 }
 0xc84   : > { %v5080_v14 = vpop.permute.xlu0 %5079  ;;  %5123 = vst.msk [vmem:[#allocation2 + $0x18] sm:$0xff] %vm5119_vm5, %v5078_v28 }
 0xc85   : > { %5124 = vst.msk [vmem:[#allocation2 + $0x20] sm:$0xff] %vm5119_vm5, %v5080_v14 }
 0xc87   : > { %v5138_v10 = vld [vmem:[#allocation2 + $0x10] sm:$0xff] }
 0xc88   : > { %v5082_v20 = vpop.permute.xlu1 %5081 }
 0xc89   : > { %5125 = vst.msk [vmem:[#allocation2 + $0x28] sm:$0xff] %vm5119_vm5, %v5082_v20 }
 0xc8b   : > { %v5139_v22 = vld [vmem:[#allocation2 + $0x18] sm:$0xff] }
 0xc8c   : > { %v5088_v50 = vpop.permute.xlu0 %5087  ;;  %v5153_v3 = vpack.c.bf16 %v5139_v22, %v5138_v10  ;;  %v5140_v7 = vld [vmem:[#allocation2 + $0x20] sm:$0xff] }
 0xc8d   : > { %5128 = vst.msk [vmem:[#allocation2 + $0x40] sm:$0xff] %vm5119_vm5, %v5088_v50 }
 0xc8e   : > { %6294 = vmatmul.mubr.bf16.vlgmr.msra.gmra.mxu0 %v5153_v3 }
 0xc90   : > { %v5090_v9 = vpop.permute.xlu1 %5089  ;;  %v5084_v48 = vpop.permute.xlu0 %5083  ;;  %v5141_v47 = vld [vmem:[#allocation2 + $0x28] sm:$0xff] }
 0xc91   : > { %5129 = vst.msk [vmem:[#allocation2 + $0x48] sm:$0xff] %vm5119_vm5, %v5090_v9  ;;  %5126 = vst.msk [vmem:[#allocation2 + $0x30] sm:$0xff] %vm5119_vm5, %v5084_v48  ;;  %v5154_v54 = vpack.c.bf16 %v5141_v47, %v5140_v7 }
 0xc93   : > { %6297 = vmatprep.mubr.bf16.mxu0 %v5154_v54 }
 0xc94   : > { %v5086_v37 = vpop.permute.xlu1 %5085  ;;  %v5092_v19 = vpop.permute.xlu0 %5091  ;;  %v5144_v1 = vld [vmem:[#allocation2 + $0x40] sm:$0xff] }
 0xc95   : > { %5127 = vst.msk [vmem:[#allocation2 + $0x38] sm:$0xff] %vm5119_vm5, %v5086_v37  ;;  %5130 = vst.msk [vmem:[#allocation2 + $0x50] sm:$0xff] %vm5119_vm5, %v5092_v19 }
 0xc98   : > { %v5096_v17 = vpop.permute.xlu0 %5095  ;;  %v5094_v11 = vpop.permute.xlu1 %5093  ;;  %v5145_v21 = vld [vmem:[#allocation2 + $0x48] sm:$0xff]  ;;  %v5142_v2 = vld [vmem:[#allocation2 + $0x30] sm:$0xff] }
 0xc99   : > { %5132 = vst.msk [vmem:[#allocation2 + $0x60] sm:$0xff] %vm5119_vm5, %v5096_v17  ;;  %5131 = vst.msk [vmem:[#allocation2 + $0x58] sm:$0xff] %vm5119_vm5, %v5094_v11  ;;  %v5156_v15 = vpack.c.bf16 %v5145_v21, %v5144_v1 }
 0xc9b   : > { %6301 = vmatprep.mubr.bf16.mxu1 %v5156_v15 }
 0xc9c   : > { %v5098_v24 = vpop.permute.xlu1 %5097  ;;  %v5143_v60 = vld [vmem:[#allocation2 + $0x38] sm:$0xff]  ;;  %v5146_v8 = vld [vmem:[#allocation2 + $0x50] sm:$0xff] }
 0xc9d   : > { %5133 = vst.msk [vmem:[#allocation2 + $0x68] sm:$0xff] %vm5119_vm5, %v5098_v24  ;;  %v5155_v12 = vpack.c.bf16 %v5143_v60, %v5142_v2 }
 0xc9f   : > { %6298 = vmatmul.mubr.bf16.gmra.mxu0 %v5155_v12 }
 0xca0   : > { %v5147_v59 = vld [vmem:[#allocation2 + $0x58] sm:$0xff]  ;;  %v5148_v62 = vld [vmem:[#allocation2 + $0x60] sm:$0xff] }
 0xca1   : > { %v5157_v43 = vpack.c.bf16 %v5147_v59, %v5146_v8 }
 0xca3   : > { %6302 = vmatmul.mubr.bf16.vlgmr.msra.gmra.mxu1 %v5157_v43 }
 0xca4   : > { %v5149_v53 = vld [vmem:[#allocation2 + $0x68] sm:$0xff] }
 0xca5   : > { %v5158_v44 = vpack.c.bf16 %v5149_v53, %v5148_v62 }
 0xca7   : > { %6305 = vmatprep.mubr.bf16.mxu1 %v5158_v44 }
 0xcd0   : > { %v5100_v38 = vpop.permute.xlu0 %5099 }
 0xcd1   : > { %5134 = vst.msk [vmem:[#allocation2 + $0x70] sm:$0xff] %vm5119_vm5, %v5100_v38 }
 0xcd4   : > { %v5102_v35 = vpop.permute.xlu1 %5101 }
 0xcd5   : > { %5135 = vst.msk [vmem:[#allocation2 + $0x78] sm:$0xff] %vm5119_vm5, %v5102_v35 }
 0xcd8   : > { %v5150_v41 = vld [vmem:[#allocation2 + $0x70] sm:$0xff] }
 0xcdc   : > { %v5151_v34 = vld [vmem:[#allocation2 + $0x78] sm:$0xff] }
 0xcdd   : > { %v5159_v6 = vpack.c.bf16 %v5151_v34, %v5150_v41 }
 0xcdf   : > { %6306 = vmatmul.mubr.bf16.gmra.mxu1 %v5159_v6 }
 0xd4e   : > { %v6295_v63 = vpop.f32.mrf.mxu0 }
 0xd4f   : > { %v5274_v58 = vadd.f32 %v6295_v63, %v5611_v40 }
 0xd50   : > { %v5265_v23 = vpop.f32.mrf.mxu0 }
 0xd51   : > { %v5266_v27 = vadd.f32 %v5611_v40, %v5265_v23 }
 0xd52   : > { %v6296_v56 = vpop.f32.mrf.mxu0 }
 0xd53   : > { %v5277_v29 = vadd.f32 %v6296_v56, %v5611_v40 }
 0xd54   : > { %v5268_v5 = vpop.f32.mrf.mxu0 }
 0xd55   : > { %v5662_v25 = vpack.c.bf16 %v5277_v29, %v5274_v58  ;;  %v5269_v46 = vadd.f32 %v5611_v40, %v5268_v5 }
 0xd57   : > { %5694 = vst [vmem:[%s8657_s30 + $0x8] sm:$0xff] %v5662_v25   ;;  %v5657_v32 = vpack.c.bf16 %v5269_v46, %v5266_v27 }
 0xd59   : > { %5658 = vst [vmem:[%s8657_s30] sm:$0xff] %v5657_v32  }
 0xd5f   : > { %v6299_v18 = vpop.f32.mrf.mxu0 }
 0xd60   : > { %v5290_v39 = vadd.f32 %v6299_v18, %v5611_v40 }
 0xd61   : > { %v5281_v33 = vpop.f32.mrf.mxu0 }
 0xd62   : > { %v5282_v45 = vadd.f32 %v5611_v40, %v5281_v33 }
 0xd63   : > { %v6300_v57 = vpop.f32.mrf.mxu0  ;;  %v6303_v0 = vpop.f32.mrf.mxu1 }
 0xd64   : > { %v5293_v13 = vadd.f32 %v6300_v57, %v5611_v40  ;;  %v5306_v49 = vadd.f32 %v6303_v0, %v5611_v40 }
 0xd65   : > { %v5284_v4 = vpop.f32.mrf.mxu0  ;;  %v5297_v30 = vpop.f32.mrf.mxu1 }
 0xd66   : > { %v5672_v26 = vpack.c.bf16 %v5293_v13, %v5290_v39  ;;  %v5285_v42 = vadd.f32 %v5611_v40, %v5284_v4  ;;  %v5298_v36 = vadd.f32 %v5611_v40, %v5297_v30 }
 0xd67   : > { %v6304_v52 = vpop.f32.mrf.mxu1 }
 0xd68   : > { %5696 = vst [vmem:[%s8657_s30 + $0x18] sm:$0xff] %v5672_v26   ;;  %v5667_v16 = vpack.c.bf16 %v5285_v42, %v5282_v45  ;;  %v5309_v55 = vadd.f32 %v6304_v52, %v5611_v40 }
 0xd69   : > { %v5300_v31 = vpop.f32.mrf.mxu1 }
 0xd6a   : > { %5695 = vst [vmem:[%s8657_s30 + $0x10] sm:$0xff] %v5667_v16   ;;  %v5682_v61 = vpack.c.bf16 %v5309_v55, %v5306_v49  ;;  %v5301_v51 = vadd.f32 %v5611_v40, %v5300_v31 }
 0xd6c   : > { %5698 = vst [vmem:[%s8657_s30 + $0x28] sm:$0xff] %v5682_v61   ;;  %v5677_v28 = vpack.c.bf16 %v5301_v51, %v5298_v36 }
 0xd6e   : > { %5697 = vst [vmem:[%s8657_s30 + $0x20] sm:$0xff] %v5677_v28  }
 0xd9f   : > { %v6307_v14 = vpop.f32.mrf.mxu1 }
 0xda0   : > { %v5322_v22 = vadd.f32 %v6307_v14, %v5611_v40 }
 0xda1   : > { %v5313_v20 = vpop.f32.mrf.mxu1 }
 0xda2   : > { %v5314_v9 = vadd.f32 %v5611_v40, %v5313_v20 }
 0xda3   : > { %v6308_v10 = vpop.f32.mrf.mxu1 }
 0xda4   : > { %v5325_v50 = vadd.f32 %v6308_v10, %v5611_v40 }
 0xda5   : > { %v5316_v3 = vpop.f32.mrf.mxu1 }
 0xda6   : > { %v5692_v48 = vpack.c.bf16 %v5325_v50, %v5322_v22  ;;  %v5317_v7 = vadd.f32 %v5611_v40, %v5316_v3 }
 0xda8   : > { %5700 = vst [vmem:[%s8657_s30 + $0x38] sm:$0xff] %v5692_v48   ;;  %v5687_v47 = vpack.c.bf16 %v5317_v7, %v5314_v9 }
 0xdaa   : > { %5699 = vst [vmem:[%s8657_s30 + $0x30] sm:$0xff] %v5687_v47  }
 0xdab PF: > { %s18_s27 = sadd.s32 1, %s6673_s27  }
 0xdac   : > { %p15_p4 = scmp.ge.s32.totalorder %s18_s27, 4  }
 0xdae   :  { %17 = sbr.rel (!%p15_p4) target bundleno = 1 (0x1), region = 85 }

</bundles_post_ra>
